<compile_context>
chip_gen: v7x
topology: tpu7x:2x2x1
jax: 0.10.0
libtpu: 0.0.40
codegen_flags: <defaults>
</compile_context>

<pallas_src>
import math
import jax
import jax.numpy as jnp
from jax.experimental import pallas as pl

# Small-but-consistent shapes (match the PyTorch module defaults)
BATCH = 2
SEQ = 8
D_MODEL = 32
NUM_HEADS = 4
HEAD_DIM = D_MODEL // NUM_HEADS
D_EXP = 4
D_HID = D_MODEL * D_EXP
NUM_LAYERS = 6
EPS = 1e-5  # nn.LayerNorm default


# --------------------------------------------------------------------------
# Single-invocation fused kernel: all layers looped inside, weights resident.
# --------------------------------------------------------------------------
def fused_encoder_kernel(x_ref,
                         wq_ref, bq_ref, wk_ref, bk_ref, wv_ref, bv_ref,
                         wo_ref, bo_ref,
                         w1_ref, b1_ref, w2_ref, b2_ref,
                         g1_ref, be1_ref, g2_ref, be2_ref,
                         o_ref):
    scale = 1.0 / math.sqrt(HEAD_DIM)
    contract_last = (((1,), (1,)), ((), ()))   # q @ k^T without explicit .T

    def layer_body(l, x):
        # ---- projections (three separate (D,D) matmuls; scale folded into q)
        q = (jnp.dot(x, wq_ref[l], preferred_element_type=jnp.float32)
             + bq_ref[l]) * scale
        k = jnp.dot(x, wk_ref[l], preferred_element_type=jnp.float32) + bk_ref[l]
        v = jnp.dot(x, wv_ref[l], preferred_element_type=jnp.float32) + bv_ref[l]
        wo = wo_ref[l]                                        # (D, D), loaded once

        # ---- all (batch, head) score tiles, stacked along sublanes ----
        s_tiles = []
        for b in range(BATCH):                                # static unroll
            r0 = b * SEQ
            for h in range(NUM_HEADS):                        # static unroll
                c0 = h * HEAD_DIM
                qh = q[r0:r0 + SEQ, c0:c0 + HEAD_DIM]
                kh = k[r0:r0 + SEQ, c0:c0 + HEAD_DIM]
                s_tiles.append(jax.lax.dot_general(
                    qh, kh, dimension_numbers=contract_last,
                    preferred_element_type=jnp.float32))
        s = jnp.concatenate(s_tiles, axis=0)                  # (B*H*S, S)

        # ---- ONE batched softmax over all head tiles ----
        s = s - jnp.max(s, axis=-1, keepdims=True)
        p = jnp.exp(s)
        # approx=True would use the idle EUP vrcp; kept exact for the 1e-4 check.
        p = p * pl.reciprocal(jnp.sum(p, axis=-1, keepdims=True), approx=False)

        # ---- per-head PV folded straight into Wo (sublane-aligned row slices;
        #      no ctx scratch, no masked lane stores, no readback) ----
        out_rows = []
        for b in range(BATCH):
            r0 = b * SEQ
            acc = jnp.zeros((SEQ, D_MODEL), jnp.float32)
            for h in range(NUM_HEADS):
                c0 = h * HEAD_DIM
                t0 = (b * NUM_HEADS + h) * SEQ
                ph = p[t0:t0 + SEQ, :]                        # (S, S) sublane slice
                vh = v[r0:r0 + SEQ, c0:c0 + HEAD_DIM]         # (S, HEAD_DIM)
                ctx = jnp.dot(ph, vh, preferred_element_type=jnp.float32)
                acc = acc + jnp.dot(ctx, wo[c0:c0 + HEAD_DIM, :],
                                    preferred_element_type=jnp.float32)
            out_rows.append(acc)
        attn_out = jnp.concatenate(out_rows, axis=0) + bo_ref[l]

        # ---- AddNorm1: LayerNorm(x + attn_out) ----
        h1 = x + attn_out
        mu1 = jnp.mean(h1, axis=-1, keepdims=True)
        var1 = jnp.mean(jnp.square(h1 - mu1), axis=-1, keepdims=True)
        x1 = (h1 - mu1) * jax.lax.rsqrt(var1 + EPS) * g1_ref[l] + be1_ref[l]

        # ---- FeedForward: Linear -> ReLU -> Linear ----
        ff = jnp.dot(x1, w1_ref[l], preferred_element_type=jnp.float32) + b1_ref[l]
        ff = jnp.maximum(ff, 0.0)
        ff = jnp.dot(ff, w2_ref[l], preferred_element_type=jnp.float32) + b2_ref[l]

        # ---- AddNorm2: LayerNorm(x1 + ff) ----
        h2 = x1 + ff
        mu2 = jnp.mean(h2, axis=-1, keepdims=True)
        var2 = jnp.mean(jnp.square(h2 - mu2), axis=-1, keepdims=True)
        return (h2 - mu2) * jax.lax.rsqrt(var2 + EPS) * g2_ref[l] + be2_ref[l]

    x0 = x_ref[...].astype(jnp.float32)
    x_final = jax.lax.fori_loop(0, NUM_LAYERS, layer_body, x0, unroll=True)
    o_ref[...] = x_final.astype(o_ref.dtype)


# --------------------------------------------------------------------------
# Wrapper: single pallas_call, no grid, whole arrays resident in VMEM.
# --------------------------------------------------------------------------
_STACKED_ORDER = ["wq", "bq", "wk", "bk", "wv", "bv", "wo", "bo",
                  "w1", "b1", "w2", "b2", "g1", "be1", "g2", "be2"]


def encoder_pallas(x, stacked):
    """x: (B, S, D). stacked: dict of per-layer-stacked params, leading dim L."""
    B, S, D = x.shape
    x2d = x.reshape(B * S, D)                  # fold batch into sublanes
    args = [x2d] + [stacked[name] for name in _STACKED_ORDER]

    out = pl.pallas_call(
        fused_encoder_kernel,
        out_shape=jax.ShapeDtypeStruct((B * S, D), x.dtype),
        # No grid / no BlockSpecs: every input is a whole-array VMEM block
        # (~300 KiB of weights total -- trivially resident on v5e/v6e/v7x).
    )(*args)
    return out.reshape(B, S, D)


# ---------------- deterministic parameter init (PyTorch-style shapes) ----------------
def _linear_init(key, fan_in, fan_out):
    kw, kb = jax.random.split(key)
    bound = 1.0 / math.sqrt(fan_in)
    w = jax.random.uniform(kw, (fan_in, fan_out), jnp.float32, -bound, bound)
    b = jax.random.uniform(kb, (1, fan_out), jnp.float32, -bound, bound)
    return w, b


def init_layer_params(key):
    ks = jax.random.split(key, 6)
    wq, bq = _linear_init(ks[0], D_MODEL, D_MODEL)
    wk, bk = _linear_init(ks[1], D_MODEL, D_MODEL)
    wv, bv = _linear_init(ks[2], D_MODEL, D_MODEL)
    wo, bo = _linear_init(ks[3], D_MODEL, D_MODEL)
    w1, b1 = _linear_init(ks[4], D_MODEL, D_HID)
    w2, b2 = _linear_init(ks[5], D_HID, D_MODEL)
    return dict(wq=wq, bq=bq, wk=wk, bk=bk, wv=wv, bv=bv, wo=wo, bo=bo,
                w1=w1, b1=b1, w2=w2, b2=b2,
                g1=jnp.ones((1, D_MODEL), jnp.float32),
                be1=jnp.zeros((1, D_MODEL), jnp.float32),
                g2=jnp.ones((1, D_MODEL), jnp.float32),
                be2=jnp.zeros((1, D_MODEL), jnp.float32))


def stack_layer_params(layer_params):
    """Stack each per-layer parameter along a leading layer axis."""
    return {name: jnp.stack([p[name] for p in layer_params])
            for name in _STACKED_ORDER}


# ---------------- pure-JAX reference (for correctness check) ----------------
def encoder_block_ref(x, p):
    q = x @ p["wq"] + p["bq"]
    k = x @ p["wk"] + p["bk"]
    v = x @ p["wv"] + p["bv"]
    B, S, D = x.shape

    def split(t):
        return t.reshape(B, S, NUM_HEADS, HEAD_DIM).transpose(0, 2, 1, 3)

    qh, kh, vh = split(q), split(k), split(v)
    s = jnp.einsum("bhqd,bhkd->bhqk", qh, kh) / math.sqrt(HEAD_DIM)
    a = jax.nn.softmax(s, axis=-1)
    ctx = jnp.einsum("bhqk,bhkd->bhqd", a, vh).transpose(0, 2, 1, 3).reshape(B, S, D)
    attn_out = ctx @ p["wo"] + p["bo"]

    def ln(h, g, b):
        mu = jnp.mean(h, axis=-1, keepdims=True)
        var = jnp.mean((h - mu) ** 2, axis=-1, keepdims=True)
        return (h - mu) / jnp.sqrt(var + EPS) * g + b

    x1 = ln(x + attn_out, p["g1"], p["be1"])
    ff = jnp.maximum(x1 @ p["w1"] + p["b1"], 0.0) @ p["w2"] + p["b2"]
    return ln(x1 + ff, p["g2"], p["be2"])


def encoder_ref(x, layer_params):
    for p in layer_params:
        x = encoder_block_ref(x, p)
    return x


if __name__ == "__main__":
    key = jax.random.PRNGKey(0)
    kx, kp = jax.random.split(key)
    x = jax.random.normal(kx, (BATCH, SEQ, D_MODEL), jnp.float32)
    layer_keys = jax.random.split(kp, NUM_LAYERS)
    layer_params = [init_layer_params(k) for k in layer_keys]
    stacked = stack_layer_params(layer_params)

    out = encoder_pallas(x, stacked)
    out = jax.block_until_ready(out)

    ref = encoder_ref(x, layer_params)
    assert out.shape == (BATCH, SEQ, D_MODEL)
    assert jnp.allclose(out, ref, atol=1e-4, rtol=1e-4), "mismatch vs reference"
    print("KERNEL_OK")
</pallas_src>

<mosaic_0001>
module attributes {stable_mosaic.version = 11 : i64} {
  func.func @fused_encoder_kernel(%arg0: memref<16x32xf32, #tpu.memory_space<vmem>>, %arg1: memref<6x32x32xf32, #tpu.memory_space<vmem>>, %arg2: memref<6x1x32xf32, #tpu.memory_space<vmem>>, %arg3: memref<6x32x32xf32, #tpu.memory_space<vmem>>, %arg4: memref<6x1x32xf32, #tpu.memory_space<vmem>>, %arg5: memref<6x32x32xf32, #tpu.memory_space<vmem>>, %arg6: memref<6x1x32xf32, #tpu.memory_space<vmem>>, %arg7: memref<6x32x32xf32, #tpu.memory_space<vmem>>, %arg8: memref<6x1x32xf32, #tpu.memory_space<vmem>>, %arg9: memref<6x32x128xf32, #tpu.memory_space<vmem>>, %arg10: memref<6x1x128xf32, #tpu.memory_space<vmem>>, %arg11: memref<6x128x32xf32, #tpu.memory_space<vmem>>, %arg12: memref<6x1x32xf32, #tpu.memory_space<vmem>>, %arg13: memref<6x1x32xf32, #tpu.memory_space<vmem>>, %arg14: memref<6x1x32xf32, #tpu.memory_space<vmem>>, %arg15: memref<6x1x32xf32, #tpu.memory_space<vmem>>, %arg16: memref<6x1x32xf32, #tpu.memory_space<vmem>>, %arg17: memref<16x32xf32, #tpu.memory_space<vmem>>) attributes {dimension_semantics = [], scalar_prefetch = 0 : i64, scratch_operands = 0 : i64, tpu.core_type = #tpu.core_type<tc>} {
    %c0 = arith.constant 0 : index
    %c0_0 = arith.constant 0 : index
    %0 = vector.load %arg0[%c0, %c0_0] : memref<16x32xf32, #tpu.memory_space<vmem>>, vector<16x32xf32>
    %c0_i32 = arith.constant 0 : i32
    %1 = arith.index_cast %c0_i32 : i32 to index
    %c0_1 = arith.constant 0 : index
    %c0_2 = arith.constant 0 : index
    %2 = vector.load %arg1[%1, %c0_1, %c0_2] : memref<6x32x32xf32, #tpu.memory_space<vmem>>, vector<1x32x32xf32>
    %3 = vector.shape_cast %2 : vector<1x32x32xf32> to vector<32x32xf32>
    %cst = arith.constant dense<0.000000e+00> : vector<16x32xf32>
    %4 = tpu.matmul %0, %3, %cst {dimension_numbers = #tpu.dot_dimension_numbers<[1], [0], [0], [1], [0, 0, 1, 1], [], []>} : vector<16x32xf32>, vector<32x32xf32>, vector<16x32xf32> -> vector<16x32xf32>
    %5 = arith.index_cast %c0_i32 : i32 to index
    %c0_3 = arith.constant 0 : index
    %c0_4 = arith.constant 0 : index
    %6 = vector.load %arg2[%5, %c0_3, %c0_4] : memref<6x1x32xf32, #tpu.memory_space<vmem>>, vector<1x1x32xf32>
    %7 = vector.shape_cast %6 : vector<1x1x32xf32> to vector<1x32xf32>
    %8 = vector.broadcast %7 : vector<1x32xf32> to vector<16x32xf32>
    %9 = arith.addf %4, %8 : vector<16x32xf32>
    %cst_5 = arith.constant 0.353553385 : f32
    %10 = vector.broadcast %cst_5 : f32 to vector<16x32xf32>
    %11 = arith.mulf %9, %10 : vector<16x32xf32>
    %12 = arith.index_cast %c0_i32 : i32 to index
    %c0_6 = arith.constant 0 : index
    %c0_7 = arith.constant 0 : index
    %13 = vector.load %arg3[%12, %c0_6, %c0_7] : memref<6x32x32xf32, #tpu.memory_space<vmem>>, vector<1x32x32xf32>
    %14 = vector.shape_cast %13 : vector<1x32x32xf32> to vector<32x32xf32>
    %cst_8 = arith.constant dense<0.000000e+00> : vector<16x32xf32>
    %15 = tpu.matmul %0, %14, %cst_8 {dimension_numbers = #tpu.dot_dimension_numbers<[1], [0], [0], [1], [0, 0, 1, 1], [], []>} : vector<16x32xf32>, vector<32x32xf32>, vector<16x32xf32> -> vector<16x32xf32>
    %16 = arith.index_cast %c0_i32 : i32 to index
    %c0_9 = arith.constant 0 : index
    %c0_10 = arith.constant 0 : index
    %17 = vector.load %arg4[%16, %c0_9, %c0_10] : memref<6x1x32xf32, #tpu.memory_space<vmem>>, vector<1x1x32xf32>
    %18 = vector.shape_cast %17 : vector<1x1x32xf32> to vector<1x32xf32>
    %19 = vector.broadcast %18 : vector<1x32xf32> to vector<16x32xf32>
    %20 = arith.addf %15, %19 : vector<16x32xf32>
    %21 = arith.index_cast %c0_i32 : i32 to index
    %c0_11 = arith.constant 0 : index
    %c0_12 = arith.constant 0 : index
    %22 = vector.load %arg5[%21, %c0_11, %c0_12] : memref<6x32x32xf32, #tpu.memory_space<vmem>>, vector<1x32x32xf32>
    %23 = vector.shape_cast %22 : vector<1x32x32xf32> to vector<32x32xf32>
    %cst_13 = arith.constant dense<0.000000e+00> : vector<16x32xf32>
    %24 = tpu.matmul %0, %23, %cst_13 {dimension_numbers = #tpu.dot_dimension_numbers<[1], [0], [0], [1], [0, 0, 1, 1], [], []>} : vector<16x32xf32>, vector<32x32xf32>, vector<16x32xf32> -> vector<16x32xf32>
    %25 = arith.index_cast %c0_i32 : i32 to index
    %c0_14 = arith.constant 0 : index
    %c0_15 = arith.constant 0 : index
    %26 = vector.load %arg6[%25, %c0_14, %c0_15] : memref<6x1x32xf32, #tpu.memory_space<vmem>>, vector<1x1x32xf32>
    %27 = vector.shape_cast %26 : vector<1x1x32xf32> to vector<1x32xf32>
    %28 = vector.broadcast %27 : vector<1x32xf32> to vector<16x32xf32>
    %29 = arith.addf %24, %28 : vector<16x32xf32>
    %30 = arith.index_cast %c0_i32 : i32 to index
    %c0_16 = arith.constant 0 : index
    %c0_17 = arith.constant 0 : index
    %31 = vector.load %arg7[%30, %c0_16, %c0_17] : memref<6x32x32xf32, #tpu.memory_space<vmem>>, vector<1x32x32xf32>
    %32 = vector.shape_cast %31 : vector<1x32x32xf32> to vector<32x32xf32>
    %33 = vector.extract_strided_slice %11 {offsets = [0, 0], sizes = [8, 8], strides = [1, 1]} : vector<16x32xf32> to vector<8x8xf32>
    %34 = vector.extract_strided_slice %20 {offsets = [0, 0], sizes = [8, 8], strides = [1, 1]} : vector<16x32xf32> to vector<8x8xf32>
    %cst_18 = arith.constant dense<0.000000e+00> : vector<8x8xf32>
    %35 = tpu.matmul %33, %34, %cst_18 {dimension_numbers = #tpu.dot_dimension_numbers<[1], [1], [0], [0], [0, 0, 1, 0], [], []>} : vector<8x8xf32>, vector<8x8xf32>, vector<8x8xf32> -> vector<8x8xf32>
    %36 = vector.extract_strided_slice %11 {offsets = [0, 8], sizes = [8, 8], strides = [1, 1]} : vector<16x32xf32> to vector<8x8xf32>
    %37 = vector.extract_strided_slice %20 {offsets = [0, 8], sizes = [8, 8], strides = [1, 1]} : vector<16x32xf32> to vector<8x8xf32>
    %cst_19 = arith.constant dense<0.000000e+00> : vector<8x8xf32>
    %38 = tpu.matmul %36, %37, %cst_19 {dimension_numbers = #tpu.dot_dimension_numbers<[1], [1], [0], [0], [0, 0, 1, 0], [], []>} : vector<8x8xf32>, vector<8x8xf32>, vector<8x8xf32> -> vector<8x8xf32>
    %39 = vector.extract_strided_slice %11 {offsets = [0, 16], sizes = [8, 8], strides = [1, 1]} : vector<16x32xf32> to vector<8x8xf32>
    %40 = vector.extract_strided_slice %20 {offsets = [0, 16], sizes = [8, 8], strides = [1, 1]} : vector<16x32xf32> to vector<8x8xf32>
    %cst_20 = arith.constant dense<0.000000e+00> : vector<8x8xf32>
    %41 = tpu.matmul %39, %40, %cst_20 {dimension_numbers = #tpu.dot_dimension_numbers<[1], [1], [0], [0], [0, 0, 1, 0], [], []>} : vector<8x8xf32>, vector<8x8xf32>, vector<8x8xf32> -> vector<8x8xf32>
    %42 = vector.extract_strided_slice %11 {offsets = [0, 24], sizes = [8, 8], strides = [1, 1]} : vector<16x32xf32> to vector<8x8xf32>
    %43 = vector.extract_strided_slice %20 {offsets = [0, 24], sizes = [8, 8], strides = [1, 1]} : vector<16x32xf32> to vector<8x8xf32>
    %cst_21 = arith.constant dense<0.000000e+00> : vector<8x8xf32>
    %44 = tpu.matmul %42, %43, %cst_21 {dimension_numbers = #tpu.dot_dimension_numbers<[1], [1], [0], [0], [0, 0, 1, 0], [], []>} : vector<8x8xf32>, vector<8x8xf32>, vector<8x8xf32> -> vector<8x8xf32>
    %45 = vector.extract_strided_slice %11 {offsets = [8, 0], sizes = [8, 8], strides = [1, 1]} : vector<16x32xf32> to vector<8x8xf32>
    %46 = vector.extract_strided_slice %20 {offsets = [8, 0], sizes = [8, 8], strides = [1, 1]} : vector<16x32xf32> to vector<8x8xf32>
    %cst_22 = arith.constant dense<0.000000e+00> : vector<8x8xf32>
    %47 = tpu.matmul %45, %46, %cst_22 {dimension_numbers = #tpu.dot_dimension_numbers<[1], [1], [0], [0], [0, 0, 1, 0], [], []>} : vector<8x8xf32>, vector<8x8xf32>, vector<8x8xf32> -> vector<8x8xf32>
    %48 = vector.extract_strided_slice %11 {offsets = [8, 8], sizes = [8, 8], strides = [1, 1]} : vector<16x32xf32> to vector<8x8xf32>
    %49 = vector.extract_strided_slice %20 {offsets = [8, 8], sizes = [8, 8], strides = [1, 1]} : vector<16x32xf32> to vector<8x8xf32>
    %cst_23 = arith.constant dense<0.000000e+00> : vector<8x8xf32>
    %50 = tpu.matmul %48, %49, %cst_23 {dimension_numbers = #tpu.dot_dimension_numbers<[1], [1], [0], [0], [0, 0, 1, 0], [], []>} : vector<8x8xf32>, vector<8x8xf32>, vector<8x8xf32> -> vector<8x8xf32>
    %51 = vector.extract_strided_slice %11 {offsets = [8, 16], sizes = [8, 8], strides = [1, 1]} : vector<16x32xf32> to vector<8x8xf32>
    %52 = vector.extract_strided_slice %20 {offsets = [8, 16], sizes = [8, 8], strides = [1, 1]} : vector<16x32xf32> to vector<8x8xf32>
    %cst_24 = arith.constant dense<0.000000e+00> : vector<8x8xf32>
    %53 = tpu.matmul %51, %52, %cst_24 {dimension_numbers = #tpu.dot_dimension_numbers<[1], [1], [0], [0], [0, 0, 1, 0], [], []>} : vector<8x8xf32>, vector<8x8xf32>, vector<8x8xf32> -> vector<8x8xf32>
    %54 = vector.extract_strided_slice %11 {offsets = [8, 24], sizes = [8, 8], strides = [1, 1]} : vector<16x32xf32> to vector<8x8xf32>
    %55 = vector.extract_strided_slice %20 {offsets = [8, 24], sizes = [8, 8], strides = [1, 1]} : vector<16x32xf32> to vector<8x8xf32>
    %cst_25 = arith.constant dense<0.000000e+00> : vector<8x8xf32>
    %56 = tpu.matmul %54, %55, %cst_25 {dimension_numbers = #tpu.dot_dimension_numbers<[1], [1], [0], [0], [0, 0, 1, 0], [], []>} : vector<8x8xf32>, vector<8x8xf32>, vector<8x8xf32> -> vector<8x8xf32>
    %57 = tpu.concatenate %35, %38, %41, %44, %47, %50, %53, %56 in 0 : vector<8x8xf32>, vector<8x8xf32>, vector<8x8xf32>, vector<8x8xf32>, vector<8x8xf32>, vector<8x8xf32>, vector<8x8xf32>, vector<8x8xf32> -> vector<64x8xf32>
    %cst_26 = arith.constant dense<0xFF800000> : vector<64xf32>
    %58 = vector.multi_reduction <maximumf>, %57, %cst_26 [1] : vector<64x8xf32> to vector<64xf32>
    %59 = vector.shape_cast %58 : vector<64xf32> to vector<64x1xf32>
    %60 = vector.broadcast %59 : vector<64x1xf32> to vector<64x8xf32>
    %61 = arith.subf %57, %60 : vector<64x8xf32>
    %62 = math.exp %61 : vector<64x8xf32>
    %cst_27 = arith.constant dense<0.000000e+00> : vector<64xf32>
    %63 = vector.multi_reduction <add>, %62, %cst_27 [1] : vector<64x8xf32> to vector<64xf32>
    %64 = vector.shape_cast %63 : vector<64xf32> to vector<64x1xf32>
    %65 = tpu.reciprocal %64 : vector<64x1xf32> -> vector<64x1xf32>
    %66 = vector.broadcast %65 : vector<64x1xf32> to vector<64x8xf32>
    %67 = arith.mulf %62, %66 : vector<64x8xf32>
    %cst_28 = arith.constant 0.000000e+00 : f32
    %68 = vector.broadcast %cst_28 : f32 to vector<8x32xf32>
    %69 = vector.extract_strided_slice %67 {offsets = [0, 0], sizes = [8, 8], strides = [1, 1]} : vector<64x8xf32> to vector<8x8xf32>
    %70 = vector.extract_strided_slice %29 {offsets = [0, 0], sizes = [8, 8], strides = [1, 1]} : vector<16x32xf32> to vector<8x8xf32>
    %cst_29 = arith.constant dense<0.000000e+00> : vector<8x8xf32>
    %71 = tpu.matmul %69, %70, %cst_29 {dimension_numbers = #tpu.dot_dimension_numbers<[1], [0], [0], [1], [0, 0, 1, 1], [], []>} : vector<8x8xf32>, vector<8x8xf32>, vector<8x8xf32> -> vector<8x8xf32>
    %72 = vector.extract_strided_slice %32 {offsets = [0, 0], sizes = [8, 32], strides = [1, 1]} : vector<32x32xf32> to vector<8x32xf32>
    %cst_30 = arith.constant dense<0.000000e+00> : vector<8x32xf32>
    %73 = tpu.matmul %71, %72, %cst_30 {dimension_numbers = #tpu.dot_dimension_numbers<[1], [0], [0], [1], [0, 0, 1, 1], [], []>} : vector<8x8xf32>, vector<8x32xf32>, vector<8x32xf32> -> vector<8x32xf32>
    %74 = arith.addf %68, %73 : vector<8x32xf32>
    %75 = vector.extract_strided_slice %67 {offsets = [8, 0], sizes = [8, 8], strides = [1, 1]} : vector<64x8xf32> to vector<8x8xf32>
    %76 = vector.extract_strided_slice %29 {offsets = [0, 8], sizes = [8, 8], strides = [1, 1]} : vector<16x32xf32> to vector<8x8xf32>
    %cst_31 = arith.constant dense<0.000000e+00> : vector<8x8xf32>
    %77 = tpu.matmul %75, %76, %cst_31 {dimension_numbers = #tpu.dot_dimension_numbers<[1], [0], [0], [1], [0, 0, 1, 1], [], []>} : vector<8x8xf32>, vector<8x8xf32>, vector<8x8xf32> -> vector<8x8xf32>
    %78 = vector.extract_strided_slice %32 {offsets = [8, 0], sizes = [8, 32], strides = [1, 1]} : vector<32x32xf32> to vector<8x32xf32>
    %cst_32 = arith.constant dense<0.000000e+00> : vector<8x32xf32>
    %79 = tpu.matmul %77, %78, %cst_32 {dimension_numbers = #tpu.dot_dimension_numbers<[1], [0], [0], [1], [0, 0, 1, 1], [], []>} : vector<8x8xf32>, vector<8x32xf32>, vector<8x32xf32> -> vector<8x32xf32>
    %80 = arith.addf %74, %79 : vector<8x32xf32>
    %81 = vector.extract_strided_slice %67 {offsets = [16, 0], sizes = [8, 8], strides = [1, 1]} : vector<64x8xf32> to vector<8x8xf32>
    %82 = vector.extract_strided_slice %29 {offsets = [0, 16], sizes = [8, 8], strides = [1, 1]} : vector<16x32xf32> to vector<8x8xf32>
    %cst_33 = arith.constant dense<0.000000e+00> : vector<8x8xf32>
    %83 = tpu.matmul %81, %82, %cst_33 {dimension_numbers = #tpu.dot_dimension_numbers<[1], [0], [0], [1], [0, 0, 1, 1], [], []>} : vector<8x8xf32>, vector<8x8xf32>, vector<8x8xf32> -> vector<8x8xf32>
    %84 = vector.extract_strided_slice %32 {offsets = [16, 0], sizes = [8, 32], strides = [1, 1]} : vector<32x32xf32> to vector<8x32xf32>
    %cst_34 = arith.constant dense<0.000000e+00> : vector<8x32xf32>
    %85 = tpu.matmul %83, %84, %cst_34 {dimension_numbers = #tpu.dot_dimension_numbers<[1], [0], [0], [1], [0, 0, 1, 1], [], []>} : vector<8x8xf32>, vector<8x32xf32>, vector<8x32xf32> -> vector<8x32xf32>
    %86 = arith.addf %80, %85 : vector<8x32xf32>
    %87 = vector.extract_strided_slice %67 {offsets = [24, 0], sizes = [8, 8], strides = [1, 1]} : vector<64x8xf32> to vector<8x8xf32>
    %88 = vector.extract_strided_slice %29 {offsets = [0, 24], sizes = [8, 8], strides = [1, 1]} : vector<16x32xf32> to vector<8x8xf32>
    %cst_35 = arith.constant dense<0.000000e+00> : vector<8x8xf32>
    %89 = tpu.matmul %87, %88, %cst_35 {dimension_numbers = #tpu.dot_dimension_numbers<[1], [0], [0], [1], [0, 0, 1, 1], [], []>} : vector<8x8xf32>, vector<8x8xf32>, vector<8x8xf32> -> vector<8x8xf32>
    %90 = vector.extract_strided_slice %32 {offsets = [24, 0], sizes = [8, 32], strides = [1, 1]} : vector<32x32xf32> to vector<8x32xf32>
    %cst_36 = arith.constant dense<0.000000e+00> : vector<8x32xf32>
    %91 = tpu.matmul %89, %90, %cst_36 {dimension_numbers = #tpu.dot_dimension_numbers<[1], [0], [0], [1], [0, 0, 1, 1], [], []>} : vector<8x8xf32>, vector<8x32xf32>, vector<8x32xf32> -> vector<8x32xf32>
    %92 = arith.addf %86, %91 : vector<8x32xf32>
    %cst_37 = arith.constant 0.000000e+00 : f32
    %93 = vector.broadcast %cst_37 : f32 to vector<8x32xf32>
    %94 = vector.extract_strided_slice %67 {offsets = [32, 0], sizes = [8, 8], strides = [1, 1]} : vector<64x8xf32> to vector<8x8xf32>
    %95 = vector.extract_strided_slice %29 {offsets = [8, 0], sizes = [8, 8], strides = [1, 1]} : vector<16x32xf32> to vector<8x8xf32>
    %cst_38 = arith.constant dense<0.000000e+00> : vector<8x8xf32>
    %96 = tpu.matmul %94, %95, %cst_38 {dimension_numbers = #tpu.dot_dimension_numbers<[1], [0], [0], [1], [0, 0, 1, 1], [], []>} : vector<8x8xf32>, vector<8x8xf32>, vector<8x8xf32> -> vector<8x8xf32>
    %97 = vector.extract_strided_slice %32 {offsets = [0, 0], sizes = [8, 32], strides = [1, 1]} : vector<32x32xf32> to vector<8x32xf32>
    %cst_39 = arith.constant dense<0.000000e+00> : vector<8x32xf32>
    %98 = tpu.matmul %96, %97, %cst_39 {dimension_numbers = #tpu.dot_dimension_numbers<[1], [0], [0], [1], [0, 0, 1, 1], [], []>} : vector<8x8xf32>, vector<8x32xf32>, vector<8x32xf32> -> vector<8x32xf32>
    %99 = arith.addf %93, %98 : vector<8x32xf32>
    %100 = vector.extract_strided_slice %67 {offsets = [40, 0], sizes = [8, 8], strides = [1, 1]} : vector<64x8xf32> to vector<8x8xf32>
    %101 = vector.extract_strided_slice %29 {offsets = [8, 8], sizes = [8, 8], strides = [1, 1]} : vector<16x32xf32> to vector<8x8xf32>
    %cst_40 = arith.constant dense<0.000000e+00> : vector<8x8xf32>
    %102 = tpu.matmul %100, %101, %cst_40 {dimension_numbers = #tpu.dot_dimension_numbers<[1], [0], [0], [1], [0, 0, 1, 1], [], []>} : vector<8x8xf32>, vector<8x8xf32>, vector<8x8xf32> -> vector<8x8xf32>
    %103 = vector.extract_strided_slice %32 {offsets = [8, 0], sizes = [8, 32], strides = [1, 1]} : vector<32x32xf32> to vector<8x32xf32>
    %cst_41 = arith.constant dense<0.000000e+00> : vector<8x32xf32>
    %104 = tpu.matmul %102, %103, %cst_41 {dimension_numbers = #tpu.dot_dimension_numbers<[1], [0], [0], [1], [0, 0, 1, 1], [], []>} : vector<8x8xf32>, vector<8x32xf32>, vector<8x32xf32> -> vector<8x32xf32>
    %105 = arith.addf %99, %104 : vector<8x32xf32>
    %106 = vector.extract_strided_slice %67 {offsets = [48, 0], sizes = [8, 8], strides = [1, 1]} : vector<64x8xf32> to vector<8x8xf32>
    %107 = vector.extract_strided_slice %29 {offsets = [8, 16], sizes = [8, 8], strides = [1, 1]} : vector<16x32xf32> to vector<8x8xf32>
    %cst_42 = arith.constant dense<0.000000e+00> : vector<8x8xf32>
    %108 = tpu.matmul %106, %107, %cst_42 {dimension_numbers = #tpu.dot_dimension_numbers<[1], [0], [0], [1], [0, 0, 1, 1], [], []>} : vector<8x8xf32>, vector<8x8xf32>, vector<8x8xf32> -> vector<8x8xf32>
    %109 = vector.extract_strided_slice %32 {offsets = [16, 0], sizes = [8, 32], strides = [1, 1]} : vector<32x32xf32> to vector<8x32xf32>
    %cst_43 = arith.constant dense<0.000000e+00> : vector<8x32xf32>
    %110 = tpu.matmul %108, %109, %cst_43 {dimension_numbers = #tpu.dot_dimension_numbers<[1], [0], [0], [1], [0, 0, 1, 1], [], []>} : vector<8x8xf32>, vector<8x32xf32>, vector<8x32xf32> -> vector<8x32xf32>
    %111 = arith.addf %105, %110 : vector<8x32xf32>
    %112 = vector.extract_strided_slice %67 {offsets = [56, 0], sizes = [8, 8], strides = [1, 1]} : vector<64x8xf32> to vector<8x8xf32>
    %113 = vector.extract_strided_slice %29 {offsets = [8, 24], sizes = [8, 8], strides = [1, 1]} : vector<16x32xf32> to vector<8x8xf32>
    %cst_44 = arith.constant dense<0.000000e+00> : vector<8x8xf32>
    %114 = tpu.matmul %112, %113, %cst_44 {dimension_numbers = #tpu.dot_dimension_numbers<[1], [0], [0], [1], [0, 0, 1, 1], [], []>} : vector<8x8xf32>, vector<8x8xf32>, vector<8x8xf32> -> vector<8x8xf32>
    %115 = vector.extract_strided_slice %32 {offsets = [24, 0], sizes = [8, 32], strides = [1, 1]} : vector<32x32xf32> to vector<8x32xf32>
    %cst_45 = arith.constant dense<0.000000e+00> : vector<8x32xf32>
    %116 = tpu.matmul %114, %115, %cst_45 {dimension_numbers = #tpu.dot_dimension_numbers<[1], [0], [0], [1], [0, 0, 1, 1], [], []>} : vector<8x8xf32>, vector<8x32xf32>, vector<8x32xf32> -> vector<8x32xf32>
    %117 = arith.addf %111, %116 : vector<8x32xf32>
    %118 = tpu.concatenate %92, %117 in 0 : vector<8x32xf32>, vector<8x32xf32> -> vector<16x32xf32>
    %119 = arith.index_cast %c0_i32 : i32 to index
    %c0_46 = arith.constant 0 : index
    %c0_47 = arith.constant 0 : index
    %120 = vector.load %arg8[%119, %c0_46, %c0_47] : memref<6x1x32xf32, #tpu.memory_space<vmem>>, vector<1x1x32xf32>
    %121 = vector.shape_cast %120 : vector<1x1x32xf32> to vector<1x32xf32>
    %122 = vector.broadcast %121 : vector<1x32xf32> to vector<16x32xf32>
    %123 = arith.addf %118, %122 : vector<16x32xf32>
    %124 = arith.addf %0, %123 : vector<16x32xf32>
    %cst_48 = arith.constant dense<0.000000e+00> : vector<16xf32>
    %125 = vector.multi_reduction <add>, %124, %cst_48 [1] : vector<16x32xf32> to vector<16xf32>
    %126 = vector.shape_cast %125 : vector<16xf32> to vector<16x1xf32>
    %cst_49 = arith.constant 3.200000e+01 : f32
    %127 = vector.broadcast %cst_49 : f32 to vector<16x1xf32>
    %128 = arith.divf %126, %127 : vector<16x1xf32>
    %129 = vector.broadcast %128 : vector<16x1xf32> to vector<16x32xf32>
    %130 = arith.subf %124, %129 : vector<16x32xf32>
    %131 = arith.mulf %130, %130 : vector<16x32xf32>
    %cst_50 = arith.constant dense<0.000000e+00> : vector<16xf32>
    %132 = vector.multi_reduction <add>, %131, %cst_50 [1] : vector<16x32xf32> to vector<16xf32>
    %133 = vector.shape_cast %132 : vector<16xf32> to vector<16x1xf32>
    %cst_51 = arith.constant 3.200000e+01 : f32
    %134 = vector.broadcast %cst_51 : f32 to vector<16x1xf32>
    %135 = arith.divf %133, %134 : vector<16x1xf32>
    %136 = vector.broadcast %128 : vector<16x1xf32> to vector<16x32xf32>
    %137 = arith.subf %124, %136 : vector<16x32xf32>
    %cst_52 = arith.constant 9.99999974E-6 : f32
    %138 = vector.broadcast %cst_52 : f32 to vector<16x1xf32>
    %139 = arith.addf %135, %138 : vector<16x1xf32>
    %140 = math.rsqrt %139 : vector<16x1xf32>
    %141 = vector.broadcast %140 : vector<16x1xf32> to vector<16x32xf32>
    %142 = arith.mulf %137, %141 : vector<16x32xf32>
    %143 = arith.index_cast %c0_i32 : i32 to index
    %c0_53 = arith.constant 0 : index
    %c0_54 = arith.constant 0 : index
    %144 = vector.load %arg13[%143, %c0_53, %c0_54] : memref<6x1x32xf32, #tpu.memory_space<vmem>>, vector<1x1x32xf32>
    %145 = vector.shape_cast %144 : vector<1x1x32xf32> to vector<1x32xf32>
    %146 = vector.broadcast %145 : vector<1x32xf32> to vector<16x32xf32>
    %147 = arith.mulf %142, %146 : vector<16x32xf32>
    %148 = arith.index_cast %c0_i32 : i32 to index
    %c0_55 = arith.constant 0 : index
    %c0_56 = arith.constant 0 : index
    %149 = vector.load %arg14[%148, %c0_55, %c0_56] : memref<6x1x32xf32, #tpu.memory_space<vmem>>, vector<1x1x32xf32>
    %150 = vector.shape_cast %149 : vector<1x1x32xf32> to vector<1x32xf32>
    %151 = vector.broadcast %150 : vector<1x32xf32> to vector<16x32xf32>
    %152 = arith.addf %147, %151 : vector<16x32xf32>
    %153 = arith.index_cast %c0_i32 : i32 to index
    %c0_57 = arith.constant 0 : index
    %c0_58 = arith.constant 0 : index
    %154 = vector.load %arg9[%153, %c0_57, %c0_58] : memref<6x32x128xf32, #tpu.memory_space<vmem>>, vector<1x32x128xf32>
    %155 = vector.shape_cast %154 : vector<1x32x128xf32> to vector<32x128xf32>
    %cst_59 = arith.constant dense<0.000000e+00> : vector<16x128xf32>
    %156 = tpu.matmul %152, %155, %cst_59 {dimension_numbers = #tpu.dot_dimension_numbers<[1], [0], [0], [1], [0, 0, 1, 1], [], []>} : vector<16x32xf32>, vector<32x128xf32>, vector<16x128xf32> -> vector<16x128xf32>
    %157 = arith.index_cast %c0_i32 : i32 to index
    %c0_60 = arith.constant 0 : index
    %c0_61 = arith.constant 0 : index
    %158 = vector.load %arg10[%157, %c0_60, %c0_61] : memref<6x1x128xf32, #tpu.memory_space<vmem>>, vector<1x1x128xf32>
    %159 = vector.shape_cast %158 : vector<1x1x128xf32> to vector<1x128xf32>
    %160 = vector.broadcast %159 : vector<1x128xf32> to vector<16x128xf32>
    %161 = arith.addf %156, %160 : vector<16x128xf32>
    %cst_62 = arith.constant 0.000000e+00 : f32
    %162 = vector.broadcast %cst_62 : f32 to vector<16x128xf32>
    %163 = arith.maximumf %161, %162 : vector<16x128xf32>
    %164 = arith.index_cast %c0_i32 : i32 to index
    %c0_63 = arith.constant 0 : index
    %c0_64 = arith.constant 0 : index
    %165 = vector.load %arg11[%164, %c0_63, %c0_64] : memref<6x128x32xf32, #tpu.memory_space<vmem>>, vector<1x128x32xf32>
    %166 = vector.shape_cast %165 : vector<1x128x32xf32> to vector<128x32xf32>
    %cst_65 = arith.constant dense<0.000000e+00> : vector<16x32xf32>
    %167 = tpu.matmul %163, %166, %cst_65 {dimension_numbers = #tpu.dot_dimension_numbers<[1], [0], [0], [1], [0, 0, 1, 1], [], []>} : vector<16x128xf32>, vector<128x32xf32>, vector<16x32xf32> -> vector<16x32xf32>
    %168 = arith.index_cast %c0_i32 : i32 to index
    %c0_66 = arith.constant 0 : index
    %c0_67 = arith.constant 0 : index
    %169 = vector.load %arg12[%168, %c0_66, %c0_67] : memref<6x1x32xf32, #tpu.memory_space<vmem>>, vector<1x1x32xf32>
    %170 = vector.shape_cast %169 : vector<1x1x32xf32> to vector<1x32xf32>
    %171 = vector.broadcast %170 : vector<1x32xf32> to vector<16x32xf32>
    %172 = arith.addf %167, %171 : vector<16x32xf32>
    %173 = arith.addf %152, %172 : vector<16x32xf32>
    %cst_68 = arith.constant dense<0.000000e+00> : vector<16xf32>
    %174 = vector.multi_reduction <add>, %173, %cst_68 [1] : vector<16x32xf32> to vector<16xf32>
    %175 = vector.shape_cast %174 : vector<16xf32> to vector<16x1xf32>
    %cst_69 = arith.constant 3.200000e+01 : f32
    %176 = vector.broadcast %cst_69 : f32 to vector<16x1xf32>
    %177 = arith.divf %175, %176 : vector<16x1xf32>
    %178 = vector.broadcast %177 : vector<16x1xf32> to vector<16x32xf32>
    %179 = arith.subf %173, %178 : vector<16x32xf32>
    %180 = arith.mulf %179, %179 : vector<16x32xf32>
    %cst_70 = arith.constant dense<0.000000e+00> : vector<16xf32>
    %181 = vector.multi_reduction <add>, %180, %cst_70 [1] : vector<16x32xf32> to vector<16xf32>
    %182 = vector.shape_cast %181 : vector<16xf32> to vector<16x1xf32>
    %cst_71 = arith.constant 3.200000e+01 : f32
    %183 = vector.broadcast %cst_71 : f32 to vector<16x1xf32>
    %184 = arith.divf %182, %183 : vector<16x1xf32>
    %185 = vector.broadcast %177 : vector<16x1xf32> to vector<16x32xf32>
    %186 = arith.subf %173, %185 : vector<16x32xf32>
    %cst_72 = arith.constant 9.99999974E-6 : f32
    %187 = vector.broadcast %cst_72 : f32 to vector<16x1xf32>
    %188 = arith.addf %184, %187 : vector<16x1xf32>
    %189 = math.rsqrt %188 : vector<16x1xf32>
    %190 = vector.broadcast %189 : vector<16x1xf32> to vector<16x32xf32>
    %191 = arith.mulf %186, %190 : vector<16x32xf32>
    %192 = arith.index_cast %c0_i32 : i32 to index
    %c0_73 = arith.constant 0 : index
    %c0_74 = arith.constant 0 : index
    %193 = vector.load %arg15[%192, %c0_73, %c0_74] : memref<6x1x32xf32, #tpu.memory_space<vmem>>, vector<1x1x32xf32>
    %194 = vector.shape_cast %193 : vector<1x1x32xf32> to vector<1x32xf32>
    %195 = vector.broadcast %194 : vector<1x32xf32> to vector<16x32xf32>
    %196 = arith.mulf %191, %195 : vector<16x32xf32>
    %197 = arith.index_cast %c0_i32 : i32 to index
    %c0_75 = arith.constant 0 : index
    %c0_76 = arith.constant 0 : index
    %198 = vector.load %arg16[%197, %c0_75, %c0_76] : memref<6x1x32xf32, #tpu.memory_space<vmem>>, vector<1x1x32xf32>
    %199 = vector.shape_cast %198 : vector<1x1x32xf32> to vector<1x32xf32>
    %200 = vector.broadcast %199 : vector<1x32xf32> to vector<16x32xf32>
    %201 = arith.addf %196, %200 : vector<16x32xf32>
    %c1_i32 = arith.constant 1 : i32
    %202 = arith.index_cast %c1_i32 : i32 to index
    %c0_77 = arith.constant 0 : index
    %c0_78 = arith.constant 0 : index
    %203 = vector.load %arg1[%202, %c0_77, %c0_78] : memref<6x32x32xf32, #tpu.memory_space<vmem>>, vector<1x32x32xf32>
    %204 = vector.shape_cast %203 : vector<1x32x32xf32> to vector<32x32xf32>
    %cst_79 = arith.constant dense<0.000000e+00> : vector<16x32xf32>
    %205 = tpu.matmul %201, %204, %cst_79 {dimension_numbers = #tpu.dot_dimension_numbers<[1], [0], [0], [1], [0, 0, 1, 1], [], []>} : vector<16x32xf32>, vector<32x32xf32>, vector<16x32xf32> -> vector<16x32xf32>
    %206 = arith.index_cast %c1_i32 : i32 to index
    %c0_80 = arith.constant 0 : index
    %c0_81 = arith.constant 0 : index
    %207 = vector.load %arg2[%206, %c0_80, %c0_81] : memref<6x1x32xf32, #tpu.memory_space<vmem>>, vector<1x1x32xf32>
    %208 = vector.shape_cast %207 : vector<1x1x32xf32> to vector<1x32xf32>
    %209 = vector.broadcast %208 : vector<1x32xf32> to vector<16x32xf32>
    %210 = arith.addf %205, %209 : vector<16x32xf32>
    %cst_82 = arith.constant 0.353553385 : f32
    %211 = vector.broadcast %cst_82 : f32 to vector<16x32xf32>
    %212 = arith.mulf %210, %211 : vector<16x32xf32>
    %213 = arith.index_cast %c1_i32 : i32 to index
    %c0_83 = arith.constant 0 : index
    %c0_84 = arith.constant 0 : index
    %214 = vector.load %arg3[%213, %c0_83, %c0_84] : memref<6x32x32xf32, #tpu.memory_space<vmem>>, vector<1x32x32xf32>
    %215 = vector.shape_cast %214 : vector<1x32x32xf32> to vector<32x32xf32>
    %cst_85 = arith.constant dense<0.000000e+00> : vector<16x32xf32>
    %216 = tpu.matmul %201, %215, %cst_85 {dimension_numbers = #tpu.dot_dimension_numbers<[1], [0], [0], [1], [0, 0, 1, 1], [], []>} : vector<16x32xf32>, vector<32x32xf32>, vector<16x32xf32> -> vector<16x32xf32>
    %217 = arith.index_cast %c1_i32 : i32 to index
    %c0_86 = arith.constant 0 : index
    %c0_87 = arith.constant 0 : index
    %218 = vector.load %arg4[%217, %c0_86, %c0_87] : memref<6x1x32xf32, #tpu.memory_space<vmem>>, vector<1x1x32xf32>
    %219 = vector.shape_cast %218 : vector<1x1x32xf32> to vector<1x32xf32>
    %220 = vector.broadcast %219 : vector<1x32xf32> to vector<16x32xf32>
    %221 = arith.addf %216, %220 : vector<16x32xf32>
    %222 = arith.index_cast %c1_i32 : i32 to index
    %c0_88 = arith.constant 0 : index
    %c0_89 = arith.constant 0 : index
    %223 = vector.load %arg5[%222, %c0_88, %c0_89] : memref<6x32x32xf32, #tpu.memory_space<vmem>>, vector<1x32x32xf32>
    %224 = vector.shape_cast %223 : vector<1x32x32xf32> to vector<32x32xf32>
    %cst_90 = arith.constant dense<0.000000e+00> : vector<16x32xf32>
    %225 = tpu.matmul %201, %224, %cst_90 {dimension_numbers = #tpu.dot_dimension_numbers<[1], [0], [0], [1], [0, 0, 1, 1], [], []>} : vector<16x32xf32>, vector<32x32xf32>, vector<16x32xf32> -> vector<16x32xf32>
    %226 = arith.index_cast %c1_i32 : i32 to index
    %c0_91 = arith.constant 0 : index
    %c0_92 = arith.constant 0 : index
    %227 = vector.load %arg6[%226, %c0_91, %c0_92] : memref<6x1x32xf32, #tpu.memory_space<vmem>>, vector<1x1x32xf32>
    %228 = vector.shape_cast %227 : vector<1x1x32xf32> to vector<1x32xf32>
    %229 = vector.broadcast %228 : vector<1x32xf32> to vector<16x32xf32>
    %230 = arith.addf %225, %229 : vector<16x32xf32>
    %231 = arith.index_cast %c1_i32 : i32 to index
    %c0_93 = arith.constant 0 : index
    %c0_94 = arith.constant 0 : index
    %232 = vector.load %arg7[%231, %c0_93, %c0_94] : memref<6x32x32xf32, #tpu.memory_space<vmem>>, vector<1x32x32xf32>
    %233 = vector.shape_cast %232 : vector<1x32x32xf32> to vector<32x32xf32>
    %234 = vector.extract_strided_slice %212 {offsets = [0, 0], sizes = [8, 8], strides = [1, 1]} : vector<16x32xf32> to vector<8x8xf32>
    %235 = vector.extract_strided_slice %221 {offsets = [0, 0], sizes = [8, 8], strides = [1, 1]} : vector<16x32xf32> to vector<8x8xf32>
    %cst_95 = arith.constant dense<0.000000e+00> : vector<8x8xf32>
    %236 = tpu.matmul %234, %235, %cst_95 {dimension_numbers = #tpu.dot_dimension_numbers<[1], [1], [0], [0], [0, 0, 1, 0], [], []>} : vector<8x8xf32>, vector<8x8xf32>, vector<8x8xf32> -> vector<8x8xf32>
    %237 = vector.extract_strided_slice %212 {offsets = [0, 8], sizes = [8, 8], strides = [1, 1]} : vector<16x32xf32> to vector<8x8xf32>
    %238 = vector.extract_strided_slice %221 {offsets = [0, 8], sizes = [8, 8], strides = [1, 1]} : vector<16x32xf32> to vector<8x8xf32>
    %cst_96 = arith.constant dense<0.000000e+00> : vector<8x8xf32>
    %239 = tpu.matmul %237, %238, %cst_96 {dimension_numbers = #tpu.dot_dimension_numbers<[1], [1], [0], [0], [0, 0, 1, 0], [], []>} : vector<8x8xf32>, vector<8x8xf32>, vector<8x8xf32> -> vector<8x8xf32>
    %240 = vector.extract_strided_slice %212 {offsets = [0, 16], sizes = [8, 8], strides = [1, 1]} : vector<16x32xf32> to vector<8x8xf32>
    %241 = vector.extract_strided_slice %221 {offsets = [0, 16], sizes = [8, 8], strides = [1, 1]} : vector<16x32xf32> to vector<8x8xf32>
    %cst_97 = arith.constant dense<0.000000e+00> : vector<8x8xf32>
    %242 = tpu.matmul %240, %241, %cst_97 {dimension_numbers = #tpu.dot_dimension_numbers<[1], [1], [0], [0], [0, 0, 1, 0], [], []>} : vector<8x8xf32>, vector<8x8xf32>, vector<8x8xf32> -> vector<8x8xf32>
    %243 = vector.extract_strided_slice %212 {offsets = [0, 24], sizes = [8, 8], strides = [1, 1]} : vector<16x32xf32> to vector<8x8xf32>
    %244 = vector.extract_strided_slice %221 {offsets = [0, 24], sizes = [8, 8], strides = [1, 1]} : vector<16x32xf32> to vector<8x8xf32>
    %cst_98 = arith.constant dense<0.000000e+00> : vector<8x8xf32>
    %245 = tpu.matmul %243, %244, %cst_98 {dimension_numbers = #tpu.dot_dimension_numbers<[1], [1], [0], [0], [0, 0, 1, 0], [], []>} : vector<8x8xf32>, vector<8x8xf32>, vector<8x8xf32> -> vector<8x8xf32>
    %246 = vector.extract_strided_slice %212 {offsets = [8, 0], sizes = [8, 8], strides = [1, 1]} : vector<16x32xf32> to vector<8x8xf32>
    %247 = vector.extract_strided_slice %221 {offsets = [8, 0], sizes = [8, 8], strides = [1, 1]} : vector<16x32xf32> to vector<8x8xf32>
    %cst_99 = arith.constant dense<0.000000e+00> : vector<8x8xf32>
    %248 = tpu.matmul %246, %247, %cst_99 {dimension_numbers = #tpu.dot_dimension_numbers<[1], [1], [0], [0], [0, 0, 1, 0], [], []>} : vector<8x8xf32>, vector<8x8xf32>, vector<8x8xf32> -> vector<8x8xf32>
    %249 = vector.extract_strided_slice %212 {offsets = [8, 8], sizes = [8, 8], strides = [1, 1]} : vector<16x32xf32> to vector<8x8xf32>
    %250 = vector.extract_strided_slice %221 {offsets = [8, 8], sizes = [8, 8], strides = [1, 1]} : vector<16x32xf32> to vector<8x8xf32>
    %cst_100 = arith.constant dense<0.000000e+00> : vector<8x8xf32>
    %251 = tpu.matmul %249, %250, %cst_100 {dimension_numbers = #tpu.dot_dimension_numbers<[1], [1], [0], [0], [0, 0, 1, 0], [], []>} : vector<8x8xf32>, vector<8x8xf32>, vector<8x8xf32> -> vector<8x8xf32>
    %252 = vector.extract_strided_slice %212 {offsets = [8, 16], sizes = [8, 8], strides = [1, 1]} : vector<16x32xf32> to vector<8x8xf32>
    %253 = vector.extract_strided_slice %221 {offsets = [8, 16], sizes = [8, 8], strides = [1, 1]} : vector<16x32xf32> to vector<8x8xf32>
    %cst_101 = arith.constant dense<0.000000e+00> : vector<8x8xf32>
    %254 = tpu.matmul %252, %253, %cst_101 {dimension_numbers = #tpu.dot_dimension_numbers<[1], [1], [0], [0], [0, 0, 1, 0], [], []>} : vector<8x8xf32>, vector<8x8xf32>, vector<8x8xf32> -> vector<8x8xf32>
    %255 = vector.extract_strided_slice %212 {offsets = [8, 24], sizes = [8, 8], strides = [1, 1]} : vector<16x32xf32> to vector<8x8xf32>
    %256 = vector.extract_strided_slice %221 {offsets = [8, 24], sizes = [8, 8], strides = [1, 1]} : vector<16x32xf32> to vector<8x8xf32>
    %cst_102 = arith.constant dense<0.000000e+00> : vector<8x8xf32>
    %257 = tpu.matmul %255, %256, %cst_102 {dimension_numbers = #tpu.dot_dimension_numbers<[1], [1], [0], [0], [0, 0, 1, 0], [], []>} : vector<8x8xf32>, vector<8x8xf32>, vector<8x8xf32> -> vector<8x8xf32>
    %258 = tpu.concatenate %236, %239, %242, %245, %248, %251, %254, %257 in 0 : vector<8x8xf32>, vector<8x8xf32>, vector<8x8xf32>, vector<8x8xf32>, vector<8x8xf32>, vector<8x8xf32>, vector<8x8xf32>, vector<8x8xf32> -> vector<64x8xf32>
    %cst_103 = arith.constant dense<0xFF800000> : vector<64xf32>
    %259 = vector.multi_reduction <maximumf>, %258, %cst_103 [1] : vector<64x8xf32> to vector<64xf32>
    %260 = vector.shape_cast %259 : vector<64xf32> to vector<64x1xf32>
    %261 = vector.broadcast %260 : vector<64x1xf32> to vector<64x8xf32>
    %262 = arith.subf %258, %261 : vector<64x8xf32>
    %263 = math.exp %262 : vector<64x8xf32>
    %cst_104 = arith.constant dense<0.000000e+00> : vector<64xf32>
    %264 = vector.multi_reduction <add>, %263, %cst_104 [1] : vector<64x8xf32> to vector<64xf32>
    %265 = vector.shape_cast %264 : vector<64xf32> to vector<64x1xf32>
    %266 = tpu.reciprocal %265 : vector<64x1xf32> -> vector<64x1xf32>
    %267 = vector.broadcast %266 : vector<64x1xf32> to vector<64x8xf32>
    %268 = arith.mulf %263, %267 : vector<64x8xf32>
    %cst_105 = arith.constant 0.000000e+00 : f32
    %269 = vector.broadcast %cst_105 : f32 to vector<8x32xf32>
    %270 = vector.extract_strided_slice %268 {offsets = [0, 0], sizes = [8, 8], strides = [1, 1]} : vector<64x8xf32> to vector<8x8xf32>
    %271 = vector.extract_strided_slice %230 {offsets = [0, 0], sizes = [8, 8], strides = [1, 1]} : vector<16x32xf32> to vector<8x8xf32>
    %cst_106 = arith.constant dense<0.000000e+00> : vector<8x8xf32>
    %272 = tpu.matmul %270, %271, %cst_106 {dimension_numbers = #tpu.dot_dimension_numbers<[1], [0], [0], [1], [0, 0, 1, 1], [], []>} : vector<8x8xf32>, vector<8x8xf32>, vector<8x8xf32> -> vector<8x8xf32>
    %273 = vector.extract_strided_slice %233 {offsets = [0, 0], sizes = [8, 32], strides = [1, 1]} : vector<32x32xf32> to vector<8x32xf32>
    %cst_107 = arith.constant dense<0.000000e+00> : vector<8x32xf32>
    %274 = tpu.matmul %272, %273, %cst_107 {dimension_numbers = #tpu.dot_dimension_numbers<[1], [0], [0], [1], [0, 0, 1, 1], [], []>} : vector<8x8xf32>, vector<8x32xf32>, vector<8x32xf32> -> vector<8x32xf32>
    %275 = arith.addf %269, %274 : vector<8x32xf32>
    %276 = vector.extract_strided_slice %268 {offsets = [8, 0], sizes = [8, 8], strides = [1, 1]} : vector<64x8xf32> to vector<8x8xf32>
    %277 = vector.extract_strided_slice %230 {offsets = [0, 8], sizes = [8, 8], strides = [1, 1]} : vector<16x32xf32> to vector<8x8xf32>
    %cst_108 = arith.constant dense<0.000000e+00> : vector<8x8xf32>
    %278 = tpu.matmul %276, %277, %cst_108 {dimension_numbers = #tpu.dot_dimension_numbers<[1], [0], [0], [1], [0, 0, 1, 1], [], []>} : vector<8x8xf32>, vector<8x8xf32>, vector<8x8xf32> -> vector<8x8xf32>
    %279 = vector.extract_strided_slice %233 {offsets = [8, 0], sizes = [8, 32], strides = [1, 1]} : vector<32x32xf32> to vector<8x32xf32>
    %cst_109 = arith.constant dense<0.000000e+00> : vector<8x32xf32>
    %280 = tpu.matmul %278, %279, %cst_109 {dimension_numbers = #tpu.dot_dimension_numbers<[1], [0], [0], [1], [0, 0, 1, 1], [], []>} : vector<8x8xf32>, vector<8x32xf32>, vector<8x32xf32> -> vector<8x32xf32>
    %281 = arith.addf %275, %280 : vector<8x32xf32>
    %282 = vector.extract_strided_slice %268 {offsets = [16, 0], sizes = [8, 8], strides = [1, 1]} : vector<64x8xf32> to vector<8x8xf32>
    %283 = vector.extract_strided_slice %230 {offsets = [0, 16], sizes = [8, 8], strides = [1, 1]} : vector<16x32xf32> to vector<8x8xf32>
    %cst_110 = arith.constant dense<0.000000e+00> : vector<8x8xf32>
    %284 = tpu.matmul %282, %283, %cst_110 {dimension_numbers = #tpu.dot_dimension_numbers<[1], [0], [0], [1], [0, 0, 1, 1], [], []>} : vector<8x8xf32>, vector<8x8xf32>, vector<8x8xf32> -> vector<8x8xf32>
    %285 = vector.extract_strided_slice %233 {offsets = [16, 0], sizes = [8, 32], strides = [1, 1]} : vector<32x32xf32> to vector<8x32xf32>
    %cst_111 = arith.constant dense<0.000000e+00> : vector<8x32xf32>
    %286 = tpu.matmul %284, %285, %cst_111 {dimension_numbers = #tpu.dot_dimension_numbers<[1], [0], [0], [1], [0, 0, 1, 1], [], []>} : vector<8x8xf32>, vector<8x32xf32>, vector<8x32xf32> -> vector<8x32xf32>
    %287 = arith.addf %281, %286 : vector<8x32xf32>
    %288 = vector.extract_strided_slice %268 {offsets = [24, 0], sizes = [8, 8], strides = [1, 1]} : vector<64x8xf32> to vector<8x8xf32>
    %289 = vector.extract_strided_slice %230 {offsets = [0, 24], sizes = [8, 8], strides = [1, 1]} : vector<16x32xf32> to vector<8x8xf32>
    %cst_112 = arith.constant dense<0.000000e+00> : vector<8x8xf32>
    %290 = tpu.matmul %288, %289, %cst_112 {dimension_numbers = #tpu.dot_dimension_numbers<[1], [0], [0], [1], [0, 0, 1, 1], [], []>} : vector<8x8xf32>, vector<8x8xf32>, vector<8x8xf32> -> vector<8x8xf32>
    %291 = vector.extract_strided_slice %233 {offsets = [24, 0], sizes = [8, 32], strides = [1, 1]} : vector<32x32xf32> to vector<8x32xf32>
    %cst_113 = arith.constant dense<0.000000e+00> : vector<8x32xf32>
    %292 = tpu.matmul %290, %291, %cst_113 {dimension_numbers = #tpu.dot_dimension_numbers<[1], [0], [0], [1], [0, 0, 1, 1], [], []>} : vector<8x8xf32>, vector<8x32xf32>, vector<8x32xf32> -> vector<8x32xf32>
    %293 = arith.addf %287, %292 : vector<8x32xf32>
    %cst_114 = arith.constant 0.000000e+00 : f32
    %294 = vector.broadcast %cst_114 : f32 to vector<8x32xf32>
    %295 = vector.extract_strided_slice %268 {offsets = [32, 0], sizes = [8, 8], strides = [1, 1]} : vector<64x8xf32> to vector<8x8xf32>
    %296 = vector.extract_strided_slice %230 {offsets = [8, 0], sizes = [8, 8], strides = [1, 1]} : vector<16x32xf32> to vector<8x8xf32>
    %cst_115 = arith.constant dense<0.000000e+00> : vector<8x8xf32>
    %297 = tpu.matmul %295, %296, %cst_115 {dimension_numbers = #tpu.dot_dimension_numbers<[1], [0], [0], [1], [0, 0, 1, 1], [], []>} : vector<8x8xf32>, vector<8x8xf32>, vector<8x8xf32> -> vector<8x8xf32>
    %298 = vector.extract_strided_slice %233 {offsets = [0, 0], sizes = [8, 32], strides = [1, 1]} : vector<32x32xf32> to vector<8x32xf32>
    %cst_116 = arith.constant dense<0.000000e+00> : vector<8x32xf32>
    %299 = tpu.matmul %297, %298, %cst_116 {dimension_numbers = #tpu.dot_dimension_numbers<[1], [0], [0], [1], [0, 0, 1, 1], [], []>} : vector<8x8xf32>, vector<8x32xf32>, vector<8x32xf32> -> vector<8x32xf32>
    %300 = arith.addf %294, %299 : vector<8x32xf32>
    %301 = vector.extract_strided_slice %268 {offsets = [40, 0], sizes = [8, 8], strides = [1, 1]} : vector<64x8xf32> to vector<8x8xf32>
    %302 = vector.extract_strided_slice %230 {offsets = [8, 8], sizes = [8, 8], strides = [1, 1]} : vector<16x32xf32> to vector<8x8xf32>
    %cst_117 = arith.constant dense<0.000000e+00> : vector<8x8xf32>
    %303 = tpu.matmul %301, %302, %cst_117 {dimension_numbers = #tpu.dot_dimension_numbers<[1], [0], [0], [1], [0, 0, 1, 1], [], []>} : vector<8x8xf32>, vector<8x8xf32>, vector<8x8xf32> -> vector<8x8xf32>
    %304 = vector.extract_strided_slice %233 {offsets = [8, 0], sizes = [8, 32], strides = [1, 1]} : vector<32x32xf32> to vector<8x32xf32>
    %cst_118 = arith.constant dense<0.000000e+00> : vector<8x32xf32>
    %305 = tpu.matmul %303, %304, %cst_118 {dimension_numbers = #tpu.dot_dimension_numbers<[1], [0], [0], [1], [0, 0, 1, 1], [], []>} : vector<8x8xf32>, vector<8x32xf32>, vector<8x32xf32> -> vector<8x32xf32>
    %306 = arith.addf %300, %305 : vector<8x32xf32>
    %307 = vector.extract_strided_slice %268 {offsets = [48, 0], sizes = [8, 8], strides = [1, 1]} : vector<64x8xf32> to vector<8x8xf32>
    %308 = vector.extract_strided_slice %230 {offsets = [8, 16], sizes = [8, 8], strides = [1, 1]} : vector<16x32xf32> to vector<8x8xf32>
    %cst_119 = arith.constant dense<0.000000e+00> : vector<8x8xf32>
    %309 = tpu.matmul %307, %308, %cst_119 {dimension_numbers = #tpu.dot_dimension_numbers<[1], [0], [0], [1], [0, 0, 1, 1], [], []>} : vector<8x8xf32>, vector<8x8xf32>, vector<8x8xf32> -> vector<8x8xf32>
    %310 = vector.extract_strided_slice %233 {offsets = [16, 0], sizes = [8, 32], strides = [1, 1]} : vector<32x32xf32> to vector<8x32xf32>
    %cst_120 = arith.constant dense<0.000000e+00> : vector<8x32xf32>
    %311 = tpu.matmul %309, %310, %cst_120 {dimension_numbers = #tpu.dot_dimension_numbers<[1], [0], [0], [1], [0, 0, 1, 1], [], []>} : vector<8x8xf32>, vector<8x32xf32>, vector<8x32xf32> -> vector<8x32xf32>
    %312 = arith.addf %306, %311 : vector<8x32xf32>
    %313 = vector.extract_strided_slice %268 {offsets = [56, 0], sizes = [8, 8], strides = [1, 1]} : vector<64x8xf32> to vector<8x8xf32>
    %314 = vector.extract_strided_slice %230 {offsets = [8, 24], sizes = [8, 8], strides = [1, 1]} : vector<16x32xf32> to vector<8x8xf32>
    %cst_121 = arith.constant dense<0.000000e+00> : vector<8x8xf32>
    %315 = tpu.matmul %313, %314, %cst_121 {dimension_numbers = #tpu.dot_dimension_numbers<[1], [0], [0], [1], [0, 0, 1, 1], [], []>} : vector<8x8xf32>, vector<8x8xf32>, vector<8x8xf32> -> vector<8x8xf32>
    %316 = vector.extract_strided_slice %233 {offsets = [24, 0], sizes = [8, 32], strides = [1, 1]} : vector<32x32xf32> to vector<8x32xf32>
    %cst_122 = arith.constant dense<0.000000e+00> : vector<8x32xf32>
    %317 = tpu.matmul %315, %316, %cst_122 {dimension_numbers = #tpu.dot_dimension_numbers<[1], [0], [0], [1], [0, 0, 1, 1], [], []>} : vector<8x8xf32>, vector<8x32xf32>, vector<8x32xf32> -> vector<8x32xf32>
    %318 = arith.addf %312, %317 : vector<8x32xf32>
    %319 = tpu.concatenate %293, %318 in 0 : vector<8x32xf32>, vector<8x32xf32> -> vector<16x32xf32>
    %320 = arith.index_cast %c1_i32 : i32 to index
    %c0_123 = arith.constant 0 : index
    %c0_124 = arith.constant 0 : index
    %321 = vector.load %arg8[%320, %c0_123, %c0_124] : memref<6x1x32xf32, #tpu.memory_space<vmem>>, vector<1x1x32xf32>
    %322 = vector.shape_cast %321 : vector<1x1x32xf32> to vector<1x32xf32>
    %323 = vector.broadcast %322 : vector<1x32xf32> to vector<16x32xf32>
    %324 = arith.addf %319, %323 : vector<16x32xf32>
    %325 = arith.addf %201, %324 : vector<16x32xf32>
    %cst_125 = arith.constant dense<0.000000e+00> : vector<16xf32>
    %326 = vector.multi_reduction <add>, %325, %cst_125 [1] : vector<16x32xf32> to vector<16xf32>
    %327 = vector.shape_cast %326 : vector<16xf32> to vector<16x1xf32>
    %cst_126 = arith.constant 3.200000e+01 : f32
    %328 = vector.broadcast %cst_126 : f32 to vector<16x1xf32>
    %329 = arith.divf %327, %328 : vector<16x1xf32>
    %330 = vector.broadcast %329 : vector<16x1xf32> to vector<16x32xf32>
    %331 = arith.subf %325, %330 : vector<16x32xf32>
    %332 = arith.mulf %331, %331 : vector<16x32xf32>
    %cst_127 = arith.constant dense<0.000000e+00> : vector<16xf32>
    %333 = vector.multi_reduction <add>, %332, %cst_127 [1] : vector<16x32xf32> to vector<16xf32>
    %334 = vector.shape_cast %333 : vector<16xf32> to vector<16x1xf32>
    %cst_128 = arith.constant 3.200000e+01 : f32
    %335 = vector.broadcast %cst_128 : f32 to vector<16x1xf32>
    %336 = arith.divf %334, %335 : vector<16x1xf32>
    %337 = vector.broadcast %329 : vector<16x1xf32> to vector<16x32xf32>
    %338 = arith.subf %325, %337 : vector<16x32xf32>
    %cst_129 = arith.constant 9.99999974E-6 : f32
    %339 = vector.broadcast %cst_129 : f32 to vector<16x1xf32>
    %340 = arith.addf %336, %339 : vector<16x1xf32>
    %341 = math.rsqrt %340 : vector<16x1xf32>
    %342 = vector.broadcast %341 : vector<16x1xf32> to vector<16x32xf32>
    %343 = arith.mulf %338, %342 : vector<16x32xf32>
    %344 = arith.index_cast %c1_i32 : i32 to index
    %c0_130 = arith.constant 0 : index
    %c0_131 = arith.constant 0 : index
    %345 = vector.load %arg13[%344, %c0_130, %c0_131] : memref<6x1x32xf32, #tpu.memory_space<vmem>>, vector<1x1x32xf32>
    %346 = vector.shape_cast %345 : vector<1x1x32xf32> to vector<1x32xf32>
    %347 = vector.broadcast %346 : vector<1x32xf32> to vector<16x32xf32>
    %348 = arith.mulf %343, %347 : vector<16x32xf32>
    %349 = arith.index_cast %c1_i32 : i32 to index
    %c0_132 = arith.constant 0 : index
    %c0_133 = arith.constant 0 : index
    %350 = vector.load %arg14[%349, %c0_132, %c0_133] : memref<6x1x32xf32, #tpu.memory_space<vmem>>, vector<1x1x32xf32>
    %351 = vector.shape_cast %350 : vector<1x1x32xf32> to vector<1x32xf32>
    %352 = vector.broadcast %351 : vector<1x32xf32> to vector<16x32xf32>
    %353 = arith.addf %348, %352 : vector<16x32xf32>
    %354 = arith.index_cast %c1_i32 : i32 to index
    %c0_134 = arith.constant 0 : index
    %c0_135 = arith.constant 0 : index
    %355 = vector.load %arg9[%354, %c0_134, %c0_135] : memref<6x32x128xf32, #tpu.memory_space<vmem>>, vector<1x32x128xf32>
    %356 = vector.shape_cast %355 : vector<1x32x128xf32> to vector<32x128xf32>
    %cst_136 = arith.constant dense<0.000000e+00> : vector<16x128xf32>
    %357 = tpu.matmul %353, %356, %cst_136 {dimension_numbers = #tpu.dot_dimension_numbers<[1], [0], [0], [1], [0, 0, 1, 1], [], []>} : vector<16x32xf32>, vector<32x128xf32>, vector<16x128xf32> -> vector<16x128xf32>
    %358 = arith.index_cast %c1_i32 : i32 to index
    %c0_137 = arith.constant 0 : index
    %c0_138 = arith.constant 0 : index
    %359 = vector.load %arg10[%358, %c0_137, %c0_138] : memref<6x1x128xf32, #tpu.memory_space<vmem>>, vector<1x1x128xf32>
    %360 = vector.shape_cast %359 : vector<1x1x128xf32> to vector<1x128xf32>
    %361 = vector.broadcast %360 : vector<1x128xf32> to vector<16x128xf32>
    %362 = arith.addf %357, %361 : vector<16x128xf32>
    %cst_139 = arith.constant 0.000000e+00 : f32
    %363 = vector.broadcast %cst_139 : f32 to vector<16x128xf32>
    %364 = arith.maximumf %362, %363 : vector<16x128xf32>
    %365 = arith.index_cast %c1_i32 : i32 to index
    %c0_140 = arith.constant 0 : index
    %c0_141 = arith.constant 0 : index
    %366 = vector.load %arg11[%365, %c0_140, %c0_141] : memref<6x128x32xf32, #tpu.memory_space<vmem>>, vector<1x128x32xf32>
    %367 = vector.shape_cast %366 : vector<1x128x32xf32> to vector<128x32xf32>
    %cst_142 = arith.constant dense<0.000000e+00> : vector<16x32xf32>
    %368 = tpu.matmul %364, %367, %cst_142 {dimension_numbers = #tpu.dot_dimension_numbers<[1], [0], [0], [1], [0, 0, 1, 1], [], []>} : vector<16x128xf32>, vector<128x32xf32>, vector<16x32xf32> -> vector<16x32xf32>
    %369 = arith.index_cast %c1_i32 : i32 to index
    %c0_143 = arith.constant 0 : index
    %c0_144 = arith.constant 0 : index
    %370 = vector.load %arg12[%369, %c0_143, %c0_144] : memref<6x1x32xf32, #tpu.memory_space<vmem>>, vector<1x1x32xf32>
    %371 = vector.shape_cast %370 : vector<1x1x32xf32> to vector<1x32xf32>
    %372 = vector.broadcast %371 : vector<1x32xf32> to vector<16x32xf32>
    %373 = arith.addf %368, %372 : vector<16x32xf32>
    %374 = arith.addf %353, %373 : vector<16x32xf32>
    %cst_145 = arith.constant dense<0.000000e+00> : vector<16xf32>
    %375 = vector.multi_reduction <add>, %374, %cst_145 [1] : vector<16x32xf32> to vector<16xf32>
    %376 = vector.shape_cast %375 : vector<16xf32> to vector<16x1xf32>
    %cst_146 = arith.constant 3.200000e+01 : f32
    %377 = vector.broadcast %cst_146 : f32 to vector<16x1xf32>
    %378 = arith.divf %376, %377 : vector<16x1xf32>
    %379 = vector.broadcast %378 : vector<16x1xf32> to vector<16x32xf32>
    %380 = arith.subf %374, %379 : vector<16x32xf32>
    %381 = arith.mulf %380, %380 : vector<16x32xf32>
    %cst_147 = arith.constant dense<0.000000e+00> : vector<16xf32>
    %382 = vector.multi_reduction <add>, %381, %cst_147 [1] : vector<16x32xf32> to vector<16xf32>
    %383 = vector.shape_cast %382 : vector<16xf32> to vector<16x1xf32>
    %cst_148 = arith.constant 3.200000e+01 : f32
    %384 = vector.broadcast %cst_148 : f32 to vector<16x1xf32>
    %385 = arith.divf %383, %384 : vector<16x1xf32>
    %386 = vector.broadcast %378 : vector<16x1xf32> to vector<16x32xf32>
    %387 = arith.subf %374, %386 : vector<16x32xf32>
    %cst_149 = arith.constant 9.99999974E-6 : f32
    %388 = vector.broadcast %cst_149 : f32 to vector<16x1xf32>
    %389 = arith.addf %385, %388 : vector<16x1xf32>
    %390 = math.rsqrt %389 : vector<16x1xf32>
    %391 = vector.broadcast %390 : vector<16x1xf32> to vector<16x32xf32>
    %392 = arith.mulf %387, %391 : vector<16x32xf32>
    %393 = arith.index_cast %c1_i32 : i32 to index
    %c0_150 = arith.constant 0 : index
    %c0_151 = arith.constant 0 : index
    %394 = vector.load %arg15[%393, %c0_150, %c0_151] : memref<6x1x32xf32, #tpu.memory_space<vmem>>, vector<1x1x32xf32>
    %395 = vector.shape_cast %394 : vector<1x1x32xf32> to vector<1x32xf32>
    %396 = vector.broadcast %395 : vector<1x32xf32> to vector<16x32xf32>
    %397 = arith.mulf %392, %396 : vector<16x32xf32>
    %398 = arith.index_cast %c1_i32 : i32 to index
    %c0_152 = arith.constant 0 : index
    %c0_153 = arith.constant 0 : index
    %399 = vector.load %arg16[%398, %c0_152, %c0_153] : memref<6x1x32xf32, #tpu.memory_space<vmem>>, vector<1x1x32xf32>
    %400 = vector.shape_cast %399 : vector<1x1x32xf32> to vector<1x32xf32>
    %401 = vector.broadcast %400 : vector<1x32xf32> to vector<16x32xf32>
    %402 = arith.addf %397, %401 : vector<16x32xf32>
    %c2_i32 = arith.constant 2 : i32
    %403 = arith.index_cast %c2_i32 : i32 to index
    %c0_154 = arith.constant 0 : index
    %c0_155 = arith.constant 0 : index
    %404 = vector.load %arg1[%403, %c0_154, %c0_155] : memref<6x32x32xf32, #tpu.memory_space<vmem>>, vector<1x32x32xf32>
    %405 = vector.shape_cast %404 : vector<1x32x32xf32> to vector<32x32xf32>
    %cst_156 = arith.constant dense<0.000000e+00> : vector<16x32xf32>
    %406 = tpu.matmul %402, %405, %cst_156 {dimension_numbers = #tpu.dot_dimension_numbers<[1], [0], [0], [1], [0, 0, 1, 1], [], []>} : vector<16x32xf32>, vector<32x32xf32>, vector<16x32xf32> -> vector<16x32xf32>
    %407 = arith.index_cast %c2_i32 : i32 to index
    %c0_157 = arith.constant 0 : index
    %c0_158 = arith.constant 0 : index
    %408 = vector.load %arg2[%407, %c0_157, %c0_158] : memref<6x1x32xf32, #tpu.memory_space<vmem>>, vector<1x1x32xf32>
    %409 = vector.shape_cast %408 : vector<1x1x32xf32> to vector<1x32xf32>
    %410 = vector.broadcast %409 : vector<1x32xf32> to vector<16x32xf32>
    %411 = arith.addf %406, %410 : vector<16x32xf32>
    %cst_159 = arith.constant 0.353553385 : f32
    %412 = vector.broadcast %cst_159 : f32 to vector<16x32xf32>
    %413 = arith.mulf %411, %412 : vector<16x32xf32>
    %414 = arith.index_cast %c2_i32 : i32 to index
    %c0_160 = arith.constant 0 : index
    %c0_161 = arith.constant 0 : index
    %415 = vector.load %arg3[%414, %c0_160, %c0_161] : memref<6x32x32xf32, #tpu.memory_space<vmem>>, vector<1x32x32xf32>
    %416 = vector.shape_cast %415 : vector<1x32x32xf32> to vector<32x32xf32>
    %cst_162 = arith.constant dense<0.000000e+00> : vector<16x32xf32>
    %417 = tpu.matmul %402, %416, %cst_162 {dimension_numbers = #tpu.dot_dimension_numbers<[1], [0], [0], [1], [0, 0, 1, 1], [], []>} : vector<16x32xf32>, vector<32x32xf32>, vector<16x32xf32> -> vector<16x32xf32>
    %418 = arith.index_cast %c2_i32 : i32 to index
    %c0_163 = arith.constant 0 : index
    %c0_164 = arith.constant 0 : index
    %419 = vector.load %arg4[%418, %c0_163, %c0_164] : memref<6x1x32xf32, #tpu.memory_space<vmem>>, vector<1x1x32xf32>
    %420 = vector.shape_cast %419 : vector<1x1x32xf32> to vector<1x32xf32>
    %421 = vector.broadcast %420 : vector<1x32xf32> to vector<16x32xf32>
    %422 = arith.addf %417, %421 : vector<16x32xf32>
    %423 = arith.index_cast %c2_i32 : i32 to index
    %c0_165 = arith.constant 0 : index
    %c0_166 = arith.constant 0 : index
    %424 = vector.load %arg5[%423, %c0_165, %c0_166] : memref<6x32x32xf32, #tpu.memory_space<vmem>>, vector<1x32x32xf32>
    %425 = vector.shape_cast %424 : vector<1x32x32xf32> to vector<32x32xf32>
    %cst_167 = arith.constant dense<0.000000e+00> : vector<16x32xf32>
    %426 = tpu.matmul %402, %425, %cst_167 {dimension_numbers = #tpu.dot_dimension_numbers<[1], [0], [0], [1], [0, 0, 1, 1], [], []>} : vector<16x32xf32>, vector<32x32xf32>, vector<16x32xf32> -> vector<16x32xf32>
    %427 = arith.index_cast %c2_i32 : i32 to index
    %c0_168 = arith.constant 0 : index
    %c0_169 = arith.constant 0 : index
    %428 = vector.load %arg6[%427, %c0_168, %c0_169] : memref<6x1x32xf32, #tpu.memory_space<vmem>>, vector<1x1x32xf32>
    %429 = vector.shape_cast %428 : vector<1x1x32xf32> to vector<1x32xf32>
    %430 = vector.broadcast %429 : vector<1x32xf32> to vector<16x32xf32>
    %431 = arith.addf %426, %430 : vector<16x32xf32>
    %432 = arith.index_cast %c2_i32 : i32 to index
    %c0_170 = arith.constant 0 : index
    %c0_171 = arith.constant 0 : index
    %433 = vector.load %arg7[%432, %c0_170, %c0_171] : memref<6x32x32xf32, #tpu.memory_space<vmem>>, vector<1x32x32xf32>
    %434 = vector.shape_cast %433 : vector<1x32x32xf32> to vector<32x32xf32>
    %435 = vector.extract_strided_slice %413 {offsets = [0, 0], sizes = [8, 8], strides = [1, 1]} : vector<16x32xf32> to vector<8x8xf32>
    %436 = vector.extract_strided_slice %422 {offsets = [0, 0], sizes = [8, 8], strides = [1, 1]} : vector<16x32xf32> to vector<8x8xf32>
    %cst_172 = arith.constant dense<0.000000e+00> : vector<8x8xf32>
    %437 = tpu.matmul %435, %436, %cst_172 {dimension_numbers = #tpu.dot_dimension_numbers<[1], [1], [0], [0], [0, 0, 1, 0], [], []>} : vector<8x8xf32>, vector<8x8xf32>, vector<8x8xf32> -> vector<8x8xf32>
    %438 = vector.extract_strided_slice %413 {offsets = [0, 8], sizes = [8, 8], strides = [1, 1]} : vector<16x32xf32> to vector<8x8xf32>
    %439 = vector.extract_strided_slice %422 {offsets = [0, 8], sizes = [8, 8], strides = [1, 1]} : vector<16x32xf32> to vector<8x8xf32>
    %cst_173 = arith.constant dense<0.000000e+00> : vector<8x8xf32>
    %440 = tpu.matmul %438, %439, %cst_173 {dimension_numbers = #tpu.dot_dimension_numbers<[1], [1], [0], [0], [0, 0, 1, 0], [], []>} : vector<8x8xf32>, vector<8x8xf32>, vector<8x8xf32> -> vector<8x8xf32>
    %441 = vector.extract_strided_slice %413 {offsets = [0, 16], sizes = [8, 8], strides = [1, 1]} : vector<16x32xf32> to vector<8x8xf32>
    %442 = vector.extract_strided_slice %422 {offsets = [0, 16], sizes = [8, 8], strides = [1, 1]} : vector<16x32xf32> to vector<8x8xf32>
    %cst_174 = arith.constant dense<0.000000e+00> : vector<8x8xf32>
    %443 = tpu.matmul %441, %442, %cst_174 {dimension_numbers = #tpu.dot_dimension_numbers<[1], [1], [0], [0], [0, 0, 1, 0], [], []>} : vector<8x8xf32>, vector<8x8xf32>, vector<8x8xf32> -> vector<8x8xf32>
    %444 = vector.extract_strided_slice %413 {offsets = [0, 24], sizes = [8, 8], strides = [1, 1]} : vector<16x32xf32> to vector<8x8xf32>
    %445 = vector.extract_strided_slice %422 {offsets = [0, 24], sizes = [8, 8], strides = [1, 1]} : vector<16x32xf32> to vector<8x8xf32>
    %cst_175 = arith.constant dense<0.000000e+00> : vector<8x8xf32>
    %446 = tpu.matmul %444, %445, %cst_175 {dimension_numbers = #tpu.dot_dimension_numbers<[1], [1], [0], [0], [0, 0, 1, 0], [], []>} : vector<8x8xf32>, vector<8x8xf32>, vector<8x8xf32> -> vector<8x8xf32>
    %447 = vector.extract_strided_slice %413 {offsets = [8, 0], sizes = [8, 8], strides = [1, 1]} : vector<16x32xf32> to vector<8x8xf32>
    %448 = vector.extract_strided_slice %422 {offsets = [8, 0], sizes = [8, 8], strides = [1, 1]} : vector<16x32xf32> to vector<8x8xf32>
    %cst_176 = arith.constant dense<0.000000e+00> : vector<8x8xf32>
    %449 = tpu.matmul %447, %448, %cst_176 {dimension_numbers = #tpu.dot_dimension_numbers<[1], [1], [0], [0], [0, 0, 1, 0], [], []>} : vector<8x8xf32>, vector<8x8xf32>, vector<8x8xf32> -> vector<8x8xf32>
    %450 = vector.extract_strided_slice %413 {offsets = [8, 8], sizes = [8, 8], strides = [1, 1]} : vector<16x32xf32> to vector<8x8xf32>
    %451 = vector.extract_strided_slice %422 {offsets = [8, 8], sizes = [8, 8], strides = [1, 1]} : vector<16x32xf32> to vector<8x8xf32>
    %cst_177 = arith.constant dense<0.000000e+00> : vector<8x8xf32>
    %452 = tpu.matmul %450, %451, %cst_177 {dimension_numbers = #tpu.dot_dimension_numbers<[1], [1], [0], [0], [0, 0, 1, 0], [], []>} : vector<8x8xf32>, vector<8x8xf32>, vector<8x8xf32> -> vector<8x8xf32>
    %453 = vector.extract_strided_slice %413 {offsets = [8, 16], sizes = [8, 8], strides = [1, 1]} : vector<16x32xf32> to vector<8x8xf32>
    %454 = vector.extract_strided_slice %422 {offsets = [8, 16], sizes = [8, 8], strides = [1, 1]} : vector<16x32xf32> to vector<8x8xf32>
    %cst_178 = arith.constant dense<0.000000e+00> : vector<8x8xf32>
    %455 = tpu.matmul %453, %454, %cst_178 {dimension_numbers = #tpu.dot_dimension_numbers<[1], [1], [0], [0], [0, 0, 1, 0], [], []>} : vector<8x8xf32>, vector<8x8xf32>, vector<8x8xf32> -> vector<8x8xf32>
    %456 = vector.extract_strided_slice %413 {offsets = [8, 24], sizes = [8, 8], strides = [1, 1]} : vector<16x32xf32> to vector<8x8xf32>
    %457 = vector.extract_strided_slice %422 {offsets = [8, 24], sizes = [8, 8], strides = [1, 1]} : vector<16x32xf32> to vector<8x8xf32>
    %cst_179 = arith.constant dense<0.000000e+00> : vector<8x8xf32>
    %458 = tpu.matmul %456, %457, %cst_179 {dimension_numbers = #tpu.dot_dimension_numbers<[1], [1], [0], [0], [0, 0, 1, 0], [], []>} : vector<8x8xf32>, vector<8x8xf32>, vector<8x8xf32> -> vector<8x8xf32>
    %459 = tpu.concatenate %437, %440, %443, %446, %449, %452, %455, %458 in 0 : vector<8x8xf32>, vector<8x8xf32>, vector<8x8xf32>, vector<8x8xf32>, vector<8x8xf32>, vector<8x8xf32>, vector<8x8xf32>, vector<8x8xf32> -> vector<64x8xf32>
    %cst_180 = arith.constant dense<0xFF800000> : vector<64xf32>
    %460 = vector.multi_reduction <maximumf>, %459, %cst_180 [1] : vector<64x8xf32> to vector<64xf32>
    %461 = vector.shape_cast %460 : vector<64xf32> to vector<64x1xf32>
    %462 = vector.broadcast %461 : vector<64x1xf32> to vector<64x8xf32>
    %463 = arith.subf %459, %462 : vector<64x8xf32>
    %464 = math.exp %463 : vector<64x8xf32>
    %cst_181 = arith.constant dense<0.000000e+00> : vector<64xf32>
    %465 = vector.multi_reduction <add>, %464, %cst_181 [1] : vector<64x8xf32> to vector<64xf32>
    %466 = vector.shape_cast %465 : vector<64xf32> to vector<64x1xf32>
    %467 = tpu.reciprocal %466 : vector<64x1xf32> -> vector<64x1xf32>
    %468 = vector.broadcast %467 : vector<64x1xf32> to vector<64x8xf32>
    %469 = arith.mulf %464, %468 : vector<64x8xf32>
    %cst_182 = arith.constant 0.000000e+00 : f32
    %470 = vector.broadcast %cst_182 : f32 to vector<8x32xf32>
    %471 = vector.extract_strided_slice %469 {offsets = [0, 0], sizes = [8, 8], strides = [1, 1]} : vector<64x8xf32> to vector<8x8xf32>
    %472 = vector.extract_strided_slice %431 {offsets = [0, 0], sizes = [8, 8], strides = [1, 1]} : vector<16x32xf32> to vector<8x8xf32>
    %cst_183 = arith.constant dense<0.000000e+00> : vector<8x8xf32>
    %473 = tpu.matmul %471, %472, %cst_183 {dimension_numbers = #tpu.dot_dimension_numbers<[1], [0], [0], [1], [0, 0, 1, 1], [], []>} : vector<8x8xf32>, vector<8x8xf32>, vector<8x8xf32> -> vector<8x8xf32>
    %474 = vector.extract_strided_slice %434 {offsets = [0, 0], sizes = [8, 32], strides = [1, 1]} : vector<32x32xf32> to vector<8x32xf32>
    %cst_184 = arith.constant dense<0.000000e+00> : vector<8x32xf32>
    %475 = tpu.matmul %473, %474, %cst_184 {dimension_numbers = #tpu.dot_dimension_numbers<[1], [0], [0], [1], [0, 0, 1, 1], [], []>} : vector<8x8xf32>, vector<8x32xf32>, vector<8x32xf32> -> vector<8x32xf32>
    %476 = arith.addf %470, %475 : vector<8x32xf32>
    %477 = vector.extract_strided_slice %469 {offsets = [8, 0], sizes = [8, 8], strides = [1, 1]} : vector<64x8xf32> to vector<8x8xf32>
    %478 = vector.extract_strided_slice %431 {offsets = [0, 8], sizes = [8, 8], strides = [1, 1]} : vector<16x32xf32> to vector<8x8xf32>
    %cst_185 = arith.constant dense<0.000000e+00> : vector<8x8xf32>
    %479 = tpu.matmul %477, %478, %cst_185 {dimension_numbers = #tpu.dot_dimension_numbers<[1], [0], [0], [1], [0, 0, 1, 1], [], []>} : vector<8x8xf32>, vector<8x8xf32>, vector<8x8xf32> -> vector<8x8xf32>
    %480 = vector.extract_strided_slice %434 {offsets = [8, 0], sizes = [8, 32], strides = [1, 1]} : vector<32x32xf32> to vector<8x32xf32>
    %cst_186 = arith.constant dense<0.000000e+00> : vector<8x32xf32>
    %481 = tpu.matmul %479, %480, %cst_186 {dimension_numbers = #tpu.dot_dimension_numbers<[1], [0], [0], [1], [0, 0, 1, 1], [], []>} : vector<8x8xf32>, vector<8x32xf32>, vector<8x32xf32> -> vector<8x32xf32>
    %482 = arith.addf %476, %481 : vector<8x32xf32>
    %483 = vector.extract_strided_slice %469 {offsets = [16, 0], sizes = [8, 8], strides = [1, 1]} : vector<64x8xf32> to vector<8x8xf32>
    %484 = vector.extract_strided_slice %431 {offsets = [0, 16], sizes = [8, 8], strides = [1, 1]} : vector<16x32xf32> to vector<8x8xf32>
    %cst_187 = arith.constant dense<0.000000e+00> : vector<8x8xf32>
    %485 = tpu.matmul %483, %484, %cst_187 {dimension_numbers = #tpu.dot_dimension_numbers<[1], [0], [0], [1], [0, 0, 1, 1], [], []>} : vector<8x8xf32>, vector<8x8xf32>, vector<8x8xf32> -> vector<8x8xf32>
    %486 = vector.extract_strided_slice %434 {offsets = [16, 0], sizes = [8, 32], strides = [1, 1]} : vector<32x32xf32> to vector<8x32xf32>
    %cst_188 = arith.constant dense<0.000000e+00> : vector<8x32xf32>
    %487 = tpu.matmul %485, %486, %cst_188 {dimension_numbers = #tpu.dot_dimension_numbers<[1], [0], [0], [1], [0, 0, 1, 1], [], []>} : vector<8x8xf32>, vector<8x32xf32>, vector<8x32xf32> -> vector<8x32xf32>
    %488 = arith.addf %482, %487 : vector<8x32xf32>
    %489 = vector.extract_strided_slice %469 {offsets = [24, 0], sizes = [8, 8], strides = [1, 1]} : vector<64x8xf32> to vector<8x8xf32>
    %490 = vector.extract_strided_slice %431 {offsets = [0, 24], sizes = [8, 8], strides = [1, 1]} : vector<16x32xf32> to vector<8x8xf32>
    %cst_189 = arith.constant dense<0.000000e+00> : vector<8x8xf32>
    %491 = tpu.matmul %489, %490, %cst_189 {dimension_numbers = #tpu.dot_dimension_numbers<[1], [0], [0], [1], [0, 0, 1, 1], [], []>} : vector<8x8xf32>, vector<8x8xf32>, vector<8x8xf32> -> vector<8x8xf32>
    %492 = vector.extract_strided_slice %434 {offsets = [24, 0], sizes = [8, 32], strides = [1, 1]} : vector<32x32xf32> to vector<8x32xf32>
    %cst_190 = arith.constant dense<0.000000e+00> : vector<8x32xf32>
    %493 = tpu.matmul %491, %492, %cst_190 {dimension_numbers = #tpu.dot_dimension_numbers<[1], [0], [0], [1], [0, 0, 1, 1], [], []>} : vector<8x8xf32>, vector<8x32xf32>, vector<8x32xf32> -> vector<8x32xf32>
    %494 = arith.addf %488, %493 : vector<8x32xf32>
    %cst_191 = arith.constant 0.000000e+00 : f32
    %495 = vector.broadcast %cst_191 : f32 to vector<8x32xf32>
    %496 = vector.extract_strided_slice %469 {offsets = [32, 0], sizes = [8, 8], strides = [1, 1]} : vector<64x8xf32> to vector<8x8xf32>
    %497 = vector.extract_strided_slice %431 {offsets = [8, 0], sizes = [8, 8], strides = [1, 1]} : vector<16x32xf32> to vector<8x8xf32>
    %cst_192 = arith.constant dense<0.000000e+00> : vector<8x8xf32>
    %498 = tpu.matmul %496, %497, %cst_192 {dimension_numbers = #tpu.dot_dimension_numbers<[1], [0], [0], [1], [0, 0, 1, 1], [], []>} : vector<8x8xf32>, vector<8x8xf32>, vector<8x8xf32> -> vector<8x8xf32>
    %499 = vector.extract_strided_slice %434 {offsets = [0, 0], sizes = [8, 32], strides = [1, 1]} : vector<32x32xf32> to vector<8x32xf32>
    %cst_193 = arith.constant dense<0.000000e+00> : vector<8x32xf32>
    %500 = tpu.matmul %498, %499, %cst_193 {dimension_numbers = #tpu.dot_dimension_numbers<[1], [0], [0], [1], [0, 0, 1, 1], [], []>} : vector<8x8xf32>, vector<8x32xf32>, vector<8x32xf32> -> vector<8x32xf32>
    %501 = arith.addf %495, %500 : vector<8x32xf32>
    %502 = vector.extract_strided_slice %469 {offsets = [40, 0], sizes = [8, 8], strides = [1, 1]} : vector<64x8xf32> to vector<8x8xf32>
    %503 = vector.extract_strided_slice %431 {offsets = [8, 8], sizes = [8, 8], strides = [1, 1]} : vector<16x32xf32> to vector<8x8xf32>
    %cst_194 = arith.constant dense<0.000000e+00> : vector<8x8xf32>
    %504 = tpu.matmul %502, %503, %cst_194 {dimension_numbers = #tpu.dot_dimension_numbers<[1], [0], [0], [1], [0, 0, 1, 1], [], []>} : vector<8x8xf32>, vector<8x8xf32>, vector<8x8xf32> -> vector<8x8xf32>
    %505 = vector.extract_strided_slice %434 {offsets = [8, 0], sizes = [8, 32], strides = [1, 1]} : vector<32x32xf32> to vector<8x32xf32>
    %cst_195 = arith.constant dense<0.000000e+00> : vector<8x32xf32>
    %506 = tpu.matmul %504, %505, %cst_195 {dimension_numbers = #tpu.dot_dimension_numbers<[1], [0], [0], [1], [0, 0, 1, 1], [], []>} : vector<8x8xf32>, vector<8x32xf32>, vector<8x32xf32> -> vector<8x32xf32>
    %507 = arith.addf %501, %506 : vector<8x32xf32>
    %508 = vector.extract_strided_slice %469 {offsets = [48, 0], sizes = [8, 8], strides = [1, 1]} : vector<64x8xf32> to vector<8x8xf32>
    %509 = vector.extract_strided_slice %431 {offsets = [8, 16], sizes = [8, 8], strides = [1, 1]} : vector<16x32xf32> to vector<8x8xf32>
    %cst_196 = arith.constant dense<0.000000e+00> : vector<8x8xf32>
    %510 = tpu.matmul %508, %509, %cst_196 {dimension_numbers = #tpu.dot_dimension_numbers<[1], [0], [0], [1], [0, 0, 1, 1], [], []>} : vector<8x8xf32>, vector<8x8xf32>, vector<8x8xf32> -> vector<8x8xf32>
    %511 = vector.extract_strided_slice %434 {offsets = [16, 0], sizes = [8, 32], strides = [1, 1]} : vector<32x32xf32> to vector<8x32xf32>
    %cst_197 = arith.constant dense<0.000000e+00> : vector<8x32xf32>
    %512 = tpu.matmul %510, %511, %cst_197 {dimension_numbers = #tpu.dot_dimension_numbers<[1], [0], [0], [1], [0, 0, 1, 1], [], []>} : vector<8x8xf32>, vector<8x32xf32>, vector<8x32xf32> -> vector<8x32xf32>
    %513 = arith.addf %507, %512 : vector<8x32xf32>
    %514 = vector.extract_strided_slice %469 {offsets = [56, 0], sizes = [8, 8], strides = [1, 1]} : vector<64x8xf32> to vector<8x8xf32>
    %515 = vector.extract_strided_slice %431 {offsets = [8, 24], sizes = [8, 8], strides = [1, 1]} : vector<16x32xf32> to vector<8x8xf32>
    %cst_198 = arith.constant dense<0.000000e+00> : vector<8x8xf32>
    %516 = tpu.matmul %514, %515, %cst_198 {dimension_numbers = #tpu.dot_dimension_numbers<[1], [0], [0], [1], [0, 0, 1, 1], [], []>} : vector<8x8xf32>, vector<8x8xf32>, vector<8x8xf32> -> vector<8x8xf32>
    %517 = vector.extract_strided_slice %434 {offsets = [24, 0], sizes = [8, 32], strides = [1, 1]} : vector<32x32xf32> to vector<8x32xf32>
    %cst_199 = arith.constant dense<0.000000e+00> : vector<8x32xf32>
    %518 = tpu.matmul %516, %517, %cst_199 {dimension_numbers = #tpu.dot_dimension_numbers<[1], [0], [0], [1], [0, 0, 1, 1], [], []>} : vector<8x8xf32>, vector<8x32xf32>, vector<8x32xf32> -> vector<8x32xf32>
    %519 = arith.addf %513, %518 : vector<8x32xf32>
    %520 = tpu.concatenate %494, %519 in 0 : vector<8x32xf32>, vector<8x32xf32> -> vector<16x32xf32>
    %521 = arith.index_cast %c2_i32 : i32 to index
    %c0_200 = arith.constant 0 : index
    %c0_201 = arith.constant 0 : index
    %522 = vector.load %arg8[%521, %c0_200, %c0_201] : memref<6x1x32xf32, #tpu.memory_space<vmem>>, vector<1x1x32xf32>
    %523 = vector.shape_cast %522 : vector<1x1x32xf32> to vector<1x32xf32>
    %524 = vector.broadcast %523 : vector<1x32xf32> to vector<16x32xf32>
    %525 = arith.addf %520, %524 : vector<16x32xf32>
    %526 = arith.addf %402, %525 : vector<16x32xf32>
    %cst_202 = arith.constant dense<0.000000e+00> : vector<16xf32>
    %527 = vector.multi_reduction <add>, %526, %cst_202 [1] : vector<16x32xf32> to vector<16xf32>
    %528 = vector.shape_cast %527 : vector<16xf32> to vector<16x1xf32>
    %cst_203 = arith.constant 3.200000e+01 : f32
    %529 = vector.broadcast %cst_203 : f32 to vector<16x1xf32>
    %530 = arith.divf %528, %529 : vector<16x1xf32>
    %531 = vector.broadcast %530 : vector<16x1xf32> to vector<16x32xf32>
    %532 = arith.subf %526, %531 : vector<16x32xf32>
    %533 = arith.mulf %532, %532 : vector<16x32xf32>
    %cst_204 = arith.constant dense<0.000000e+00> : vector<16xf32>
    %534 = vector.multi_reduction <add>, %533, %cst_204 [1] : vector<16x32xf32> to vector<16xf32>
    %535 = vector.shape_cast %534 : vector<16xf32> to vector<16x1xf32>
    %cst_205 = arith.constant 3.200000e+01 : f32
    %536 = vector.broadcast %cst_205 : f32 to vector<16x1xf32>
    %537 = arith.divf %535, %536 : vector<16x1xf32>
    %538 = vector.broadcast %530 : vector<16x1xf32> to vector<16x32xf32>
    %539 = arith.subf %526, %538 : vector<16x32xf32>
    %cst_206 = arith.constant 9.99999974E-6 : f32
    %540 = vector.broadcast %cst_206 : f32 to vector<16x1xf32>
    %541 = arith.addf %537, %540 : vector<16x1xf32>
    %542 = math.rsqrt %541 : vector<16x1xf32>
    %543 = vector.broadcast %542 : vector<16x1xf32> to vector<16x32xf32>
    %544 = arith.mulf %539, %543 : vector<16x32xf32>
    %545 = arith.index_cast %c2_i32 : i32 to index
    %c0_207 = arith.constant 0 : index
    %c0_208 = arith.constant 0 : index
    %546 = vector.load %arg13[%545, %c0_207, %c0_208] : memref<6x1x32xf32, #tpu.memory_space<vmem>>, vector<1x1x32xf32>
    %547 = vector.shape_cast %546 : vector<1x1x32xf32> to vector<1x32xf32>
    %548 = vector.broadcast %547 : vector<1x32xf32> to vector<16x32xf32>
    %549 = arith.mulf %544, %548 : vector<16x32xf32>
    %550 = arith.index_cast %c2_i32 : i32 to index
    %c0_209 = arith.constant 0 : index
    %c0_210 = arith.constant 0 : index
    %551 = vector.load %arg14[%550, %c0_209, %c0_210] : memref<6x1x32xf32, #tpu.memory_space<vmem>>, vector<1x1x32xf32>
    %552 = vector.shape_cast %551 : vector<1x1x32xf32> to vector<1x32xf32>
    %553 = vector.broadcast %552 : vector<1x32xf32> to vector<16x32xf32>
    %554 = arith.addf %549, %553 : vector<16x32xf32>
    %555 = arith.index_cast %c2_i32 : i32 to index
    %c0_211 = arith.constant 0 : index
    %c0_212 = arith.constant 0 : index
    %556 = vector.load %arg9[%555, %c0_211, %c0_212] : memref<6x32x128xf32, #tpu.memory_space<vmem>>, vector<1x32x128xf32>
    %557 = vector.shape_cast %556 : vector<1x32x128xf32> to vector<32x128xf32>
    %cst_213 = arith.constant dense<0.000000e+00> : vector<16x128xf32>
    %558 = tpu.matmul %554, %557, %cst_213 {dimension_numbers = #tpu.dot_dimension_numbers<[1], [0], [0], [1], [0, 0, 1, 1], [], []>} : vector<16x32xf32>, vector<32x128xf32>, vector<16x128xf32> -> vector<16x128xf32>
    %559 = arith.index_cast %c2_i32 : i32 to index
    %c0_214 = arith.constant 0 : index
    %c0_215 = arith.constant 0 : index
    %560 = vector.load %arg10[%559, %c0_214, %c0_215] : memref<6x1x128xf32, #tpu.memory_space<vmem>>, vector<1x1x128xf32>
    %561 = vector.shape_cast %560 : vector<1x1x128xf32> to vector<1x128xf32>
    %562 = vector.broadcast %561 : vector<1x128xf32> to vector<16x128xf32>
    %563 = arith.addf %558, %562 : vector<16x128xf32>
    %cst_216 = arith.constant 0.000000e+00 : f32
    %564 = vector.broadcast %cst_216 : f32 to vector<16x128xf32>
    %565 = arith.maximumf %563, %564 : vector<16x128xf32>
    %566 = arith.index_cast %c2_i32 : i32 to index
    %c0_217 = arith.constant 0 : index
    %c0_218 = arith.constant 0 : index
    %567 = vector.load %arg11[%566, %c0_217, %c0_218] : memref<6x128x32xf32, #tpu.memory_space<vmem>>, vector<1x128x32xf32>
    %568 = vector.shape_cast %567 : vector<1x128x32xf32> to vector<128x32xf32>
    %cst_219 = arith.constant dense<0.000000e+00> : vector<16x32xf32>
    %569 = tpu.matmul %565, %568, %cst_219 {dimension_numbers = #tpu.dot_dimension_numbers<[1], [0], [0], [1], [0, 0, 1, 1], [], []>} : vector<16x128xf32>, vector<128x32xf32>, vector<16x32xf32> -> vector<16x32xf32>
    %570 = arith.index_cast %c2_i32 : i32 to index
    %c0_220 = arith.constant 0 : index
    %c0_221 = arith.constant 0 : index
    %571 = vector.load %arg12[%570, %c0_220, %c0_221] : memref<6x1x32xf32, #tpu.memory_space<vmem>>, vector<1x1x32xf32>
    %572 = vector.shape_cast %571 : vector<1x1x32xf32> to vector<1x32xf32>
    %573 = vector.broadcast %572 : vector<1x32xf32> to vector<16x32xf32>
    %574 = arith.addf %569, %573 : vector<16x32xf32>
    %575 = arith.addf %554, %574 : vector<16x32xf32>
    %cst_222 = arith.constant dense<0.000000e+00> : vector<16xf32>
    %576 = vector.multi_reduction <add>, %575, %cst_222 [1] : vector<16x32xf32> to vector<16xf32>
    %577 = vector.shape_cast %576 : vector<16xf32> to vector<16x1xf32>
    %cst_223 = arith.constant 3.200000e+01 : f32
    %578 = vector.broadcast %cst_223 : f32 to vector<16x1xf32>
    %579 = arith.divf %577, %578 : vector<16x1xf32>
    %580 = vector.broadcast %579 : vector<16x1xf32> to vector<16x32xf32>
    %581 = arith.subf %575, %580 : vector<16x32xf32>
    %582 = arith.mulf %581, %581 : vector<16x32xf32>
    %cst_224 = arith.constant dense<0.000000e+00> : vector<16xf32>
    %583 = vector.multi_reduction <add>, %582, %cst_224 [1] : vector<16x32xf32> to vector<16xf32>
    %584 = vector.shape_cast %583 : vector<16xf32> to vector<16x1xf32>
    %cst_225 = arith.constant 3.200000e+01 : f32
    %585 = vector.broadcast %cst_225 : f32 to vector<16x1xf32>
    %586 = arith.divf %584, %585 : vector<16x1xf32>
    %587 = vector.broadcast %579 : vector<16x1xf32> to vector<16x32xf32>
    %588 = arith.subf %575, %587 : vector<16x32xf32>
    %cst_226 = arith.constant 9.99999974E-6 : f32
    %589 = vector.broadcast %cst_226 : f32 to vector<16x1xf32>
    %590 = arith.addf %586, %589 : vector<16x1xf32>
    %591 = math.rsqrt %590 : vector<16x1xf32>
    %592 = vector.broadcast %591 : vector<16x1xf32> to vector<16x32xf32>
    %593 = arith.mulf %588, %592 : vector<16x32xf32>
    %594 = arith.index_cast %c2_i32 : i32 to index
    %c0_227 = arith.constant 0 : index
    %c0_228 = arith.constant 0 : index
    %595 = vector.load %arg15[%594, %c0_227, %c0_228] : memref<6x1x32xf32, #tpu.memory_space<vmem>>, vector<1x1x32xf32>
    %596 = vector.shape_cast %595 : vector<1x1x32xf32> to vector<1x32xf32>
    %597 = vector.broadcast %596 : vector<1x32xf32> to vector<16x32xf32>
    %598 = arith.mulf %593, %597 : vector<16x32xf32>
    %599 = arith.index_cast %c2_i32 : i32 to index
    %c0_229 = arith.constant 0 : index
    %c0_230 = arith.constant 0 : index
    %600 = vector.load %arg16[%599, %c0_229, %c0_230] : memref<6x1x32xf32, #tpu.memory_space<vmem>>, vector<1x1x32xf32>
    %601 = vector.shape_cast %600 : vector<1x1x32xf32> to vector<1x32xf32>
    %602 = vector.broadcast %601 : vector<1x32xf32> to vector<16x32xf32>
    %603 = arith.addf %598, %602 : vector<16x32xf32>
    %c3_i32 = arith.constant 3 : i32
    %604 = arith.index_cast %c3_i32 : i32 to index
    %c0_231 = arith.constant 0 : index
    %c0_232 = arith.constant 0 : index
    %605 = vector.load %arg1[%604, %c0_231, %c0_232] : memref<6x32x32xf32, #tpu.memory_space<vmem>>, vector<1x32x32xf32>
    %606 = vector.shape_cast %605 : vector<1x32x32xf32> to vector<32x32xf32>
    %cst_233 = arith.constant dense<0.000000e+00> : vector<16x32xf32>
    %607 = tpu.matmul %603, %606, %cst_233 {dimension_numbers = #tpu.dot_dimension_numbers<[1], [0], [0], [1], [0, 0, 1, 1], [], []>} : vector<16x32xf32>, vector<32x32xf32>, vector<16x32xf32> -> vector<16x32xf32>
    %608 = arith.index_cast %c3_i32 : i32 to index
    %c0_234 = arith.constant 0 : index
    %c0_235 = arith.constant 0 : index
    %609 = vector.load %arg2[%608, %c0_234, %c0_235] : memref<6x1x32xf32, #tpu.memory_space<vmem>>, vector<1x1x32xf32>
    %610 = vector.shape_cast %609 : vector<1x1x32xf32> to vector<1x32xf32>
    %611 = vector.broadcast %610 : vector<1x32xf32> to vector<16x32xf32>
    %612 = arith.addf %607, %611 : vector<16x32xf32>
    %cst_236 = arith.constant 0.353553385 : f32
    %613 = vector.broadcast %cst_236 : f32 to vector<16x32xf32>
    %614 = arith.mulf %612, %613 : vector<16x32xf32>
    %615 = arith.index_cast %c3_i32 : i32 to index
    %c0_237 = arith.constant 0 : index
    %c0_238 = arith.constant 0 : index
    %616 = vector.load %arg3[%615, %c0_237, %c0_238] : memref<6x32x32xf32, #tpu.memory_space<vmem>>, vector<1x32x32xf32>
    %617 = vector.shape_cast %616 : vector<1x32x32xf32> to vector<32x32xf32>
    %cst_239 = arith.constant dense<0.000000e+00> : vector<16x32xf32>
    %618 = tpu.matmul %603, %617, %cst_239 {dimension_numbers = #tpu.dot_dimension_numbers<[1], [0], [0], [1], [0, 0, 1, 1], [], []>} : vector<16x32xf32>, vector<32x32xf32>, vector<16x32xf32> -> vector<16x32xf32>
    %619 = arith.index_cast %c3_i32 : i32 to index
    %c0_240 = arith.constant 0 : index
    %c0_241 = arith.constant 0 : index
    %620 = vector.load %arg4[%619, %c0_240, %c0_241] : memref<6x1x32xf32, #tpu.memory_space<vmem>>, vector<1x1x32xf32>
    %621 = vector.shape_cast %620 : vector<1x1x32xf32> to vector<1x32xf32>
    %622 = vector.broadcast %621 : vector<1x32xf32> to vector<16x32xf32>
    %623 = arith.addf %618, %622 : vector<16x32xf32>
    %624 = arith.index_cast %c3_i32 : i32 to index
    %c0_242 = arith.constant 0 : index
    %c0_243 = arith.constant 0 : index
    %625 = vector.load %arg5[%624, %c0_242, %c0_243] : memref<6x32x32xf32, #tpu.memory_space<vmem>>, vector<1x32x32xf32>
    %626 = vector.shape_cast %625 : vector<1x32x32xf32> to vector<32x32xf32>
    %cst_244 = arith.constant dense<0.000000e+00> : vector<16x32xf32>
    %627 = tpu.matmul %603, %626, %cst_244 {dimension_numbers = #tpu.dot_dimension_numbers<[1], [0], [0], [1], [0, 0, 1, 1], [], []>} : vector<16x32xf32>, vector<32x32xf32>, vector<16x32xf32> -> vector<16x32xf32>
    %628 = arith.index_cast %c3_i32 : i32 to index
    %c0_245 = arith.constant 0 : index
    %c0_246 = arith.constant 0 : index
    %629 = vector.load %arg6[%628, %c0_245, %c0_246] : memref<6x1x32xf32, #tpu.memory_space<vmem>>, vector<1x1x32xf32>
    %630 = vector.shape_cast %629 : vector<1x1x32xf32> to vector<1x32xf32>
    %631 = vector.broadcast %630 : vector<1x32xf32> to vector<16x32xf32>
    %632 = arith.addf %627, %631 : vector<16x32xf32>
    %633 = arith.index_cast %c3_i32 : i32 to index
    %c0_247 = arith.constant 0 : index
    %c0_248 = arith.constant 0 : index
    %634 = vector.load %arg7[%633, %c0_247, %c0_248] : memref<6x32x32xf32, #tpu.memory_space<vmem>>, vector<1x32x32xf32>
    %635 = vector.shape_cast %634 : vector<1x32x32xf32> to vector<32x32xf32>
    %636 = vector.extract_strided_slice %614 {offsets = [0, 0], sizes = [8, 8], strides = [1, 1]} : vector<16x32xf32> to vector<8x8xf32>
    %637 = vector.extract_strided_slice %623 {offsets = [0, 0], sizes = [8, 8], strides = [1, 1]} : vector<16x32xf32> to vector<8x8xf32>
    %cst_249 = arith.constant dense<0.000000e+00> : vector<8x8xf32>
    %638 = tpu.matmul %636, %637, %cst_249 {dimension_numbers = #tpu.dot_dimension_numbers<[1], [1], [0], [0], [0, 0, 1, 0], [], []>} : vector<8x8xf32>, vector<8x8xf32>, vector<8x8xf32> -> vector<8x8xf32>
    %639 = vector.extract_strided_slice %614 {offsets = [0, 8], sizes = [8, 8], strides = [1, 1]} : vector<16x32xf32> to vector<8x8xf32>
    %640 = vector.extract_strided_slice %623 {offsets = [0, 8], sizes = [8, 8], strides = [1, 1]} : vector<16x32xf32> to vector<8x8xf32>
    %cst_250 = arith.constant dense<0.000000e+00> : vector<8x8xf32>
    %641 = tpu.matmul %639, %640, %cst_250 {dimension_numbers = #tpu.dot_dimension_numbers<[1], [1], [0], [0], [0, 0, 1, 0], [], []>} : vector<8x8xf32>, vector<8x8xf32>, vector<8x8xf32> -> vector<8x8xf32>
    %642 = vector.extract_strided_slice %614 {offsets = [0, 16], sizes = [8, 8], strides = [1, 1]} : vector<16x32xf32> to vector<8x8xf32>
    %643 = vector.extract_strided_slice %623 {offsets = [0, 16], sizes = [8, 8], strides = [1, 1]} : vector<16x32xf32> to vector<8x8xf32>
    %cst_251 = arith.constant dense<0.000000e+00> : vector<8x8xf32>
    %644 = tpu.matmul %642, %643, %cst_251 {dimension_numbers = #tpu.dot_dimension_numbers<[1], [1], [0], [0], [0, 0, 1, 0], [], []>} : vector<8x8xf32>, vector<8x8xf32>, vector<8x8xf32> -> vector<8x8xf32>
    %645 = vector.extract_strided_slice %614 {offsets = [0, 24], sizes = [8, 8], strides = [1, 1]} : vector<16x32xf32> to vector<8x8xf32>
    %646 = vector.extract_strided_slice %623 {offsets = [0, 24], sizes = [8, 8], strides = [1, 1]} : vector<16x32xf32> to vector<8x8xf32>
    %cst_252 = arith.constant dense<0.000000e+00> : vector<8x8xf32>
    %647 = tpu.matmul %645, %646, %cst_252 {dimension_numbers = #tpu.dot_dimension_numbers<[1], [1], [0], [0], [0, 0, 1, 0], [], []>} : vector<8x8xf32>, vector<8x8xf32>, vector<8x8xf32> -> vector<8x8xf32>
    %648 = vector.extract_strided_slice %614 {offsets = [8, 0], sizes = [8, 8], strides = [1, 1]} : vector<16x32xf32> to vector<8x8xf32>
    %649 = vector.extract_strided_slice %623 {offsets = [8, 0], sizes = [8, 8], strides = [1, 1]} : vector<16x32xf32> to vector<8x8xf32>
    %cst_253 = arith.constant dense<0.000000e+00> : vector<8x8xf32>
    %650 = tpu.matmul %648, %649, %cst_253 {dimension_numbers = #tpu.dot_dimension_numbers<[1], [1], [0], [0], [0, 0, 1, 0], [], []>} : vector<8x8xf32>, vector<8x8xf32>, vector<8x8xf32> -> vector<8x8xf32>
    %651 = vector.extract_strided_slice %614 {offsets = [8, 8], sizes = [8, 8], strides = [1, 1]} : vector<16x32xf32> to vector<8x8xf32>
    %652 = vector.extract_strided_slice %623 {offsets = [8, 8], sizes = [8, 8], strides = [1, 1]} : vector<16x32xf32> to vector<8x8xf32>
    %cst_254 = arith.constant dense<0.000000e+00> : vector<8x8xf32>
    %653 = tpu.matmul %651, %652, %cst_254 {dimension_numbers = #tpu.dot_dimension_numbers<[1], [1], [0], [0], [0, 0, 1, 0], [], []>} : vector<8x8xf32>, vector<8x8xf32>, vector<8x8xf32> -> vector<8x8xf32>
    %654 = vector.extract_strided_slice %614 {offsets = [8, 16], sizes = [8, 8], strides = [1, 1]} : vector<16x32xf32> to vector<8x8xf32>
    %655 = vector.extract_strided_slice %623 {offsets = [8, 16], sizes = [8, 8], strides = [1, 1]} : vector<16x32xf32> to vector<8x8xf32>
    %cst_255 = arith.constant dense<0.000000e+00> : vector<8x8xf32>
    %656 = tpu.matmul %654, %655, %cst_255 {dimension_numbers = #tpu.dot_dimension_numbers<[1], [1], [0], [0], [0, 0, 1, 0], [], []>} : vector<8x8xf32>, vector<8x8xf32>, vector<8x8xf32> -> vector<8x8xf32>
    %657 = vector.extract_strided_slice %614 {offsets = [8, 24], sizes = [8, 8], strides = [1, 1]} : vector<16x32xf32> to vector<8x8xf32>
    %658 = vector.extract_strided_slice %623 {offsets = [8, 24], sizes = [8, 8], strides = [1, 1]} : vector<16x32xf32> to vector<8x8xf32>
    %cst_256 = arith.constant dense<0.000000e+00> : vector<8x8xf32>
    %659 = tpu.matmul %657, %658, %cst_256 {dimension_numbers = #tpu.dot_dimension_numbers<[1], [1], [0], [0], [0, 0, 1, 0], [], []>} : vector<8x8xf32>, vector<8x8xf32>, vector<8x8xf32> -> vector<8x8xf32>
    %660 = tpu.concatenate %638, %641, %644, %647, %650, %653, %656, %659 in 0 : vector<8x8xf32>, vector<8x8xf32>, vector<8x8xf32>, vector<8x8xf32>, vector<8x8xf32>, vector<8x8xf32>, vector<8x8xf32>, vector<8x8xf32> -> vector<64x8xf32>
    %cst_257 = arith.constant dense<0xFF800000> : vector<64xf32>
    %661 = vector.multi_reduction <maximumf>, %660, %cst_257 [1] : vector<64x8xf32> to vector<64xf32>
    %662 = vector.shape_cast %661 : vector<64xf32> to vector<64x1xf32>
    %663 = vector.broadcast %662 : vector<64x1xf32> to vector<64x8xf32>
    %664 = arith.subf %660, %663 : vector<64x8xf32>
    %665 = math.exp %664 : vector<64x8xf32>
    %cst_258 = arith.constant dense<0.000000e+00> : vector<64xf32>
    %666 = vector.multi_reduction <add>, %665, %cst_258 [1] : vector<64x8xf32> to vector<64xf32>
    %667 = vector.shape_cast %666 : vector<64xf32> to vector<64x1xf32>
    %668 = tpu.reciprocal %667 : vector<64x1xf32> -> vector<64x1xf32>
    %669 = vector.broadcast %668 : vector<64x1xf32> to vector<64x8xf32>
    %670 = arith.mulf %665, %669 : vector<64x8xf32>
    %cst_259 = arith.constant 0.000000e+00 : f32
    %671 = vector.broadcast %cst_259 : f32 to vector<8x32xf32>
    %672 = vector.extract_strided_slice %670 {offsets = [0, 0], sizes = [8, 8], strides = [1, 1]} : vector<64x8xf32> to vector<8x8xf32>
    %673 = vector.extract_strided_slice %632 {offsets = [0, 0], sizes = [8, 8], strides = [1, 1]} : vector<16x32xf32> to vector<8x8xf32>
    %cst_260 = arith.constant dense<0.000000e+00> : vector<8x8xf32>
    %674 = tpu.matmul %672, %673, %cst_260 {dimension_numbers = #tpu.dot_dimension_numbers<[1], [0], [0], [1], [0, 0, 1, 1], [], []>} : vector<8x8xf32>, vector<8x8xf32>, vector<8x8xf32> -> vector<8x8xf32>
    %675 = vector.extract_strided_slice %635 {offsets = [0, 0], sizes = [8, 32], strides = [1, 1]} : vector<32x32xf32> to vector<8x32xf32>
    %cst_261 = arith.constant dense<0.000000e+00> : vector<8x32xf32>
    %676 = tpu.matmul %674, %675, %cst_261 {dimension_numbers = #tpu.dot_dimension_numbers<[1], [0], [0], [1], [0, 0, 1, 1], [], []>} : vector<8x8xf32>, vector<8x32xf32>, vector<8x32xf32> -> vector<8x32xf32>
    %677 = arith.addf %671, %676 : vector<8x32xf32>
    %678 = vector.extract_strided_slice %670 {offsets = [8, 0], sizes = [8, 8], strides = [1, 1]} : vector<64x8xf32> to vector<8x8xf32>
    %679 = vector.extract_strided_slice %632 {offsets = [0, 8], sizes = [8, 8], strides = [1, 1]} : vector<16x32xf32> to vector<8x8xf32>
    %cst_262 = arith.constant dense<0.000000e+00> : vector<8x8xf32>
    %680 = tpu.matmul %678, %679, %cst_262 {dimension_numbers = #tpu.dot_dimension_numbers<[1], [0], [0], [1], [0, 0, 1, 1], [], []>} : vector<8x8xf32>, vector<8x8xf32>, vector<8x8xf32> -> vector<8x8xf32>
    %681 = vector.extract_strided_slice %635 {offsets = [8, 0], sizes = [8, 32], strides = [1, 1]} : vector<32x32xf32> to vector<8x32xf32>
    %cst_263 = arith.constant dense<0.000000e+00> : vector<8x32xf32>
    %682 = tpu.matmul %680, %681, %cst_263 {dimension_numbers = #tpu.dot_dimension_numbers<[1], [0], [0], [1], [0, 0, 1, 1], [], []>} : vector<8x8xf32>, vector<8x32xf32>, vector<8x32xf32> -> vector<8x32xf32>
    %683 = arith.addf %677, %682 : vector<8x32xf32>
    %684 = vector.extract_strided_slice %670 {offsets = [16, 0], sizes = [8, 8], strides = [1, 1]} : vector<64x8xf32> to vector<8x8xf32>
    %685 = vector.extract_strided_slice %632 {offsets = [0, 16], sizes = [8, 8], strides = [1, 1]} : vector<16x32xf32> to vector<8x8xf32>
    %cst_264 = arith.constant dense<0.000000e+00> : vector<8x8xf32>
    %686 = tpu.matmul %684, %685, %cst_264 {dimension_numbers = #tpu.dot_dimension_numbers<[1], [0], [0], [1], [0, 0, 1, 1], [], []>} : vector<8x8xf32>, vector<8x8xf32>, vector<8x8xf32> -> vector<8x8xf32>
    %687 = vector.extract_strided_slice %635 {offsets = [16, 0], sizes = [8, 32], strides = [1, 1]} : vector<32x32xf32> to vector<8x32xf32>
    %cst_265 = arith.constant dense<0.000000e+00> : vector<8x32xf32>
    %688 = tpu.matmul %686, %687, %cst_265 {dimension_numbers = #tpu.dot_dimension_numbers<[1], [0], [0], [1], [0, 0, 1, 1], [], []>} : vector<8x8xf32>, vector<8x32xf32>, vector<8x32xf32> -> vector<8x32xf32>
    %689 = arith.addf %683, %688 : vector<8x32xf32>
    %690 = vector.extract_strided_slice %670 {offsets = [24, 0], sizes = [8, 8], strides = [1, 1]} : vector<64x8xf32> to vector<8x8xf32>
    %691 = vector.extract_strided_slice %632 {offsets = [0, 24], sizes = [8, 8], strides = [1, 1]} : vector<16x32xf32> to vector<8x8xf32>
    %cst_266 = arith.constant dense<0.000000e+00> : vector<8x8xf32>
    %692 = tpu.matmul %690, %691, %cst_266 {dimension_numbers = #tpu.dot_dimension_numbers<[1], [0], [0], [1], [0, 0, 1, 1], [], []>} : vector<8x8xf32>, vector<8x8xf32>, vector<8x8xf32> -> vector<8x8xf32>
    %693 = vector.extract_strided_slice %635 {offsets = [24, 0], sizes = [8, 32], strides = [1, 1]} : vector<32x32xf32> to vector<8x32xf32>
    %cst_267 = arith.constant dense<0.000000e+00> : vector<8x32xf32>
    %694 = tpu.matmul %692, %693, %cst_267 {dimension_numbers = #tpu.dot_dimension_numbers<[1], [0], [0], [1], [0, 0, 1, 1], [], []>} : vector<8x8xf32>, vector<8x32xf32>, vector<8x32xf32> -> vector<8x32xf32>
    %695 = arith.addf %689, %694 : vector<8x32xf32>
    %cst_268 = arith.constant 0.000000e+00 : f32
    %696 = vector.broadcast %cst_268 : f32 to vector<8x32xf32>
    %697 = vector.extract_strided_slice %670 {offsets = [32, 0], sizes = [8, 8], strides = [1, 1]} : vector<64x8xf32> to vector<8x8xf32>
    %698 = vector.extract_strided_slice %632 {offsets = [8, 0], sizes = [8, 8], strides = [1, 1]} : vector<16x32xf32> to vector<8x8xf32>
    %cst_269 = arith.constant dense<0.000000e+00> : vector<8x8xf32>
    %699 = tpu.matmul %697, %698, %cst_269 {dimension_numbers = #tpu.dot_dimension_numbers<[1], [0], [0], [1], [0, 0, 1, 1], [], []>} : vector<8x8xf32>, vector<8x8xf32>, vector<8x8xf32> -> vector<8x8xf32>
    %700 = vector.extract_strided_slice %635 {offsets = [0, 0], sizes = [8, 32], strides = [1, 1]} : vector<32x32xf32> to vector<8x32xf32>
    %cst_270 = arith.constant dense<0.000000e+00> : vector<8x32xf32>
    %701 = tpu.matmul %699, %700, %cst_270 {dimension_numbers = #tpu.dot_dimension_numbers<[1], [0], [0], [1], [0, 0, 1, 1], [], []>} : vector<8x8xf32>, vector<8x32xf32>, vector<8x32xf32> -> vector<8x32xf32>
    %702 = arith.addf %696, %701 : vector<8x32xf32>
    %703 = vector.extract_strided_slice %670 {offsets = [40, 0], sizes = [8, 8], strides = [1, 1]} : vector<64x8xf32> to vector<8x8xf32>
    %704 = vector.extract_strided_slice %632 {offsets = [8, 8], sizes = [8, 8], strides = [1, 1]} : vector<16x32xf32> to vector<8x8xf32>
    %cst_271 = arith.constant dense<0.000000e+00> : vector<8x8xf32>
    %705 = tpu.matmul %703, %704, %cst_271 {dimension_numbers = #tpu.dot_dimension_numbers<[1], [0], [0], [1], [0, 0, 1, 1], [], []>} : vector<8x8xf32>, vector<8x8xf32>, vector<8x8xf32> -> vector<8x8xf32>
    %706 = vector.extract_strided_slice %635 {offsets = [8, 0], sizes = [8, 32], strides = [1, 1]} : vector<32x32xf32> to vector<8x32xf32>
    %cst_272 = arith.constant dense<0.000000e+00> : vector<8x32xf32>
    %707 = tpu.matmul %705, %706, %cst_272 {dimension_numbers = #tpu.dot_dimension_numbers<[1], [0], [0], [1], [0, 0, 1, 1], [], []>} : vector<8x8xf32>, vector<8x32xf32>, vector<8x32xf32> -> vector<8x32xf32>
    %708 = arith.addf %702, %707 : vector<8x32xf32>
    %709 = vector.extract_strided_slice %670 {offsets = [48, 0], sizes = [8, 8], strides = [1, 1]} : vector<64x8xf32> to vector<8x8xf32>
    %710 = vector.extract_strided_slice %632 {offsets = [8, 16], sizes = [8, 8], strides = [1, 1]} : vector<16x32xf32> to vector<8x8xf32>
    %cst_273 = arith.constant dense<0.000000e+00> : vector<8x8xf32>
    %711 = tpu.matmul %709, %710, %cst_273 {dimension_numbers = #tpu.dot_dimension_numbers<[1], [0], [0], [1], [0, 0, 1, 1], [], []>} : vector<8x8xf32>, vector<8x8xf32>, vector<8x8xf32> -> vector<8x8xf32>
    %712 = vector.extract_strided_slice %635 {offsets = [16, 0], sizes = [8, 32], strides = [1, 1]} : vector<32x32xf32> to vector<8x32xf32>
    %cst_274 = arith.constant dense<0.000000e+00> : vector<8x32xf32>
    %713 = tpu.matmul %711, %712, %cst_274 {dimension_numbers = #tpu.dot_dimension_numbers<[1], [0], [0], [1], [0, 0, 1, 1], [], []>} : vector<8x8xf32>, vector<8x32xf32>, vector<8x32xf32> -> vector<8x32xf32>
    %714 = arith.addf %708, %713 : vector<8x32xf32>
    %715 = vector.extract_strided_slice %670 {offsets = [56, 0], sizes = [8, 8], strides = [1, 1]} : vector<64x8xf32> to vector<8x8xf32>
    %716 = vector.extract_strided_slice %632 {offsets = [8, 24], sizes = [8, 8], strides = [1, 1]} : vector<16x32xf32> to vector<8x8xf32>
    %cst_275 = arith.constant dense<0.000000e+00> : vector<8x8xf32>
    %717 = tpu.matmul %715, %716, %cst_275 {dimension_numbers = #tpu.dot_dimension_numbers<[1], [0], [0], [1], [0, 0, 1, 1], [], []>} : vector<8x8xf32>, vector<8x8xf32>, vector<8x8xf32> -> vector<8x8xf32>
    %718 = vector.extract_strided_slice %635 {offsets = [24, 0], sizes = [8, 32], strides = [1, 1]} : vector<32x32xf32> to vector<8x32xf32>
    %cst_276 = arith.constant dense<0.000000e+00> : vector<8x32xf32>
    %719 = tpu.matmul %717, %718, %cst_276 {dimension_numbers = #tpu.dot_dimension_numbers<[1], [0], [0], [1], [0, 0, 1, 1], [], []>} : vector<8x8xf32>, vector<8x32xf32>, vector<8x32xf32> -> vector<8x32xf32>
    %720 = arith.addf %714, %719 : vector<8x32xf32>
    %721 = tpu.concatenate %695, %720 in 0 : vector<8x32xf32>, vector<8x32xf32> -> vector<16x32xf32>
    %722 = arith.index_cast %c3_i32 : i32 to index
    %c0_277 = arith.constant 0 : index
    %c0_278 = arith.constant 0 : index
    %723 = vector.load %arg8[%722, %c0_277, %c0_278] : memref<6x1x32xf32, #tpu.memory_space<vmem>>, vector<1x1x32xf32>
    %724 = vector.shape_cast %723 : vector<1x1x32xf32> to vector<1x32xf32>
    %725 = vector.broadcast %724 : vector<1x32xf32> to vector<16x32xf32>
    %726 = arith.addf %721, %725 : vector<16x32xf32>
    %727 = arith.addf %603, %726 : vector<16x32xf32>
    %cst_279 = arith.constant dense<0.000000e+00> : vector<16xf32>
    %728 = vector.multi_reduction <add>, %727, %cst_279 [1] : vector<16x32xf32> to vector<16xf32>
    %729 = vector.shape_cast %728 : vector<16xf32> to vector<16x1xf32>
    %cst_280 = arith.constant 3.200000e+01 : f32
    %730 = vector.broadcast %cst_280 : f32 to vector<16x1xf32>
    %731 = arith.divf %729, %730 : vector<16x1xf32>
    %732 = vector.broadcast %731 : vector<16x1xf32> to vector<16x32xf32>
    %733 = arith.subf %727, %732 : vector<16x32xf32>
    %734 = arith.mulf %733, %733 : vector<16x32xf32>
    %cst_281 = arith.constant dense<0.000000e+00> : vector<16xf32>
    %735 = vector.multi_reduction <add>, %734, %cst_281 [1] : vector<16x32xf32> to vector<16xf32>
    %736 = vector.shape_cast %735 : vector<16xf32> to vector<16x1xf32>
    %cst_282 = arith.constant 3.200000e+01 : f32
    %737 = vector.broadcast %cst_282 : f32 to vector<16x1xf32>
    %738 = arith.divf %736, %737 : vector<16x1xf32>
    %739 = vector.broadcast %731 : vector<16x1xf32> to vector<16x32xf32>
    %740 = arith.subf %727, %739 : vector<16x32xf32>
    %cst_283 = arith.constant 9.99999974E-6 : f32
    %741 = vector.broadcast %cst_283 : f32 to vector<16x1xf32>
    %742 = arith.addf %738, %741 : vector<16x1xf32>
    %743 = math.rsqrt %742 : vector<16x1xf32>
    %744 = vector.broadcast %743 : vector<16x1xf32> to vector<16x32xf32>
    %745 = arith.mulf %740, %744 : vector<16x32xf32>
    %746 = arith.index_cast %c3_i32 : i32 to index
    %c0_284 = arith.constant 0 : index
    %c0_285 = arith.constant 0 : index
    %747 = vector.load %arg13[%746, %c0_284, %c0_285] : memref<6x1x32xf32, #tpu.memory_space<vmem>>, vector<1x1x32xf32>
    %748 = vector.shape_cast %747 : vector<1x1x32xf32> to vector<1x32xf32>
    %749 = vector.broadcast %748 : vector<1x32xf32> to vector<16x32xf32>
    %750 = arith.mulf %745, %749 : vector<16x32xf32>
    %751 = arith.index_cast %c3_i32 : i32 to index
    %c0_286 = arith.constant 0 : index
    %c0_287 = arith.constant 0 : index
    %752 = vector.load %arg14[%751, %c0_286, %c0_287] : memref<6x1x32xf32, #tpu.memory_space<vmem>>, vector<1x1x32xf32>
    %753 = vector.shape_cast %752 : vector<1x1x32xf32> to vector<1x32xf32>
    %754 = vector.broadcast %753 : vector<1x32xf32> to vector<16x32xf32>
    %755 = arith.addf %750, %754 : vector<16x32xf32>
    %756 = arith.index_cast %c3_i32 : i32 to index
    %c0_288 = arith.constant 0 : index
    %c0_289 = arith.constant 0 : index
    %757 = vector.load %arg9[%756, %c0_288, %c0_289] : memref<6x32x128xf32, #tpu.memory_space<vmem>>, vector<1x32x128xf32>
    %758 = vector.shape_cast %757 : vector<1x32x128xf32> to vector<32x128xf32>
    %cst_290 = arith.constant dense<0.000000e+00> : vector<16x128xf32>
    %759 = tpu.matmul %755, %758, %cst_290 {dimension_numbers = #tpu.dot_dimension_numbers<[1], [0], [0], [1], [0, 0, 1, 1], [], []>} : vector<16x32xf32>, vector<32x128xf32>, vector<16x128xf32> -> vector<16x128xf32>
    %760 = arith.index_cast %c3_i32 : i32 to index
    %c0_291 = arith.constant 0 : index
    %c0_292 = arith.constant 0 : index
    %761 = vector.load %arg10[%760, %c0_291, %c0_292] : memref<6x1x128xf32, #tpu.memory_space<vmem>>, vector<1x1x128xf32>
    %762 = vector.shape_cast %761 : vector<1x1x128xf32> to vector<1x128xf32>
    %763 = vector.broadcast %762 : vector<1x128xf32> to vector<16x128xf32>
    %764 = arith.addf %759, %763 : vector<16x128xf32>
    %cst_293 = arith.constant 0.000000e+00 : f32
    %765 = vector.broadcast %cst_293 : f32 to vector<16x128xf32>
    %766 = arith.maximumf %764, %765 : vector<16x128xf32>
    %767 = arith.index_cast %c3_i32 : i32 to index
    %c0_294 = arith.constant 0 : index
    %c0_295 = arith.constant 0 : index
    %768 = vector.load %arg11[%767, %c0_294, %c0_295] : memref<6x128x32xf32, #tpu.memory_space<vmem>>, vector<1x128x32xf32>
    %769 = vector.shape_cast %768 : vector<1x128x32xf32> to vector<128x32xf32>
    %cst_296 = arith.constant dense<0.000000e+00> : vector<16x32xf32>
    %770 = tpu.matmul %766, %769, %cst_296 {dimension_numbers = #tpu.dot_dimension_numbers<[1], [0], [0], [1], [0, 0, 1, 1], [], []>} : vector<16x128xf32>, vector<128x32xf32>, vector<16x32xf32> -> vector<16x32xf32>
    %771 = arith.index_cast %c3_i32 : i32 to index
    %c0_297 = arith.constant 0 : index
    %c0_298 = arith.constant 0 : index
    %772 = vector.load %arg12[%771, %c0_297, %c0_298] : memref<6x1x32xf32, #tpu.memory_space<vmem>>, vector<1x1x32xf32>
    %773 = vector.shape_cast %772 : vector<1x1x32xf32> to vector<1x32xf32>
    %774 = vector.broadcast %773 : vector<1x32xf32> to vector<16x32xf32>
    %775 = arith.addf %770, %774 : vector<16x32xf32>
    %776 = arith.addf %755, %775 : vector<16x32xf32>
    %cst_299 = arith.constant dense<0.000000e+00> : vector<16xf32>
    %777 = vector.multi_reduction <add>, %776, %cst_299 [1] : vector<16x32xf32> to vector<16xf32>
    %778 = vector.shape_cast %777 : vector<16xf32> to vector<16x1xf32>
    %cst_300 = arith.constant 3.200000e+01 : f32
    %779 = vector.broadcast %cst_300 : f32 to vector<16x1xf32>
    %780 = arith.divf %778, %779 : vector<16x1xf32>
    %781 = vector.broadcast %780 : vector<16x1xf32> to vector<16x32xf32>
    %782 = arith.subf %776, %781 : vector<16x32xf32>
    %783 = arith.mulf %782, %782 : vector<16x32xf32>
    %cst_301 = arith.constant dense<0.000000e+00> : vector<16xf32>
    %784 = vector.multi_reduction <add>, %783, %cst_301 [1] : vector<16x32xf32> to vector<16xf32>
    %785 = vector.shape_cast %784 : vector<16xf32> to vector<16x1xf32>
    %cst_302 = arith.constant 3.200000e+01 : f32
    %786 = vector.broadcast %cst_302 : f32 to vector<16x1xf32>
    %787 = arith.divf %785, %786 : vector<16x1xf32>
    %788 = vector.broadcast %780 : vector<16x1xf32> to vector<16x32xf32>
    %789 = arith.subf %776, %788 : vector<16x32xf32>
    %cst_303 = arith.constant 9.99999974E-6 : f32
    %790 = vector.broadcast %cst_303 : f32 to vector<16x1xf32>
    %791 = arith.addf %787, %790 : vector<16x1xf32>
    %792 = math.rsqrt %791 : vector<16x1xf32>
    %793 = vector.broadcast %792 : vector<16x1xf32> to vector<16x32xf32>
    %794 = arith.mulf %789, %793 : vector<16x32xf32>
    %795 = arith.index_cast %c3_i32 : i32 to index
    %c0_304 = arith.constant 0 : index
    %c0_305 = arith.constant 0 : index
    %796 = vector.load %arg15[%795, %c0_304, %c0_305] : memref<6x1x32xf32, #tpu.memory_space<vmem>>, vector<1x1x32xf32>
    %797 = vector.shape_cast %796 : vector<1x1x32xf32> to vector<1x32xf32>
    %798 = vector.broadcast %797 : vector<1x32xf32> to vector<16x32xf32>
    %799 = arith.mulf %794, %798 : vector<16x32xf32>
    %800 = arith.index_cast %c3_i32 : i32 to index
    %c0_306 = arith.constant 0 : index
    %c0_307 = arith.constant 0 : index
    %801 = vector.load %arg16[%800, %c0_306, %c0_307] : memref<6x1x32xf32, #tpu.memory_space<vmem>>, vector<1x1x32xf32>
    %802 = vector.shape_cast %801 : vector<1x1x32xf32> to vector<1x32xf32>
    %803 = vector.broadcast %802 : vector<1x32xf32> to vector<16x32xf32>
    %804 = arith.addf %799, %803 : vector<16x32xf32>
    %c4_i32 = arith.constant 4 : i32
    %805 = arith.index_cast %c4_i32 : i32 to index
    %c0_308 = arith.constant 0 : index
    %c0_309 = arith.constant 0 : index
    %806 = vector.load %arg1[%805, %c0_308, %c0_309] : memref<6x32x32xf32, #tpu.memory_space<vmem>>, vector<1x32x32xf32>
    %807 = vector.shape_cast %806 : vector<1x32x32xf32> to vector<32x32xf32>
    %cst_310 = arith.constant dense<0.000000e+00> : vector<16x32xf32>
    %808 = tpu.matmul %804, %807, %cst_310 {dimension_numbers = #tpu.dot_dimension_numbers<[1], [0], [0], [1], [0, 0, 1, 1], [], []>} : vector<16x32xf32>, vector<32x32xf32>, vector<16x32xf32> -> vector<16x32xf32>
    %809 = arith.index_cast %c4_i32 : i32 to index
    %c0_311 = arith.constant 0 : index
    %c0_312 = arith.constant 0 : index
    %810 = vector.load %arg2[%809, %c0_311, %c0_312] : memref<6x1x32xf32, #tpu.memory_space<vmem>>, vector<1x1x32xf32>
    %811 = vector.shape_cast %810 : vector<1x1x32xf32> to vector<1x32xf32>
    %812 = vector.broadcast %811 : vector<1x32xf32> to vector<16x32xf32>
    %813 = arith.addf %808, %812 : vector<16x32xf32>
    %cst_313 = arith.constant 0.353553385 : f32
    %814 = vector.broadcast %cst_313 : f32 to vector<16x32xf32>
    %815 = arith.mulf %813, %814 : vector<16x32xf32>
    %816 = arith.index_cast %c4_i32 : i32 to index
    %c0_314 = arith.constant 0 : index
    %c0_315 = arith.constant 0 : index
    %817 = vector.load %arg3[%816, %c0_314, %c0_315] : memref<6x32x32xf32, #tpu.memory_space<vmem>>, vector<1x32x32xf32>
    %818 = vector.shape_cast %817 : vector<1x32x32xf32> to vector<32x32xf32>
    %cst_316 = arith.constant dense<0.000000e+00> : vector<16x32xf32>
    %819 = tpu.matmul %804, %818, %cst_316 {dimension_numbers = #tpu.dot_dimension_numbers<[1], [0], [0], [1], [0, 0, 1, 1], [], []>} : vector<16x32xf32>, vector<32x32xf32>, vector<16x32xf32> -> vector<16x32xf32>
    %820 = arith.index_cast %c4_i32 : i32 to index
    %c0_317 = arith.constant 0 : index
    %c0_318 = arith.constant 0 : index
    %821 = vector.load %arg4[%820, %c0_317, %c0_318] : memref<6x1x32xf32, #tpu.memory_space<vmem>>, vector<1x1x32xf32>
    %822 = vector.shape_cast %821 : vector<1x1x32xf32> to vector<1x32xf32>
    %823 = vector.broadcast %822 : vector<1x32xf32> to vector<16x32xf32>
    %824 = arith.addf %819, %823 : vector<16x32xf32>
    %825 = arith.index_cast %c4_i32 : i32 to index
    %c0_319 = arith.constant 0 : index
    %c0_320 = arith.constant 0 : index
    %826 = vector.load %arg5[%825, %c0_319, %c0_320] : memref<6x32x32xf32, #tpu.memory_space<vmem>>, vector<1x32x32xf32>
    %827 = vector.shape_cast %826 : vector<1x32x32xf32> to vector<32x32xf32>
    %cst_321 = arith.constant dense<0.000000e+00> : vector<16x32xf32>
    %828 = tpu.matmul %804, %827, %cst_321 {dimension_numbers = #tpu.dot_dimension_numbers<[1], [0], [0], [1], [0, 0, 1, 1], [], []>} : vector<16x32xf32>, vector<32x32xf32>, vector<16x32xf32> -> vector<16x32xf32>
    %829 = arith.index_cast %c4_i32 : i32 to index
    %c0_322 = arith.constant 0 : index
    %c0_323 = arith.constant 0 : index
    %830 = vector.load %arg6[%829, %c0_322, %c0_323] : memref<6x1x32xf32, #tpu.memory_space<vmem>>, vector<1x1x32xf32>
    %831 = vector.shape_cast %830 : vector<1x1x32xf32> to vector<1x32xf32>
    %832 = vector.broadcast %831 : vector<1x32xf32> to vector<16x32xf32>
    %833 = arith.addf %828, %832 : vector<16x32xf32>
    %834 = arith.index_cast %c4_i32 : i32 to index
    %c0_324 = arith.constant 0 : index
    %c0_325 = arith.constant 0 : index
    %835 = vector.load %arg7[%834, %c0_324, %c0_325] : memref<6x32x32xf32, #tpu.memory_space<vmem>>, vector<1x32x32xf32>
    %836 = vector.shape_cast %835 : vector<1x32x32xf32> to vector<32x32xf32>
    %837 = vector.extract_strided_slice %815 {offsets = [0, 0], sizes = [8, 8], strides = [1, 1]} : vector<16x32xf32> to vector<8x8xf32>
    %838 = vector.extract_strided_slice %824 {offsets = [0, 0], sizes = [8, 8], strides = [1, 1]} : vector<16x32xf32> to vector<8x8xf32>
    %cst_326 = arith.constant dense<0.000000e+00> : vector<8x8xf32>
    %839 = tpu.matmul %837, %838, %cst_326 {dimension_numbers = #tpu.dot_dimension_numbers<[1], [1], [0], [0], [0, 0, 1, 0], [], []>} : vector<8x8xf32>, vector<8x8xf32>, vector<8x8xf32> -> vector<8x8xf32>
    %840 = vector.extract_strided_slice %815 {offsets = [0, 8], sizes = [8, 8], strides = [1, 1]} : vector<16x32xf32> to vector<8x8xf32>
    %841 = vector.extract_strided_slice %824 {offsets = [0, 8], sizes = [8, 8], strides = [1, 1]} : vector<16x32xf32> to vector<8x8xf32>
    %cst_327 = arith.constant dense<0.000000e+00> : vector<8x8xf32>
    %842 = tpu.matmul %840, %841, %cst_327 {dimension_numbers = #tpu.dot_dimension_numbers<[1], [1], [0], [0], [0, 0, 1, 0], [], []>} : vector<8x8xf32>, vector<8x8xf32>, vector<8x8xf32> -> vector<8x8xf32>
    %843 = vector.extract_strided_slice %815 {offsets = [0, 16], sizes = [8, 8], strides = [1, 1]} : vector<16x32xf32> to vector<8x8xf32>
    %844 = vector.extract_strided_slice %824 {offsets = [0, 16], sizes = [8, 8], strides = [1, 1]} : vector<16x32xf32> to vector<8x8xf32>
    %cst_328 = arith.constant dense<0.000000e+00> : vector<8x8xf32>
    %845 = tpu.matmul %843, %844, %cst_328 {dimension_numbers = #tpu.dot_dimension_numbers<[1], [1], [0], [0], [0, 0, 1, 0], [], []>} : vector<8x8xf32>, vector<8x8xf32>, vector<8x8xf32> -> vector<8x8xf32>
    %846 = vector.extract_strided_slice %815 {offsets = [0, 24], sizes = [8, 8], strides = [1, 1]} : vector<16x32xf32> to vector<8x8xf32>
    %847 = vector.extract_strided_slice %824 {offsets = [0, 24], sizes = [8, 8], strides = [1, 1]} : vector<16x32xf32> to vector<8x8xf32>
    %cst_329 = arith.constant dense<0.000000e+00> : vector<8x8xf32>
    %848 = tpu.matmul %846, %847, %cst_329 {dimension_numbers = #tpu.dot_dimension_numbers<[1], [1], [0], [0], [0, 0, 1, 0], [], []>} : vector<8x8xf32>, vector<8x8xf32>, vector<8x8xf32> -> vector<8x8xf32>
    %849 = vector.extract_strided_slice %815 {offsets = [8, 0], sizes = [8, 8], strides = [1, 1]} : vector<16x32xf32> to vector<8x8xf32>
    %850 = vector.extract_strided_slice %824 {offsets = [8, 0], sizes = [8, 8], strides = [1, 1]} : vector<16x32xf32> to vector<8x8xf32>
    %cst_330 = arith.constant dense<0.000000e+00> : vector<8x8xf32>
    %851 = tpu.matmul %849, %850, %cst_330 {dimension_numbers = #tpu.dot_dimension_numbers<[1], [1], [0], [0], [0, 0, 1, 0], [], []>} : vector<8x8xf32>, vector<8x8xf32>, vector<8x8xf32> -> vector<8x8xf32>
    %852 = vector.extract_strided_slice %815 {offsets = [8, 8], sizes = [8, 8], strides = [1, 1]} : vector<16x32xf32> to vector<8x8xf32>
    %853 = vector.extract_strided_slice %824 {offsets = [8, 8], sizes = [8, 8], strides = [1, 1]} : vector<16x32xf32> to vector<8x8xf32>
    %cst_331 = arith.constant dense<0.000000e+00> : vector<8x8xf32>
    %854 = tpu.matmul %852, %853, %cst_331 {dimension_numbers = #tpu.dot_dimension_numbers<[1], [1], [0], [0], [0, 0, 1, 0], [], []>} : vector<8x8xf32>, vector<8x8xf32>, vector<8x8xf32> -> vector<8x8xf32>
    %855 = vector.extract_strided_slice %815 {offsets = [8, 16], sizes = [8, 8], strides = [1, 1]} : vector<16x32xf32> to vector<8x8xf32>
    %856 = vector.extract_strided_slice %824 {offsets = [8, 16], sizes = [8, 8], strides = [1, 1]} : vector<16x32xf32> to vector<8x8xf32>
    %cst_332 = arith.constant dense<0.000000e+00> : vector<8x8xf32>
    %857 = tpu.matmul %855, %856, %cst_332 {dimension_numbers = #tpu.dot_dimension_numbers<[1], [1], [0], [0], [0, 0, 1, 0], [], []>} : vector<8x8xf32>, vector<8x8xf32>, vector<8x8xf32> -> vector<8x8xf32>
    %858 = vector.extract_strided_slice %815 {offsets = [8, 24], sizes = [8, 8], strides = [1, 1]} : vector<16x32xf32> to vector<8x8xf32>
    %859 = vector.extract_strided_slice %824 {offsets = [8, 24], sizes = [8, 8], strides = [1, 1]} : vector<16x32xf32> to vector<8x8xf32>
    %cst_333 = arith.constant dense<0.000000e+00> : vector<8x8xf32>
    %860 = tpu.matmul %858, %859, %cst_333 {dimension_numbers = #tpu.dot_dimension_numbers<[1], [1], [0], [0], [0, 0, 1, 0], [], []>} : vector<8x8xf32>, vector<8x8xf32>, vector<8x8xf32> -> vector<8x8xf32>
    %861 = tpu.concatenate %839, %842, %845, %848, %851, %854, %857, %860 in 0 : vector<8x8xf32>, vector<8x8xf32>, vector<8x8xf32>, vector<8x8xf32>, vector<8x8xf32>, vector<8x8xf32>, vector<8x8xf32>, vector<8x8xf32> -> vector<64x8xf32>
    %cst_334 = arith.constant dense<0xFF800000> : vector<64xf32>
    %862 = vector.multi_reduction <maximumf>, %861, %cst_334 [1] : vector<64x8xf32> to vector<64xf32>
    %863 = vector.shape_cast %862 : vector<64xf32> to vector<64x1xf32>
    %864 = vector.broadcast %863 : vector<64x1xf32> to vector<64x8xf32>
    %865 = arith.subf %861, %864 : vector<64x8xf32>
    %866 = math.exp %865 : vector<64x8xf32>
    %cst_335 = arith.constant dense<0.000000e+00> : vector<64xf32>
    %867 = vector.multi_reduction <add>, %866, %cst_335 [1] : vector<64x8xf32> to vector<64xf32>
    %868 = vector.shape_cast %867 : vector<64xf32> to vector<64x1xf32>
    %869 = tpu.reciprocal %868 : vector<64x1xf32> -> vector<64x1xf32>
    %870 = vector.broadcast %869 : vector<64x1xf32> to vector<64x8xf32>
    %871 = arith.mulf %866, %870 : vector<64x8xf32>
    %cst_336 = arith.constant 0.000000e+00 : f32
    %872 = vector.broadcast %cst_336 : f32 to vector<8x32xf32>
    %873 = vector.extract_strided_slice %871 {offsets = [0, 0], sizes = [8, 8], strides = [1, 1]} : vector<64x8xf32> to vector<8x8xf32>
    %874 = vector.extract_strided_slice %833 {offsets = [0, 0], sizes = [8, 8], strides = [1, 1]} : vector<16x32xf32> to vector<8x8xf32>
    %cst_337 = arith.constant dense<0.000000e+00> : vector<8x8xf32>
    %875 = tpu.matmul %873, %874, %cst_337 {dimension_numbers = #tpu.dot_dimension_numbers<[1], [0], [0], [1], [0, 0, 1, 1], [], []>} : vector<8x8xf32>, vector<8x8xf32>, vector<8x8xf32> -> vector<8x8xf32>
    %876 = vector.extract_strided_slice %836 {offsets = [0, 0], sizes = [8, 32], strides = [1, 1]} : vector<32x32xf32> to vector<8x32xf32>
    %cst_338 = arith.constant dense<0.000000e+00> : vector<8x32xf32>
    %877 = tpu.matmul %875, %876, %cst_338 {dimension_numbers = #tpu.dot_dimension_numbers<[1], [0], [0], [1], [0, 0, 1, 1], [], []>} : vector<8x8xf32>, vector<8x32xf32>, vector<8x32xf32> -> vector<8x32xf32>
    %878 = arith.addf %872, %877 : vector<8x32xf32>
    %879 = vector.extract_strided_slice %871 {offsets = [8, 0], sizes = [8, 8], strides = [1, 1]} : vector<64x8xf32> to vector<8x8xf32>
    %880 = vector.extract_strided_slice %833 {offsets = [0, 8], sizes = [8, 8], strides = [1, 1]} : vector<16x32xf32> to vector<8x8xf32>
    %cst_339 = arith.constant dense<0.000000e+00> : vector<8x8xf32>
    %881 = tpu.matmul %879, %880, %cst_339 {dimension_numbers = #tpu.dot_dimension_numbers<[1], [0], [0], [1], [0, 0, 1, 1], [], []>} : vector<8x8xf32>, vector<8x8xf32>, vector<8x8xf32> -> vector<8x8xf32>
    %882 = vector.extract_strided_slice %836 {offsets = [8, 0], sizes = [8, 32], strides = [1, 1]} : vector<32x32xf32> to vector<8x32xf32>
    %cst_340 = arith.constant dense<0.000000e+00> : vector<8x32xf32>
    %883 = tpu.matmul %881, %882, %cst_340 {dimension_numbers = #tpu.dot_dimension_numbers<[1], [0], [0], [1], [0, 0, 1, 1], [], []>} : vector<8x8xf32>, vector<8x32xf32>, vector<8x32xf32> -> vector<8x32xf32>
    %884 = arith.addf %878, %883 : vector<8x32xf32>
    %885 = vector.extract_strided_slice %871 {offsets = [16, 0], sizes = [8, 8], strides = [1, 1]} : vector<64x8xf32> to vector<8x8xf32>
    %886 = vector.extract_strided_slice %833 {offsets = [0, 16], sizes = [8, 8], strides = [1, 1]} : vector<16x32xf32> to vector<8x8xf32>
    %cst_341 = arith.constant dense<0.000000e+00> : vector<8x8xf32>
    %887 = tpu.matmul %885, %886, %cst_341 {dimension_numbers = #tpu.dot_dimension_numbers<[1], [0], [0], [1], [0, 0, 1, 1], [], []>} : vector<8x8xf32>, vector<8x8xf32>, vector<8x8xf32> -> vector<8x8xf32>
    %888 = vector.extract_strided_slice %836 {offsets = [16, 0], sizes = [8, 32], strides = [1, 1]} : vector<32x32xf32> to vector<8x32xf32>
    %cst_342 = arith.constant dense<0.000000e+00> : vector<8x32xf32>
    %889 = tpu.matmul %887, %888, %cst_342 {dimension_numbers = #tpu.dot_dimension_numbers<[1], [0], [0], [1], [0, 0, 1, 1], [], []>} : vector<8x8xf32>, vector<8x32xf32>, vector<8x32xf32> -> vector<8x32xf32>
    %890 = arith.addf %884, %889 : vector<8x32xf32>
    %891 = vector.extract_strided_slice %871 {offsets = [24, 0], sizes = [8, 8], strides = [1, 1]} : vector<64x8xf32> to vector<8x8xf32>
    %892 = vector.extract_strided_slice %833 {offsets = [0, 24], sizes = [8, 8], strides = [1, 1]} : vector<16x32xf32> to vector<8x8xf32>
    %cst_343 = arith.constant dense<0.000000e+00> : vector<8x8xf32>
    %893 = tpu.matmul %891, %892, %cst_343 {dimension_numbers = #tpu.dot_dimension_numbers<[1], [0], [0], [1], [0, 0, 1, 1], [], []>} : vector<8x8xf32>, vector<8x8xf32>, vector<8x8xf32> -> vector<8x8xf32>
    %894 = vector.extract_strided_slice %836 {offsets = [24, 0], sizes = [8, 32], strides = [1, 1]} : vector<32x32xf32> to vector<8x32xf32>
    %cst_344 = arith.constant dense<0.000000e+00> : vector<8x32xf32>
    %895 = tpu.matmul %893, %894, %cst_344 {dimension_numbers = #tpu.dot_dimension_numbers<[1], [0], [0], [1], [0, 0, 1, 1], [], []>} : vector<8x8xf32>, vector<8x32xf32>, vector<8x32xf32> -> vector<8x32xf32>
    %896 = arith.addf %890, %895 : vector<8x32xf32>
    %cst_345 = arith.constant 0.000000e+00 : f32
    %897 = vector.broadcast %cst_345 : f32 to vector<8x32xf32>
    %898 = vector.extract_strided_slice %871 {offsets = [32, 0], sizes = [8, 8], strides = [1, 1]} : vector<64x8xf32> to vector<8x8xf32>
    %899 = vector.extract_strided_slice %833 {offsets = [8, 0], sizes = [8, 8], strides = [1, 1]} : vector<16x32xf32> to vector<8x8xf32>
    %cst_346 = arith.constant dense<0.000000e+00> : vector<8x8xf32>
    %900 = tpu.matmul %898, %899, %cst_346 {dimension_numbers = #tpu.dot_dimension_numbers<[1], [0], [0], [1], [0, 0, 1, 1], [], []>} : vector<8x8xf32>, vector<8x8xf32>, vector<8x8xf32> -> vector<8x8xf32>
    %901 = vector.extract_strided_slice %836 {offsets = [0, 0], sizes = [8, 32], strides = [1, 1]} : vector<32x32xf32> to vector<8x32xf32>
    %cst_347 = arith.constant dense<0.000000e+00> : vector<8x32xf32>
    %902 = tpu.matmul %900, %901, %cst_347 {dimension_numbers = #tpu.dot_dimension_numbers<[1], [0], [0], [1], [0, 0, 1, 1], [], []>} : vector<8x8xf32>, vector<8x32xf32>, vector<8x32xf32> -> vector<8x32xf32>
    %903 = arith.addf %897, %902 : vector<8x32xf32>
    %904 = vector.extract_strided_slice %871 {offsets = [40, 0], sizes = [8, 8], strides = [1, 1]} : vector<64x8xf32> to vector<8x8xf32>
    %905 = vector.extract_strided_slice %833 {offsets = [8, 8], sizes = [8, 8], strides = [1, 1]} : vector<16x32xf32> to vector<8x8xf32>
    %cst_348 = arith.constant dense<0.000000e+00> : vector<8x8xf32>
    %906 = tpu.matmul %904, %905, %cst_348 {dimension_numbers = #tpu.dot_dimension_numbers<[1], [0], [0], [1], [0, 0, 1, 1], [], []>} : vector<8x8xf32>, vector<8x8xf32>, vector<8x8xf32> -> vector<8x8xf32>
    %907 = vector.extract_strided_slice %836 {offsets = [8, 0], sizes = [8, 32], strides = [1, 1]} : vector<32x32xf32> to vector<8x32xf32>
    %cst_349 = arith.constant dense<0.000000e+00> : vector<8x32xf32>
    %908 = tpu.matmul %906, %907, %cst_349 {dimension_numbers = #tpu.dot_dimension_numbers<[1], [0], [0], [1], [0, 0, 1, 1], [], []>} : vector<8x8xf32>, vector<8x32xf32>, vector<8x32xf32> -> vector<8x32xf32>
    %909 = arith.addf %903, %908 : vector<8x32xf32>
    %910 = vector.extract_strided_slice %871 {offsets = [48, 0], sizes = [8, 8], strides = [1, 1]} : vector<64x8xf32> to vector<8x8xf32>
    %911 = vector.extract_strided_slice %833 {offsets = [8, 16], sizes = [8, 8], strides = [1, 1]} : vector<16x32xf32> to vector<8x8xf32>
    %cst_350 = arith.constant dense<0.000000e+00> : vector<8x8xf32>
    %912 = tpu.matmul %910, %911, %cst_350 {dimension_numbers = #tpu.dot_dimension_numbers<[1], [0], [0], [1], [0, 0, 1, 1], [], []>} : vector<8x8xf32>, vector<8x8xf32>, vector<8x8xf32> -> vector<8x8xf32>
    %913 = vector.extract_strided_slice %836 {offsets = [16, 0], sizes = [8, 32], strides = [1, 1]} : vector<32x32xf32> to vector<8x32xf32>
    %cst_351 = arith.constant dense<0.000000e+00> : vector<8x32xf32>
    %914 = tpu.matmul %912, %913, %cst_351 {dimension_numbers = #tpu.dot_dimension_numbers<[1], [0], [0], [1], [0, 0, 1, 1], [], []>} : vector<8x8xf32>, vector<8x32xf32>, vector<8x32xf32> -> vector<8x32xf32>
    %915 = arith.addf %909, %914 : vector<8x32xf32>
    %916 = vector.extract_strided_slice %871 {offsets = [56, 0], sizes = [8, 8], strides = [1, 1]} : vector<64x8xf32> to vector<8x8xf32>
    %917 = vector.extract_strided_slice %833 {offsets = [8, 24], sizes = [8, 8], strides = [1, 1]} : vector<16x32xf32> to vector<8x8xf32>
    %cst_352 = arith.constant dense<0.000000e+00> : vector<8x8xf32>
    %918 = tpu.matmul %916, %917, %cst_352 {dimension_numbers = #tpu.dot_dimension_numbers<[1], [0], [0], [1], [0, 0, 1, 1], [], []>} : vector<8x8xf32>, vector<8x8xf32>, vector<8x8xf32> -> vector<8x8xf32>
    %919 = vector.extract_strided_slice %836 {offsets = [24, 0], sizes = [8, 32], strides = [1, 1]} : vector<32x32xf32> to vector<8x32xf32>
    %cst_353 = arith.constant dense<0.000000e+00> : vector<8x32xf32>
    %920 = tpu.matmul %918, %919, %cst_353 {dimension_numbers = #tpu.dot_dimension_numbers<[1], [0], [0], [1], [0, 0, 1, 1], [], []>} : vector<8x8xf32>, vector<8x32xf32>, vector<8x32xf32> -> vector<8x32xf32>
    %921 = arith.addf %915, %920 : vector<8x32xf32>
    %922 = tpu.concatenate %896, %921 in 0 : vector<8x32xf32>, vector<8x32xf32> -> vector<16x32xf32>
    %923 = arith.index_cast %c4_i32 : i32 to index
    %c0_354 = arith.constant 0 : index
    %c0_355 = arith.constant 0 : index
    %924 = vector.load %arg8[%923, %c0_354, %c0_355] : memref<6x1x32xf32, #tpu.memory_space<vmem>>, vector<1x1x32xf32>
    %925 = vector.shape_cast %924 : vector<1x1x32xf32> to vector<1x32xf32>
    %926 = vector.broadcast %925 : vector<1x32xf32> to vector<16x32xf32>
    %927 = arith.addf %922, %926 : vector<16x32xf32>
    %928 = arith.addf %804, %927 : vector<16x32xf32>
    %cst_356 = arith.constant dense<0.000000e+00> : vector<16xf32>
    %929 = vector.multi_reduction <add>, %928, %cst_356 [1] : vector<16x32xf32> to vector<16xf32>
    %930 = vector.shape_cast %929 : vector<16xf32> to vector<16x1xf32>
    %cst_357 = arith.constant 3.200000e+01 : f32
    %931 = vector.broadcast %cst_357 : f32 to vector<16x1xf32>
    %932 = arith.divf %930, %931 : vector<16x1xf32>
    %933 = vector.broadcast %932 : vector<16x1xf32> to vector<16x32xf32>
    %934 = arith.subf %928, %933 : vector<16x32xf32>
    %935 = arith.mulf %934, %934 : vector<16x32xf32>
    %cst_358 = arith.constant dense<0.000000e+00> : vector<16xf32>
    %936 = vector.multi_reduction <add>, %935, %cst_358 [1] : vector<16x32xf32> to vector<16xf32>
    %937 = vector.shape_cast %936 : vector<16xf32> to vector<16x1xf32>
    %cst_359 = arith.constant 3.200000e+01 : f32
    %938 = vector.broadcast %cst_359 : f32 to vector<16x1xf32>
    %939 = arith.divf %937, %938 : vector<16x1xf32>
    %940 = vector.broadcast %932 : vector<16x1xf32> to vector<16x32xf32>
    %941 = arith.subf %928, %940 : vector<16x32xf32>
    %cst_360 = arith.constant 9.99999974E-6 : f32
    %942 = vector.broadcast %cst_360 : f32 to vector<16x1xf32>
    %943 = arith.addf %939, %942 : vector<16x1xf32>
    %944 = math.rsqrt %943 : vector<16x1xf32>
    %945 = vector.broadcast %944 : vector<16x1xf32> to vector<16x32xf32>
    %946 = arith.mulf %941, %945 : vector<16x32xf32>
    %947 = arith.index_cast %c4_i32 : i32 to index
    %c0_361 = arith.constant 0 : index
    %c0_362 = arith.constant 0 : index
    %948 = vector.load %arg13[%947, %c0_361, %c0_362] : memref<6x1x32xf32, #tpu.memory_space<vmem>>, vector<1x1x32xf32>
    %949 = vector.shape_cast %948 : vector<1x1x32xf32> to vector<1x32xf32>
    %950 = vector.broadcast %949 : vector<1x32xf32> to vector<16x32xf32>
    %951 = arith.mulf %946, %950 : vector<16x32xf32>
    %952 = arith.index_cast %c4_i32 : i32 to index
    %c0_363 = arith.constant 0 : index
    %c0_364 = arith.constant 0 : index
    %953 = vector.load %arg14[%952, %c0_363, %c0_364] : memref<6x1x32xf32, #tpu.memory_space<vmem>>, vector<1x1x32xf32>
    %954 = vector.shape_cast %953 : vector<1x1x32xf32> to vector<1x32xf32>
    %955 = vector.broadcast %954 : vector<1x32xf32> to vector<16x32xf32>
    %956 = arith.addf %951, %955 : vector<16x32xf32>
    %957 = arith.index_cast %c4_i32 : i32 to index
    %c0_365 = arith.constant 0 : index
    %c0_366 = arith.constant 0 : index
    %958 = vector.load %arg9[%957, %c0_365, %c0_366] : memref<6x32x128xf32, #tpu.memory_space<vmem>>, vector<1x32x128xf32>
    %959 = vector.shape_cast %958 : vector<1x32x128xf32> to vector<32x128xf32>
    %cst_367 = arith.constant dense<0.000000e+00> : vector<16x128xf32>
    %960 = tpu.matmul %956, %959, %cst_367 {dimension_numbers = #tpu.dot_dimension_numbers<[1], [0], [0], [1], [0, 0, 1, 1], [], []>} : vector<16x32xf32>, vector<32x128xf32>, vector<16x128xf32> -> vector<16x128xf32>
    %961 = arith.index_cast %c4_i32 : i32 to index
    %c0_368 = arith.constant 0 : index
    %c0_369 = arith.constant 0 : index
    %962 = vector.load %arg10[%961, %c0_368, %c0_369] : memref<6x1x128xf32, #tpu.memory_space<vmem>>, vector<1x1x128xf32>
    %963 = vector.shape_cast %962 : vector<1x1x128xf32> to vector<1x128xf32>
    %964 = vector.broadcast %963 : vector<1x128xf32> to vector<16x128xf32>
    %965 = arith.addf %960, %964 : vector<16x128xf32>
    %cst_370 = arith.constant 0.000000e+00 : f32
    %966 = vector.broadcast %cst_370 : f32 to vector<16x128xf32>
    %967 = arith.maximumf %965, %966 : vector<16x128xf32>
    %968 = arith.index_cast %c4_i32 : i32 to index
    %c0_371 = arith.constant 0 : index
    %c0_372 = arith.constant 0 : index
    %969 = vector.load %arg11[%968, %c0_371, %c0_372] : memref<6x128x32xf32, #tpu.memory_space<vmem>>, vector<1x128x32xf32>
    %970 = vector.shape_cast %969 : vector<1x128x32xf32> to vector<128x32xf32>
    %cst_373 = arith.constant dense<0.000000e+00> : vector<16x32xf32>
    %971 = tpu.matmul %967, %970, %cst_373 {dimension_numbers = #tpu.dot_dimension_numbers<[1], [0], [0], [1], [0, 0, 1, 1], [], []>} : vector<16x128xf32>, vector<128x32xf32>, vector<16x32xf32> -> vector<16x32xf32>
    %972 = arith.index_cast %c4_i32 : i32 to index
    %c0_374 = arith.constant 0 : index
    %c0_375 = arith.constant 0 : index
    %973 = vector.load %arg12[%972, %c0_374, %c0_375] : memref<6x1x32xf32, #tpu.memory_space<vmem>>, vector<1x1x32xf32>
    %974 = vector.shape_cast %973 : vector<1x1x32xf32> to vector<1x32xf32>
    %975 = vector.broadcast %974 : vector<1x32xf32> to vector<16x32xf32>
    %976 = arith.addf %971, %975 : vector<16x32xf32>
    %977 = arith.addf %956, %976 : vector<16x32xf32>
    %cst_376 = arith.constant dense<0.000000e+00> : vector<16xf32>
    %978 = vector.multi_reduction <add>, %977, %cst_376 [1] : vector<16x32xf32> to vector<16xf32>
    %979 = vector.shape_cast %978 : vector<16xf32> to vector<16x1xf32>
    %cst_377 = arith.constant 3.200000e+01 : f32
    %980 = vector.broadcast %cst_377 : f32 to vector<16x1xf32>
    %981 = arith.divf %979, %980 : vector<16x1xf32>
    %982 = vector.broadcast %981 : vector<16x1xf32> to vector<16x32xf32>
    %983 = arith.subf %977, %982 : vector<16x32xf32>
    %984 = arith.mulf %983, %983 : vector<16x32xf32>
    %cst_378 = arith.constant dense<0.000000e+00> : vector<16xf32>
    %985 = vector.multi_reduction <add>, %984, %cst_378 [1] : vector<16x32xf32> to vector<16xf32>
    %986 = vector.shape_cast %985 : vector<16xf32> to vector<16x1xf32>
    %cst_379 = arith.constant 3.200000e+01 : f32
    %987 = vector.broadcast %cst_379 : f32 to vector<16x1xf32>
    %988 = arith.divf %986, %987 : vector<16x1xf32>
    %989 = vector.broadcast %981 : vector<16x1xf32> to vector<16x32xf32>
    %990 = arith.subf %977, %989 : vector<16x32xf32>
    %cst_380 = arith.constant 9.99999974E-6 : f32
    %991 = vector.broadcast %cst_380 : f32 to vector<16x1xf32>
    %992 = arith.addf %988, %991 : vector<16x1xf32>
    %993 = math.rsqrt %992 : vector<16x1xf32>
    %994 = vector.broadcast %993 : vector<16x1xf32> to vector<16x32xf32>
    %995 = arith.mulf %990, %994 : vector<16x32xf32>
    %996 = arith.index_cast %c4_i32 : i32 to index
    %c0_381 = arith.constant 0 : index
    %c0_382 = arith.constant 0 : index
    %997 = vector.load %arg15[%996, %c0_381, %c0_382] : memref<6x1x32xf32, #tpu.memory_space<vmem>>, vector<1x1x32xf32>
    %998 = vector.shape_cast %997 : vector<1x1x32xf32> to vector<1x32xf32>
    %999 = vector.broadcast %998 : vector<1x32xf32> to vector<16x32xf32>
    %1000 = arith.mulf %995, %999 : vector<16x32xf32>
    %1001 = arith.index_cast %c4_i32 : i32 to index
    %c0_383 = arith.constant 0 : index
    %c0_384 = arith.constant 0 : index
    %1002 = vector.load %arg16[%1001, %c0_383, %c0_384] : memref<6x1x32xf32, #tpu.memory_space<vmem>>, vector<1x1x32xf32>
    %1003 = vector.shape_cast %1002 : vector<1x1x32xf32> to vector<1x32xf32>
    %1004 = vector.broadcast %1003 : vector<1x32xf32> to vector<16x32xf32>
    %1005 = arith.addf %1000, %1004 : vector<16x32xf32>
    %c5_i32 = arith.constant 5 : i32
    %1006 = arith.index_cast %c5_i32 : i32 to index
    %c0_385 = arith.constant 0 : index
    %c0_386 = arith.constant 0 : index
    %1007 = vector.load %arg1[%1006, %c0_385, %c0_386] : memref<6x32x32xf32, #tpu.memory_space<vmem>>, vector<1x32x32xf32>
    %1008 = vector.shape_cast %1007 : vector<1x32x32xf32> to vector<32x32xf32>
    %cst_387 = arith.constant dense<0.000000e+00> : vector<16x32xf32>
    %1009 = tpu.matmul %1005, %1008, %cst_387 {dimension_numbers = #tpu.dot_dimension_numbers<[1], [0], [0], [1], [0, 0, 1, 1], [], []>} : vector<16x32xf32>, vector<32x32xf32>, vector<16x32xf32> -> vector<16x32xf32>
    %1010 = arith.index_cast %c5_i32 : i32 to index
    %c0_388 = arith.constant 0 : index
    %c0_389 = arith.constant 0 : index
    %1011 = vector.load %arg2[%1010, %c0_388, %c0_389] : memref<6x1x32xf32, #tpu.memory_space<vmem>>, vector<1x1x32xf32>
    %1012 = vector.shape_cast %1011 : vector<1x1x32xf32> to vector<1x32xf32>
    %1013 = vector.broadcast %1012 : vector<1x32xf32> to vector<16x32xf32>
    %1014 = arith.addf %1009, %1013 : vector<16x32xf32>
    %cst_390 = arith.constant 0.353553385 : f32
    %1015 = vector.broadcast %cst_390 : f32 to vector<16x32xf32>
    %1016 = arith.mulf %1014, %1015 : vector<16x32xf32>
    %1017 = arith.index_cast %c5_i32 : i32 to index
    %c0_391 = arith.constant 0 : index
    %c0_392 = arith.constant 0 : index
    %1018 = vector.load %arg3[%1017, %c0_391, %c0_392] : memref<6x32x32xf32, #tpu.memory_space<vmem>>, vector<1x32x32xf32>
    %1019 = vector.shape_cast %1018 : vector<1x32x32xf32> to vector<32x32xf32>
    %cst_393 = arith.constant dense<0.000000e+00> : vector<16x32xf32>
    %1020 = tpu.matmul %1005, %1019, %cst_393 {dimension_numbers = #tpu.dot_dimension_numbers<[1], [0], [0], [1], [0, 0, 1, 1], [], []>} : vector<16x32xf32>, vector<32x32xf32>, vector<16x32xf32> -> vector<16x32xf32>
    %1021 = arith.index_cast %c5_i32 : i32 to index
    %c0_394 = arith.constant 0 : index
    %c0_395 = arith.constant 0 : index
    %1022 = vector.load %arg4[%1021, %c0_394, %c0_395] : memref<6x1x32xf32, #tpu.memory_space<vmem>>, vector<1x1x32xf32>
    %1023 = vector.shape_cast %1022 : vector<1x1x32xf32> to vector<1x32xf32>
    %1024 = vector.broadcast %1023 : vector<1x32xf32> to vector<16x32xf32>
    %1025 = arith.addf %1020, %1024 : vector<16x32xf32>
    %1026 = arith.index_cast %c5_i32 : i32 to index
    %c0_396 = arith.constant 0 : index
    %c0_397 = arith.constant 0 : index
    %1027 = vector.load %arg5[%1026, %c0_396, %c0_397] : memref<6x32x32xf32, #tpu.memory_space<vmem>>, vector<1x32x32xf32>
    %1028 = vector.shape_cast %1027 : vector<1x32x32xf32> to vector<32x32xf32>
    %cst_398 = arith.constant dense<0.000000e+00> : vector<16x32xf32>
    %1029 = tpu.matmul %1005, %1028, %cst_398 {dimension_numbers = #tpu.dot_dimension_numbers<[1], [0], [0], [1], [0, 0, 1, 1], [], []>} : vector<16x32xf32>, vector<32x32xf32>, vector<16x32xf32> -> vector<16x32xf32>
    %1030 = arith.index_cast %c5_i32 : i32 to index
    %c0_399 = arith.constant 0 : index
    %c0_400 = arith.constant 0 : index
    %1031 = vector.load %arg6[%1030, %c0_399, %c0_400] : memref<6x1x32xf32, #tpu.memory_space<vmem>>, vector<1x1x32xf32>
    %1032 = vector.shape_cast %1031 : vector<1x1x32xf32> to vector<1x32xf32>
    %1033 = vector.broadcast %1032 : vector<1x32xf32> to vector<16x32xf32>
    %1034 = arith.addf %1029, %1033 : vector<16x32xf32>
    %1035 = arith.index_cast %c5_i32 : i32 to index
    %c0_401 = arith.constant 0 : index
    %c0_402 = arith.constant 0 : index
    %1036 = vector.load %arg7[%1035, %c0_401, %c0_402] : memref<6x32x32xf32, #tpu.memory_space<vmem>>, vector<1x32x32xf32>
    %1037 = vector.shape_cast %1036 : vector<1x32x32xf32> to vector<32x32xf32>
    %1038 = vector.extract_strided_slice %1016 {offsets = [0, 0], sizes = [8, 8], strides = [1, 1]} : vector<16x32xf32> to vector<8x8xf32>
    %1039 = vector.extract_strided_slice %1025 {offsets = [0, 0], sizes = [8, 8], strides = [1, 1]} : vector<16x32xf32> to vector<8x8xf32>
    %cst_403 = arith.constant dense<0.000000e+00> : vector<8x8xf32>
    %1040 = tpu.matmul %1038, %1039, %cst_403 {dimension_numbers = #tpu.dot_dimension_numbers<[1], [1], [0], [0], [0, 0, 1, 0], [], []>} : vector<8x8xf32>, vector<8x8xf32>, vector<8x8xf32> -> vector<8x8xf32>
    %1041 = vector.extract_strided_slice %1016 {offsets = [0, 8], sizes = [8, 8], strides = [1, 1]} : vector<16x32xf32> to vector<8x8xf32>
    %1042 = vector.extract_strided_slice %1025 {offsets = [0, 8], sizes = [8, 8], strides = [1, 1]} : vector<16x32xf32> to vector<8x8xf32>
    %cst_404 = arith.constant dense<0.000000e+00> : vector<8x8xf32>
    %1043 = tpu.matmul %1041, %1042, %cst_404 {dimension_numbers = #tpu.dot_dimension_numbers<[1], [1], [0], [0], [0, 0, 1, 0], [], []>} : vector<8x8xf32>, vector<8x8xf32>, vector<8x8xf32> -> vector<8x8xf32>
    %1044 = vector.extract_strided_slice %1016 {offsets = [0, 16], sizes = [8, 8], strides = [1, 1]} : vector<16x32xf32> to vector<8x8xf32>
    %1045 = vector.extract_strided_slice %1025 {offsets = [0, 16], sizes = [8, 8], strides = [1, 1]} : vector<16x32xf32> to vector<8x8xf32>
    %cst_405 = arith.constant dense<0.000000e+00> : vector<8x8xf32>
    %1046 = tpu.matmul %1044, %1045, %cst_405 {dimension_numbers = #tpu.dot_dimension_numbers<[1], [1], [0], [0], [0, 0, 1, 0], [], []>} : vector<8x8xf32>, vector<8x8xf32>, vector<8x8xf32> -> vector<8x8xf32>
    %1047 = vector.extract_strided_slice %1016 {offsets = [0, 24], sizes = [8, 8], strides = [1, 1]} : vector<16x32xf32> to vector<8x8xf32>
    %1048 = vector.extract_strided_slice %1025 {offsets = [0, 24], sizes = [8, 8], strides = [1, 1]} : vector<16x32xf32> to vector<8x8xf32>
    %cst_406 = arith.constant dense<0.000000e+00> : vector<8x8xf32>
    %1049 = tpu.matmul %1047, %1048, %cst_406 {dimension_numbers = #tpu.dot_dimension_numbers<[1], [1], [0], [0], [0, 0, 1, 0], [], []>} : vector<8x8xf32>, vector<8x8xf32>, vector<8x8xf32> -> vector<8x8xf32>
    %1050 = vector.extract_strided_slice %1016 {offsets = [8, 0], sizes = [8, 8], strides = [1, 1]} : vector<16x32xf32> to vector<8x8xf32>
    %1051 = vector.extract_strided_slice %1025 {offsets = [8, 0], sizes = [8, 8], strides = [1, 1]} : vector<16x32xf32> to vector<8x8xf32>
    %cst_407 = arith.constant dense<0.000000e+00> : vector<8x8xf32>
    %1052 = tpu.matmul %1050, %1051, %cst_407 {dimension_numbers = #tpu.dot_dimension_numbers<[1], [1], [0], [0], [0, 0, 1, 0], [], []>} : vector<8x8xf32>, vector<8x8xf32>, vector<8x8xf32> -> vector<8x8xf32>
    %1053 = vector.extract_strided_slice %1016 {offsets = [8, 8], sizes = [8, 8], strides = [1, 1]} : vector<16x32xf32> to vector<8x8xf32>
    %1054 = vector.extract_strided_slice %1025 {offsets = [8, 8], sizes = [8, 8], strides = [1, 1]} : vector<16x32xf32> to vector<8x8xf32>
    %cst_408 = arith.constant dense<0.000000e+00> : vector<8x8xf32>
    %1055 = tpu.matmul %1053, %1054, %cst_408 {dimension_numbers = #tpu.dot_dimension_numbers<[1], [1], [0], [0], [0, 0, 1, 0], [], []>} : vector<8x8xf32>, vector<8x8xf32>, vector<8x8xf32> -> vector<8x8xf32>
    %1056 = vector.extract_strided_slice %1016 {offsets = [8, 16], sizes = [8, 8], strides = [1, 1]} : vector<16x32xf32> to vector<8x8xf32>
    %1057 = vector.extract_strided_slice %1025 {offsets = [8, 16], sizes = [8, 8], strides = [1, 1]} : vector<16x32xf32> to vector<8x8xf32>
    %cst_409 = arith.constant dense<0.000000e+00> : vector<8x8xf32>
    %1058 = tpu.matmul %1056, %1057, %cst_409 {dimension_numbers = #tpu.dot_dimension_numbers<[1], [1], [0], [0], [0, 0, 1, 0], [], []>} : vector<8x8xf32>, vector<8x8xf32>, vector<8x8xf32> -> vector<8x8xf32>
    %1059 = vector.extract_strided_slice %1016 {offsets = [8, 24], sizes = [8, 8], strides = [1, 1]} : vector<16x32xf32> to vector<8x8xf32>
    %1060 = vector.extract_strided_slice %1025 {offsets = [8, 24], sizes = [8, 8], strides = [1, 1]} : vector<16x32xf32> to vector<8x8xf32>
    %cst_410 = arith.constant dense<0.000000e+00> : vector<8x8xf32>
    %1061 = tpu.matmul %1059, %1060, %cst_410 {dimension_numbers = #tpu.dot_dimension_numbers<[1], [1], [0], [0], [0, 0, 1, 0], [], []>} : vector<8x8xf32>, vector<8x8xf32>, vector<8x8xf32> -> vector<8x8xf32>
    %1062 = tpu.concatenate %1040, %1043, %1046, %1049, %1052, %1055, %1058, %1061 in 0 : vector<8x8xf32>, vector<8x8xf32>, vector<8x8xf32>, vector<8x8xf32>, vector<8x8xf32>, vector<8x8xf32>, vector<8x8xf32>, vector<8x8xf32> -> vector<64x8xf32>
    %cst_411 = arith.constant dense<0xFF800000> : vector<64xf32>
    %1063 = vector.multi_reduction <maximumf>, %1062, %cst_411 [1] : vector<64x8xf32> to vector<64xf32>
    %1064 = vector.shape_cast %1063 : vector<64xf32> to vector<64x1xf32>
    %1065 = vector.broadcast %1064 : vector<64x1xf32> to vector<64x8xf32>
    %1066 = arith.subf %1062, %1065 : vector<64x8xf32>
    %1067 = math.exp %1066 : vector<64x8xf32>
    %cst_412 = arith.constant dense<0.000000e+00> : vector<64xf32>
    %1068 = vector.multi_reduction <add>, %1067, %cst_412 [1] : vector<64x8xf32> to vector<64xf32>
    %1069 = vector.shape_cast %1068 : vector<64xf32> to vector<64x1xf32>
    %1070 = tpu.reciprocal %1069 : vector<64x1xf32> -> vector<64x1xf32>
    %1071 = vector.broadcast %1070 : vector<64x1xf32> to vector<64x8xf32>
    %1072 = arith.mulf %1067, %1071 : vector<64x8xf32>
    %cst_413 = arith.constant 0.000000e+00 : f32
    %1073 = vector.broadcast %cst_413 : f32 to vector<8x32xf32>
    %1074 = vector.extract_strided_slice %1072 {offsets = [0, 0], sizes = [8, 8], strides = [1, 1]} : vector<64x8xf32> to vector<8x8xf32>
    %1075 = vector.extract_strided_slice %1034 {offsets = [0, 0], sizes = [8, 8], strides = [1, 1]} : vector<16x32xf32> to vector<8x8xf32>
    %cst_414 = arith.constant dense<0.000000e+00> : vector<8x8xf32>
    %1076 = tpu.matmul %1074, %1075, %cst_414 {dimension_numbers = #tpu.dot_dimension_numbers<[1], [0], [0], [1], [0, 0, 1, 1], [], []>} : vector<8x8xf32>, vector<8x8xf32>, vector<8x8xf32> -> vector<8x8xf32>
    %1077 = vector.extract_strided_slice %1037 {offsets = [0, 0], sizes = [8, 32], strides = [1, 1]} : vector<32x32xf32> to vector<8x32xf32>
    %cst_415 = arith.constant dense<0.000000e+00> : vector<8x32xf32>
    %1078 = tpu.matmul %1076, %1077, %cst_415 {dimension_numbers = #tpu.dot_dimension_numbers<[1], [0], [0], [1], [0, 0, 1, 1], [], []>} : vector<8x8xf32>, vector<8x32xf32>, vector<8x32xf32> -> vector<8x32xf32>
    %1079 = arith.addf %1073, %1078 : vector<8x32xf32>
    %1080 = vector.extract_strided_slice %1072 {offsets = [8, 0], sizes = [8, 8], strides = [1, 1]} : vector<64x8xf32> to vector<8x8xf32>
    %1081 = vector.extract_strided_slice %1034 {offsets = [0, 8], sizes = [8, 8], strides = [1, 1]} : vector<16x32xf32> to vector<8x8xf32>
    %cst_416 = arith.constant dense<0.000000e+00> : vector<8x8xf32>
    %1082 = tpu.matmul %1080, %1081, %cst_416 {dimension_numbers = #tpu.dot_dimension_numbers<[1], [0], [0], [1], [0, 0, 1, 1], [], []>} : vector<8x8xf32>, vector<8x8xf32>, vector<8x8xf32> -> vector<8x8xf32>
    %1083 = vector.extract_strided_slice %1037 {offsets = [8, 0], sizes = [8, 32], strides = [1, 1]} : vector<32x32xf32> to vector<8x32xf32>
    %cst_417 = arith.constant dense<0.000000e+00> : vector<8x32xf32>
    %1084 = tpu.matmul %1082, %1083, %cst_417 {dimension_numbers = #tpu.dot_dimension_numbers<[1], [0], [0], [1], [0, 0, 1, 1], [], []>} : vector<8x8xf32>, vector<8x32xf32>, vector<8x32xf32> -> vector<8x32xf32>
    %1085 = arith.addf %1079, %1084 : vector<8x32xf32>
    %1086 = vector.extract_strided_slice %1072 {offsets = [16, 0], sizes = [8, 8], strides = [1, 1]} : vector<64x8xf32> to vector<8x8xf32>
    %1087 = vector.extract_strided_slice %1034 {offsets = [0, 16], sizes = [8, 8], strides = [1, 1]} : vector<16x32xf32> to vector<8x8xf32>
    %cst_418 = arith.constant dense<0.000000e+00> : vector<8x8xf32>
    %1088 = tpu.matmul %1086, %1087, %cst_418 {dimension_numbers = #tpu.dot_dimension_numbers<[1], [0], [0], [1], [0, 0, 1, 1], [], []>} : vector<8x8xf32>, vector<8x8xf32>, vector<8x8xf32> -> vector<8x8xf32>
    %1089 = vector.extract_strided_slice %1037 {offsets = [16, 0], sizes = [8, 32], strides = [1, 1]} : vector<32x32xf32> to vector<8x32xf32>
    %cst_419 = arith.constant dense<0.000000e+00> : vector<8x32xf32>
    %1090 = tpu.matmul %1088, %1089, %cst_419 {dimension_numbers = #tpu.dot_dimension_numbers<[1], [0], [0], [1], [0, 0, 1, 1], [], []>} : vector<8x8xf32>, vector<8x32xf32>, vector<8x32xf32> -> vector<8x32xf32>
    %1091 = arith.addf %1085, %1090 : vector<8x32xf32>
    %1092 = vector.extract_strided_slice %1072 {offsets = [24, 0], sizes = [8, 8], strides = [1, 1]} : vector<64x8xf32> to vector<8x8xf32>
    %1093 = vector.extract_strided_slice %1034 {offsets = [0, 24], sizes = [8, 8], strides = [1, 1]} : vector<16x32xf32> to vector<8x8xf32>
    %cst_420 = arith.constant dense<0.000000e+00> : vector<8x8xf32>
    %1094 = tpu.matmul %1092, %1093, %cst_420 {dimension_numbers = #tpu.dot_dimension_numbers<[1], [0], [0], [1], [0, 0, 1, 1], [], []>} : vector<8x8xf32>, vector<8x8xf32>, vector<8x8xf32> -> vector<8x8xf32>
    %1095 = vector.extract_strided_slice %1037 {offsets = [24, 0], sizes = [8, 32], strides = [1, 1]} : vector<32x32xf32> to vector<8x32xf32>
    %cst_421 = arith.constant dense<0.000000e+00> : vector<8x32xf32>
    %1096 = tpu.matmul %1094, %1095, %cst_421 {dimension_numbers = #tpu.dot_dimension_numbers<[1], [0], [0], [1], [0, 0, 1, 1], [], []>} : vector<8x8xf32>, vector<8x32xf32>, vector<8x32xf32> -> vector<8x32xf32>
    %1097 = arith.addf %1091, %1096 : vector<8x32xf32>
    %cst_422 = arith.constant 0.000000e+00 : f32
    %1098 = vector.broadcast %cst_422 : f32 to vector<8x32xf32>
    %1099 = vector.extract_strided_slice %1072 {offsets = [32, 0], sizes = [8, 8], strides = [1, 1]} : vector<64x8xf32> to vector<8x8xf32>
    %1100 = vector.extract_strided_slice %1034 {offsets = [8, 0], sizes = [8, 8], strides = [1, 1]} : vector<16x32xf32> to vector<8x8xf32>
    %cst_423 = arith.constant dense<0.000000e+00> : vector<8x8xf32>
    %1101 = tpu.matmul %1099, %1100, %cst_423 {dimension_numbers = #tpu.dot_dimension_numbers<[1], [0], [0], [1], [0, 0, 1, 1], [], []>} : vector<8x8xf32>, vector<8x8xf32>, vector<8x8xf32> -> vector<8x8xf32>
    %1102 = vector.extract_strided_slice %1037 {offsets = [0, 0], sizes = [8, 32], strides = [1, 1]} : vector<32x32xf32> to vector<8x32xf32>
    %cst_424 = arith.constant dense<0.000000e+00> : vector<8x32xf32>
    %1103 = tpu.matmul %1101, %1102, %cst_424 {dimension_numbers = #tpu.dot_dimension_numbers<[1], [0], [0], [1], [0, 0, 1, 1], [], []>} : vector<8x8xf32>, vector<8x32xf32>, vector<8x32xf32> -> vector<8x32xf32>
    %1104 = arith.addf %1098, %1103 : vector<8x32xf32>
    %1105 = vector.extract_strided_slice %1072 {offsets = [40, 0], sizes = [8, 8], strides = [1, 1]} : vector<64x8xf32> to vector<8x8xf32>
    %1106 = vector.extract_strided_slice %1034 {offsets = [8, 8], sizes = [8, 8], strides = [1, 1]} : vector<16x32xf32> to vector<8x8xf32>
    %cst_425 = arith.constant dense<0.000000e+00> : vector<8x8xf32>
    %1107 = tpu.matmul %1105, %1106, %cst_425 {dimension_numbers = #tpu.dot_dimension_numbers<[1], [0], [0], [1], [0, 0, 1, 1], [], []>} : vector<8x8xf32>, vector<8x8xf32>, vector<8x8xf32> -> vector<8x8xf32>
    %1108 = vector.extract_strided_slice %1037 {offsets = [8, 0], sizes = [8, 32], strides = [1, 1]} : vector<32x32xf32> to vector<8x32xf32>
    %cst_426 = arith.constant dense<0.000000e+00> : vector<8x32xf32>
    %1109 = tpu.matmul %1107, %1108, %cst_426 {dimension_numbers = #tpu.dot_dimension_numbers<[1], [0], [0], [1], [0, 0, 1, 1], [], []>} : vector<8x8xf32>, vector<8x32xf32>, vector<8x32xf32> -> vector<8x32xf32>
    %1110 = arith.addf %1104, %1109 : vector<8x32xf32>
    %1111 = vector.extract_strided_slice %1072 {offsets = [48, 0], sizes = [8, 8], strides = [1, 1]} : vector<64x8xf32> to vector<8x8xf32>
    %1112 = vector.extract_strided_slice %1034 {offsets = [8, 16], sizes = [8, 8], strides = [1, 1]} : vector<16x32xf32> to vector<8x8xf32>
    %cst_427 = arith.constant dense<0.000000e+00> : vector<8x8xf32>
    %1113 = tpu.matmul %1111, %1112, %cst_427 {dimension_numbers = #tpu.dot_dimension_numbers<[1], [0], [0], [1], [0, 0, 1, 1], [], []>} : vector<8x8xf32>, vector<8x8xf32>, vector<8x8xf32> -> vector<8x8xf32>
    %1114 = vector.extract_strided_slice %1037 {offsets = [16, 0], sizes = [8, 32], strides = [1, 1]} : vector<32x32xf32> to vector<8x32xf32>
    %cst_428 = arith.constant dense<0.000000e+00> : vector<8x32xf32>
    %1115 = tpu.matmul %1113, %1114, %cst_428 {dimension_numbers = #tpu.dot_dimension_numbers<[1], [0], [0], [1], [0, 0, 1, 1], [], []>} : vector<8x8xf32>, vector<8x32xf32>, vector<8x32xf32> -> vector<8x32xf32>
    %1116 = arith.addf %1110, %1115 : vector<8x32xf32>
    %1117 = vector.extract_strided_slice %1072 {offsets = [56, 0], sizes = [8, 8], strides = [1, 1]} : vector<64x8xf32> to vector<8x8xf32>
    %1118 = vector.extract_strided_slice %1034 {offsets = [8, 24], sizes = [8, 8], strides = [1, 1]} : vector<16x32xf32> to vector<8x8xf32>
    %cst_429 = arith.constant dense<0.000000e+00> : vector<8x8xf32>
    %1119 = tpu.matmul %1117, %1118, %cst_429 {dimension_numbers = #tpu.dot_dimension_numbers<[1], [0], [0], [1], [0, 0, 1, 1], [], []>} : vector<8x8xf32>, vector<8x8xf32>, vector<8x8xf32> -> vector<8x8xf32>
    %1120 = vector.extract_strided_slice %1037 {offsets = [24, 0], sizes = [8, 32], strides = [1, 1]} : vector<32x32xf32> to vector<8x32xf32>
    %cst_430 = arith.constant dense<0.000000e+00> : vector<8x32xf32>
    %1121 = tpu.matmul %1119, %1120, %cst_430 {dimension_numbers = #tpu.dot_dimension_numbers<[1], [0], [0], [1], [0, 0, 1, 1], [], []>} : vector<8x8xf32>, vector<8x32xf32>, vector<8x32xf32> -> vector<8x32xf32>
    %1122 = arith.addf %1116, %1121 : vector<8x32xf32>
    %1123 = tpu.concatenate %1097, %1122 in 0 : vector<8x32xf32>, vector<8x32xf32> -> vector<16x32xf32>
    %1124 = arith.index_cast %c5_i32 : i32 to index
    %c0_431 = arith.constant 0 : index
    %c0_432 = arith.constant 0 : index
    %1125 = vector.load %arg8[%1124, %c0_431, %c0_432] : memref<6x1x32xf32, #tpu.memory_space<vmem>>, vector<1x1x32xf32>
    %1126 = vector.shape_cast %1125 : vector<1x1x32xf32> to vector<1x32xf32>
    %1127 = vector.broadcast %1126 : vector<1x32xf32> to vector<16x32xf32>
    %1128 = arith.addf %1123, %1127 : vector<16x32xf32>
    %1129 = arith.addf %1005, %1128 : vector<16x32xf32>
    %cst_433 = arith.constant dense<0.000000e+00> : vector<16xf32>
    %1130 = vector.multi_reduction <add>, %1129, %cst_433 [1] : vector<16x32xf32> to vector<16xf32>
    %1131 = vector.shape_cast %1130 : vector<16xf32> to vector<16x1xf32>
    %cst_434 = arith.constant 3.200000e+01 : f32
    %1132 = vector.broadcast %cst_434 : f32 to vector<16x1xf32>
    %1133 = arith.divf %1131, %1132 : vector<16x1xf32>
    %1134 = vector.broadcast %1133 : vector<16x1xf32> to vector<16x32xf32>
    %1135 = arith.subf %1129, %1134 : vector<16x32xf32>
    %1136 = arith.mulf %1135, %1135 : vector<16x32xf32>
    %cst_435 = arith.constant dense<0.000000e+00> : vector<16xf32>
    %1137 = vector.multi_reduction <add>, %1136, %cst_435 [1] : vector<16x32xf32> to vector<16xf32>
    %1138 = vector.shape_cast %1137 : vector<16xf32> to vector<16x1xf32>
    %cst_436 = arith.constant 3.200000e+01 : f32
    %1139 = vector.broadcast %cst_436 : f32 to vector<16x1xf32>
    %1140 = arith.divf %1138, %1139 : vector<16x1xf32>
    %1141 = vector.broadcast %1133 : vector<16x1xf32> to vector<16x32xf32>
    %1142 = arith.subf %1129, %1141 : vector<16x32xf32>
    %cst_437 = arith.constant 9.99999974E-6 : f32
    %1143 = vector.broadcast %cst_437 : f32 to vector<16x1xf32>
    %1144 = arith.addf %1140, %1143 : vector<16x1xf32>
    %1145 = math.rsqrt %1144 : vector<16x1xf32>
    %1146 = vector.broadcast %1145 : vector<16x1xf32> to vector<16x32xf32>
    %1147 = arith.mulf %1142, %1146 : vector<16x32xf32>
    %1148 = arith.index_cast %c5_i32 : i32 to index
    %c0_438 = arith.constant 0 : index
    %c0_439 = arith.constant 0 : index
    %1149 = vector.load %arg13[%1148, %c0_438, %c0_439] : memref<6x1x32xf32, #tpu.memory_space<vmem>>, vector<1x1x32xf32>
    %1150 = vector.shape_cast %1149 : vector<1x1x32xf32> to vector<1x32xf32>
    %1151 = vector.broadcast %1150 : vector<1x32xf32> to vector<16x32xf32>
    %1152 = arith.mulf %1147, %1151 : vector<16x32xf32>
    %1153 = arith.index_cast %c5_i32 : i32 to index
    %c0_440 = arith.constant 0 : index
    %c0_441 = arith.constant 0 : index
    %1154 = vector.load %arg14[%1153, %c0_440, %c0_441] : memref<6x1x32xf32, #tpu.memory_space<vmem>>, vector<1x1x32xf32>
    %1155 = vector.shape_cast %1154 : vector<1x1x32xf32> to vector<1x32xf32>
    %1156 = vector.broadcast %1155 : vector<1x32xf32> to vector<16x32xf32>
    %1157 = arith.addf %1152, %1156 : vector<16x32xf32>
    %1158 = arith.index_cast %c5_i32 : i32 to index
    %c0_442 = arith.constant 0 : index
    %c0_443 = arith.constant 0 : index
    %1159 = vector.load %arg9[%1158, %c0_442, %c0_443] : memref<6x32x128xf32, #tpu.memory_space<vmem>>, vector<1x32x128xf32>
    %1160 = vector.shape_cast %1159 : vector<1x32x128xf32> to vector<32x128xf32>
    %cst_444 = arith.constant dense<0.000000e+00> : vector<16x128xf32>
    %1161 = tpu.matmul %1157, %1160, %cst_444 {dimension_numbers = #tpu.dot_dimension_numbers<[1], [0], [0], [1], [0, 0, 1, 1], [], []>} : vector<16x32xf32>, vector<32x128xf32>, vector<16x128xf32> -> vector<16x128xf32>
    %1162 = arith.index_cast %c5_i32 : i32 to index
    %c0_445 = arith.constant 0 : index
    %c0_446 = arith.constant 0 : index
    %1163 = vector.load %arg10[%1162, %c0_445, %c0_446] : memref<6x1x128xf32, #tpu.memory_space<vmem>>, vector<1x1x128xf32>
    %1164 = vector.shape_cast %1163 : vector<1x1x128xf32> to vector<1x128xf32>
    %1165 = vector.broadcast %1164 : vector<1x128xf32> to vector<16x128xf32>
    %1166 = arith.addf %1161, %1165 : vector<16x128xf32>
    %cst_447 = arith.constant 0.000000e+00 : f32
    %1167 = vector.broadcast %cst_447 : f32 to vector<16x128xf32>
    %1168 = arith.maximumf %1166, %1167 : vector<16x128xf32>
    %1169 = arith.index_cast %c5_i32 : i32 to index
    %c0_448 = arith.constant 0 : index
    %c0_449 = arith.constant 0 : index
    %1170 = vector.load %arg11[%1169, %c0_448, %c0_449] : memref<6x128x32xf32, #tpu.memory_space<vmem>>, vector<1x128x32xf32>
    %1171 = vector.shape_cast %1170 : vector<1x128x32xf32> to vector<128x32xf32>
    %cst_450 = arith.constant dense<0.000000e+00> : vector<16x32xf32>
    %1172 = tpu.matmul %1168, %1171, %cst_450 {dimension_numbers = #tpu.dot_dimension_numbers<[1], [0], [0], [1], [0, 0, 1, 1], [], []>} : vector<16x128xf32>, vector<128x32xf32>, vector<16x32xf32> -> vector<16x32xf32>
    %1173 = arith.index_cast %c5_i32 : i32 to index
    %c0_451 = arith.constant 0 : index
    %c0_452 = arith.constant 0 : index
    %1174 = vector.load %arg12[%1173, %c0_451, %c0_452] : memref<6x1x32xf32, #tpu.memory_space<vmem>>, vector<1x1x32xf32>
    %1175 = vector.shape_cast %1174 : vector<1x1x32xf32> to vector<1x32xf32>
    %1176 = vector.broadcast %1175 : vector<1x32xf32> to vector<16x32xf32>
    %1177 = arith.addf %1172, %1176 : vector<16x32xf32>
    %1178 = arith.addf %1157, %1177 : vector<16x32xf32>
    %cst_453 = arith.constant dense<0.000000e+00> : vector<16xf32>
    %1179 = vector.multi_reduction <add>, %1178, %cst_453 [1] : vector<16x32xf32> to vector<16xf32>
    %1180 = vector.shape_cast %1179 : vector<16xf32> to vector<16x1xf32>
    %cst_454 = arith.constant 3.200000e+01 : f32
    %1181 = vector.broadcast %cst_454 : f32 to vector<16x1xf32>
    %1182 = arith.divf %1180, %1181 : vector<16x1xf32>
    %1183 = vector.broadcast %1182 : vector<16x1xf32> to vector<16x32xf32>
    %1184 = arith.subf %1178, %1183 : vector<16x32xf32>
    %1185 = arith.mulf %1184, %1184 : vector<16x32xf32>
    %cst_455 = arith.constant dense<0.000000e+00> : vector<16xf32>
    %1186 = vector.multi_reduction <add>, %1185, %cst_455 [1] : vector<16x32xf32> to vector<16xf32>
    %1187 = vector.shape_cast %1186 : vector<16xf32> to vector<16x1xf32>
    %cst_456 = arith.constant 3.200000e+01 : f32
    %1188 = vector.broadcast %cst_456 : f32 to vector<16x1xf32>
    %1189 = arith.divf %1187, %1188 : vector<16x1xf32>
    %1190 = vector.broadcast %1182 : vector<16x1xf32> to vector<16x32xf32>
    %1191 = arith.subf %1178, %1190 : vector<16x32xf32>
    %cst_457 = arith.constant 9.99999974E-6 : f32
    %1192 = vector.broadcast %cst_457 : f32 to vector<16x1xf32>
    %1193 = arith.addf %1189, %1192 : vector<16x1xf32>
    %1194 = math.rsqrt %1193 : vector<16x1xf32>
    %1195 = vector.broadcast %1194 : vector<16x1xf32> to vector<16x32xf32>
    %1196 = arith.mulf %1191, %1195 : vector<16x32xf32>
    %1197 = arith.index_cast %c5_i32 : i32 to index
    %c0_458 = arith.constant 0 : index
    %c0_459 = arith.constant 0 : index
    %1198 = vector.load %arg15[%1197, %c0_458, %c0_459] : memref<6x1x32xf32, #tpu.memory_space<vmem>>, vector<1x1x32xf32>
    %1199 = vector.shape_cast %1198 : vector<1x1x32xf32> to vector<1x32xf32>
    %1200 = vector.broadcast %1199 : vector<1x32xf32> to vector<16x32xf32>
    %1201 = arith.mulf %1196, %1200 : vector<16x32xf32>
    %1202 = arith.index_cast %c5_i32 : i32 to index
    %c0_460 = arith.constant 0 : index
    %c0_461 = arith.constant 0 : index
    %1203 = vector.load %arg16[%1202, %c0_460, %c0_461] : memref<6x1x32xf32, #tpu.memory_space<vmem>>, vector<1x1x32xf32>
    %1204 = vector.shape_cast %1203 : vector<1x1x32xf32> to vector<1x32xf32>
    %1205 = vector.broadcast %1204 : vector<1x32xf32> to vector<16x32xf32>
    %1206 = arith.addf %1201, %1205 : vector<16x32xf32>
    %c6_i32 = arith.constant 6 : i32
    %c0_462 = arith.constant 0 : index
    %c0_463 = arith.constant 0 : index
    %1207 = vector.load %arg17[%c0_462, %c0_463] : memref<16x32xf32, #tpu.memory_space<vmem>>, vector<16x32xf32>
    tpu.vector_store %arg17[%c0_462, %c0_463], %1206 {strides = array<i32>} : memref<16x32xf32, #tpu.memory_space<vmem>>, vector<16x32xf32>,
    return
  }
}

</mosaic_0001>

<bundles_post_ra>
// kernel: tpu_custom_call.1
= control target key start
LH: loop header
LB: loop body
LE: loop exit
PB: predicated region body
PF: predicated region fallthrough
CT: control target
= control target key end

     0   :  { %s20265_s0 = inlined_call_operand.hbm [shape: f32[16,32], index: 0, kind: input, shape index: {}]   ;;  %s20266_s1 = inlined_call_operand.vmem [shape: f32[6,32,32], index: 1, kind: input, shape index: {}]   ;;  %s20267_s2 = inlined_call_operand.hbm [shape: f32[6,1,32], index: 2, kind: input, shape index: {}]   ;;  %s20268_s3 = inlined_call_operand.vmem [shape: f32[6,32,32], index: 3, kind: input, shape index: {}]   ;;  %s20269_s4 = inlined_call_operand.vmem [shape: f32[6,1,32], index: 4, kind: input, shape index: {}]   ;;  %s20270_s5 = inlined_call_operand.vmem [shape: f32[6,32,32], index: 5, kind: input, shape index: {}]   ;;  %s20271_s6 = inlined_call_operand.vmem [shape: f32[6,1,32], index: 6, kind: input, shape index: {}]   ;;  %s20272_s7 = inlined_call_operand.vmem [shape: f32[6,32,32], index: 7, kind: input, shape index: {}]   ;;  %s20273_s8 = inlined_call_operand.vmem [shape: f32[6,1,32], index: 8, kind: input, shape index: {}]   ;;  %s20274_s9 = inlined_call_operand.vmem [shape: f32[6,32,128], index: 9, kind: input, shape index: {}]   ;;  %s20275_s10 = inlined_call_operand.vmem [shape: f32[6,1,128], index: 10, kind: input, shape index: {}]   ;;  %s20276_s11 = inlined_call_operand.vmem [shape: f32[6,128,32], index: 11, kind: input, shape index: {}]   ;;  %s20277_s12 = inlined_call_operand.vmem [shape: f32[6,1,32], index: 12, kind: input, shape index: {}]   ;;  %s20278_s13 = inlined_call_operand.vmem [shape: f32[6,1,32], index: 13, kind: input, shape index: {}]   ;;  %s20279_s14 = inlined_call_operand.vmem [shape: f32[6,1,32], index: 14, kind: input, shape index: {}]   ;;  %s20280_s15 = inlined_call_operand.vmem [shape: f32[6,1,32], index: 15, kind: input, shape index: {}]   ;;  %s20281_s16 = inlined_call_operand.vmem [shape: f32[6,1,32], index: 16, kind: input, shape index: {}]   ;;  %s20282_s17 = inlined_call_operand.hbm [shape: f32[16,32], index: 17, kind: output, shape index: {}]  }
   0x1   :  { %20286 = sst [smem:[#allocation11_spill]] %s20265_s0 }
   0x2   :  { %20287 = sst [smem:[#allocation12_spill]] %s20266_s1 }
   0x3   :  { %20288 = sst [smem:[#allocation13_spill]] %s20282_s17 }
   0x4   :  { %22 = vsyncpa [#allocation3], 0 }
   0x5   :  { %23 = vsyncpa [#allocation6], 0 }
   0x6   :  { %24 = vsyncpa [#allocation4], 0  ;;  %s17935_s24 = smov [#allocation2]   ;;  %s20289_s28 = sld [smem:[#allocation11_spill]] }
   0x7   :  { %s30_s25 = sshll.u32 %s17935_s24, 4  ;;  %s31_s25 = int_to_ptr.vmem [resolvable:$true] %s30_s25 }
   0xc   :  { %s17863_s29 = scalar_lea.hbm %s20289_s28, 256 }
   0xd   :  { %p17864_p0 = scmp.ne.s32.totalorder %s20289_s28, %s17863_s29  ;;  %p17867_p1 = scmp.lt.u32.totalorder %s17863_s29, %s20289_s28 }
   0xf   :  { %p17869_p2 = pnand %p17867_p1, %p17864_p0 }
  0x11   :  { %17872 = shalt.err (!%p17869_p2)
}
  0x12   :  { %s17873_s1 = scalar_lea.vmem %s31_s25, 256  ;;  %p17878_p4 = scmp.lt.s32.totalorder %s31_s25, %s31_s25 }
  0x13   :  { %p17874_p3 = scmp.ne.s32.totalorder %s31_s25, %s17873_s1  ;;  %p17879_p5 = scmp.lt.s32.totalorder %s17873_s1, %s17873_s1 }
  0x15   :  { %p17880_p6 = por %p17879_p5, %p17878_p4 }
  0x17   :  { %p17881_p7 = pnand %p17880_p6, %p17874_p3 }
  0x19   :  { %17884 = shalt.err (!%p17881_p7)
}
  0x1a   :  { %s17936_s20 = smov 128   ;;  %s17937_s21 = smov 8  }
  0x1b   :  { %36 = dma.hbm_to_vmem [thread:$0]  %s20289_s28, 256, %s31_s25, [#allocation3], %s17936_s20, %s17936_s20, %s17937_s21  }
  0x1c   :  { %s17938_s24 = smov [#allocation5]   ;;  %s17885_s0 = scalar_lea.hbm %s20267_s2, 96 }
  0x1d   :  { %s44_s26 = sshll.u32 %s17938_s24, 4  ;;  %p17886_p8 = scmp.ne.s32.totalorder %s20267_s2, %s17885_s0  ;;  %s45_s26 = int_to_ptr.vmem [resolvable:$true] %s44_s26 }
  0x1e   :  { %p17889_p9 = scmp.lt.u32.totalorder %s17885_s0, %s20267_s2 }
  0x20   :  { %p17891_p10 = pnand %p17889_p9, %p17886_p8 }
  0x22   :  { %17894 = shalt.err (!%p17891_p10)
}
  0x23   :  { %s17895_s17 = scalar_lea.vmem %s45_s26, 96  ;;  %p17900_p12 = scmp.lt.s32.totalorder %s45_s26, %s45_s26 }
  0x24   :  { %p17896_p11 = scmp.ne.s32.totalorder %s45_s26, %s17895_s17  ;;  %p17901_p13 = scmp.lt.s32.totalorder %s17895_s17, %s17895_s17 }
  0x26   :  { %p17902_p0 = por %p17901_p13, %p17900_p12 }
  0x28   :  { %p17903_p1 = pnand %p17902_p0, %p17896_p11 }
  0x2a   :  { %17906 = shalt.err (!%p17903_p1)
}
  0x2b   :  { %s17939_s25 = smov 16   ;;  %s17940_s28 = smov 1  }
  0x2c   :  { %50 = dma.hbm_to_vmem [thread:$0]  %s20267_s2, 96, %s45_s26, [#allocation6], %s17939_s25, %s17939_s25, %s17940_s28  }
  0x2d   :  { %17929 = dma.done.wait [#allocation3], 256  }
  0x2e   :  { %17930 = vsyncadd [#allocation3], 4294967040 }
  0x2f   :  { %17931 = dma.done.wait [#allocation6], 96  }
  0x30   :  { %17932 = vsyncadd [#allocation6], 4294967200  ;;  %vm98_vm0 = vcmask 261120   ;;  %s20290_s29 = sld [smem:[#allocation12_spill]]  ;;  %v18076_v5 = vld [vmem:[#allocation2] sm:$0xff]  ;;  %v183_v8 = vld [vmem:[%s20268_s3 + $0x8] sm:$0xff] }
  0x31   :  { %16041 = vmatprep.mubr.msk.f32.mxu0 %vm98_vm0, %v18076_v5  ;;  %v182_v7 = vld [vmem:[%s20268_s3] sm:$0xff]  ;;  %v184_v10 = vld [vmem:[%s20268_s3 + $0x10] sm:$0xff]  ;;  %v185_v11 = vld [vmem:[%s20268_s3 + $0x18] sm:$0xff]  ;;  %v17941_v20 = vmov 0.0   ;;  %vm17942_vm1 = vmmov 0   ;;  %vm358_vm2 = vcmask 64512  }
  0x32   :  { %v17235_v9 = vpack.c.bf16 %v183_v8, %v182_v7  ;;  %v18092_v12 = vld [vmem:[#allocation2 + $0x8] sm:$0xff]  ;;  %v17239_v13 = vpack.c.bf16 %v185_v11, %v184_v10  ;;  %v268_v14 = vld [vmem:[%s20270_s5] sm:$0xff]  ;;  %v270_v17 = vld [vmem:[%s20270_s5 + $0x10] sm:$0xff]  ;;  %16071 = vmatprep.subr.mxu1 %v17941_v20  ;;  %16073 = vmatprep.mubr.msk.f32.mxu1 %vm17942_vm1, %v17941_v20  ;;  %s17943_s22 = smov 112   ;;  %s17944_s23 = smov 120  }
  0x33   :  { %v269_v15 = vld [vmem:[%s20270_s5 + $0x8] sm:$0xff]  ;;  %v271_v18 = vld [vmem:[%s20270_s5 + $0x18] sm:$0xff]  ;;  %v14971_v23 = vld [vmem:[%s20269_s4] ss:$0 sm:$0xff]  ;;  %s17945_s24 = smov 104  }
  0x34   :  { %v17243_v16 = vpack.c.bf16 %v269_v15, %v268_v14  ;;  %v17247_v19 = vpack.c.bf16 %v271_v18, %v270_v17  ;;  %v14968_v24 = vld [vmem:[#allocation5] ss:$0 sm:$0xff]  ;;  %v14974_v34 = vld [vmem:[%s20271_s6] ss:$0 sm:$0xff] }
  0x36   :  { %v87_v0 = vld [vmem:[%s20290_s29] sm:$0xff]  ;;  %v88_v1 = vld [vmem:[%s20290_s29 + $0x8] sm:$0xff]  ;;  %v89_v2 = vld [vmem:[%s20290_s29 + $0x10] sm:$0xff] }
  0x37   :  { %v17227_v3 = vpack.c.bf16 %v88_v1, %v87_v0  ;;  %v90_v4 = vld [vmem:[%s20290_s29 + $0x18] sm:$0xff] }
  0x38   :  { %v17231_v6 = vpack.c.bf16 %v90_v4, %v89_v2 }
  0x39   :  { %17228 = vmatprep.subr.bf16.mxu0 %v17227_v3 }
  0x3a   :  { %17230 = vmatpush3.bf16.msra.mxu0 %v17227_v3 }
  0x3b   :  { %17232 = vmatprep.subr.bf16.mxu0 %v17231_v6 }
  0x3e   :  { %17234 = vmatpush3.bf16.msra.mxu0 %v17231_v6 }
  0x3f   :  { %17236 = vmatprep.subr.bf16.mxu0 %v17235_v9 }
  0x41   :  { %16042 = vmatmul.mubr.msk.f32.vlgmr.msra.gmra.mrb[0].mxu0 %vm98_vm0, %v18092_v12 }
  0x42   :  { %17238 = vmatpush3.bf16.msra.mxu0 %v17235_v9  ;;  %16052 = vmatprep.mubr.msk.f32.mxu0 %vm98_vm0, %v18076_v5 }
  0x43   :  { %17240 = vmatprep.subr.bf16.mxu0 %v17239_v13 }
  0x46   :  { %17242 = vmatpush3.bf16.msra.mxu0 %v17239_v13 }
  0x47   :  { %17244 = vmatprep.subr.bf16.mxu0 %v17243_v16 }
  0x49   :  { %16053 = vmatmul.mubr.msk.f32.vlgmr.msra.gmra.mrb[2].mxu0 %vm98_vm0, %v18092_v12 }
  0x4a   :  { %17246 = vmatpush3.bf16.msra.mxu0 %v17243_v16  ;;  %16063 = vmatprep.mubr.msk.f32.mxu0 %vm98_vm0, %v18076_v5 }
  0x4b   :  { %17248 = vmatprep.subr.bf16.mxu0 %v17247_v19 }
  0x4e   :  { %17250 = vmatpush3.bf16.msra.mxu0 %v17247_v19 }
  0x4f   :  { %16066 = vmatprep.subr.mxu0 %v17941_v20 }
  0x51   :  { %16064 = vmatmul.mubr.msk.f32.vlgmr.msra.gmra.mrb[4].mxu0 %vm98_vm0, %v18092_v12 }
  0x52   :  { %16068 = vmatprep.mubr.msk.f32.mxu0 %vm17942_vm1, %v17941_v20 }
 0x114   :  { %v16043_v21 = vpop.f32.mrb[0].mxu0 }
 0x115   :  { %v171_v22 = vpop.f32.mrb[1].mxu0  ;;  %v177_v31 = vadd.f32 %v16043_v21, %v14968_v24 }
 0x116   :  { %v172_v28 = vadd.f32 %v14968_v24, %v171_v22 }
 0x117   :  { %v18138_v32 = vmul.f32 0.35355338, %v177_v31 }
 0x118   :  { %v180_v30 = vmul.f32 0.35355338, %v172_v28 }
 0x11c   :  { %v16054_v25 = vpop.f32.mrb[2].mxu0 }
 0x11d   :  { %v18125_v26 = vadd.f32 %v16054_v25, %v14971_v23  ;;  %v259_v27 = vpop.f32.mrb[3].mxu0 }
 0x11e   :  { %v260_v29 = vadd.f32 %v14971_v23, %v259_v27 }
 0x120   :  { %515 = vrot.lane.b32.xlu1 %v260_v29, %s17943_s22  ;;  %437 = vrot.lane.b32.xlu0 %v260_v29, %s17944_s23 }
 0x121   :  { %16067 = vmatpush3.xpose.msk.msra.mxu0 %vm358_vm2, %v260_v29 }
 0x122   :  { %16076 = vmatprep.subr.mxu0 %v17941_v20 }
 0x124   :  { %16069 = vmatmul.mubr.msk.f32.vlgmr.msra.gmra.mrb[6].mxu0 %vm358_vm2, %v180_v30  ;;  %513 = vrot.lane.b32.xlu1 %v180_v30, %s17943_s22  ;;  %v16065_v33 = vpop.f32.mrb[4].mxu0 }
 0x125   :  { %435 = vrot.lane.b32.xlu0 %v180_v30, %s17944_s23  ;;  %16078 = vmatprep.mubr.msk.f32.mxu0 %vm17942_vm1, %v17941_v20  ;;  %v18145_v35 = vadd.f32 %v16065_v33, %v14974_v34  ;;  %v345_v36 = vpop.f32.mrb[5].mxu0 }
 0x126   :  { %v18178_v54 = vadd.f32 %v14974_v34, %v345_v36 }
 0x128   :  { %591 = vrot.lane.b32.xlu1 %v180_v30, %s17945_s24 }
 0x129   :  { %593 = vrot.lane.b32.xlu0 %v260_v29, %s17945_s24 }
 0x12c   :  { %745 = vrot.lane.b32.xlu1 %v18138_v32, %s17944_s23 }
 0x192   :  { %v516_v37 = vpop.permute.xlu1 %515  ;;  %v438_v38 = vpop.permute.xlu0 %437 }
 0x193   :  { %16072 = vmatpush3.xpose.msk.msra.mxu1 %vm358_vm2, %v438_v38  ;;  %16077 = vmatpush3.xpose.msk.msra.mxu0 %vm358_vm2, %v516_v37  ;;  %v18234_v37 = vld [vmem:[%s20272_s7 + $0x8] sm:$0xff] }
 0x194   :  { %16086 = vmatprep.subr.mxu0 %v17941_v20  ;;  %16081 = vmatprep.subr.mxu1 %v17941_v20 }
 0x196   :  { %v514_v39 = vpop.permute.xlu1 %513 }
 0x197   :  { %v436_v40 = vpop.permute.xlu0 %435  ;;  %16079 = vmatmul.mubr.msk.f32.vlgmr.msra.gmra.mrb[8].mxu0 %vm358_vm2, %v514_v39 }
 0x198   :  { %16074 = vmatmul.mubr.msk.f32.vlgmr.msra.gmra.mrb[0].mxu1 %vm358_vm2, %v436_v40  ;;  %16087 = vmatpush3.xpose.msk.msra.mxu0 %vm358_vm2, %v18125_v26 }
 0x199   :  { %16088 = vmatprep.mubr.msk.f32.mxu0 %vm17942_vm1, %v17941_v20  ;;  %16083 = vmatprep.mubr.msk.f32.mxu1 %vm17942_vm1, %v17941_v20 }
 0x19a   :  { %16096 = vmatprep.subr.mxu0 %v17941_v20  ;;  %v592_v42 = vpop.permute.xlu1 %591 }
 0x19b   :  { %v594_v41 = vpop.permute.xlu0 %593  ;;  %16089 = vmatmul.mubr.msk.f32.vlgmr.msra.gmra.mrb[10].mxu0 %vm358_vm2, %v18138_v32 }
 0x19c   :  { %16082 = vmatpush3.xpose.msk.msra.mxu1 %vm358_vm2, %v594_v41  ;;  %16098 = vmatprep.mubr.msk.f32.mxu0 %vm17942_vm1, %v17941_v20 }
 0x19d   :  { %16091 = vmatprep.subr.mxu1 %v17941_v20 }
 0x19e   :  { %v746_v61 = vpop.permute.xlu1 %745 }
 0x19f   :  { %16084 = vmatmul.mubr.msk.f32.vlgmr.msra.gmra.mrb[2].mxu1 %vm358_vm2, %v592_v42 }
 0x1a0   :  { %16093 = vmatprep.mubr.msk.f32.mxu1 %vm17942_vm1, %v17941_v20 }
 0x1f7   :  { %v18169_v43 = vpop.f32.mrb[6].mxu0 }
 0x1f8   :  { %v16070_v44 = vpop.f32.mrb[7].mxu0  ;;  %v979_v8 = vsel %vm358_vm2, %v18169_v43, -inf }
 0x26a   :  { %v587_v45 = vpop.f32.mrb[8].mxu0 }
 0x26b   :  { %v509_v46 = vpop.f32.mrb[0].mxu1  ;;  %v16080_v47 = vpop.f32.mrb[9].mxu0  ;;  %v985_v55 = vsel %vm358_vm2, %v587_v45, -inf }
 0x26c   :  { %v16075_v48 = vpop.f32.mrb[1].mxu1  ;;  %v982_v49 = vsel %vm358_vm2, %v509_v46, -inf }
 0x26d   :  { %983 = vmax.xlane.f32.xlu0 %v982_v49  ;;  %v354_v48 = vld [vmem:[%s20272_s7] sm:$0xff] }
 0x26e   :  { %v18172_v50 = vpop.f32.mrb[10].mxu0 }
 0x26f   :  { %v16090_v51 = vpop.f32.mrb[11].mxu0  ;;  %v991_v29 = vsel %vm358_vm2, %v18172_v50, -inf }
 0x272   :  { %v18174_v52 = vpop.f32.mrb[2].mxu1 }
 0x273   :  { %v16085_v53 = vpop.f32.mrb[3].mxu1  ;;  %v988_v56 = vsel %vm358_vm2, %v18174_v52, -inf }
 0x283   :  { %747 = vrot.lane.b32.xlu0 %v18125_v26, %s17944_s23 }
 0x287   :  { %903 = vrot.lane.b32.xlu0 %v18125_v26, %s17945_s24 }
 0x28b   :  { %1141 = vrot.lane.b32.xlu0 %v18178_v54, %s17944_s23 }
 0x2aa   :  { %986 = vmax.xlane.f32.xlu0 %v985_v55 }
 0x2ae   :  { %989 = vmax.xlane.f32.xlu0 %v988_v56 }
 0x2c4   :  { %825 = vrot.lane.b32.xlu0 %v18125_v26, %s17943_s22 }
 0x2fa   :  { %v984_v57 = vpop.xlane.xlu0 %983 }
 0x2fb   :  { %v1004_v58 = vsub.f32 %v509_v46, %v984_v57 }
 0x2fd   :  { %v1013_v59 = vmul.f32 1.442695, %v1004_v58 }
 0x2fe   :  { %v748_v60 = vpop.permute.xlu0 %747 }
 0x2ff   :  { %17623 = vpow2.f32 %v1013_v59  ;;  %16092 = vmatpush3.xpose.msk.msra.mxu1 %vm358_vm2, %v748_v60 }
 0x300   :  { %16101 = vmatprep.subr.mxu1 %v17941_v20 }
 0x302   :  { %16094 = vmatmul.mubr.msk.f32.vlgmr.msra.gmra.mrb[4].mxu1 %vm358_vm2, %v746_v61  ;;  %v904_v62 = vpop.permute.xlu0 %903 }
 0x303   :  { %16102 = vmatpush3.xpose.msk.msra.mxu1 %vm358_vm2, %v904_v62  ;;  %16103 = vmatprep.mubr.msk.f32.mxu1 %vm17942_vm1, %v17941_v20 }
 0x304   :  { %16111 = vmatprep.subr.mxu1 %v17941_v20 }
 0x306   :  { %v1142_v1 = vpop.permute.xlu0 %1141 }
 0x309   :  { %v17624_v63 = vpop.eup %17623 }
 0x30a   :  { %v1030_v0 = vsel %vm358_vm2, %v17624_v63, 0.0 }
 0x30b   :  { %1031 = vadd.xlane.f32.xlu1 %v1030_v0 }
 0x31c   :  { %901 = vrot.lane.b32.xlu1 %v18138_v32, %s17945_s24 }
 0x337   :  { %v987_v2 = vpop.xlane.xlu0 %986 }
 0x338   :  { %v1005_v3 = vsub.f32 %v587_v45, %v987_v2 }
 0x33a   :  { %v1015_v4 = vmul.f32 1.442695, %v1005_v3 }
 0x33b   :  { %v990_v6 = vpop.xlane.xlu0 %989 }
 0x33c   :  { %17625 = vpow2.f32 %v1015_v4  ;;  %v1006_v24 = vsub.f32 %v18174_v52, %v990_v6  ;;  %v18281_v6 = vld [vmem:[%s20272_s7 + $0x18] sm:$0xff] }
 0x33e   :  { %v1017_v25 = vmul.f32 1.442695, %v1006_v24 }
 0x33f   :  { %v826_v7 = vpop.permute.xlu0 %825 }
 0x340   :  { %980 = vmax.xlane.f32.xlu1 %v979_v8  ;;  %16097 = vmatpush3.xpose.msk.msra.mxu0 %vm358_vm2, %v826_v7 }
 0x341   :  { %16106 = vmatprep.subr.mxu0 %v17941_v20 }
 0x346   :  { %v17626_v9 = vpop.eup %17625 }
 0x347   :  { %v1033_v10 = vsel %vm358_vm2, %v17626_v9, 0.0 }
 0x348   :  { %1034 = vadd.xlane.f32.xlu0 %v1033_v10 }
 0x35e   :  { %1513 = vrot.lane.b32.xlu0 %v18178_v54, %s17945_s24 }
 0x398   :  { %v1032_v11 = vpop.xlane.xlu1 %1031 }
 0x399   :  { %17627 = vrcp.f32 %v1032_v11 }
 0x39c   :  { %v902_v13 = vpop.permute.xlu1 %901 }
 0x39d   :  { %16104 = vmatmul.mubr.msk.f32.vlgmr.msra.gmra.mrb[6].mxu1 %vm358_vm2, %v902_v13 }
 0x39e   :  { %16112 = vmatpush3.msra.mxu1 %v1142_v1  ;;  %16113 = vmatprep.mubr.msk.f32.mxu1 %vm17942_vm1, %v17941_v20 }
 0x39f   :  { %16121 = vmatprep.subr.mxu1 %v17941_v20 }
 0x3a3   :  { %v17628_v14 = vpop.eup %17627 }
 0x3a4   :  { %v1060_v15 = vmul.f32 %v17628_v14, %v17624_v63  ;;  %v18270_v63 = vld [vmem:[%s20272_s7 + $0x10] sm:$0xff] }
 0x3a6   :  { %16114 = vmatmul.mubr.msk.f32.vlgmr.msra.gmra.mrb[8].mxu1 %vm358_vm2, %v1060_v15 }
 0x3a7   :  { %16123 = vmatprep.mubr.msk.f32.mxu1 %vm17942_vm1, %v17941_v20  ;;  %16122 = vmatpush3.msra.mxu1 %v354_v48 }
 0x3a8   :  { %16131 = vmatprep.subr.mxu1 %v17941_v20 }
 0x3cd   :  { %v981_v16 = vpop.xlane.xlu1 %980 }
 0x3ce   :  { %v1003_v17 = vsub.f32 %v18169_v43, %v981_v16 }
 0x3d0   :  { %v1011_v18 = vmul.f32 1.442695, %v1003_v17 }
 0x3d2   :  { %17629 = vpow2.f32 %v1011_v18 }
 0x3d3   :  { %17631 = vpow2.f32 %v1017_v25 }
 0x3d5   :  { %v819_v19 = vpop.f32.mrb[4].mxu1  ;;  %v1035_v40 = vpop.xlane.xlu0 %1034 }
 0x3d6   :  { %v16095_v21 = vpop.f32.mrb[5].mxu1  ;;  %v994_v28 = vsel %vm358_vm2, %v819_v19, -inf }
 0x3d9   :  { %v1514_v45 = vpop.permute.xlu0 %1513 }
 0x3dc   :  { %v17630_v22 = vpop.eup %17629 }
 0x3dd   :  { %v1027_v23 = vsel %vm358_vm2, %v17630_v22, 0.0  ;;  %v17632_v26 = vpop.eup %17631 }
 0x3de   :  { %1028 = vadd.xlane.f32.xlu1 %v1027_v23  ;;  %v1036_v27 = vsel %vm358_vm2, %v17632_v26, 0.0 }
 0x3ef   :  { %823 = vrot.lane.b32.xlu1 %v18138_v32, %s17943_s22 }
 0x413   :  { %1037 = vadd.xlane.f32.xlu1 %v1036_v27 }
 0x424   :  { %1363 = vrot.lane.b32.xlu1 %v18178_v54, %s17943_s22 }
 0x448   :  { %995 = vmax.xlane.f32.xlu1 %v994_v28 }
 0x44c   :  { %992 = vmax.xlane.f32.xlu1 %v991_v29 }
 0x46b   :  { %v1029_v30 = vpop.xlane.xlu1 %1028 }
 0x46c   :  { %17633 = vrcp.f32 %v1029_v30 }
 0x46d   :  { %17635 = vrcp.f32 %v1035_v40 }
 0x46f   :  { %v824_v31 = vpop.permute.xlu1 %823 }
 0x470   :  { %16099 = vmatmul.mubr.msk.f32.vlgmr.msra.gmra.mrb[12].mxu0 %vm358_vm2, %v824_v31  ;;  %v18225_v32 = vpop.f32.mrb[6].mxu1 }
 0x471   :  { %16107 = vmatpush3.msra.mxu0 %v18178_v54  ;;  %v16105_v33 = vpop.f32.mrb[7].mxu1  ;;  %16108 = vmatprep.mubr.msk.f32.mxu0 %vm17942_vm1, %v17941_v20  ;;  %v1000_v61 = vsel %vm358_vm2, %v18225_v32, -inf }
 0x472   :  { %16116 = vmatprep.subr.mxu0 %v17941_v20 }
 0x476   :  { %v17634_v34 = vpop.eup %17633 }
 0x477   :  { %v1059_v36 = vmul.f32 %v17634_v34, %v17630_v22  ;;  %v17636_v42 = vpop.eup %17635 }
 0x478   :  { %v1061_v44 = vmul.f32 %v17636_v42, %v17626_v9 }
 0x479   :  { %16109 = vmatmul.mubr.msk.f32.vlgmr.msra.gmra.mrb[14].mxu0 %vm358_vm2, %v1059_v36  ;;  %v1213_v38 = vpop.f32.mrb[8].mxu1 }
 0x47a   :  { %v16115_v39 = vpop.f32.mrb[9].mxu1  ;;  %16117 = vmatpush3.msra.mxu0 %v18234_v37  ;;  %16118 = vmatprep.mubr.msk.f32.mxu0 %vm17942_vm1, %v17941_v20 }
 0x47b   :  { %16126 = vmatprep.subr.mxu0 %v17941_v20 }
 0x47d   :  { %16119 = vmatmul.mubr.msk.f32.vlgmr.msra.gmra.mrb[16].mxu0 %vm358_vm2, %v1213_v38  ;;  %v18309_v38 = vld [vmem:[%s20273_s8] ss:$0 sm:$0xff] }
 0x47e   :  { %16128 = vmatprep.mubr.msk.f32.mxu0 %vm17942_vm1, %v17941_v20 }
 0x4a0   :  { %v1038_v41 = vpop.xlane.xlu1 %1037 }
 0x4a1   :  { %17637 = vrcp.f32 %v1038_v41 }
 0x4a4   :  { %v1364_v43 = vpop.permute.xlu1 %1363 }
 0x4a5   :  { %16127 = vmatpush3.msra.mxu0 %v1364_v43 }
 0x4a6   :  { %16129 = vmatmul.mubr.msk.f32.vlgmr.msra.gmra.mrb[18].mxu0 %vm358_vm2, %v1061_v44  ;;  %16136 = vmatprep.subr.mxu0 %v17941_v20 }
 0x4a7   :  { %16137 = vmatpush3.msra.mxu0 %v1514_v45  ;;  %16138 = vmatprep.mubr.msk.f32.mxu0 %vm17942_vm1, %v17941_v20 }
 0x4a8   :  { %16146 = vmatprep.subr.mxu0 %v17941_v20 }
 0x4ab   :  { %v17638_v46 = vpop.eup %17637 }
 0x4ac   :  { %v1062_v47 = vmul.f32 %v17638_v46, %v17632_v26 }
 0x4ae   :  { %16139 = vmatmul.mubr.msk.f32.vlgmr.msra.gmra.mrb[20].mxu0 %vm358_vm2, %v1062_v47 }
 0x4af   :  { %16147 = vmatpush3.msra.mxu0 %v18145_v35  ;;  %16148 = vmatprep.mubr.msk.f32.mxu0 %vm17942_vm1, %v17941_v20 }
 0x4b0   :  { %16156 = vmatprep.subr.mxu0 %v17941_v20 }
 0x4d5   :  { %v996_v49 = vpop.xlane.xlu1 %995 }
 0x4d6   :  { %v1008_v51 = vsub.f32 %v819_v19, %v996_v49 }
 0x4d8   :  { %v1021_v52 = vmul.f32 1.442695, %v1008_v51 }
 0x4d9   :  { %v993_v55 = vpop.xlane.xlu1 %992 }
 0x4da   :  { %17639 = vpow2.f32 %v1021_v52  ;;  %v1007_v56 = vsub.f32 %v18172_v50, %v993_v55 }
 0x4dc   :  { %v1019_v57 = vmul.f32 1.442695, %v1007_v56 }
 0x4de   :  { %17641 = vpow2.f32 %v1019_v57 }
 0x4e4   :  { %v17640_v53 = vpop.eup %17639 }
 0x4e5   :  { %v1042_v54 = vsel %vm358_vm2, %v17640_v53, 0.0 }
 0x4e6   :  { %1043 = vadd.xlane.f32.xlu0 %v1042_v54 }
 0x4e8   :  { %v17642_v62 = vpop.eup %17641 }
 0x4e9   :  { %v1039_v50 = vsel %vm358_vm2, %v17642_v62, 0.0 }
 0x4fc   :  { %1737 = vrot.lane.b32.xlu0 %v18145_v35, %s17944_s23 }
 0x500   :  { %1959 = vrot.lane.b32.xlu0 %v18145_v35, %s17943_s22 }
 0x543   :  { %v897_v58 = vpop.f32.mrb[12].mxu0 }
 0x544   :  { %v16100_v59 = vpop.f32.mrb[13].mxu0  ;;  %v997_v60 = vsel %vm358_vm2, %v897_v58, -inf }
 0x545   :  { %998 = vmax.xlane.f32.xlu1 %v997_v60 }
 0x549   :  { %1001 = vmax.xlane.f32.xlu1 %v1000_v61 }
 0x54c   :  { %v1136_v0 = vpop.f32.mrb[14].mxu0 }
 0x54d   :  { %1040 = vadd.xlane.f32.xlu1 %v1039_v50  ;;  %v16110_v1 = vpop.f32.mrb[15].mxu0  ;;  %16124 = vmatmul.mubr.msk.f32.vlgmr.msra.gmra.mrb[10].mxu1 %vm358_vm2, %v1136_v0 }
 0x54e   :  { %16132 = vmatpush3.msra.mxu1 %v18270_v63  ;;  %16133 = vmatprep.mubr.msk.f32.mxu1 %vm17942_vm1, %v17941_v20 }
 0x54f   :  { %16141 = vmatprep.subr.mxu1 %v17941_v20 }
 0x550   :  { %v1286_v2 = vpop.f32.mrb[16].mxu0 }
 0x551   :  { %v16120_v3 = vpop.f32.mrb[17].mxu0 }
 0x573   :  { %v1044_v4 = vpop.xlane.xlu0 %1043 }
 0x574   :  { %17643 = vrcp.f32 %v1044_v4  ;;  %v18336_v4 = vld [vmem:[%s20278_s13] ss:$0 sm:$0xff] }
 0x577   :  { %v1738_v11 = vpop.permute.xlu0 %1737 }
 0x579   :  { %v1435_v7 = vpop.f32.mrb[18].mxu0 }
 0x57a   :  { %v16130_v8 = vpop.f32.mrb[19].mxu0  ;;  %16134 = vmatmul.mubr.msk.f32.vlgmr.msra.gmra.mrb[12].mxu1 %vm358_vm2, %v1435_v7 }
 0x57b   :  { %16142 = vmatpush3.msra.mxu1 %v18281_v6  ;;  %16143 = vmatprep.mubr.msk.f32.mxu1 %vm17942_vm1, %v17941_v20  ;;  %v1960_v42 = vpop.permute.xlu0 %1959 }
 0x57c   :  { %16151 = vmatprep.subr.mxu1 %v17941_v20 }
 0x57e   :  { %v17644_v9 = vpop.eup %17643 }
 0x57f   :  { %v1064_v14 = vmul.f32 %v17644_v9, %v17640_v53 }
 0x581   :  { %v1585_v10 = vpop.f32.mrb[20].mxu0 }
 0x582   :  { %v16140_v13 = vpop.f32.mrb[21].mxu0  ;;  %16144 = vmatmul.mubr.msk.f32.vlgmr.msra.gmra.mrb[14].mxu1 %vm358_vm2, %v1585_v10 }
 0x583   :  { %16152 = vmatpush3.msra.mxu1 %v1738_v11  ;;  %16153 = vmatprep.mubr.msk.f32.mxu1 %vm17942_vm1, %v17941_v20 }
 0x584   :  { %16161 = vmatprep.subr.mxu1 %v17941_v20 }
 0x586   :  { %16154 = vmatmul.mubr.msk.f32.vlgmr.msra.gmra.mrb[16].mxu1 %vm358_vm2, %v1064_v14 }
 0x587   :  { %16162 = vmatpush3.msra.mxu1 %v354_v48  ;;  %16163 = vmatprep.mubr.msk.f32.mxu1 %vm17942_vm1, %v17941_v20 }
 0x588   :  { %16171 = vmatprep.subr.mxu1 %v17941_v20 }
 0x5d2   :  { %v999_v15 = vpop.xlane.xlu1 %998 }
 0x5d3   :  { %v1009_v16 = vsub.f32 %v897_v58, %v999_v15 }
 0x5d5   :  { %v1023_v17 = vmul.f32 1.442695, %v1009_v16 }
 0x5d6   :  { %v1002_v18 = vpop.xlane.xlu1 %1001 }
 0x5d7   :  { %17645 = vpow2.f32 %v1023_v17  ;;  %v1010_v19 = vsub.f32 %v18225_v32, %v1002_v18 }
 0x5d9   :  { %v1025_v21 = vmul.f32 1.442695, %v1010_v19 }
 0x5da   :  { %v1041_v22 = vpop.xlane.xlu1 %1040 }
 0x5db   :  { %17647 = vpow2.f32 %v1025_v21 }
 0x5dc   :  { %17649 = vrcp.f32 %v1041_v22 }
 0x5e1   :  { %v17646_v23 = vpop.eup %17645 }
 0x5e2   :  { %v1045_v24 = vsel %vm358_vm2, %v17646_v23, 0.0 }
 0x5e3   :  { %1046 = vadd.xlane.f32.xlu1 %v1045_v24 }
 0x5e5   :  { %v17648_v25 = vpop.eup %17647 }
 0x5e6   :  { %v17650_v26 = vpop.eup %17649  ;;  %v1048_v27 = vsel %vm358_vm2, %v17648_v25, 0.0 }
 0x5e7   :  { %1049 = vadd.xlane.f32.xlu1 %v1048_v27  ;;  %v1063_v28 = vmul.f32 %v17650_v26, %v17642_v62 }
 0x5e9   :  { %16149 = vmatmul.mubr.msk.f32.vlgmr.msra.gmra.mrb[22].mxu0 %vm358_vm2, %v1063_v28 }
 0x5ea   :  { %16157 = vmatpush3.msra.mxu0 %v18234_v37  ;;  %16158 = vmatprep.mubr.msk.f32.mxu0 %vm17942_vm1, %v17941_v20 }
 0x5eb   :  { %16166 = vmatprep.subr.mxu0 %v17941_v20 }
 0x5f8   :  { %2109 = vrot.lane.b32.xlu1 %v18145_v35, %s17945_s24 }
 0x620   :  { %v1359_v29 = vpop.f32.mrb[10].mxu1 }
 0x621   :  { %v1360_v30 = vadd.f32 %v1359_v29, %v1286_v2  ;;  %v16125_v31 = vpop.f32.mrb[11].mxu1  ;;  %v2315_v29 = vld [vmem:[%s20274_s9] sm:$0xff] }
 0x64d   :  { %v1508_v32 = vpop.f32.mrb[12].mxu1 }
 0x64e   :  { %v1512_v33 = vadd.f32 %v1508_v32, %v1360_v30  ;;  %v16135_v34 = vpop.f32.mrb[13].mxu1  ;;  %v2316_v30 = vld [vmem:[%s20274_s9 + $0x8] sm:$0xff]  ;;  %v2318_v32 = vld [vmem:[%s20274_s9 + $0x18] sm:$0xff] }
 0x64f   :  { %v17251_v31 = vpack.c.bf16 %v2316_v30, %v2315_v29  ;;  %v2409_v34 = vld [vmem:[%s20276_s11] sm:$0xff]  ;;  %v15019_v30 = vld [vmem:[%s20290_s29 + $0x28] sm:$0xff] }
 0x650   :  { %v15018_v29 = vld [vmem:[%s20290_s29 + $0x20] sm:$0xff] }
 0x655   :  { %v1658_v36 = vpop.f32.mrb[14].mxu1 }
 0x656   :  { %v1662_v37 = vadd.f32 %v1658_v36, %v1512_v33  ;;  %v16145_v39 = vpop.f32.mrb[15].mxu1  ;;  %v2410_v36 = vld [vmem:[%s20276_s11 + $0x8] sm:$0xff] }
 0x657   :  { %v2412_v39 = vld [vmem:[%s20276_s11 + $0x18] sm:$0xff] }
 0x658   :  { %v2266_v40 = vadd.f32 %v18309_v38, %v1662_v37  ;;  %v17259_v37 = vpack.c.bf16 %v2410_v36, %v2409_v34  ;;  %v15025_v34 = vld [vmem:[%s20268_s3 + $0x20] sm:$0xff]  ;;  %v15026_v36 = vld [vmem:[%s20268_s3 + $0x28] sm:$0xff] }
 0x659   :  { %v1809_v41 = vpop.f32.mrb[16].mxu1 }
 0x65a   :  { %v16155_v43 = vpop.f32.mrb[17].mxu1  ;;  %16159 = vmatmul.mubr.msk.f32.vlgmr.msra.gmra.mrb[24].mxu0 %vm358_vm2, %v1809_v41  ;;  %v2268_v35 = vadd.f32 %v2266_v40, %v18076_v5  ;;  %v2413_v41 = vld [vmem:[%s20276_s11 + $0x20] sm:$0xff] }
 0x65b   :  { %16167 = vmatpush3.msra.mxu0 %v1960_v42  ;;  %16168 = vmatprep.mubr.msk.f32.mxu0 %vm17942_vm1, %v17941_v20  ;;  %v2414_v42 = vld [vmem:[%s20276_s11 + $0x28] sm:$0xff] }
 0x65c   :  { %v2270_v44 = vsel %vm98_vm0, %v2268_v35, 0.0  ;;  %16176 = vmatprep.subr.mxu0 %v17941_v20  ;;  %v17267_v43 = vpack.c.bf16 %v2414_v42, %v2413_v41 }
 0x65d   :  { %2271 = vadd.xlane.f32.xlu0 %v2270_v44  ;;  %v2416_v44 = vld [vmem:[%s20276_s11 + $0x38] sm:$0xff] }
 0x670   :  { %v1047_v45 = vpop.xlane.xlu1 %1046 }
 0x671   :  { %17651 = vrcp.f32 %v1047_v45 }
 0x674   :  { %v1050_v46 = vpop.xlane.xlu1 %1049 }
 0x675   :  { %17653 = vrcp.f32 %v1050_v46  ;;  %v2417_v46 = vld [vmem:[%s20276_s11 + $0x40] sm:$0xff] }
 0x678   :  { %v2110_v49 = vpop.permute.xlu1 %2109 }
 0x67b   :  { %v17652_v47 = vpop.eup %17651 }
 0x67c   :  { %v1065_v48 = vmul.f32 %v17652_v47, %v17646_v23  ;;  %v2418_v47 = vld [vmem:[%s20276_s11 + $0x48] sm:$0xff] }
 0x67e   :  { %16169 = vmatmul.mubr.msk.f32.vlgmr.msra.gmra.mrb[26].mxu0 %vm358_vm2, %v1065_v48  ;;  %v17275_v48 = vpack.c.bf16 %v2418_v47, %v2417_v46  ;;  %v15017_v46 = vld [vmem:[%s20281_s16] ss:$0 sm:$0xff] }
 0x67f   :  { %v17654_v51 = vpop.eup %17653  ;;  %16177 = vmatpush3.msra.mxu0 %v2110_v49  ;;  %16178 = vmatprep.mubr.msk.f32.mxu0 %vm17942_vm1, %v17941_v20  ;;  %v2419_v49 = vld [vmem:[%s20276_s11 + $0x50] sm:$0xff] }
 0x680   :  { %v1066_v5 = vmul.f32 %v17654_v51, %v17648_v25  ;;  %17252 = vmatprep.subr.bf16.mxu0 %v17251_v31  ;;  %v2420_v51 = vld [vmem:[%s20276_s11 + $0x58] sm:$0xff] }
 0x682   :  { %16179 = vmatmul.mubr.msk.f32.vlgmr.msra.gmra.mrb[28].mxu0 %vm358_vm2, %v1066_v5  ;;  %v17279_v5 = vpack.c.bf16 %v2420_v51, %v2419_v49 }
 0x683   :  { %17254 = vmatpush3.bf16.msra.mxu0 %v17251_v31  ;;  %v15020_v31 = vld [vmem:[%s20290_s29 + $0x30] sm:$0xff] }
 0x6bc   :  { %v1732_v52 = vpop.f32.mrb[22].mxu0 }
 0x6bd   :  { %v16150_v53 = vpop.f32.mrb[23].mxu0  ;;  %16164 = vmatmul.mubr.msk.f32.vlgmr.msra.gmra.mrb[18].mxu1 %vm358_vm2, %v1732_v52  ;;  %v2421_v52 = vld [vmem:[%s20276_s11 + $0x60] sm:$0xff] }
 0x6be   :  { %16172 = vmatpush3.msra.mxu1 %v18270_v63  ;;  %16173 = vmatprep.mubr.msk.f32.mxu1 %vm17942_vm1, %v17941_v20  ;;  %v2422_v53 = vld [vmem:[%s20276_s11 + $0x68] sm:$0xff] }
 0x6bf   :  { %16181 = vmatprep.subr.mxu1 %v17941_v20 }
 0x6ea   :  { %v2272_v54 = vpop.xlane.xlu0 %2271 }
 0x6eb   :  { %v2277_v55 = vmul.f32 0.03125, %v2272_v54  ;;  %v17283_v54 = vpack.c.bf16 %v2422_v53, %v2421_v52  ;;  %v15028_v52 = vld [vmem:[%s20268_s3 + $0x38] sm:$0xff] }
 0x6ed   :  { %v2279_v56 = vsub.f32 %v2268_v35, %v2277_v55  ;;  %v2415_v35 = vld [vmem:[%s20276_s11 + $0x30] sm:$0xff] }
 0x6ee   :  { %v17271_v45 = vpack.c.bf16 %v2416_v44, %v2415_v35  ;;  %v15016_v44 = vld [vmem:[%s20280_s15] ss:$0 sm:$0xff] }
 0x6ef   :  { %v2281_v57 = vmul.f32 %v2279_v56, %v2279_v56 }
 0x6f1   :  { %v2283_v58 = vsel %vm98_vm0, %v2281_v57, 0.0 }
 0x6f2   :  { %2284 = vadd.xlane.f32.xlu0 %v2283_v58 }
 0x72d   :  { %v1882_v59 = vpop.f32.mrb[24].mxu0 }
 0x72e   :  { %v16160_v60 = vpop.f32.mrb[25].mxu0 }
 0x751   :  { %v2031_v61 = vpop.f32.mrb[26].mxu0 }
 0x752   :  { %v16170_v62 = vpop.f32.mrb[27].mxu0  ;;  %16174 = vmatmul.mubr.msk.f32.vlgmr.msra.gmra.mrb[20].mxu1 %vm358_vm2, %v2031_v61 }
 0x753   :  { %16182 = vmatpush3.msra.mxu1 %v18281_v6  ;;  %16183 = vmatprep.mubr.msk.f32.mxu1 %vm17942_vm1, %v17941_v20  ;;  %v18341_v6 = vld [vmem:[%s20279_s14] ss:$0 sm:$0xff]  ;;  %v2423_v62 = vld [vmem:[%s20276_s11 + $0x70] sm:$0xff] }
 0x754   :  { %17260 = vmatprep.subr.bf16.mxu1 %v17259_v37 }
 0x755   :  { %v2181_v63 = vpop.f32.mrb[28].mxu0 }
 0x756   :  { %v16180_v0 = vpop.f32.mrb[29].mxu0  ;;  %16184 = vmatmul.mubr.msk.f32.vlgmr.msra.gmra.mrb[22].mxu1 %vm358_vm2, %v2181_v63  ;;  %v2424_v63 = vld [vmem:[%s20276_s11 + $0x78] sm:$0xff] }
 0x757   :  { %17262 = vmatpush3.bf16.msra.mxu1 %v17259_v37  ;;  %v17287_v0 = vpack.c.bf16 %v2424_v63, %v2423_v62  ;;  %v15022_v62 = vld [vmem:[#allocation5 + $0x1] ss:$0 sm:$0xff] }
 0x77f   :  { %v2285_v50 = vpop.xlane.xlu0 %2284 }
 0x780   :  { %v2289_v1 = vmul.f32 0.03125, %v2285_v50  ;;  %v15012_v50 = vld [vmem:[%s20275_s10] ss:$0 sm:$0xff] }
 0x782   :  { %v2291_v2 = vadd.f32 1e-05, %v2289_v1 }
 0x784   :  { %17655 = vrsqrt.f32 %v2291_v2 }
 0x78e   :  { %v17656_v3 = vpop.eup %17655 }
 0x78f   :  { %v2295_v7 = vmul.f32 %v17656_v3, %v2279_v56 }
 0x790   :  { %v1955_v8 = vpop.f32.mrb[18].mxu1 }
 0x791   :  { %v1956_v9 = vadd.f32 %v1955_v8, %v1882_v59  ;;  %v16165_v10 = vpop.f32.mrb[19].mxu1  ;;  %v2304_v11 = vmul.f32 %v18336_v4, %v2295_v7 }
 0x793   :  { %v18345_v13 = vadd.f32 %v18341_v6, %v2304_v11 }
 0x795   :  { %16194 = vmatprep.mubr.msk.f32.mxu0 %vm98_vm0, %v18345_v13 }
 0x825   :  { %v2104_v14 = vpop.f32.mrb[20].mxu1 }
 0x826   :  { %v2108_v15 = vadd.f32 %v2104_v14, %v1956_v9  ;;  %v16175_v16 = vpop.f32.mrb[21].mxu1 }
 0x829   :  { %v2254_v17 = vpop.f32.mrb[22].mxu1 }
 0x82a   :  { %v2258_v18 = vadd.f32 %v2254_v17, %v2108_v15  ;;  %v16185_v19 = vpop.f32.mrb[23].mxu1 }
 0x82c   :  { %v2267_v21 = vadd.f32 %v18309_v38, %v2258_v18  ;;  %v2411_v38 = vld [vmem:[%s20276_s11 + $0x10] sm:$0xff] }
 0x82d   :  { %v17263_v40 = vpack.c.bf16 %v2412_v39, %v2411_v38  ;;  %v17299_v38 = vpack.c.bf16 %v15026_v36, %v15025_v34 }
 0x82e   :  { %v2269_v22 = vadd.f32 %v2267_v21, %v18092_v12  ;;  %v2317_v12 = vld [vmem:[%s20274_s9 + $0x10] sm:$0xff] }
 0x82f   :  { %v17255_v33 = vpack.c.bf16 %v2318_v32, %v2317_v12  ;;  %17264 = vmatprep.subr.bf16.mxu1 %v17263_v40  ;;  %v17291_v12 = vpack.c.bf16 %v15019_v30, %v15018_v29  ;;  %v15021_v32 = vld [vmem:[%s20290_s29 + $0x38] sm:$0xff] }
 0x830   :  { %v2273_v23 = vsel %vm98_vm0, %v2269_v22, 0.0  ;;  %17266 = vmatpush3.bf16.msra.mxu1 %v17263_v40 }
 0x831   :  { %2274 = vadd.xlane.f32.xlu1 %v2273_v23  ;;  %17256 = vmatprep.subr.bf16.mxu0 %v17255_v33 }
 0x832   :  { %17258 = vmatpush3.bf16.msra.mxu0 %v17255_v33  ;;  %17268 = vmatprep.subr.bf16.mxu1 %v17267_v43  ;;  %v17295_v33 = vpack.c.bf16 %v15021_v32, %v15020_v31 }
 0x833   :  { %17292 = vmatprep.subr.bf16.mxu0 %v17291_v12 }
 0x834   :  { %17270 = vmatpush3.bf16.msra.mxu1 %v17267_v43 }
 0x835   :  { %17272 = vmatprep.subr.bf16.mxu1 %v17271_v45 }
 0x838   :  { %17274 = vmatpush3.bf16.msra.mxu1 %v17271_v45 }
 0x839   :  { %17276 = vmatprep.subr.bf16.mxu1 %v17275_v48 }
 0x83c   :  { %17278 = vmatpush3.bf16.msra.mxu1 %v17275_v48 }
 0x83d   :  { %17280 = vmatprep.subr.bf16.mxu1 %v17279_v5 }
 0x840   :  { %17282 = vmatpush3.bf16.msra.mxu1 %v17279_v5  ;;  %v15027_v5 = vld [vmem:[%s20268_s3 + $0x30] sm:$0xff] }
 0x841   :  { %17284 = vmatprep.subr.bf16.mxu1 %v17283_v54 }
 0x844   :  { %17286 = vmatpush3.bf16.msra.mxu1 %v17283_v54 }
 0x845   :  { %17288 = vmatprep.subr.bf16.mxu1 %v17287_v0 }
 0x848   :  { %17290 = vmatpush3.bf16.msra.mxu1 %v17287_v0 }
 0x849   :  { %16270 = vmatprep.subr.mxu1 %v17941_v20 }
 0x8be   :  { %v2275_v24 = vpop.xlane.xlu1 %2274 }
 0x8bf   :  { %v2278_v25 = vmul.f32 0.03125, %v2275_v24 }
 0x8c1   :  { %v2280_v26 = vsub.f32 %v2269_v22, %v2278_v25 }
 0x8c3   :  { %v2282_v27 = vmul.f32 %v2280_v26, %v2280_v26 }
 0x8c5   :  { %v2286_v28 = vsel %vm98_vm0, %v2282_v27, 0.0 }
 0x8c6   :  { %2287 = vadd.xlane.f32.xlu0 %v2286_v28 }
 0x953   :  { %v2288_v55 = vpop.xlane.xlu0 %2287 }
 0x954   :  { %v2290_v56 = vmul.f32 0.03125, %v2288_v55  ;;  %v17303_v55 = vpack.c.bf16 %v15028_v52, %v15027_v5 }
 0x956   :  { %v2292_v57 = vadd.f32 1e-05, %v2290_v56  ;;  %v15033_v56 = vld [vmem:[%s20270_s5 + $0x20] sm:$0xff] }
 0x958   :  { %17657 = vrsqrt.f32 %v2292_v57  ;;  %v15034_v57 = vld [vmem:[%s20270_s5 + $0x28] sm:$0xff] }
 0x962   :  { %v17658_v58 = vpop.eup %17657 }
 0x963   :  { %v2296_v59 = vmul.f32 %v17658_v58, %v2280_v26  ;;  %v17307_v58 = vpack.c.bf16 %v15034_v57, %v15033_v56 }
 0x965   :  { %v2305_v60 = vmul.f32 %v18336_v4, %v2296_v59  ;;  %v15035_v59 = vld [vmem:[%s20270_s5 + $0x30] sm:$0xff] }
 0x967   :  { %v2314_v61 = vadd.f32 %v18341_v6, %v2305_v60  ;;  %v15015_v6 = vld [vmem:[%s20277_s12] ss:$0 sm:$0xff]  ;;  %v15036_v60 = vld [vmem:[%s20270_s5 + $0x38] sm:$0xff] }
 0x969   :  { %16195 = vmatmul.mubr.msk.f32.vlgmr.msra.gmra.mrb[30].mxu0 %vm98_vm0, %v2314_v61 }
 0x96a   :  { %17294 = vmatpush3.bf16.msra.mxu0 %v17291_v12 }
 0x96b   :  { %17296 = vmatprep.subr.bf16.mxu0 %v17295_v33 }
 0x96e   :  { %17298 = vmatpush3.bf16.msra.mxu0 %v17295_v33 }
 0x96f   :  { %17300 = vmatprep.subr.bf16.mxu0 %v17299_v38 }
 0xa3c   :  { %v16196_v1 = vpop.f32.mrb[30].mxu0 }
 0xa3d   :  { %v2404_v2 = vadd.f32 %v16196_v1, %v15012_v50  ;;  %v2398_v3 = vpop.f32.mrb[31].mxu0 }
 0xa3e   :  { %v2399_v4 = vadd.f32 %v15012_v50, %v2398_v3 }
 0xa3f   :  { %v2408_v8 = vmax.f32 %v2404_v2, 0.0  ;;  %v15030_v2 = vld [vmem:[%s20269_s4 + $0x1] ss:$0 sm:$0xff] }
 0xa40   :  { %v2407_v7 = vmax.f32 %v2399_v4, 0.0 }
 0xa42   :  { %16229 = vmatprep.mubr.f32.mxu1 %v2407_v7 }
 0xa43   :  { %16230 = vmatmul.mubr.f32.vlgmr.msra.gmra.mrb[24].mxu1 %v2408_v8 }
 0xa44   :  { %16272 = vmatprep.mubr.msk.f32.mxu1 %vm17942_vm1, %v17941_v20 }
 0xb16   :  { %v16231_v9 = vpop.f32.mrb[24].mxu1 }
 0xb17   :  { %v2498_v10 = vpop.f32.mrb[25].mxu1  ;;  %v2504_v11 = vadd.f32 %v16231_v9, %v15015_v6 }
 0xb18   :  { %v2499_v14 = vadd.f32 %v15015_v6, %v2498_v10  ;;  %v15038_v6 = vld [vmem:[%s20271_s6 + $0x1] ss:$0 sm:$0xff] }
 0xb19   :  { %v2508_v17 = vadd.f32 %v2504_v11, %v2314_v61  ;;  %v17311_v61 = vpack.c.bf16 %v15036_v60, %v15035_v59 }
 0xb1a   :  { %v2507_v15 = vadd.f32 %v2499_v14, %v18345_v13 }
 0xb1b   :  { %v2512_v18 = vsel %vm98_vm0, %v2508_v17, 0.0 }
 0xb1c   :  { %v2509_v16 = vsel %vm98_vm0, %v2507_v15, 0.0 }
 0xb1d   :  { %2510 = vadd.xlane.f32.xlu0 %v2509_v16 }
 0xb21   :  { %2513 = vadd.xlane.f32.xlu0 %v2512_v18 }
 0xbaa   :  { %v2511_v19 = vpop.xlane.xlu0 %2510 }
 0xbab   :  { %v2515_v21 = vmul.f32 0.03125, %v2511_v19 }
 0xbad   :  { %v2517_v22 = vsub.f32 %v2507_v15, %v2515_v21 }
 0xbae   :  { %v2514_v23 = vpop.xlane.xlu0 %2513 }
 0xbaf   :  { %v2516_v24 = vmul.f32 0.03125, %v2514_v23  ;;  %v2519_v25 = vmul.f32 %v2517_v22, %v2517_v22 }
 0xbb1   :  { %v2518_v26 = vsub.f32 %v2508_v17, %v2516_v24  ;;  %v2521_v27 = vsel %vm98_vm0, %v2519_v25, 0.0 }
 0xbb2   :  { %2522 = vadd.xlane.f32.xlu0 %v2521_v27 }
 0xbb3   :  { %v2520_v28 = vmul.f32 %v2518_v26, %v2518_v26 }
 0xbb5   :  { %v2524_v13 = vsel %vm98_vm0, %v2520_v28, 0.0 }
 0xbb6   :  { %2525 = vadd.xlane.f32.xlu0 %v2524_v13 }
 0xc3f   :  { %v2523_v37 = vpop.xlane.xlu0 %2522 }
 0xc40   :  { %v2527_v39 = vmul.f32 0.03125, %v2523_v37 }
 0xc42   :  { %v2529_v40 = vadd.f32 1e-05, %v2527_v39 }
 0xc43   :  { %v2526_v41 = vpop.xlane.xlu0 %2525 }
 0xc44   :  { %17659 = vrsqrt.f32 %v2529_v40  ;;  %v2528_v42 = vmul.f32 0.03125, %v2526_v41 }
 0xc46   :  { %v2530_v43 = vadd.f32 1e-05, %v2528_v42 }
 0xc48   :  { %17661 = vrsqrt.f32 %v2530_v43 }
 0xc4e   :  { %v17660_v35 = vpop.eup %17659 }
 0xc4f   :  { %v2533_v45 = vmul.f32 %v17660_v35, %v2517_v22 }
 0xc51   :  { %v2542_v47 = vmul.f32 %v15016_v44, %v2533_v45 }
 0xc52   :  { %v17662_v48 = vpop.eup %17661 }
 0xc53   :  { %v2534_v49 = vmul.f32 %v17662_v48, %v2518_v26  ;;  %v18454_v51 = vadd.f32 %v15017_v46, %v2542_v47 }
 0xc55   :  { %v2543_v53 = vmul.f32 %v15016_v44, %v2534_v49  ;;  %16240 = vmatprep.mubr.msk.f32.mxu0 %vm98_vm0, %v18454_v51 }
 0xc57   :  { %v18464_v54 = vadd.f32 %v15017_v46, %v2543_v53 }
 0xc59   :  { %16241 = vmatmul.mubr.msk.f32.vlgmr.msra.gmra.mrb[32].mxu0 %vm98_vm0, %v18464_v54 }
 0xc5a   :  { %17302 = vmatpush3.bf16.msra.mxu0 %v17299_v38  ;;  %16251 = vmatprep.mubr.msk.f32.mxu0 %vm98_vm0, %v18454_v51 }
 0xc5b   :  { %17304 = vmatprep.subr.bf16.mxu0 %v17303_v55 }
 0xc5e   :  { %17306 = vmatpush3.bf16.msra.mxu0 %v17303_v55 }
 0xc5f   :  { %17308 = vmatprep.subr.bf16.mxu0 %v17307_v58 }
 0xc61   :  { %16252 = vmatmul.mubr.msk.f32.vlgmr.msra.gmra.mrb[34].mxu0 %vm98_vm0, %v18464_v54 }
 0xc62   :  { %17310 = vmatpush3.bf16.msra.mxu0 %v17307_v58  ;;  %16262 = vmatprep.mubr.msk.f32.mxu0 %vm98_vm0, %v18454_v51 }
 0xc63   :  { %17312 = vmatprep.subr.bf16.mxu0 %v17311_v61 }
 0xc66   :  { %17314 = vmatpush3.bf16.msra.mxu0 %v17311_v61 }
 0xc67   :  { %16265 = vmatprep.subr.mxu0 %v17941_v20 }
 0xc69   :  { %16263 = vmatmul.mubr.msk.f32.vlgmr.msra.gmra.mrb[36].mxu0 %vm98_vm0, %v18464_v54 }
 0xc6a   :  { %16267 = vmatprep.mubr.msk.f32.mxu0 %vm17942_vm1, %v17941_v20 }
 0xd2c   :  { %v16242_v63 = vpop.f32.mrb[32].mxu0 }
 0xd2d   :  { %v2638_v0 = vpop.f32.mrb[33].mxu0  ;;  %v2644_v14 = vadd.f32 %v16242_v63, %v15022_v62 }
 0xd2e   :  { %v2639_v50 = vadd.f32 %v15022_v62, %v2638_v0 }
 0xd2f   :  { %v18510_v15 = vmul.f32 0.35355338, %v2644_v14 }
 0xd30   :  { %v2647_v1 = vmul.f32 0.35355338, %v2639_v50 }
 0xd32   :  { %2906 = vrot.lane.b32.xlu0 %v2647_v1, %s17944_s23 }
 0xd34   :  { %v16253_v3 = vpop.f32.mrb[34].mxu0 }
 0xd35   :  { %v2734_v4 = vadd.f32 %v16253_v3, %v15030_v2  ;;  %v2728_v7 = vpop.f32.mrb[35].mxu0 }
 0xd36   :  { %v2729_v8 = vadd.f32 %v15030_v2, %v2728_v7 }
 0xd38   :  { %2908 = vrot.lane.b32.xlu1 %v2729_v8, %s17944_s23  ;;  %16266 = vmatpush3.xpose.msk.msra.mxu0 %vm358_vm2, %v2729_v8 }
 0xd39   :  { %3064 = vrot.lane.b32.xlu0 %v2729_v8, %s17945_s24  ;;  %16275 = vmatprep.subr.mxu0 %v17941_v20 }
 0xd3b   :  { %16268 = vmatmul.mubr.msk.f32.vlgmr.msra.gmra.mrb[38].mxu0 %vm358_vm2, %v2647_v1 }
 0xd3c   :  { %v16264_v9 = vpop.f32.mrb[36].mxu0  ;;  %2986 = vrot.lane.b32.xlu1 %v2729_v8, %s17943_s22  ;;  %16277 = vmatprep.mubr.msk.f32.mxu0 %vm17942_vm1, %v17941_v20 }
 0xd3d   :  { %v18506_v10 = vadd.f32 %v16264_v9, %v15038_v6  ;;  %v2816_v11 = vpop.f32.mrb[37].mxu0 }
 0xd3e   :  { %v18544_v32 = vadd.f32 %v15038_v6, %v2816_v11 }
 0xd40   :  { %2984 = vrot.lane.b32.xlu1 %v2647_v1, %s17943_s22 }
 0xd44   :  { %3062 = vrot.lane.b32.xlu1 %v2647_v1, %s17945_s24 }
 0xd48   :  { %3216 = vrot.lane.b32.xlu1 %v18510_v15, %s17944_s23 }
 0xda4   :  { %v2907_v16 = vpop.permute.xlu0 %2906 }
 0xdaa   :  { %v2909_v17 = vpop.permute.xlu1 %2908 }
 0xdab   :  { %16271 = vmatpush3.xpose.msk.msra.mxu1 %vm358_vm2, %v2909_v17  ;;  %v3065_v18 = vpop.permute.xlu0 %3064 }
 0xdac   :  { %16280 = vmatprep.subr.mxu1 %v17941_v20 }
 0xdae   :  { %v2987_v19 = vpop.permute.xlu1 %2986  ;;  %16273 = vmatmul.mubr.msk.f32.vlgmr.msra.gmra.mrb[26].mxu1 %vm358_vm2, %v2907_v16  ;;  %v18597_v16 = vld [vmem:[%s20272_s7 + $0x28] sm:$0xff] }
 0xdaf   :  { %16276 = vmatpush3.xpose.msk.msra.mxu0 %vm358_vm2, %v2987_v19  ;;  %16281 = vmatpush3.xpose.msk.msra.mxu1 %vm358_vm2, %v3065_v18 }
 0xdb0   :  { %16285 = vmatprep.subr.mxu0 %v17941_v20  ;;  %16282 = vmatprep.mubr.msk.f32.mxu1 %vm17942_vm1, %v17941_v20 }
 0xdb1   :  { %16290 = vmatprep.subr.mxu1 %v17941_v20 }
 0xdb2   :  { %v2985_v21 = vpop.permute.xlu1 %2984 }
 0xdb3   :  { %16278 = vmatmul.mubr.msk.f32.vlgmr.msra.gmra.mrb[40].mxu0 %vm358_vm2, %v2985_v21 }
 0xdb4   :  { %16286 = vmatpush3.xpose.msk.msra.mxu0 %vm358_vm2, %v2734_v4  ;;  %16287 = vmatprep.mubr.msk.f32.mxu0 %vm17942_vm1, %v17941_v20 }
 0xdb5   :  { %16295 = vmatprep.subr.mxu0 %v17941_v20 }
 0xdb6   :  { %v3063_v22 = vpop.permute.xlu1 %3062 }
 0xdb7   :  { %16283 = vmatmul.mubr.msk.f32.vlgmr.msra.gmra.mrb[28].mxu1 %vm358_vm2, %v3063_v22  ;;  %16288 = vmatmul.mubr.msk.f32.vlgmr.msra.gmra.mrb[42].mxu0 %vm358_vm2, %v18510_v15 }
 0xdb8   :  { %16292 = vmatprep.mubr.msk.f32.mxu1 %vm17942_vm1, %v17941_v20  ;;  %16297 = vmatprep.mubr.msk.f32.mxu0 %vm17942_vm1, %v17941_v20 }
 0xdba   :  { %v3217_v40 = vpop.permute.xlu1 %3216 }
 0xe0e   :  { %v18535_v23 = vpop.f32.mrb[38].mxu0 }
 0xe0f   :  { %v16269_v24 = vpop.f32.mrb[39].mxu0  ;;  %v3450_v49 = vsel %vm358_vm2, %v18535_v23, -inf }
 0xe81   :  { %v2980_v25 = vpop.f32.mrb[26].mxu1 }
 0xe82   :  { %v16274_v26 = vpop.f32.mrb[27].mxu1  ;;  %v3453_v27 = vsel %vm358_vm2, %v2980_v25, -inf }
 0xe83   :  { %3454 = vmax.xlane.f32.xlu0 %v3453_v27 }
 0xe86   :  { %v3058_v28 = vpop.f32.mrb[40].mxu0 }
 0xe87   :  { %v16279_v13 = vpop.f32.mrb[41].mxu0  ;;  %v3456_v33 = vsel %vm358_vm2, %v3058_v28, -inf }
 0xe8a   :  { %v18538_v29 = vpop.f32.mrb[28].mxu1  ;;  %v18540_v30 = vpop.f32.mrb[42].mxu0 }
 0xe8b   :  { %v16284_v31 = vpop.f32.mrb[29].mxu1  ;;  %v16289_v12 = vpop.f32.mrb[43].mxu0  ;;  %v3459_v34 = vsel %vm358_vm2, %v18538_v29, -inf  ;;  %v3462_v7 = vsel %vm358_vm2, %v18540_v30, -inf }
 0xe99   :  { %3218 = vrot.lane.b32.xlu0 %v2734_v4, %s17944_s23 }
 0xe9d   :  { %3374 = vrot.lane.b32.xlu0 %v2734_v4, %s17945_s24 }
 0xea1   :  { %3612 = vrot.lane.b32.xlu0 %v18544_v32, %s17944_s23 }
 0xec0   :  { %3457 = vmax.xlane.f32.xlu0 %v3456_v33 }
 0xec4   :  { %3460 = vmax.xlane.f32.xlu0 %v3459_v34 }
 0xeda   :  { %3296 = vrot.lane.b32.xlu0 %v2734_v4, %s17943_s22 }
 0xf10   :  { %v3455_v36 = vpop.xlane.xlu0 %3454 }
 0xf11   :  { %v3475_v38 = vsub.f32 %v2980_v25, %v3455_v36 }
 0xf13   :  { %v3484_v37 = vmul.f32 1.442695, %v3475_v38 }
 0xf14   :  { %v3219_v39 = vpop.permute.xlu0 %3218 }
 0xf15   :  { %17663 = vpow2.f32 %v3484_v37  ;;  %16291 = vmatpush3.xpose.msk.msra.mxu1 %vm358_vm2, %v3219_v39 }
 0xf16   :  { %16300 = vmatprep.subr.mxu1 %v17941_v20 }
 0xf18   :  { %16293 = vmatmul.mubr.msk.f32.vlgmr.msra.gmra.mrb[30].mxu1 %vm358_vm2, %v3217_v40  ;;  %v3375_v41 = vpop.permute.xlu0 %3374 }
 0xf19   :  { %16301 = vmatpush3.xpose.msk.msra.mxu1 %vm358_vm2, %v3375_v41  ;;  %16302 = vmatprep.mubr.msk.f32.mxu1 %vm17942_vm1, %v17941_v20 }
 0xf1a   :  { %16310 = vmatprep.subr.mxu1 %v17941_v20 }
 0xf1c   :  { %v3613_v35 = vpop.permute.xlu0 %3612 }
 0xf1f   :  { %v17664_v42 = vpop.eup %17663 }
 0xf20   :  { %v3501_v43 = vsel %vm358_vm2, %v17664_v42, 0.0 }
 0xf21   :  { %3502 = vadd.xlane.f32.xlu1 %v3501_v43 }
 0xf32   :  { %3372 = vrot.lane.b32.xlu1 %v18510_v15, %s17945_s24 }
 0xf4d   :  { %v3458_v44 = vpop.xlane.xlu0 %3457 }
 0xf4e   :  { %v3476_v45 = vsub.f32 %v3058_v28, %v3458_v44  ;;  %v15041_v28 = vld [vmem:[%s20272_s7 + $0x20] sm:$0xff] }
 0xf50   :  { %v3486_v46 = vmul.f32 1.442695, %v3476_v45 }
 0xf51   :  { %v3461_v47 = vpop.xlane.xlu0 %3460 }
 0xf52   :  { %17665 = vpow2.f32 %v3486_v46  ;;  %v3477_v50 = vsub.f32 %v18538_v29, %v3461_v47  ;;  %v18644_v47 = vld [vmem:[%s20272_s7 + $0x38] sm:$0xff] }
 0xf54   :  { %v3488_v1 = vmul.f32 1.442695, %v3477_v50 }
 0xf55   :  { %v3297_v48 = vpop.permute.xlu0 %3296 }
 0xf56   :  { %3451 = vmax.xlane.f32.xlu1 %v3450_v49  ;;  %16296 = vmatpush3.xpose.msk.msra.mxu0 %vm358_vm2, %v3297_v48 }
 0xf57   :  { %16305 = vmatprep.subr.mxu0 %v17941_v20 }
 0xf5c   :  { %v17666_v5 = vpop.eup %17665 }
 0xf5d   :  { %v3504_v52 = vsel %vm358_vm2, %v17666_v5, 0.0 }
 0xf5e   :  { %3505 = vadd.xlane.f32.xlu0 %v3504_v52 }
 0xf74   :  { %3984 = vrot.lane.b32.xlu0 %v18544_v32, %s17945_s24 }
 0xfae   :  { %v3503_v53 = vpop.xlane.xlu1 %3502 }
 0xfaf   :  { %17667 = vrcp.f32 %v3503_v53 }
 0xfb2   :  { %v3373_v55 = vpop.permute.xlu1 %3372 }
 0xfb3   :  { %16303 = vmatmul.mubr.msk.f32.vlgmr.msra.gmra.mrb[32].mxu1 %vm358_vm2, %v3373_v55 }
 0xfb4   :  { %16311 = vmatpush3.msra.mxu1 %v3613_v35  ;;  %16312 = vmatprep.mubr.msk.f32.mxu1 %vm17942_vm1, %v17941_v20 }
 0xfb5   :  { %16320 = vmatprep.subr.mxu1 %v17941_v20 }
 0xfb9   :  { %v17668_v56 = vpop.eup %17667 }
 0xfba   :  { %v3531_v57 = vmul.f32 %v17668_v56, %v17664_v42  ;;  %v18633_v42 = vld [vmem:[%s20272_s7 + $0x30] sm:$0xff] }
 0xfbc   :  { %16313 = vmatmul.mubr.msk.f32.vlgmr.msra.gmra.mrb[34].mxu1 %vm358_vm2, %v3531_v57 }
 0xfbd   :  { %16322 = vmatprep.mubr.msk.f32.mxu1 %vm17942_vm1, %v17941_v20  ;;  %16321 = vmatpush3.msra.mxu1 %v15041_v28 }
 0xfbe   :  { %16330 = vmatprep.subr.mxu1 %v17941_v20 }
 0xfe3   :  { %v3452_v58 = vpop.xlane.xlu1 %3451 }
 0xfe4   :  { %v3474_v59 = vsub.f32 %v18535_v23, %v3452_v58 }
 0xfe6   :  { %v3482_v60 = vmul.f32 1.442695, %v3474_v59 }
 0xfe8   :  { %17669 = vpow2.f32 %v3482_v60 }
 0xfe9   :  { %17671 = vpow2.f32 %v3488_v1 }
 0xfeb   :  { %v3290_v61 = vpop.f32.mrb[30].mxu1  ;;  %v3506_v19 = vpop.xlane.xlu0 %3505 }
 0xfec   :  { %v16294_v62 = vpop.f32.mrb[31].mxu1  ;;  %v3465_v4 = vsel %vm358_vm2, %v3290_v61, -inf }
 0xfef   :  { %v3985_v25 = vpop.permute.xlu0 %3984 }
 0xff2   :  { %v17670_v63 = vpop.eup %17669 }
 0xff3   :  { %v3498_v0 = vsel %vm358_vm2, %v17670_v63, 0.0  ;;  %v17672_v2 = vpop.eup %17671 }
 0xff4   :  { %3499 = vadd.xlane.f32.xlu1 %v3498_v0  ;;  %v3507_v3 = vsel %vm358_vm2, %v17672_v2, 0.0 }
0x1005   :  { %3294 = vrot.lane.b32.xlu1 %v18510_v15, %s17943_s22 }
0x1029   :  { %3508 = vadd.xlane.f32.xlu1 %v3507_v3 }
0x103a   :  { %3834 = vrot.lane.b32.xlu1 %v18544_v32, %s17943_s22 }
0x105e   :  { %3466 = vmax.xlane.f32.xlu1 %v3465_v4 }
0x1062   :  { %3463 = vmax.xlane.f32.xlu1 %v3462_v7 }
0x1081   :  { %v3500_v8 = vpop.xlane.xlu1 %3499 }
0x1082   :  { %17673 = vrcp.f32 %v3500_v8 }
0x1083   :  { %17675 = vrcp.f32 %v3506_v19 }
0x1085   :  { %v3295_v6 = vpop.permute.xlu1 %3294 }
0x1086   :  { %16298 = vmatmul.mubr.msk.f32.vlgmr.msra.gmra.mrb[44].mxu0 %vm358_vm2, %v3295_v6  ;;  %v18588_v9 = vpop.f32.mrb[32].mxu1 }
0x1087   :  { %16306 = vmatpush3.msra.mxu0 %v18544_v32  ;;  %v16304_v11 = vpop.f32.mrb[33].mxu1  ;;  %16307 = vmatprep.mubr.msk.f32.mxu0 %vm17942_vm1, %v17941_v20  ;;  %v3471_v40 = vsel %vm358_vm2, %v18588_v9, -inf }
0x1088   :  { %16315 = vmatprep.subr.mxu0 %v17941_v20 }
0x108c   :  { %v17674_v14 = vpop.eup %17673 }
0x108d   :  { %v3530_v15 = vmul.f32 %v17674_v14, %v17670_v63  ;;  %v17676_v22 = vpop.eup %17675 }
0x108e   :  { %v3532_v24 = vmul.f32 %v17676_v22, %v17666_v5 }
0x108f   :  { %16308 = vmatmul.mubr.msk.f32.vlgmr.msra.gmra.mrb[46].mxu0 %vm358_vm2, %v3530_v15  ;;  %v3684_v17 = vpop.f32.mrb[34].mxu1 }
0x1090   :  { %v16314_v18 = vpop.f32.mrb[35].mxu1  ;;  %16316 = vmatpush3.msra.mxu0 %v18597_v16  ;;  %16317 = vmatprep.mubr.msk.f32.mxu0 %vm17942_vm1, %v17941_v20 }
0x1091   :  { %16325 = vmatprep.subr.mxu0 %v17941_v20 }
0x1093   :  { %16318 = vmatmul.mubr.msk.f32.vlgmr.msra.gmra.mrb[48].mxu0 %vm358_vm2, %v3684_v17  ;;  %v18672_v17 = vld [vmem:[%s20273_s8 + $0x1] ss:$0 sm:$0xff] }
0x1094   :  { %16327 = vmatprep.mubr.msk.f32.mxu0 %vm17942_vm1, %v17941_v20 }
0x10b6   :  { %v3509_v21 = vpop.xlane.xlu1 %3508 }
0x10b7   :  { %17677 = vrcp.f32 %v3509_v21 }
0x10ba   :  { %v3835_v23 = vpop.permute.xlu1 %3834 }
0x10bb   :  { %16326 = vmatpush3.msra.mxu0 %v3835_v23 }
0x10bc   :  { %16328 = vmatmul.mubr.msk.f32.vlgmr.msra.gmra.mrb[50].mxu0 %vm358_vm2, %v3532_v24  ;;  %16335 = vmatprep.subr.mxu0 %v17941_v20 }
0x10bd   :  { %16336 = vmatpush3.msra.mxu0 %v3985_v25  ;;  %16337 = vmatprep.mubr.msk.f32.mxu0 %vm17942_vm1, %v17941_v20 }
0x10be   :  { %16345 = vmatprep.subr.mxu0 %v17941_v20 }
0x10c1   :  { %v17678_v26 = vpop.eup %17677 }
0x10c2   :  { %v3533_v27 = vmul.f32 %v17678_v26, %v17672_v2 }
0x10c4   :  { %16338 = vmatmul.mubr.msk.f32.vlgmr.msra.gmra.mrb[52].mxu0 %vm358_vm2, %v3533_v27 }
0x10c5   :  { %16346 = vmatpush3.msra.mxu0 %v18506_v10  ;;  %16347 = vmatprep.mubr.msk.f32.mxu0 %vm17942_vm1, %v17941_v20 }
0x10c6   :  { %16355 = vmatprep.subr.mxu0 %v17941_v20 }
0x10eb   :  { %v3467_v13 = vpop.xlane.xlu1 %3466 }
0x10ec   :  { %v3479_v29 = vsub.f32 %v3290_v61, %v3467_v13 }
0x10ee   :  { %v3492_v31 = vmul.f32 1.442695, %v3479_v29 }
0x10ef   :  { %v3464_v33 = vpop.xlane.xlu1 %3463 }
0x10f0   :  { %17679 = vpow2.f32 %v3492_v31  ;;  %v3478_v34 = vsub.f32 %v18540_v30, %v3464_v33 }
0x10f2   :  { %v3490_v36 = vmul.f32 1.442695, %v3478_v34 }
0x10f4   :  { %17681 = vpow2.f32 %v3490_v36 }
0x10fa   :  { %v17680_v12 = vpop.eup %17679 }
0x10fb   :  { %v3513_v32 = vsel %vm358_vm2, %v17680_v12, 0.0 }
0x10fc   :  { %3514 = vadd.xlane.f32.xlu0 %v3513_v32 }
0x10fe   :  { %v17682_v41 = vpop.eup %17681 }
0x10ff   :  { %v3510_v30 = vsel %vm358_vm2, %v17682_v41, 0.0 }
0x1112   :  { %4208 = vrot.lane.b32.xlu0 %v18506_v10, %s17944_s23 }
0x1116   :  { %4430 = vrot.lane.b32.xlu0 %v18506_v10, %s17943_s22 }
0x1159   :  { %v3368_v38 = vpop.f32.mrb[44].mxu0 }
0x115a   :  { %v16299_v37 = vpop.f32.mrb[45].mxu0  ;;  %v3468_v39 = vsel %vm358_vm2, %v3368_v38, -inf }
0x115b   :  { %3469 = vmax.xlane.f32.xlu1 %v3468_v39 }
0x115f   :  { %3472 = vmax.xlane.f32.xlu1 %v3471_v40 }
0x1162   :  { %v3607_v43 = vpop.f32.mrb[46].mxu0 }
0x1163   :  { %3511 = vadd.xlane.f32.xlu1 %v3510_v30  ;;  %v16309_v35 = vpop.f32.mrb[47].mxu0  ;;  %16323 = vmatmul.mubr.msk.f32.vlgmr.msra.gmra.mrb[36].mxu1 %vm358_vm2, %v3607_v43 }
0x1164   :  { %16331 = vmatpush3.msra.mxu1 %v18633_v42  ;;  %16332 = vmatprep.mubr.msk.f32.mxu1 %vm17942_vm1, %v17941_v20 }
0x1165   :  { %16340 = vmatprep.subr.mxu1 %v17941_v20 }
0x1166   :  { %v3757_v44 = vpop.f32.mrb[48].mxu0 }
0x1167   :  { %v16319_v45 = vpop.f32.mrb[49].mxu0 }
0x1189   :  { %v3515_v46 = vpop.xlane.xlu0 %3514 }
0x118a   :  { %17683 = vrcp.f32 %v3515_v46  ;;  %v18699_v46 = vld [vmem:[%s20278_s13 + $0x1] ss:$0 sm:$0xff] }
0x118d   :  { %v4209_v53 = vpop.permute.xlu0 %4208 }
0x118f   :  { %v3906_v48 = vpop.f32.mrb[50].mxu0 }
0x1190   :  { %v16329_v49 = vpop.f32.mrb[51].mxu0  ;;  %16333 = vmatmul.mubr.msk.f32.vlgmr.msra.gmra.mrb[38].mxu1 %vm358_vm2, %v3906_v48 }
0x1191   :  { %16341 = vmatpush3.msra.mxu1 %v18644_v47  ;;  %16342 = vmatprep.mubr.msk.f32.mxu1 %vm17942_vm1, %v17941_v20  ;;  %v4431_v22 = vpop.permute.xlu0 %4430 }
0x1192   :  { %16350 = vmatprep.subr.mxu1 %v17941_v20 }
0x1194   :  { %v17684_v5 = vpop.eup %17683 }
0x1195   :  { %v3535_v56 = vmul.f32 %v17684_v5, %v17680_v12 }
0x1197   :  { %v4056_v52 = vpop.f32.mrb[52].mxu0 }
0x1198   :  { %v16339_v55 = vpop.f32.mrb[53].mxu0  ;;  %16343 = vmatmul.mubr.msk.f32.vlgmr.msra.gmra.mrb[40].mxu1 %vm358_vm2, %v4056_v52 }
0x1199   :  { %16351 = vmatpush3.msra.mxu1 %v4209_v53  ;;  %16352 = vmatprep.mubr.msk.f32.mxu1 %vm17942_vm1, %v17941_v20 }
0x119a   :  { %16360 = vmatprep.subr.mxu1 %v17941_v20 }
0x119c   :  { %16353 = vmatmul.mubr.msk.f32.vlgmr.msra.gmra.mrb[42].mxu1 %vm358_vm2, %v3535_v56 }
0x119d   :  { %16361 = vmatpush3.msra.mxu1 %v15041_v28  ;;  %16362 = vmatprep.mubr.msk.f32.mxu1 %vm17942_vm1, %v17941_v20 }
0x119e   :  { %16370 = vmatprep.subr.mxu1 %v17941_v20 }
0x11e8   :  { %v3470_v57 = vpop.xlane.xlu1 %3469 }
0x11e9   :  { %v3480_v58 = vsub.f32 %v3368_v38, %v3470_v57 }
0x11eb   :  { %v3494_v59 = vmul.f32 1.442695, %v3480_v58 }
0x11ec   :  { %v3473_v60 = vpop.xlane.xlu1 %3472 }
0x11ed   :  { %17685 = vpow2.f32 %v3494_v59  ;;  %v3481_v61 = vsub.f32 %v18588_v9, %v3473_v60 }
0x11ef   :  { %v3496_v62 = vmul.f32 1.442695, %v3481_v61 }
0x11f0   :  { %v3512_v63 = vpop.xlane.xlu1 %3511 }
0x11f1   :  { %17687 = vpow2.f32 %v3496_v62 }
0x11f2   :  { %17689 = vrcp.f32 %v3512_v63 }
0x11f7   :  { %v17686_v0 = vpop.eup %17685 }
0x11f8   :  { %v3516_v50 = vsel %vm358_vm2, %v17686_v0, 0.0 }
0x11f9   :  { %3517 = vadd.xlane.f32.xlu1 %v3516_v50 }
0x11fb   :  { %v17688_v1 = vpop.eup %17687 }
0x11fc   :  { %v17690_v2 = vpop.eup %17689  ;;  %v3519_v3 = vsel %vm358_vm2, %v17688_v1, 0.0 }
0x11fd   :  { %3520 = vadd.xlane.f32.xlu1 %v3519_v3  ;;  %v3534_v4 = vmul.f32 %v17690_v2, %v17682_v41 }
0x11ff   :  { %16348 = vmatmul.mubr.msk.f32.vlgmr.msra.gmra.mrb[54].mxu0 %vm358_vm2, %v3534_v4 }
0x1200   :  { %16356 = vmatpush3.msra.mxu0 %v18597_v16  ;;  %16357 = vmatprep.mubr.msk.f32.mxu0 %vm17942_vm1, %v17941_v20 }
0x1201   :  { %16365 = vmatprep.subr.mxu0 %v17941_v20 }
0x120e   :  { %4580 = vrot.lane.b32.xlu1 %v18506_v10, %s17945_s24 }
0x1236   :  { %v3830_v7 = vpop.f32.mrb[36].mxu1 }
0x1237   :  { %v3831_v8 = vadd.f32 %v3830_v7, %v3757_v44  ;;  %v16324_v6 = vpop.f32.mrb[37].mxu1  ;;  %v15083_v7 = vld [vmem:[%s20274_s9 + $0x20] sm:$0xff] }
0x1263   :  { %v3979_v9 = vpop.f32.mrb[38].mxu1 }
0x1264   :  { %v3983_v11 = vadd.f32 %v3979_v9, %v3831_v8  ;;  %v16334_v14 = vpop.f32.mrb[39].mxu1  ;;  %v15084_v8 = vld [vmem:[%s20274_s9 + $0x28] sm:$0xff]  ;;  %v15086_v9 = vld [vmem:[%s20274_s9 + $0x38] sm:$0xff] }
0x1265   :  { %v17315_v6 = vpack.c.bf16 %v15084_v8, %v15083_v7  ;;  %v15091_v14 = vld [vmem:[%s20276_s11 + $0x80] sm:$0xff]  ;;  %v15114_v8 = vld [vmem:[%s20290_s29 + $0x48] sm:$0xff] }
0x1266   :  { %v15113_v7 = vld [vmem:[%s20290_s29 + $0x40] sm:$0xff] }
0x126b   :  { %v4129_v15 = vpop.f32.mrb[40].mxu1 }
0x126c   :  { %v4133_v16 = vadd.f32 %v4129_v15, %v3983_v11  ;;  %v16344_v18 = vpop.f32.mrb[41].mxu1  ;;  %v15092_v15 = vld [vmem:[%s20276_s11 + $0x88] sm:$0xff] }
0x126d   :  { %v15094_v18 = vld [vmem:[%s20276_s11 + $0x98] sm:$0xff] }
0x126e   :  { %v4738_v19 = vadd.f32 %v18672_v17, %v4133_v16  ;;  %v17323_v16 = vpack.c.bf16 %v15092_v15, %v15091_v14  ;;  %v15120_v14 = vld [vmem:[%s20268_s3 + $0x40] sm:$0xff]  ;;  %v15121_v15 = vld [vmem:[%s20268_s3 + $0x48] sm:$0xff] }
0x126f   :  { %v4280_v21 = vpop.f32.mrb[42].mxu1 }
0x1270   :  { %v16354_v23 = vpop.f32.mrb[43].mxu1  ;;  %16358 = vmatmul.mubr.msk.f32.vlgmr.msra.gmra.mrb[56].mxu0 %vm358_vm2, %v4280_v21  ;;  %v4740_v10 = vadd.f32 %v4738_v19, %v18454_v51  ;;  %v15095_v21 = vld [vmem:[%s20276_s11 + $0xa0] sm:$0xff] }
0x1271   :  { %16366 = vmatpush3.msra.mxu0 %v4431_v22  ;;  %16367 = vmatprep.mubr.msk.f32.mxu0 %vm17942_vm1, %v17941_v20  ;;  %v15096_v22 = vld [vmem:[%s20276_s11 + $0xa8] sm:$0xff] }
0x1272   :  { %v4742_v24 = vsel %vm98_vm0, %v4740_v10, 0.0  ;;  %16375 = vmatprep.subr.mxu0 %v17941_v20  ;;  %v17331_v23 = vpack.c.bf16 %v15096_v22, %v15095_v21 }
0x1273   :  { %4743 = vadd.xlane.f32.xlu0 %v4742_v24  ;;  %v15098_v24 = vld [vmem:[%s20276_s11 + $0xb8] sm:$0xff] }
0x1286   :  { %v3518_v25 = vpop.xlane.xlu1 %3517 }
0x1287   :  { %17691 = vrcp.f32 %v3518_v25 }
0x128a   :  { %v3521_v26 = vpop.xlane.xlu1 %3520 }
0x128b   :  { %17693 = vrcp.f32 %v3521_v26  ;;  %v15099_v26 = vld [vmem:[%s20276_s11 + $0xc0] sm:$0xff] }
0x128e   :  { %v4581_v13 = vpop.permute.xlu1 %4580 }
0x1291   :  { %v17692_v27 = vpop.eup %17691 }
0x1292   :  { %v3536_v28 = vmul.f32 %v17692_v27, %v17686_v0  ;;  %v15100_v27 = vld [vmem:[%s20276_s11 + $0xc8] sm:$0xff] }
0x1294   :  { %16368 = vmatmul.mubr.msk.f32.vlgmr.msra.gmra.mrb[58].mxu0 %vm358_vm2, %v3536_v28  ;;  %v17339_v28 = vpack.c.bf16 %v15100_v27, %v15099_v26  ;;  %v15112_v26 = vld [vmem:[%s20281_s16 + $0x1] ss:$0 sm:$0xff] }
0x1295   :  { %v17694_v29 = vpop.eup %17693  ;;  %16376 = vmatpush3.msra.mxu0 %v4581_v13  ;;  %16377 = vmatprep.mubr.msk.f32.mxu0 %vm17942_vm1, %v17941_v20  ;;  %v15101_v13 = vld [vmem:[%s20276_s11 + $0xd0] sm:$0xff] }
0x1296   :  { %v3537_v51 = vmul.f32 %v17694_v29, %v17688_v1  ;;  %17316 = vmatprep.subr.bf16.mxu0 %v17315_v6  ;;  %v15102_v29 = vld [vmem:[%s20276_s11 + $0xd8] sm:$0xff] }
0x1298   :  { %16378 = vmatmul.mubr.msk.f32.vlgmr.msra.gmra.mrb[60].mxu0 %vm358_vm2, %v3537_v51  ;;  %v17343_v51 = vpack.c.bf16 %v15102_v29, %v15101_v13 }
0x1299   :  { %17318 = vmatpush3.bf16.msra.mxu0 %v17315_v6  ;;  %v15115_v6 = vld [vmem:[%s20290_s29 + $0x50] sm:$0xff] }
0x12d2   :  { %v4203_v31 = vpop.f32.mrb[54].mxu0 }
0x12d3   :  { %v16349_v12 = vpop.f32.mrb[55].mxu0  ;;  %16363 = vmatmul.mubr.msk.f32.vlgmr.msra.gmra.mrb[44].mxu1 %vm358_vm2, %v4203_v31  ;;  %v15103_v31 = vld [vmem:[%s20276_s11 + $0xe0] sm:$0xff] }
0x12d4   :  { %16371 = vmatpush3.msra.mxu1 %v18633_v42  ;;  %16372 = vmatprep.mubr.msk.f32.mxu1 %vm17942_vm1, %v17941_v20  ;;  %v15104_v12 = vld [vmem:[%s20276_s11 + $0xe8] sm:$0xff] }
0x12d5   :  { %16380 = vmatprep.subr.mxu1 %v17941_v20 }
0x1300   :  { %v4744_v32 = vpop.xlane.xlu0 %4743 }
0x1301   :  { %v4748_v33 = vmul.f32 0.03125, %v4744_v32  ;;  %v17347_v32 = vpack.c.bf16 %v15104_v12, %v15103_v31  ;;  %v15123_v31 = vld [vmem:[%s20268_s3 + $0x58] sm:$0xff] }
0x1303   :  { %v4750_v34 = vsub.f32 %v4740_v10, %v4748_v33  ;;  %v15097_v10 = vld [vmem:[%s20276_s11 + $0xb0] sm:$0xff] }
0x1304   :  { %v17335_v25 = vpack.c.bf16 %v15098_v24, %v15097_v10  ;;  %v15110_v24 = vld [vmem:[%s20280_s15 + $0x1] ss:$0 sm:$0xff] }
0x1305   :  { %v4752_v36 = vmul.f32 %v4750_v34, %v4750_v34 }
0x1307   :  { %v4754_v38 = vsel %vm98_vm0, %v4752_v36, 0.0 }
0x1308   :  { %4755 = vadd.xlane.f32.xlu0 %v4754_v38 }
0x1343   :  { %v4353_v37 = vpop.f32.mrb[56].mxu0 }
0x1344   :  { %v16359_v39 = vpop.f32.mrb[57].mxu0 }
0x1367   :  { %v4502_v40 = vpop.f32.mrb[58].mxu0 }
0x1368   :  { %v16369_v41 = vpop.f32.mrb[59].mxu0  ;;  %16373 = vmatmul.mubr.msk.f32.vlgmr.msra.gmra.mrb[46].mxu1 %vm358_vm2, %v4502_v40 }
0x1369   :  { %16381 = vmatpush3.msra.mxu1 %v18644_v47  ;;  %16382 = vmatprep.mubr.msk.f32.mxu1 %vm17942_vm1, %v17941_v20  ;;  %v18704_v47 = vld [vmem:[%s20279_s14 + $0x1] ss:$0 sm:$0xff]  ;;  %v15105_v41 = vld [vmem:[%s20276_s11 + $0xf0] sm:$0xff] }
0x136a   :  { %17324 = vmatprep.subr.bf16.mxu1 %v17323_v16 }
0x136b   :  { %v4652_v42 = vpop.f32.mrb[60].mxu0 }
0x136c   :  { %v16379_v43 = vpop.f32.mrb[61].mxu0  ;;  %16383 = vmatmul.mubr.msk.f32.vlgmr.msra.gmra.mrb[48].mxu1 %vm358_vm2, %v4652_v42  ;;  %v15106_v42 = vld [vmem:[%s20276_s11 + $0xf8] sm:$0xff] }
0x136d   :  { %17326 = vmatpush3.bf16.msra.mxu1 %v17323_v16  ;;  %v17351_v43 = vpack.c.bf16 %v15106_v42, %v15105_v41  ;;  %v15117_v41 = vld [vmem:[#allocation5 + $0x2] ss:$0 sm:$0xff] }
0x1395   :  { %v4756_v30 = vpop.xlane.xlu0 %4755 }
0x1396   :  { %v4760_v35 = vmul.f32 0.03125, %v4756_v30  ;;  %v15088_v30 = vld [vmem:[%s20275_s10 + $0x1] ss:$0 sm:$0xff] }
0x1398   :  { %v4762_v44 = vadd.f32 1e-05, %v4760_v35 }
0x139a   :  { %17695 = vrsqrt.f32 %v4762_v44 }
0x13a4   :  { %v17696_v45 = vpop.eup %17695 }
0x13a5   :  { %v4766_v48 = vmul.f32 %v17696_v45, %v4750_v34 }
0x13a6   :  { %v4426_v49 = vpop.f32.mrb[44].mxu1 }
0x13a7   :  { %v4427_v5 = vadd.f32 %v4426_v49, %v4353_v37  ;;  %v16364_v52 = vpop.f32.mrb[45].mxu1  ;;  %v4776_v53 = vmul.f32 %v18699_v46, %v4766_v48 }
0x13a9   :  { %v18708_v55 = vadd.f32 %v18704_v47, %v4776_v53 }
0x13ab   :  { %16393 = vmatprep.mubr.msk.f32.mxu0 %vm98_vm0, %v18708_v55 }
0x143b   :  { %v4575_v56 = vpop.f32.mrb[46].mxu1 }
0x143c   :  { %v4579_v57 = vadd.f32 %v4575_v56, %v4427_v5  ;;  %v16374_v58 = vpop.f32.mrb[47].mxu1 }
0x143f   :  { %v4725_v59 = vpop.f32.mrb[48].mxu1 }
0x1440   :  { %v4729_v60 = vadd.f32 %v4725_v59, %v4579_v57  ;;  %v16384_v61 = vpop.f32.mrb[49].mxu1 }
0x1442   :  { %v4739_v62 = vadd.f32 %v18672_v17, %v4729_v60  ;;  %v15093_v17 = vld [vmem:[%s20276_s11 + $0x90] sm:$0xff] }
0x1443   :  { %v17327_v19 = vpack.c.bf16 %v15094_v18, %v15093_v17  ;;  %v17363_v17 = vpack.c.bf16 %v15121_v15, %v15120_v14 }
0x1444   :  { %v4741_v63 = vadd.f32 %v4739_v62, %v18464_v54  ;;  %v15085_v54 = vld [vmem:[%s20274_s9 + $0x30] sm:$0xff] }
0x1445   :  { %v17319_v11 = vpack.c.bf16 %v15086_v9, %v15085_v54  ;;  %17328 = vmatprep.subr.bf16.mxu1 %v17327_v19  ;;  %v17355_v54 = vpack.c.bf16 %v15114_v8, %v15113_v7  ;;  %v15116_v9 = vld [vmem:[%s20290_s29 + $0x58] sm:$0xff] }
0x1446   :  { %v4745_v0 = vsel %vm98_vm0, %v4741_v63, 0.0  ;;  %17330 = vmatpush3.bf16.msra.mxu1 %v17327_v19 }
0x1447   :  { %4746 = vadd.xlane.f32.xlu1 %v4745_v0  ;;  %17320 = vmatprep.subr.bf16.mxu0 %v17319_v11 }
0x1448   :  { %17322 = vmatpush3.bf16.msra.mxu0 %v17319_v11  ;;  %17332 = vmatprep.subr.bf16.mxu1 %v17331_v23  ;;  %v17359_v11 = vpack.c.bf16 %v15116_v9, %v15115_v6 }
0x1449   :  { %17356 = vmatprep.subr.bf16.mxu0 %v17355_v54 }
0x144a   :  { %17334 = vmatpush3.bf16.msra.mxu1 %v17331_v23 }
0x144b   :  { %17336 = vmatprep.subr.bf16.mxu1 %v17335_v25 }
0x144e   :  { %17338 = vmatpush3.bf16.msra.mxu1 %v17335_v25 }
0x144f   :  { %17340 = vmatprep.subr.bf16.mxu1 %v17339_v28 }
0x1452   :  { %17342 = vmatpush3.bf16.msra.mxu1 %v17339_v28 }
0x1453   :  { %17344 = vmatprep.subr.bf16.mxu1 %v17343_v51 }
0x1456   :  { %17346 = vmatpush3.bf16.msra.mxu1 %v17343_v51  ;;  %v15122_v51 = vld [vmem:[%s20268_s3 + $0x50] sm:$0xff] }
0x1457   :  { %17348 = vmatprep.subr.bf16.mxu1 %v17347_v32 }
0x145a   :  { %17350 = vmatpush3.bf16.msra.mxu1 %v17347_v32 }
0x145b   :  { %17352 = vmatprep.subr.bf16.mxu1 %v17351_v43 }
0x145e   :  { %17354 = vmatpush3.bf16.msra.mxu1 %v17351_v43 }
0x145f   :  { %16469 = vmatprep.subr.mxu1 %v17941_v20 }
0x14d4   :  { %v4747_v50 = vpop.xlane.xlu1 %4746 }
0x14d5   :  { %v4749_v1 = vmul.f32 0.03125, %v4747_v50 }
0x14d7   :  { %v4751_v2 = vsub.f32 %v4741_v63, %v4749_v1 }
0x14d9   :  { %v4753_v3 = vmul.f32 %v4751_v2, %v4751_v2 }
0x14db   :  { %v4757_v4 = vsel %vm98_vm0, %v4753_v3, 0.0 }
0x14dc   :  { %4758 = vadd.xlane.f32.xlu0 %v4757_v4 }
0x1569   :  { %v4759_v33 = vpop.xlane.xlu0 %4758 }
0x156a   :  { %v4761_v34 = vmul.f32 0.03125, %v4759_v33  ;;  %v17367_v33 = vpack.c.bf16 %v15123_v31, %v15122_v51 }
0x156c   :  { %v4763_v36 = vadd.f32 1e-05, %v4761_v34  ;;  %v15128_v34 = vld [vmem:[%s20270_s5 + $0x40] sm:$0xff] }
0x156e   :  { %17697 = vrsqrt.f32 %v4763_v36  ;;  %v15129_v36 = vld [vmem:[%s20270_s5 + $0x48] sm:$0xff] }
0x1578   :  { %v17698_v38 = vpop.eup %17697 }
0x1579   :  { %v4767_v37 = vmul.f32 %v17698_v38, %v4751_v2  ;;  %v17371_v38 = vpack.c.bf16 %v15129_v36, %v15128_v34 }
0x157b   :  { %v4777_v39 = vmul.f32 %v18699_v46, %v4767_v37  ;;  %v15130_v37 = vld [vmem:[%s20270_s5 + $0x50] sm:$0xff] }
0x157d   :  { %v4787_v40 = vadd.f32 %v18704_v47, %v4777_v39  ;;  %v15108_v47 = vld [vmem:[%s20277_s12 + $0x1] ss:$0 sm:$0xff]  ;;  %v15131_v39 = vld [vmem:[%s20270_s5 + $0x58] sm:$0xff] }
0x157f   :  { %16394 = vmatmul.mubr.msk.f32.vlgmr.msra.gmra.mrb[62].mxu0 %vm98_vm0, %v4787_v40 }
0x1580   :  { %17358 = vmatpush3.bf16.msra.mxu0 %v17355_v54 }
0x1581   :  { %17360 = vmatprep.subr.bf16.mxu0 %v17359_v11 }
0x1584   :  { %17362 = vmatpush3.bf16.msra.mxu0 %v17359_v11 }
0x1585   :  { %17364 = vmatprep.subr.bf16.mxu0 %v17363_v17 }
0x1652   :  { %v16395_v35 = vpop.f32.mrb[62].mxu0 }
0x1653   :  { %v4879_v44 = vadd.f32 %v16395_v35, %v15088_v30  ;;  %v4873_v45 = vpop.f32.mrb[63].mxu0 }
0x1654   :  { %v4874_v46 = vadd.f32 %v15088_v30, %v4873_v45 }
0x1655   :  { %v4883_v49 = vmax.f32 %v4879_v44, 0.0  ;;  %v15125_v44 = vld [vmem:[%s20269_s4 + $0x2] ss:$0 sm:$0xff] }
0x1656   :  { %v4882_v48 = vmax.f32 %v4874_v46, 0.0 }
0x1658   :  { %16428 = vmatprep.mubr.f32.mxu1 %v4882_v48 }
0x1659   :  { %16429 = vmatmul.mubr.f32.vlgmr.msra.gmra.mrb[50].mxu1 %v4883_v49 }
0x165a   :  { %16471 = vmatprep.mubr.msk.f32.mxu1 %vm17942_vm1, %v17941_v20 }
0x172c   :  { %v16430_v5 = vpop.f32.mrb[50].mxu1 }
0x172d   :  { %v4975_v52 = vpop.f32.mrb[51].mxu1  ;;  %v4981_v53 = vadd.f32 %v16430_v5, %v15108_v47 }
0x172e   :  { %v4976_v56 = vadd.f32 %v15108_v47, %v4975_v52  ;;  %v15133_v47 = vld [vmem:[%s20271_s6 + $0x2] ss:$0 sm:$0xff] }
0x172f   :  { %v4985_v59 = vadd.f32 %v4981_v53, %v4787_v40  ;;  %v17375_v40 = vpack.c.bf16 %v15131_v39, %v15130_v37 }
0x1730   :  { %v4984_v57 = vadd.f32 %v4976_v56, %v18708_v55 }
0x1731   :  { %v4989_v60 = vsel %vm98_vm0, %v4985_v59, 0.0 }
0x1732   :  { %v4986_v58 = vsel %vm98_vm0, %v4984_v57, 0.0 }
0x1733   :  { %4987 = vadd.xlane.f32.xlu0 %v4986_v58 }
0x1737   :  { %4990 = vadd.xlane.f32.xlu0 %v4989_v60 }
0x17c0   :  { %v4988_v61 = vpop.xlane.xlu0 %4987 }
0x17c1   :  { %v4992_v62 = vmul.f32 0.03125, %v4988_v61 }
0x17c3   :  { %v4994_v63 = vsub.f32 %v4984_v57, %v4992_v62 }
0x17c4   :  { %v4991_v0 = vpop.xlane.xlu0 %4990 }
0x17c5   :  { %v4993_v50 = vmul.f32 0.03125, %v4991_v0  ;;  %v4996_v1 = vmul.f32 %v4994_v63, %v4994_v63 }
0x17c7   :  { %v4995_v2 = vsub.f32 %v4985_v59, %v4993_v50  ;;  %v4998_v3 = vsel %vm98_vm0, %v4996_v1, 0.0 }
0x17c8   :  { %4999 = vadd.xlane.f32.xlu0 %v4998_v3 }
0x17c9   :  { %v4997_v4 = vmul.f32 %v4995_v2, %v4995_v2 }
0x17cb   :  { %v5001_v55 = vsel %vm98_vm0, %v4997_v4, 0.0 }
0x17cc   :  { %5002 = vadd.xlane.f32.xlu0 %v5001_v55 }
0x1855   :  { %v5000_v16 = vpop.xlane.xlu0 %4999 }
0x1856   :  { %v5004_v18 = vmul.f32 0.03125, %v5000_v16 }
0x1858   :  { %v5006_v19 = vadd.f32 1e-05, %v5004_v18 }
0x1859   :  { %v5003_v21 = vpop.xlane.xlu0 %5002 }
0x185a   :  { %17699 = vrsqrt.f32 %v5006_v19  ;;  %v5005_v22 = vmul.f32 0.03125, %v5003_v21 }
0x185c   :  { %v5007_v23 = vadd.f32 1e-05, %v5005_v22 }
0x185e   :  { %17701 = vrsqrt.f32 %v5007_v23 }
0x1864   :  { %v17700_v10 = vpop.eup %17699 }
0x1865   :  { %v5010_v25 = vmul.f32 %v17700_v10, %v4994_v63 }
0x1867   :  { %v5020_v27 = vmul.f32 %v15110_v24, %v5010_v25 }
0x1868   :  { %v17702_v28 = vpop.eup %17701 }
0x1869   :  { %v5011_v13 = vmul.f32 %v17702_v28, %v4995_v2  ;;  %v18817_v29 = vadd.f32 %v15112_v26, %v5020_v27 }
0x186b   :  { %v5021_v12 = vmul.f32 %v15110_v24, %v5011_v13  ;;  %16439 = vmatprep.mubr.msk.f32.mxu0 %vm98_vm0, %v18817_v29 }
0x186d   :  { %v18827_v32 = vadd.f32 %v15112_v26, %v5021_v12 }
0x186f   :  { %16440 = vmatmul.mubr.msk.f32.vlgmr.msra.gmra.mrb[64].mxu0 %vm98_vm0, %v18827_v32 }
0x1870   :  { %17366 = vmatpush3.bf16.msra.mxu0 %v17363_v17  ;;  %16450 = vmatprep.mubr.msk.f32.mxu0 %vm98_vm0, %v18817_v29 }
0x1871   :  { %17368 = vmatprep.subr.bf16.mxu0 %v17367_v33 }
0x1874   :  { %17370 = vmatpush3.bf16.msra.mxu0 %v17367_v33 }
0x1875   :  { %17372 = vmatprep.subr.bf16.mxu0 %v17371_v38 }
0x1877   :  { %16451 = vmatmul.mubr.msk.f32.vlgmr.msra.gmra.mrb[66].mxu0 %vm98_vm0, %v18827_v32 }
0x1878   :  { %17374 = vmatpush3.bf16.msra.mxu0 %v17371_v38  ;;  %16461 = vmatprep.mubr.msk.f32.mxu0 %vm98_vm0, %v18817_v29 }
0x1879   :  { %17376 = vmatprep.subr.bf16.mxu0 %v17375_v40 }
0x187c   :  { %17378 = vmatpush3.bf16.msra.mxu0 %v17375_v40 }
0x187d   :  { %16464 = vmatprep.subr.mxu0 %v17941_v20 }
0x187f   :  { %16462 = vmatmul.mubr.msk.f32.vlgmr.msra.gmra.mrb[68].mxu0 %vm98_vm0, %v18827_v32 }
0x1880   :  { %16466 = vmatprep.mubr.msk.f32.mxu0 %vm17942_vm1, %v17941_v20 }
0x1942   :  { %v16441_v42 = vpop.f32.mrb[64].mxu0 }
0x1943   :  { %v5117_v43 = vpop.f32.mrb[65].mxu0  ;;  %v5123_v56 = vadd.f32 %v16441_v42, %v15117_v41 }
0x1944   :  { %v5118_v30 = vadd.f32 %v15117_v41, %v5117_v43 }
0x1945   :  { %v18873_v57 = vmul.f32 0.35355338, %v5123_v56 }
0x1946   :  { %v5126_v35 = vmul.f32 0.35355338, %v5118_v30 }
0x1948   :  { %5385 = vrot.lane.b32.xlu0 %v5126_v35, %s17944_s23 }
0x194a   :  { %v16452_v45 = vpop.f32.mrb[66].mxu0 }
0x194b   :  { %v5213_v46 = vadd.f32 %v16452_v45, %v15125_v44  ;;  %v5207_v48 = vpop.f32.mrb[67].mxu0 }
0x194c   :  { %v5208_v49 = vadd.f32 %v15125_v44, %v5207_v48 }
0x194e   :  { %5387 = vrot.lane.b32.xlu1 %v5208_v49, %s17944_s23  ;;  %16465 = vmatpush3.xpose.msk.msra.mxu0 %vm358_vm2, %v5208_v49 }
0x194f   :  { %5543 = vrot.lane.b32.xlu0 %v5208_v49, %s17945_s24  ;;  %16474 = vmatprep.subr.mxu0 %v17941_v20 }
0x1951   :  { %16467 = vmatmul.mubr.msk.f32.vlgmr.msra.gmra.mrb[70].mxu0 %vm358_vm2, %v5126_v35 }
0x1952   :  { %v16463_v5 = vpop.f32.mrb[68].mxu0  ;;  %5465 = vrot.lane.b32.xlu1 %v5208_v49, %s17943_s22  ;;  %16476 = vmatprep.mubr.msk.f32.mxu0 %vm17942_vm1, %v17941_v20 }
0x1953   :  { %v18869_v52 = vadd.f32 %v16463_v5, %v15133_v47  ;;  %v5295_v53 = vpop.f32.mrb[69].mxu0 }
0x1954   :  { %v18907_v9 = vadd.f32 %v15133_v47, %v5295_v53 }
0x1956   :  { %5463 = vrot.lane.b32.xlu1 %v5126_v35, %s17943_s22 }
0x195a   :  { %5541 = vrot.lane.b32.xlu1 %v5126_v35, %s17945_s24 }
0x195e   :  { %5695 = vrot.lane.b32.xlu1 %v18873_v57, %s17944_s23 }
0x19ba   :  { %v5386_v58 = vpop.permute.xlu0 %5385 }
0x19c0   :  { %v5388_v59 = vpop.permute.xlu1 %5387 }
0x19c1   :  { %16470 = vmatpush3.xpose.msk.msra.mxu1 %vm358_vm2, %v5388_v59  ;;  %v5544_v60 = vpop.permute.xlu0 %5543 }
0x19c2   :  { %16479 = vmatprep.subr.mxu1 %v17941_v20 }
0x19c4   :  { %v5466_v61 = vpop.permute.xlu1 %5465  ;;  %16472 = vmatmul.mubr.msk.f32.vlgmr.msra.gmra.mrb[52].mxu1 %vm358_vm2, %v5386_v58  ;;  %v18960_v58 = vld [vmem:[%s20272_s7 + $0x48] sm:$0xff] }
0x19c5   :  { %16475 = vmatpush3.xpose.msk.msra.mxu0 %vm358_vm2, %v5466_v61  ;;  %16480 = vmatpush3.xpose.msk.msra.mxu1 %vm358_vm2, %v5544_v60 }
0x19c6   :  { %16484 = vmatprep.subr.mxu0 %v17941_v20  ;;  %16481 = vmatprep.mubr.msk.f32.mxu1 %vm17942_vm1, %v17941_v20 }
0x19c7   :  { %16489 = vmatprep.subr.mxu1 %v17941_v20 }
0x19c8   :  { %v5464_v62 = vpop.permute.xlu1 %5463 }
0x19c9   :  { %16477 = vmatmul.mubr.msk.f32.vlgmr.msra.gmra.mrb[72].mxu0 %vm358_vm2, %v5464_v62 }
0x19ca   :  { %16485 = vmatpush3.xpose.msk.msra.mxu0 %vm358_vm2, %v5213_v46  ;;  %16486 = vmatprep.mubr.msk.f32.mxu0 %vm17942_vm1, %v17941_v20 }
0x19cb   :  { %16494 = vmatprep.subr.mxu0 %v17941_v20 }
0x19cc   :  { %v5542_v63 = vpop.permute.xlu1 %5541 }
0x19cd   :  { %16482 = vmatmul.mubr.msk.f32.vlgmr.msra.gmra.mrb[54].mxu1 %vm358_vm2, %v5542_v63  ;;  %16487 = vmatmul.mubr.msk.f32.vlgmr.msra.gmra.mrb[74].mxu0 %vm358_vm2, %v18873_v57 }
0x19ce   :  { %16491 = vmatprep.mubr.msk.f32.mxu1 %vm17942_vm1, %v17941_v20  ;;  %16496 = vmatprep.mubr.msk.f32.mxu0 %vm17942_vm1, %v17941_v20 }
0x19d0   :  { %v5696_v19 = vpop.permute.xlu1 %5695 }
0x1a24   :  { %v18898_v0 = vpop.f32.mrb[70].mxu0 }
0x1a25   :  { %v16468_v50 = vpop.f32.mrb[71].mxu0  ;;  %v5929_v13 = vsel %vm358_vm2, %v18898_v0, -inf }
0x1a97   :  { %v5459_v1 = vpop.f32.mrb[52].mxu1 }
0x1a98   :  { %v16473_v2 = vpop.f32.mrb[53].mxu1  ;;  %v5932_v3 = vsel %vm358_vm2, %v5459_v1, -inf }
0x1a99   :  { %5933 = vmax.xlane.f32.xlu0 %v5932_v3 }
0x1a9c   :  { %v5537_v4 = vpop.f32.mrb[72].mxu0 }
0x1a9d   :  { %v16478_v55 = vpop.f32.mrb[73].mxu0  ;;  %v5935_v11 = vsel %vm358_vm2, %v5537_v4, -inf }
0x1aa0   :  { %v18901_v7 = vpop.f32.mrb[54].mxu1  ;;  %v18903_v8 = vpop.f32.mrb[74].mxu0 }
0x1aa1   :  { %v16483_v6 = vpop.f32.mrb[55].mxu1  ;;  %v16488_v54 = vpop.f32.mrb[75].mxu0  ;;  %v5938_v14 = vsel %vm358_vm2, %v18901_v7, -inf  ;;  %v5941_v48 = vsel %vm358_vm2, %v18903_v8, -inf }
0x1aaf   :  { %5697 = vrot.lane.b32.xlu0 %v5213_v46, %s17944_s23 }
0x1ab3   :  { %5853 = vrot.lane.b32.xlu0 %v5213_v46, %s17945_s24 }
0x1ab7   :  { %6091 = vrot.lane.b32.xlu0 %v18907_v9, %s17944_s23 }
0x1ad6   :  { %5936 = vmax.xlane.f32.xlu0 %v5935_v11 }
0x1ada   :  { %5939 = vmax.xlane.f32.xlu0 %v5938_v14 }
0x1af0   :  { %5775 = vrot.lane.b32.xlu0 %v5213_v46, %s17943_s22 }
0x1b26   :  { %v5934_v15 = vpop.xlane.xlu0 %5933 }
0x1b27   :  { %v5954_v17 = vsub.f32 %v5459_v1, %v5934_v15 }
0x1b29   :  { %v5963_v16 = vmul.f32 1.442695, %v5954_v17 }
0x1b2a   :  { %v5698_v18 = vpop.permute.xlu0 %5697 }
0x1b2b   :  { %17703 = vpow2.f32 %v5963_v16  ;;  %16490 = vmatpush3.xpose.msk.msra.mxu1 %vm358_vm2, %v5698_v18 }
0x1b2c   :  { %16499 = vmatprep.subr.mxu1 %v17941_v20 }
0x1b2e   :  { %16492 = vmatmul.mubr.msk.f32.vlgmr.msra.gmra.mrb[56].mxu1 %vm358_vm2, %v5696_v19  ;;  %v5854_v21 = vpop.permute.xlu0 %5853 }
0x1b2f   :  { %16500 = vmatpush3.xpose.msk.msra.mxu1 %vm358_vm2, %v5854_v21  ;;  %16501 = vmatprep.mubr.msk.f32.mxu1 %vm17942_vm1, %v17941_v20 }
0x1b30   :  { %16509 = vmatprep.subr.mxu1 %v17941_v20 }
0x1b32   :  { %v6092_v10 = vpop.permute.xlu0 %6091 }
0x1b35   :  { %v17704_v22 = vpop.eup %17703 }
0x1b36   :  { %v5980_v23 = vsel %vm358_vm2, %v17704_v22, 0.0 }
0x1b37   :  { %5981 = vadd.xlane.f32.xlu1 %v5980_v23 }
0x1b48   :  { %5851 = vrot.lane.b32.xlu1 %v18873_v57, %s17945_s24 }
0x1b63   :  { %v5937_v24 = vpop.xlane.xlu0 %5936 }
0x1b64   :  { %v5955_v25 = vsub.f32 %v5537_v4, %v5937_v24  ;;  %v15136_v4 = vld [vmem:[%s20272_s7 + $0x40] sm:$0xff] }
0x1b66   :  { %v5965_v26 = vmul.f32 1.442695, %v5955_v25 }
0x1b67   :  { %v5940_v27 = vpop.xlane.xlu0 %5939 }
0x1b68   :  { %17705 = vpow2.f32 %v5965_v26  ;;  %v5956_v30 = vsub.f32 %v18901_v7, %v5940_v27  ;;  %v19007_v27 = vld [vmem:[%s20272_s7 + $0x58] sm:$0xff] }
0x1b6a   :  { %v5967_v35 = vmul.f32 1.442695, %v5956_v30 }
0x1b6b   :  { %v5776_v28 = vpop.permute.xlu0 %5775 }
0x1b6c   :  { %5930 = vmax.xlane.f32.xlu1 %v5929_v13  ;;  %16495 = vmatpush3.xpose.msk.msra.mxu0 %vm358_vm2, %v5776_v28 }
0x1b6d   :  { %16504 = vmatprep.subr.mxu0 %v17941_v20 }
0x1b72   :  { %v17706_v51 = vpop.eup %17705 }
0x1b73   :  { %v5983_v31 = vsel %vm358_vm2, %v17706_v51, 0.0 }
0x1b74   :  { %5984 = vadd.xlane.f32.xlu0 %v5983_v31 }
0x1b8a   :  { %6463 = vrot.lane.b32.xlu0 %v18907_v9, %s17945_s24 }
0x1bc4   :  { %v5982_v12 = vpop.xlane.xlu1 %5981 }
0x1bc5   :  { %17707 = vrcp.f32 %v5982_v12 }
0x1bc8   :  { %v5852_v33 = vpop.permute.xlu1 %5851 }
0x1bc9   :  { %16502 = vmatmul.mubr.msk.f32.vlgmr.msra.gmra.mrb[58].mxu1 %vm358_vm2, %v5852_v33 }
0x1bca   :  { %16510 = vmatpush3.msra.mxu1 %v6092_v10  ;;  %16511 = vmatprep.mubr.msk.f32.mxu1 %vm17942_vm1, %v17941_v20 }
0x1bcb   :  { %16519 = vmatprep.subr.mxu1 %v17941_v20 }
0x1bcf   :  { %v17708_v34 = vpop.eup %17707 }
0x1bd0   :  { %v6010_v36 = vmul.f32 %v17708_v34, %v17704_v22  ;;  %v18996_v22 = vld [vmem:[%s20272_s7 + $0x50] sm:$0xff] }
0x1bd2   :  { %16512 = vmatmul.mubr.msk.f32.vlgmr.msra.gmra.mrb[60].mxu1 %vm358_vm2, %v6010_v36 }
0x1bd3   :  { %16521 = vmatprep.mubr.msk.f32.mxu1 %vm17942_vm1, %v17941_v20  ;;  %16520 = vmatpush3.msra.mxu1 %v15136_v4 }
0x1bd4   :  { %16529 = vmatprep.subr.mxu1 %v17941_v20 }
0x1bf9   :  { %v5931_v38 = vpop.xlane.xlu1 %5930 }
0x1bfa   :  { %v5953_v37 = vsub.f32 %v18898_v0, %v5931_v38 }
0x1bfc   :  { %v5961_v39 = vmul.f32 1.442695, %v5953_v37 }
0x1bfe   :  { %17709 = vpow2.f32 %v5961_v39 }
0x1bff   :  { %17711 = vpow2.f32 %v5967_v35 }
0x1c01   :  { %v5769_v40 = vpop.f32.mrb[56].mxu1  ;;  %v5985_v61 = vpop.xlane.xlu0 %5984 }
0x1c02   :  { %v16493_v41 = vpop.f32.mrb[57].mxu1  ;;  %v5944_v46 = vsel %vm358_vm2, %v5769_v40, -inf }
0x1c05   :  { %v6464_v1 = vpop.permute.xlu0 %6463 }
0x1c08   :  { %v17710_v42 = vpop.eup %17709 }
0x1c09   :  { %v5977_v43 = vsel %vm358_vm2, %v17710_v42, 0.0  ;;  %v17712_v44 = vpop.eup %17711 }
0x1c0a   :  { %5978 = vadd.xlane.f32.xlu1 %v5977_v43  ;;  %v5986_v45 = vsel %vm358_vm2, %v17712_v44, 0.0 }
0x1c1b   :  { %5773 = vrot.lane.b32.xlu1 %v18873_v57, %s17943_s22 }
0x1c3f   :  { %5987 = vadd.xlane.f32.xlu1 %v5986_v45 }
0x1c50   :  { %6313 = vrot.lane.b32.xlu1 %v18907_v9, %s17943_s22 }
0x1c74   :  { %5945 = vmax.xlane.f32.xlu1 %v5944_v46 }
0x1c78   :  { %5942 = vmax.xlane.f32.xlu1 %v5941_v48 }
0x1c97   :  { %v5979_v49 = vpop.xlane.xlu1 %5978 }
0x1c98   :  { %17713 = vrcp.f32 %v5979_v49 }
0x1c99   :  { %17715 = vrcp.f32 %v5985_v61 }
0x1c9b   :  { %v5774_v47 = vpop.permute.xlu1 %5773 }
0x1c9c   :  { %16497 = vmatmul.mubr.msk.f32.vlgmr.msra.gmra.mrb[76].mxu0 %vm358_vm2, %v5774_v47  ;;  %v18951_v5 = vpop.f32.mrb[58].mxu1 }
0x1c9d   :  { %16505 = vmatpush3.msra.mxu0 %v18907_v9  ;;  %v16503_v53 = vpop.f32.mrb[59].mxu1  ;;  %16506 = vmatprep.mubr.msk.f32.mxu0 %vm17942_vm1, %v17941_v20  ;;  %v5950_v19 = vsel %vm358_vm2, %v18951_v5, -inf }
0x1c9e   :  { %16514 = vmatprep.subr.mxu0 %v17941_v20 }
0x1ca2   :  { %v17714_v56 = vpop.eup %17713 }
0x1ca3   :  { %v6009_v57 = vmul.f32 %v17714_v56, %v17710_v42  ;;  %v17716_v63 = vpop.eup %17715 }
0x1ca4   :  { %v6011_v50 = vmul.f32 %v17716_v63, %v17706_v51 }
0x1ca5   :  { %16507 = vmatmul.mubr.msk.f32.vlgmr.msra.gmra.mrb[78].mxu0 %vm358_vm2, %v6009_v57  ;;  %v6163_v59 = vpop.f32.mrb[60].mxu1 }
0x1ca6   :  { %v16513_v60 = vpop.f32.mrb[61].mxu1  ;;  %16515 = vmatpush3.msra.mxu0 %v18960_v58  ;;  %16516 = vmatprep.mubr.msk.f32.mxu0 %vm17942_vm1, %v17941_v20 }
0x1ca7   :  { %16524 = vmatprep.subr.mxu0 %v17941_v20 }
0x1ca9   :  { %16517 = vmatmul.mubr.msk.f32.vlgmr.msra.gmra.mrb[80].mxu0 %vm358_vm2, %v6163_v59  ;;  %v19035_v59 = vld [vmem:[%s20273_s8 + $0x2] ss:$0 sm:$0xff] }
0x1caa   :  { %16526 = vmatprep.mubr.msk.f32.mxu0 %vm17942_vm1, %v17941_v20 }
0x1ccc   :  { %v5988_v62 = vpop.xlane.xlu1 %5987 }
0x1ccd   :  { %17717 = vrcp.f32 %v5988_v62 }
0x1cd0   :  { %v6314_v0 = vpop.permute.xlu1 %6313 }
0x1cd1   :  { %16525 = vmatpush3.msra.mxu0 %v6314_v0 }
0x1cd2   :  { %16527 = vmatmul.mubr.msk.f32.vlgmr.msra.gmra.mrb[82].mxu0 %vm358_vm2, %v6011_v50  ;;  %16534 = vmatprep.subr.mxu0 %v17941_v20 }
0x1cd3   :  { %16535 = vmatpush3.msra.mxu0 %v6464_v1  ;;  %16536 = vmatprep.mubr.msk.f32.mxu0 %vm17942_vm1, %v17941_v20 }
0x1cd4   :  { %16544 = vmatprep.subr.mxu0 %v17941_v20 }
0x1cd7   :  { %v17718_v2 = vpop.eup %17717 }
0x1cd8   :  { %v6012_v3 = vmul.f32 %v17718_v2, %v17712_v44 }
0x1cda   :  { %16537 = vmatmul.mubr.msk.f32.vlgmr.msra.gmra.mrb[84].mxu0 %vm358_vm2, %v6012_v3 }
0x1cdb   :  { %16545 = vmatpush3.msra.mxu0 %v18869_v52  ;;  %16546 = vmatprep.mubr.msk.f32.mxu0 %vm17942_vm1, %v17941_v20 }
0x1cdc   :  { %16554 = vmatprep.subr.mxu0 %v17941_v20 }
0x1d01   :  { %v5946_v55 = vpop.xlane.xlu1 %5945 }
0x1d02   :  { %v5958_v7 = vsub.f32 %v5769_v40, %v5946_v55 }
0x1d04   :  { %v5971_v6 = vmul.f32 1.442695, %v5958_v7 }
0x1d05   :  { %v5943_v11 = vpop.xlane.xlu1 %5942 }
0x1d06   :  { %17719 = vpow2.f32 %v5971_v6  ;;  %v5957_v14 = vsub.f32 %v18903_v8, %v5943_v11 }
0x1d08   :  { %v5969_v15 = vmul.f32 1.442695, %v5957_v14 }
0x1d0a   :  { %17721 = vpow2.f32 %v5969_v15 }
0x1d10   :  { %v17720_v54 = vpop.eup %17719 }
0x1d11   :  { %v5992_v9 = vsel %vm358_vm2, %v17720_v54, 0.0 }
0x1d12   :  { %5993 = vadd.xlane.f32.xlu0 %v5992_v9 }
0x1d14   :  { %v17722_v21 = vpop.eup %17721 }
0x1d15   :  { %v5989_v8 = vsel %vm358_vm2, %v17722_v21, 0.0 }
0x1d28   :  { %6687 = vrot.lane.b32.xlu0 %v18869_v52, %s17944_s23 }
0x1d2c   :  { %6909 = vrot.lane.b32.xlu0 %v18869_v52, %s17943_s22 }
0x1d6f   :  { %v5847_v17 = vpop.f32.mrb[76].mxu0 }
0x1d70   :  { %v16498_v16 = vpop.f32.mrb[77].mxu0  ;;  %v5947_v18 = vsel %vm358_vm2, %v5847_v17, -inf }
0x1d71   :  { %5948 = vmax.xlane.f32.xlu1 %v5947_v18 }
0x1d75   :  { %5951 = vmax.xlane.f32.xlu1 %v5950_v19 }
0x1d78   :  { %v6086_v23 = vpop.f32.mrb[78].mxu0 }
0x1d79   :  { %5990 = vadd.xlane.f32.xlu1 %v5989_v8  ;;  %v16508_v10 = vpop.f32.mrb[79].mxu0  ;;  %16522 = vmatmul.mubr.msk.f32.vlgmr.msra.gmra.mrb[62].mxu1 %vm358_vm2, %v6086_v23 }
0x1d7a   :  { %16530 = vmatpush3.msra.mxu1 %v18996_v22  ;;  %16531 = vmatprep.mubr.msk.f32.mxu1 %vm17942_vm1, %v17941_v20 }
0x1d7b   :  { %16539 = vmatprep.subr.mxu1 %v17941_v20 }
0x1d7c   :  { %v6236_v24 = vpop.f32.mrb[80].mxu0 }
0x1d7d   :  { %v16518_v25 = vpop.f32.mrb[81].mxu0 }
0x1d9f   :  { %v5994_v26 = vpop.xlane.xlu0 %5993 }
0x1da0   :  { %17723 = vrcp.f32 %v5994_v26  ;;  %v19062_v26 = vld [vmem:[%s20278_s13 + $0x2] ss:$0 sm:$0xff] }
0x1da3   :  { %v6688_v12 = vpop.permute.xlu0 %6687 }
0x1da5   :  { %v6385_v28 = vpop.f32.mrb[82].mxu0 }
0x1da6   :  { %v16528_v13 = vpop.f32.mrb[83].mxu0  ;;  %16532 = vmatmul.mubr.msk.f32.vlgmr.msra.gmra.mrb[64].mxu1 %vm358_vm2, %v6385_v28 }
0x1da7   :  { %16540 = vmatpush3.msra.mxu1 %v19007_v27  ;;  %16541 = vmatprep.mubr.msk.f32.mxu1 %vm17942_vm1, %v17941_v20  ;;  %v6910_v63 = vpop.permute.xlu0 %6909 }
0x1da8   :  { %16549 = vmatprep.subr.mxu1 %v17941_v20 }
0x1daa   :  { %v17724_v51 = vpop.eup %17723 }
0x1dab   :  { %v6014_v34 = vmul.f32 %v17724_v51, %v17720_v54 }
0x1dad   :  { %v6535_v31 = vpop.f32.mrb[84].mxu0 }
0x1dae   :  { %v16538_v33 = vpop.f32.mrb[85].mxu0  ;;  %16542 = vmatmul.mubr.msk.f32.vlgmr.msra.gmra.mrb[66].mxu1 %vm358_vm2, %v6535_v31 }
0x1daf   :  { %16550 = vmatpush3.msra.mxu1 %v6688_v12  ;;  %16551 = vmatprep.mubr.msk.f32.mxu1 %vm17942_vm1, %v17941_v20 }
0x1db0   :  { %16559 = vmatprep.subr.mxu1 %v17941_v20 }
0x1db2   :  { %16552 = vmatmul.mubr.msk.f32.vlgmr.msra.gmra.mrb[68].mxu1 %vm358_vm2, %v6014_v34 }
0x1db3   :  { %16560 = vmatpush3.msra.mxu1 %v15136_v4  ;;  %16561 = vmatprep.mubr.msk.f32.mxu1 %vm17942_vm1, %v17941_v20 }
0x1db4   :  { %16569 = vmatprep.subr.mxu1 %v17941_v20 }
0x1dfe   :  { %v5949_v36 = vpop.xlane.xlu1 %5948 }
0x1dff   :  { %v5959_v38 = vsub.f32 %v5847_v17, %v5949_v36 }
0x1e01   :  { %v5973_v37 = vmul.f32 1.442695, %v5959_v38 }
0x1e02   :  { %v5952_v39 = vpop.xlane.xlu1 %5951 }
0x1e03   :  { %17725 = vpow2.f32 %v5973_v37  ;;  %v5960_v40 = vsub.f32 %v18951_v5, %v5952_v39 }
0x1e05   :  { %v5975_v41 = vmul.f32 1.442695, %v5960_v40 }
0x1e06   :  { %v5991_v42 = vpop.xlane.xlu1 %5990 }
0x1e07   :  { %17727 = vpow2.f32 %v5975_v41 }
0x1e08   :  { %17729 = vrcp.f32 %v5991_v42 }
0x1e0d   :  { %v17726_v43 = vpop.eup %17725 }
0x1e0e   :  { %v5995_v30 = vsel %vm358_vm2, %v17726_v43, 0.0 }
0x1e0f   :  { %5996 = vadd.xlane.f32.xlu1 %v5995_v30 }
0x1e11   :  { %v17728_v35 = vpop.eup %17727 }
0x1e12   :  { %v17730_v44 = vpop.eup %17729  ;;  %v5998_v45 = vsel %vm358_vm2, %v17728_v35, 0.0 }
0x1e13   :  { %5999 = vadd.xlane.f32.xlu1 %v5998_v45  ;;  %v6013_v46 = vmul.f32 %v17730_v44, %v17722_v21 }
0x1e15   :  { %16547 = vmatmul.mubr.msk.f32.vlgmr.msra.gmra.mrb[86].mxu0 %vm358_vm2, %v6013_v46 }
0x1e16   :  { %16555 = vmatpush3.msra.mxu0 %v18960_v58  ;;  %16556 = vmatprep.mubr.msk.f32.mxu0 %vm17942_vm1, %v17941_v20 }
0x1e17   :  { %16564 = vmatprep.subr.mxu0 %v17941_v20 }
0x1e24   :  { %7059 = vrot.lane.b32.xlu1 %v18869_v52, %s17945_s24 }
0x1e4c   :  { %v6309_v48 = vpop.f32.mrb[62].mxu1 }
0x1e4d   :  { %v6310_v49 = vadd.f32 %v6309_v48, %v6236_v24  ;;  %v16523_v47 = vpop.f32.mrb[63].mxu1  ;;  %v15178_v48 = vld [vmem:[%s20274_s9 + $0x40] sm:$0xff] }
0x1e79   :  { %v6458_v5 = vpop.f32.mrb[64].mxu1 }
0x1e7a   :  { %v6462_v53 = vadd.f32 %v6458_v5, %v6310_v49  ;;  %v16533_v56 = vpop.f32.mrb[65].mxu1  ;;  %v15179_v49 = vld [vmem:[%s20274_s9 + $0x48] sm:$0xff]  ;;  %v15181_v5 = vld [vmem:[%s20274_s9 + $0x58] sm:$0xff] }
0x1e7b   :  { %v17379_v47 = vpack.c.bf16 %v15179_v49, %v15178_v48  ;;  %v15186_v56 = vld [vmem:[%s20276_s11 + $0x100] sm:$0xff]  ;;  %v15209_v49 = vld [vmem:[%s20290_s29 + $0x68] sm:$0xff] }
0x1e7c   :  { %v15208_v48 = vld [vmem:[%s20290_s29 + $0x60] sm:$0xff] }
0x1e81   :  { %v6608_v57 = vpop.f32.mrb[66].mxu1 }
0x1e82   :  { %v6612_v58 = vadd.f32 %v6608_v57, %v6462_v53  ;;  %v16543_v60 = vpop.f32.mrb[67].mxu1  ;;  %v15187_v57 = vld [vmem:[%s20276_s11 + $0x108] sm:$0xff] }
0x1e83   :  { %v15189_v60 = vld [vmem:[%s20276_s11 + $0x118] sm:$0xff] }
0x1e84   :  { %v7217_v61 = vadd.f32 %v19035_v59, %v6612_v58  ;;  %v17387_v58 = vpack.c.bf16 %v15187_v57, %v15186_v56  ;;  %v15215_v56 = vld [vmem:[%s20268_s3 + $0x60] sm:$0xff]  ;;  %v15216_v57 = vld [vmem:[%s20268_s3 + $0x68] sm:$0xff] }
0x1e85   :  { %v6759_v62 = vpop.f32.mrb[68].mxu1 }
0x1e86   :  { %v16553_v0 = vpop.f32.mrb[69].mxu1  ;;  %16557 = vmatmul.mubr.msk.f32.vlgmr.msra.gmra.mrb[88].mxu0 %vm358_vm2, %v6759_v62  ;;  %v7219_v52 = vadd.f32 %v7217_v61, %v18817_v29  ;;  %v15190_v62 = vld [vmem:[%s20276_s11 + $0x120] sm:$0xff] }
0x1e87   :  { %16565 = vmatpush3.msra.mxu0 %v6910_v63  ;;  %16566 = vmatprep.mubr.msk.f32.mxu0 %vm17942_vm1, %v17941_v20  ;;  %v15191_v63 = vld [vmem:[%s20276_s11 + $0x128] sm:$0xff] }
0x1e88   :  { %v7221_v50 = vsel %vm98_vm0, %v7219_v52, 0.0  ;;  %16574 = vmatprep.subr.mxu0 %v17941_v20  ;;  %v17395_v0 = vpack.c.bf16 %v15191_v63, %v15190_v62 }
0x1e89   :  { %7222 = vadd.xlane.f32.xlu0 %v7221_v50  ;;  %v15193_v50 = vld [vmem:[%s20276_s11 + $0x138] sm:$0xff] }
0x1e9c   :  { %v5997_v1 = vpop.xlane.xlu1 %5996 }
0x1e9d   :  { %17731 = vrcp.f32 %v5997_v1 }
0x1ea0   :  { %v6000_v2 = vpop.xlane.xlu1 %5999 }
0x1ea1   :  { %17733 = vrcp.f32 %v6000_v2  ;;  %v15194_v2 = vld [vmem:[%s20276_s11 + $0x140] sm:$0xff] }
0x1ea4   :  { %v7060_v55 = vpop.permute.xlu1 %7059 }
0x1ea7   :  { %v17732_v3 = vpop.eup %17731 }
0x1ea8   :  { %v6015_v4 = vmul.f32 %v17732_v3, %v17726_v43  ;;  %v15195_v3 = vld [vmem:[%s20276_s11 + $0x148] sm:$0xff] }
0x1eaa   :  { %16567 = vmatmul.mubr.msk.f32.vlgmr.msra.gmra.mrb[90].mxu0 %vm358_vm2, %v6015_v4  ;;  %v17403_v4 = vpack.c.bf16 %v15195_v3, %v15194_v2  ;;  %v15207_v2 = vld [vmem:[%s20281_s16 + $0x2] ss:$0 sm:$0xff] }
0x1eab   :  { %v17734_v7 = vpop.eup %17733  ;;  %16575 = vmatpush3.msra.mxu0 %v7060_v55  ;;  %16576 = vmatprep.mubr.msk.f32.mxu0 %vm17942_vm1, %v17941_v20  ;;  %v15196_v55 = vld [vmem:[%s20276_s11 + $0x150] sm:$0xff] }
0x1eac   :  { %v6016_v29 = vmul.f32 %v17734_v7, %v17728_v35  ;;  %17380 = vmatprep.subr.bf16.mxu0 %v17379_v47  ;;  %v15197_v7 = vld [vmem:[%s20276_s11 + $0x158] sm:$0xff] }
0x1eae   :  { %16577 = vmatmul.mubr.msk.f32.vlgmr.msra.gmra.mrb[92].mxu0 %vm358_vm2, %v6016_v29  ;;  %v17407_v29 = vpack.c.bf16 %v15197_v7, %v15196_v55 }
0x1eaf   :  { %17382 = vmatpush3.bf16.msra.mxu0 %v17379_v47  ;;  %v15210_v47 = vld [vmem:[%s20290_s29 + $0x70] sm:$0xff] }
0x1ee8   :  { %v6682_v6 = vpop.f32.mrb[86].mxu0 }
0x1ee9   :  { %v16548_v54 = vpop.f32.mrb[87].mxu0  ;;  %16562 = vmatmul.mubr.msk.f32.vlgmr.msra.gmra.mrb[70].mxu1 %vm358_vm2, %v6682_v6  ;;  %v15198_v6 = vld [vmem:[%s20276_s11 + $0x160] sm:$0xff] }
0x1eea   :  { %16570 = vmatpush3.msra.mxu1 %v18996_v22  ;;  %16571 = vmatprep.mubr.msk.f32.mxu1 %vm17942_vm1, %v17941_v20  ;;  %v15199_v54 = vld [vmem:[%s20276_s11 + $0x168] sm:$0xff] }
0x1eeb   :  { %16579 = vmatprep.subr.mxu1 %v17941_v20 }
0x1f16   :  { %v7223_v9 = vpop.xlane.xlu0 %7222 }
0x1f17   :  { %v7227_v11 = vmul.f32 0.03125, %v7223_v9  ;;  %v17411_v9 = vpack.c.bf16 %v15199_v54, %v15198_v6  ;;  %v15218_v6 = vld [vmem:[%s20268_s3 + $0x78] sm:$0xff] }
0x1f19   :  { %v7229_v14 = vsub.f32 %v7219_v52, %v7227_v11  ;;  %v15192_v52 = vld [vmem:[%s20276_s11 + $0x130] sm:$0xff] }
0x1f1a   :  { %v17399_v1 = vpack.c.bf16 %v15193_v50, %v15192_v52  ;;  %v15205_v50 = vld [vmem:[%s20280_s15 + $0x2] ss:$0 sm:$0xff] }
0x1f1b   :  { %v7231_v15 = vmul.f32 %v7229_v14, %v7229_v14 }
0x1f1d   :  { %v7233_v17 = vsel %vm98_vm0, %v7231_v15, 0.0 }
0x1f1e   :  { %7234 = vadd.xlane.f32.xlu0 %v7233_v17 }
0x1f59   :  { %v6832_v16 = vpop.f32.mrb[88].mxu0 }
0x1f5a   :  { %v16558_v18 = vpop.f32.mrb[89].mxu0 }
0x1f7d   :  { %v6981_v19 = vpop.f32.mrb[90].mxu0 }
0x1f7e   :  { %v16568_v21 = vpop.f32.mrb[91].mxu0  ;;  %16572 = vmatmul.mubr.msk.f32.vlgmr.msra.gmra.mrb[72].mxu1 %vm358_vm2, %v6981_v19 }
0x1f7f   :  { %16580 = vmatpush3.msra.mxu1 %v19007_v27  ;;  %16581 = vmatprep.mubr.msk.f32.mxu1 %vm17942_vm1, %v17941_v20  ;;  %v19067_v27 = vld [vmem:[%s20279_s14 + $0x2] ss:$0 sm:$0xff]  ;;  %v15200_v21 = vld [vmem:[%s20276_s11 + $0x170] sm:$0xff] }
0x1f80   :  { %17388 = vmatprep.subr.bf16.mxu1 %v17387_v58 }
0x1f81   :  { %v7131_v22 = vpop.f32.mrb[92].mxu0 }
0x1f82   :  { %v16578_v23 = vpop.f32.mrb[93].mxu0  ;;  %16582 = vmatmul.mubr.msk.f32.vlgmr.msra.gmra.mrb[74].mxu1 %vm358_vm2, %v7131_v22  ;;  %v15201_v22 = vld [vmem:[%s20276_s11 + $0x178] sm:$0xff] }
0x1f83   :  { %17390 = vmatpush3.bf16.msra.mxu1 %v17387_v58  ;;  %v17415_v23 = vpack.c.bf16 %v15201_v22, %v15200_v21  ;;  %v15212_v21 = vld [vmem:[#allocation5 + $0x3] ss:$0 sm:$0xff] }
0x1fab   :  { %v7235_v8 = vpop.xlane.xlu0 %7234 }
0x1fac   :  { %v7239_v10 = vmul.f32 0.03125, %v7235_v8  ;;  %v15183_v8 = vld [vmem:[%s20275_s10 + $0x2] ss:$0 sm:$0xff] }
0x1fae   :  { %v7241_v24 = vadd.f32 1e-05, %v7239_v10 }
0x1fb0   :  { %17735 = vrsqrt.f32 %v7241_v24 }
0x1fba   :  { %v17736_v25 = vpop.eup %17735 }
0x1fbb   :  { %v7245_v28 = vmul.f32 %v17736_v25, %v7229_v14 }
0x1fbc   :  { %v6905_v13 = vpop.f32.mrb[70].mxu1 }
0x1fbd   :  { %v6906_v51 = vadd.f32 %v6905_v13, %v6832_v16  ;;  %v16563_v31 = vpop.f32.mrb[71].mxu1  ;;  %v7255_v12 = vmul.f32 %v19062_v26, %v7245_v28 }
0x1fbf   :  { %v19071_v33 = vadd.f32 %v19067_v27, %v7255_v12 }
0x1fc1   :  { %16592 = vmatprep.mubr.msk.f32.mxu0 %vm98_vm0, %v19071_v33 }
0x2051   :  { %v7054_v34 = vpop.f32.mrb[72].mxu1 }
0x2052   :  { %v7058_v36 = vadd.f32 %v7054_v34, %v6906_v51  ;;  %v16573_v38 = vpop.f32.mrb[73].mxu1 }
0x2055   :  { %v7204_v37 = vpop.f32.mrb[74].mxu1 }
0x2056   :  { %v7208_v39 = vadd.f32 %v7204_v37, %v7058_v36  ;;  %v16583_v40 = vpop.f32.mrb[75].mxu1 }
0x2058   :  { %v7218_v41 = vadd.f32 %v19035_v59, %v7208_v39  ;;  %v15188_v59 = vld [vmem:[%s20276_s11 + $0x110] sm:$0xff] }
0x2059   :  { %v17391_v61 = vpack.c.bf16 %v15189_v60, %v15188_v59  ;;  %v17427_v59 = vpack.c.bf16 %v15216_v57, %v15215_v56 }
0x205a   :  { %v7220_v42 = vadd.f32 %v7218_v41, %v18827_v32  ;;  %v15180_v32 = vld [vmem:[%s20274_s9 + $0x50] sm:$0xff] }
0x205b   :  { %v17383_v53 = vpack.c.bf16 %v15181_v5, %v15180_v32  ;;  %17392 = vmatprep.subr.bf16.mxu1 %v17391_v61  ;;  %v17419_v32 = vpack.c.bf16 %v15209_v49, %v15208_v48  ;;  %v15211_v5 = vld [vmem:[%s20290_s29 + $0x78] sm:$0xff] }
0x205c   :  { %v7224_v43 = vsel %vm98_vm0, %v7220_v42, 0.0  ;;  %17394 = vmatpush3.bf16.msra.mxu1 %v17391_v61 }
0x205d   :  { %7225 = vadd.xlane.f32.xlu1 %v7224_v43  ;;  %17384 = vmatprep.subr.bf16.mxu0 %v17383_v53 }
0x205e   :  { %17386 = vmatpush3.bf16.msra.mxu0 %v17383_v53  ;;  %17396 = vmatprep.subr.bf16.mxu1 %v17395_v0  ;;  %v17423_v53 = vpack.c.bf16 %v15211_v5, %v15210_v47 }
0x205f   :  { %17420 = vmatprep.subr.bf16.mxu0 %v17419_v32 }
0x2060   :  { %17398 = vmatpush3.bf16.msra.mxu1 %v17395_v0 }
0x2061   :  { %17400 = vmatprep.subr.bf16.mxu1 %v17399_v1 }
0x2064   :  { %17402 = vmatpush3.bf16.msra.mxu1 %v17399_v1 }
0x2065   :  { %17404 = vmatprep.subr.bf16.mxu1 %v17403_v4 }
0x2068   :  { %17406 = vmatpush3.bf16.msra.mxu1 %v17403_v4 }
0x2069   :  { %17408 = vmatprep.subr.bf16.mxu1 %v17407_v29 }
0x206c   :  { %17410 = vmatpush3.bf16.msra.mxu1 %v17407_v29  ;;  %v15217_v29 = vld [vmem:[%s20268_s3 + $0x70] sm:$0xff] }
0x206d   :  { %17412 = vmatprep.subr.bf16.mxu1 %v17411_v9 }
0x2070   :  { %17414 = vmatpush3.bf16.msra.mxu1 %v17411_v9 }
0x2071   :  { %17416 = vmatprep.subr.bf16.mxu1 %v17415_v23 }
0x2074   :  { %17418 = vmatpush3.bf16.msra.mxu1 %v17415_v23 }
0x2075   :  { %16668 = vmatprep.subr.mxu1 %v17941_v20 }
0x20ea   :  { %v7226_v30 = vpop.xlane.xlu1 %7225 }
0x20eb   :  { %v7228_v35 = vmul.f32 0.03125, %v7226_v30 }
0x20ed   :  { %v7230_v44 = vsub.f32 %v7220_v42, %v7228_v35 }
0x20ef   :  { %v7232_v45 = vmul.f32 %v7230_v44, %v7230_v44 }
0x20f1   :  { %v7236_v46 = vsel %vm98_vm0, %v7232_v45, 0.0 }
0x20f2   :  { %7237 = vadd.xlane.f32.xlu0 %v7236_v46 }
0x217f   :  { %v7238_v11 = vpop.xlane.xlu0 %7237 }
0x2180   :  { %v7240_v14 = vmul.f32 0.03125, %v7238_v11  ;;  %v17431_v11 = vpack.c.bf16 %v15218_v6, %v15217_v29 }
0x2182   :  { %v7242_v15 = vadd.f32 1e-05, %v7240_v14  ;;  %v15223_v14 = vld [vmem:[%s20270_s5 + $0x60] sm:$0xff] }
0x2184   :  { %17737 = vrsqrt.f32 %v7242_v15  ;;  %v15224_v15 = vld [vmem:[%s20270_s5 + $0x68] sm:$0xff] }
0x218e   :  { %v17738_v17 = vpop.eup %17737 }
0x218f   :  { %v7246_v16 = vmul.f32 %v17738_v17, %v7230_v44  ;;  %v17435_v17 = vpack.c.bf16 %v15224_v15, %v15223_v14 }
0x2191   :  { %v7256_v18 = vmul.f32 %v19062_v26, %v7246_v16  ;;  %v15225_v16 = vld [vmem:[%s20270_s5 + $0x70] sm:$0xff] }
0x2193   :  { %v7266_v19 = vadd.f32 %v19067_v27, %v7256_v18  ;;  %v15203_v27 = vld [vmem:[%s20277_s12 + $0x2] ss:$0 sm:$0xff]  ;;  %v15226_v18 = vld [vmem:[%s20270_s5 + $0x78] sm:$0xff] }
0x2195   :  { %16593 = vmatmul.mubr.msk.f32.vlgmr.msra.gmra.mrb[94].mxu0 %vm98_vm0, %v7266_v19 }
0x2196   :  { %17422 = vmatpush3.bf16.msra.mxu0 %v17419_v32 }
0x2197   :  { %17424 = vmatprep.subr.bf16.mxu0 %v17423_v53 }
0x219a   :  { %17426 = vmatpush3.bf16.msra.mxu0 %v17423_v53 }
0x219b   :  { %17428 = vmatprep.subr.bf16.mxu0 %v17427_v59 }
0x2268   :  { %v16594_v10 = vpop.f32.mrb[94].mxu0 }
0x2269   :  { %v7358_v24 = vadd.f32 %v16594_v10, %v15183_v8  ;;  %v7352_v25 = vpop.f32.mrb[95].mxu0 }
0x226a   :  { %v7353_v26 = vadd.f32 %v15183_v8, %v7352_v25 }
0x226b   :  { %v7362_v13 = vmax.f32 %v7358_v24, 0.0  ;;  %v15220_v24 = vld [vmem:[%s20269_s4 + $0x3] ss:$0 sm:$0xff] }
0x226c   :  { %v7361_v28 = vmax.f32 %v7353_v26, 0.0 }
0x226e   :  { %16627 = vmatprep.mubr.f32.mxu1 %v7361_v28 }
0x226f   :  { %16628 = vmatmul.mubr.f32.vlgmr.msra.gmra.mrb[76].mxu1 %v7362_v13 }
0x2270   :  { %16670 = vmatprep.mubr.msk.f32.mxu1 %vm17942_vm1, %v17941_v20 }
0x2342   :  { %v16629_v51 = vpop.f32.mrb[76].mxu1 }
0x2343   :  { %v7454_v31 = vpop.f32.mrb[77].mxu1  ;;  %v7460_v12 = vadd.f32 %v16629_v51, %v15203_v27 }
0x2344   :  { %v7455_v34 = vadd.f32 %v15203_v27, %v7454_v31  ;;  %v15228_v27 = vld [vmem:[%s20271_s6 + $0x3] ss:$0 sm:$0xff] }
0x2345   :  { %v7464_v38 = vadd.f32 %v7460_v12, %v7266_v19  ;;  %v17439_v19 = vpack.c.bf16 %v15226_v18, %v15225_v16 }
0x2346   :  { %v7463_v36 = vadd.f32 %v7455_v34, %v19071_v33 }
0x2347   :  { %v7468_v39 = vsel %vm98_vm0, %v7464_v38, 0.0 }
0x2348   :  { %v7465_v37 = vsel %vm98_vm0, %v7463_v36, 0.0 }
0x2349   :  { %7466 = vadd.xlane.f32.xlu0 %v7465_v37 }
0x234d   :  { %7469 = vadd.xlane.f32.xlu0 %v7468_v39 }
0x23d6   :  { %v7467_v40 = vpop.xlane.xlu0 %7466 }
0x23d7   :  { %v7471_v41 = vmul.f32 0.03125, %v7467_v40 }
0x23d9   :  { %v7473_v42 = vsub.f32 %v7463_v36, %v7471_v41 }
0x23da   :  { %v7470_v43 = vpop.xlane.xlu0 %7469 }
0x23db   :  { %v7472_v30 = vmul.f32 0.03125, %v7470_v43  ;;  %v7475_v35 = vmul.f32 %v7473_v42, %v7473_v42 }
0x23dd   :  { %v7474_v44 = vsub.f32 %v7464_v38, %v7472_v30  ;;  %v7477_v45 = vsel %vm98_vm0, %v7475_v35, 0.0 }
0x23de   :  { %7478 = vadd.xlane.f32.xlu0 %v7477_v45 }
0x23df   :  { %v7476_v46 = vmul.f32 %v7474_v44, %v7474_v44 }
0x23e1   :  { %v7480_v33 = vsel %vm98_vm0, %v7476_v46, 0.0 }
0x23e2   :  { %7481 = vadd.xlane.f32.xlu0 %v7480_v33 }
0x246b   :  { %v7479_v58 = vpop.xlane.xlu0 %7478 }
0x246c   :  { %v7483_v60 = vmul.f32 0.03125, %v7479_v58 }
0x246e   :  { %v7485_v61 = vadd.f32 1e-05, %v7483_v60 }
0x246f   :  { %v7482_v62 = vpop.xlane.xlu0 %7481 }
0x2470   :  { %17739 = vrsqrt.f32 %v7485_v61  ;;  %v7484_v63 = vmul.f32 0.03125, %v7482_v62 }
0x2472   :  { %v7486_v0 = vadd.f32 1e-05, %v7484_v63 }
0x2474   :  { %17741 = vrsqrt.f32 %v7486_v0 }
0x247a   :  { %v17740_v52 = vpop.eup %17739 }
0x247b   :  { %v7489_v1 = vmul.f32 %v17740_v52, %v7473_v42 }
0x247d   :  { %v7499_v3 = vmul.f32 %v15205_v50, %v7489_v1 }
0x247e   :  { %v17742_v4 = vpop.eup %17741 }
0x247f   :  { %v7490_v55 = vmul.f32 %v17742_v4, %v7474_v44  ;;  %v19180_v7 = vadd.f32 %v15207_v2, %v7499_v3 }
0x2481   :  { %v7500_v54 = vmul.f32 %v15205_v50, %v7490_v55  ;;  %16638 = vmatprep.mubr.msk.f32.mxu0 %vm98_vm0, %v19180_v7 }
0x2483   :  { %v19190_v9 = vadd.f32 %v15207_v2, %v7500_v54 }
0x2485   :  { %16639 = vmatmul.mubr.msk.f32.vlgmr.msra.gmra.mrb[96].mxu0 %vm98_vm0, %v19190_v9 }
0x2486   :  { %17430 = vmatpush3.bf16.msra.mxu0 %v17427_v59  ;;  %16649 = vmatprep.mubr.msk.f32.mxu0 %vm98_vm0, %v19180_v7 }
0x2487   :  { %17432 = vmatprep.subr.bf16.mxu0 %v17431_v11 }
0x248a   :  { %17434 = vmatpush3.bf16.msra.mxu0 %v17431_v11 }
0x248b   :  { %17436 = vmatprep.subr.bf16.mxu0 %v17435_v17 }
0x248d   :  { %16650 = vmatmul.mubr.msk.f32.vlgmr.msra.gmra.mrb[98].mxu0 %vm98_vm0, %v19190_v9 }
0x248e   :  { %17438 = vmatpush3.bf16.msra.mxu0 %v17435_v17  ;;  %16660 = vmatprep.mubr.msk.f32.mxu0 %vm98_vm0, %v19180_v7 }
0x248f   :  { %17440 = vmatprep.subr.bf16.mxu0 %v17439_v19 }
0x2492   :  { %17442 = vmatpush3.bf16.msra.mxu0 %v17439_v19 }
0x2493   :  { %16663 = vmatprep.subr.mxu0 %v17941_v20 }
0x2495   :  { %16661 = vmatmul.mubr.msk.f32.vlgmr.msra.gmra.mrb[100].mxu0 %vm98_vm0, %v19190_v9 }
0x2496   :  { %16665 = vmatprep.mubr.msk.f32.mxu0 %vm17942_vm1, %v17941_v20 }
0x2558   :  { %v16640_v22 = vpop.f32.mrb[96].mxu0 }
0x2559   :  { %v7596_v23 = vpop.f32.mrb[97].mxu0  ;;  %v7602_v34 = vadd.f32 %v16640_v22, %v15212_v21 }
0x255a   :  { %v7597_v8 = vadd.f32 %v15212_v21, %v7596_v23 }
0x255b   :  { %v19236_v36 = vmul.f32 0.35355338, %v7602_v34 }
0x255c   :  { %v7605_v10 = vmul.f32 0.35355338, %v7597_v8 }
0x255e   :  { %7864 = vrot.lane.b32.xlu0 %v7605_v10, %s17944_s23 }
0x2560   :  { %v16651_v25 = vpop.f32.mrb[98].mxu0 }
0x2561   :  { %v7692_v26 = vadd.f32 %v16651_v25, %v15220_v24  ;;  %v7686_v28 = vpop.f32.mrb[99].mxu0 }
0x2562   :  { %v7687_v13 = vadd.f32 %v15220_v24, %v7686_v28 }
0x2564   :  { %7866 = vrot.lane.b32.xlu1 %v7687_v13, %s17944_s23  ;;  %16664 = vmatpush3.xpose.msk.msra.mxu0 %vm358_vm2, %v7687_v13 }
0x2565   :  { %8022 = vrot.lane.b32.xlu0 %v7687_v13, %s17945_s24  ;;  %16673 = vmatprep.subr.mxu0 %v17941_v20 }
0x2567   :  { %16666 = vmatmul.mubr.msk.f32.vlgmr.msra.gmra.mrb[102].mxu0 %vm358_vm2, %v7605_v10 }
0x2568   :  { %v16662_v51 = vpop.f32.mrb[100].mxu0  ;;  %7944 = vrot.lane.b32.xlu1 %v7687_v13, %s17943_s22  ;;  %16675 = vmatprep.mubr.msk.f32.mxu0 %vm17942_vm1, %v17941_v20 }
0x2569   :  { %v19232_v31 = vadd.f32 %v16662_v51, %v15228_v27  ;;  %v7774_v12 = vpop.f32.mrb[101].mxu0 }
0x256a   :  { %v19270_v5 = vadd.f32 %v15228_v27, %v7774_v12 }
0x256c   :  { %7942 = vrot.lane.b32.xlu1 %v7605_v10, %s17943_s22 }
0x2570   :  { %8020 = vrot.lane.b32.xlu1 %v7605_v10, %s17945_s24 }
0x2574   :  { %8174 = vrot.lane.b32.xlu1 %v19236_v36, %s17944_s23 }
0x25d0   :  { %v7865_v38 = vpop.permute.xlu0 %7864 }
0x25d6   :  { %v7867_v37 = vpop.permute.xlu1 %7866 }
0x25d7   :  { %16669 = vmatpush3.xpose.msk.msra.mxu1 %vm358_vm2, %v7867_v37  ;;  %v8023_v39 = vpop.permute.xlu0 %8022 }
0x25d8   :  { %16678 = vmatprep.subr.mxu1 %v17941_v20 }
0x25da   :  { %v7945_v40 = vpop.permute.xlu1 %7944  ;;  %16671 = vmatmul.mubr.msk.f32.vlgmr.msra.gmra.mrb[78].mxu1 %vm358_vm2, %v7865_v38  ;;  %v19323_v38 = vld [vmem:[%s20272_s7 + $0x68] sm:$0xff] }
0x25db   :  { %16674 = vmatpush3.xpose.msk.msra.mxu0 %vm358_vm2, %v7945_v40  ;;  %16679 = vmatpush3.xpose.msk.msra.mxu1 %vm358_vm2, %v8023_v39 }
0x25dc   :  { %16683 = vmatprep.subr.mxu0 %v17941_v20  ;;  %16680 = vmatprep.mubr.msk.f32.mxu1 %vm17942_vm1, %v17941_v20 }
0x25dd   :  { %16688 = vmatprep.subr.mxu1 %v17941_v20 }
0x25de   :  { %v7943_v41 = vpop.permute.xlu1 %7942 }
0x25df   :  { %16676 = vmatmul.mubr.msk.f32.vlgmr.msra.gmra.mrb[104].mxu0 %vm358_vm2, %v7943_v41 }
0x25e0   :  { %16684 = vmatpush3.xpose.msk.msra.mxu0 %vm358_vm2, %v7692_v26  ;;  %16685 = vmatprep.mubr.msk.f32.mxu0 %vm17942_vm1, %v17941_v20 }
0x25e1   :  { %16693 = vmatprep.subr.mxu0 %v17941_v20 }
0x25e2   :  { %v8021_v42 = vpop.permute.xlu1 %8020 }
0x25e3   :  { %16681 = vmatmul.mubr.msk.f32.vlgmr.msra.gmra.mrb[80].mxu1 %vm358_vm2, %v8021_v42  ;;  %16686 = vmatmul.mubr.msk.f32.vlgmr.msra.gmra.mrb[106].mxu0 %vm358_vm2, %v19236_v36 }
0x25e4   :  { %16690 = vmatprep.mubr.msk.f32.mxu1 %vm17942_vm1, %v17941_v20  ;;  %16695 = vmatprep.mubr.msk.f32.mxu0 %vm17942_vm1, %v17941_v20 }
0x25e6   :  { %v8175_v61 = vpop.permute.xlu1 %8174 }
0x263a   :  { %v19261_v43 = vpop.f32.mrb[102].mxu0 }
0x263b   :  { %v16667_v30 = vpop.f32.mrb[103].mxu0  ;;  %v8408_v55 = vsel %vm358_vm2, %v19261_v43, -inf }
0x26ad   :  { %v7938_v35 = vpop.f32.mrb[78].mxu1 }
0x26ae   :  { %v16672_v44 = vpop.f32.mrb[79].mxu1  ;;  %v8411_v45 = vsel %vm358_vm2, %v7938_v35, -inf }
0x26af   :  { %8412 = vmax.xlane.f32.xlu0 %v8411_v45 }
0x26b2   :  { %v8016_v46 = vpop.f32.mrb[104].mxu0 }
0x26b3   :  { %v16677_v33 = vpop.f32.mrb[105].mxu0  ;;  %v8414_v53 = vsel %vm358_vm2, %v8016_v46, -inf }
0x26b6   :  { %v19264_v48 = vpop.f32.mrb[80].mxu1  ;;  %v19266_v49 = vpop.f32.mrb[106].mxu0 }
0x26b7   :  { %v16682_v47 = vpop.f32.mrb[81].mxu1  ;;  %v16687_v32 = vpop.f32.mrb[107].mxu0  ;;  %v8417_v56 = vsel %vm358_vm2, %v19264_v48, -inf  ;;  %v8420_v28 = vsel %vm358_vm2, %v19266_v49, -inf }
0x26c5   :  { %8176 = vrot.lane.b32.xlu0 %v7692_v26, %s17944_s23 }
0x26c9   :  { %8332 = vrot.lane.b32.xlu0 %v7692_v26, %s17945_s24 }
0x26cd   :  { %8570 = vrot.lane.b32.xlu0 %v19270_v5, %s17944_s23 }
0x26ec   :  { %8415 = vmax.xlane.f32.xlu0 %v8414_v53 }
0x26f0   :  { %8418 = vmax.xlane.f32.xlu0 %v8417_v56 }
0x2706   :  { %8254 = vrot.lane.b32.xlu0 %v7692_v26, %s17943_s22 }
0x273c   :  { %v8413_v57 = vpop.xlane.xlu0 %8412 }
0x273d   :  { %v8433_v59 = vsub.f32 %v7938_v35, %v8413_v57 }
0x273f   :  { %v8442_v58 = vmul.f32 1.442695, %v8433_v59 }
0x2740   :  { %v8177_v60 = vpop.permute.xlu0 %8176 }
0x2741   :  { %17743 = vpow2.f32 %v8442_v58  ;;  %16689 = vmatpush3.xpose.msk.msra.mxu1 %vm358_vm2, %v8177_v60 }
0x2742   :  { %16698 = vmatprep.subr.mxu1 %v17941_v20 }
0x2744   :  { %16691 = vmatmul.mubr.msk.f32.vlgmr.msra.gmra.mrb[82].mxu1 %vm358_vm2, %v8175_v61  ;;  %v8333_v62 = vpop.permute.xlu0 %8332 }
0x2745   :  { %16699 = vmatpush3.xpose.msk.msra.mxu1 %vm358_vm2, %v8333_v62  ;;  %16700 = vmatprep.mubr.msk.f32.mxu1 %vm17942_vm1, %v17941_v20 }
0x2746   :  { %16708 = vmatprep.subr.mxu1 %v17941_v20 }
0x2748   :  { %v8571_v52 = vpop.permute.xlu0 %8570 }
0x274b   :  { %v17744_v63 = vpop.eup %17743 }
0x274c   :  { %v8459_v0 = vsel %vm358_vm2, %v17744_v63, 0.0 }
0x274d   :  { %8460 = vadd.xlane.f32.xlu1 %v8459_v0 }
0x275e   :  { %8330 = vrot.lane.b32.xlu1 %v19236_v36, %s17945_s24 }
0x2779   :  { %v8416_v50 = vpop.xlane.xlu0 %8415 }
0x277a   :  { %v8434_v1 = vsub.f32 %v8016_v46, %v8416_v50  ;;  %v15231_v46 = vld [vmem:[%s20272_s7 + $0x60] sm:$0xff] }
0x277c   :  { %v8444_v2 = vmul.f32 1.442695, %v8434_v1 }
0x277d   :  { %v8419_v3 = vpop.xlane.xlu0 %8418 }
0x277e   :  { %17745 = vpow2.f32 %v8444_v2  ;;  %v8435_v8 = vsub.f32 %v19264_v48, %v8419_v3  ;;  %v19370_v3 = vld [vmem:[%s20272_s7 + $0x78] sm:$0xff] }
0x2780   :  { %v8446_v10 = vmul.f32 1.442695, %v8435_v8 }
0x2781   :  { %v8255_v4 = vpop.permute.xlu0 %8254 }
0x2782   :  { %8409 = vmax.xlane.f32.xlu1 %v8408_v55  ;;  %16694 = vmatpush3.xpose.msk.msra.mxu0 %vm358_vm2, %v8255_v4 }
0x2783   :  { %16703 = vmatprep.subr.mxu0 %v17941_v20 }
0x2788   :  { %v17746_v29 = vpop.eup %17745 }
0x2789   :  { %v8462_v6 = vsel %vm358_vm2, %v17746_v29, 0.0 }
0x278a   :  { %8463 = vadd.xlane.f32.xlu0 %v8462_v6 }
0x27a0   :  { %8942 = vrot.lane.b32.xlu0 %v19270_v5, %s17945_s24 }
0x27da   :  { %v8461_v54 = vpop.xlane.xlu1 %8460 }
0x27db   :  { %17747 = vrcp.f32 %v8461_v54 }
0x27de   :  { %v8331_v11 = vpop.permute.xlu1 %8330 }
0x27df   :  { %16701 = vmatmul.mubr.msk.f32.vlgmr.msra.gmra.mrb[84].mxu1 %vm358_vm2, %v8331_v11 }
0x27e0   :  { %16709 = vmatpush3.msra.mxu1 %v8571_v52  ;;  %16710 = vmatprep.mubr.msk.f32.mxu1 %vm17942_vm1, %v17941_v20 }
0x27e1   :  { %16718 = vmatprep.subr.mxu1 %v17941_v20 }
0x27e5   :  { %v17748_v14 = vpop.eup %17747 }
0x27e6   :  { %v8489_v15 = vmul.f32 %v17748_v14, %v17744_v63  ;;  %v19359_v63 = vld [vmem:[%s20272_s7 + $0x70] sm:$0xff] }
0x27e8   :  { %16711 = vmatmul.mubr.msk.f32.vlgmr.msra.gmra.mrb[86].mxu1 %vm358_vm2, %v8489_v15 }
0x27e9   :  { %16720 = vmatprep.mubr.msk.f32.mxu1 %vm17942_vm1, %v17941_v20  ;;  %16719 = vmatpush3.msra.mxu1 %v15231_v46 }
0x27ea   :  { %16728 = vmatprep.subr.mxu1 %v17941_v20 }
0x280f   :  { %v8410_v17 = vpop.xlane.xlu1 %8409 }
0x2810   :  { %v8432_v16 = vsub.f32 %v19261_v43, %v8410_v17 }
0x2812   :  { %v8440_v18 = vmul.f32 1.442695, %v8432_v16 }
0x2814   :  { %17749 = vpow2.f32 %v8440_v18 }
0x2815   :  { %17751 = vpow2.f32 %v8446_v10 }
0x2817   :  { %v8248_v19 = vpop.f32.mrb[82].mxu1  ;;  %v8464_v40 = vpop.xlane.xlu0 %8463 }
0x2818   :  { %v16692_v21 = vpop.f32.mrb[83].mxu1  ;;  %v8423_v26 = vsel %vm358_vm2, %v8248_v19, -inf }
0x281b   :  { %v8943_v35 = vpop.permute.xlu0 %8942 }
0x281e   :  { %v17750_v22 = vpop.eup %17749 }
0x281f   :  { %v8456_v23 = vsel %vm358_vm2, %v17750_v22, 0.0  ;;  %v17752_v24 = vpop.eup %17751 }
0x2820   :  { %8457 = vadd.xlane.f32.xlu1 %v8456_v23  ;;  %v8465_v25 = vsel %vm358_vm2, %v17752_v24, 0.0 }
0x2831   :  { %8252 = vrot.lane.b32.xlu1 %v19236_v36, %s17943_s22 }
0x2855   :  { %8466 = vadd.xlane.f32.xlu1 %v8465_v25 }
0x2866   :  { %8792 = vrot.lane.b32.xlu1 %v19270_v5, %s17943_s22 }
0x288a   :  { %8424 = vmax.xlane.f32.xlu1 %v8423_v26 }
0x288e   :  { %8421 = vmax.xlane.f32.xlu1 %v8420_v28 }
0x28ad   :  { %v8458_v13 = vpop.xlane.xlu1 %8457 }
0x28ae   :  { %17753 = vrcp.f32 %v8458_v13 }
0x28af   :  { %17755 = vrcp.f32 %v8464_v40 }
0x28b1   :  { %v8253_v27 = vpop.permute.xlu1 %8252 }
0x28b2   :  { %16696 = vmatmul.mubr.msk.f32.vlgmr.msra.gmra.mrb[108].mxu0 %vm358_vm2, %v8253_v27  ;;  %v19314_v51 = vpop.f32.mrb[84].mxu1 }
0x28b3   :  { %16704 = vmatpush3.msra.mxu0 %v19270_v5  ;;  %v16702_v12 = vpop.f32.mrb[85].mxu1  ;;  %16705 = vmatprep.mubr.msk.f32.mxu0 %vm17942_vm1, %v17941_v20  ;;  %v8429_v61 = vsel %vm358_vm2, %v19314_v51, -inf }
0x28b4   :  { %16713 = vmatprep.subr.mxu0 %v17941_v20 }
0x28b8   :  { %v17754_v34 = vpop.eup %17753 }
0x28b9   :  { %v8488_v36 = vmul.f32 %v17754_v34, %v17750_v22  ;;  %v17756_v42 = vpop.eup %17755 }
0x28ba   :  { %v8490_v30 = vmul.f32 %v17756_v42, %v17746_v29 }
0x28bb   :  { %16706 = vmatmul.mubr.msk.f32.vlgmr.msra.gmra.mrb[110].mxu0 %vm358_vm2, %v8488_v36  ;;  %v8642_v37 = vpop.f32.mrb[86].mxu1 }
0x28bc   :  { %v16712_v39 = vpop.f32.mrb[87].mxu1  ;;  %16714 = vmatpush3.msra.mxu0 %v19323_v38  ;;  %16715 = vmatprep.mubr.msk.f32.mxu0 %vm17942_vm1, %v17941_v20 }
0x28bd   :  { %16723 = vmatprep.subr.mxu0 %v17941_v20 }
0x28bf   :  { %16716 = vmatmul.mubr.msk.f32.vlgmr.msra.gmra.mrb[112].mxu0 %vm358_vm2, %v8642_v37  ;;  %v19398_v37 = vld [vmem:[%s20273_s8 + $0x3] ss:$0 sm:$0xff] }
0x28c0   :  { %16725 = vmatprep.mubr.msk.f32.mxu0 %vm17942_vm1, %v17941_v20 }
0x28e2   :  { %v8467_v41 = vpop.xlane.xlu1 %8466 }
0x28e3   :  { %17757 = vrcp.f32 %v8467_v41 }
0x28e6   :  { %v8793_v43 = vpop.permute.xlu1 %8792 }
0x28e7   :  { %16724 = vmatpush3.msra.mxu0 %v8793_v43 }
0x28e8   :  { %16726 = vmatmul.mubr.msk.f32.vlgmr.msra.gmra.mrb[114].mxu0 %vm358_vm2, %v8490_v30  ;;  %16733 = vmatprep.subr.mxu0 %v17941_v20 }
0x28e9   :  { %16734 = vmatpush3.msra.mxu0 %v8943_v35  ;;  %16735 = vmatprep.mubr.msk.f32.mxu0 %vm17942_vm1, %v17941_v20 }
0x28ea   :  { %16743 = vmatprep.subr.mxu0 %v17941_v20 }
0x28ed   :  { %v17758_v44 = vpop.eup %17757 }
0x28ee   :  { %v8491_v45 = vmul.f32 %v17758_v44, %v17752_v24 }
0x28f0   :  { %16736 = vmatmul.mubr.msk.f32.vlgmr.msra.gmra.mrb[116].mxu0 %vm358_vm2, %v8491_v45 }
0x28f1   :  { %16744 = vmatpush3.msra.mxu0 %v19232_v31  ;;  %16745 = vmatprep.mubr.msk.f32.mxu0 %vm17942_vm1, %v17941_v20 }
0x28f2   :  { %16753 = vmatprep.subr.mxu0 %v17941_v20 }
0x2917   :  { %v8425_v33 = vpop.xlane.xlu1 %8424 }
0x2918   :  { %v8437_v48 = vsub.f32 %v8248_v19, %v8425_v33 }
0x291a   :  { %v8450_v47 = vmul.f32 1.442695, %v8437_v48 }
0x291b   :  { %v8422_v53 = vpop.xlane.xlu1 %8421 }
0x291c   :  { %17759 = vpow2.f32 %v8450_v47  ;;  %v8436_v56 = vsub.f32 %v19266_v49, %v8422_v53 }
0x291e   :  { %v8448_v57 = vmul.f32 1.442695, %v8436_v56 }
0x2920   :  { %17761 = vpow2.f32 %v8448_v57 }
0x2926   :  { %v17760_v32 = vpop.eup %17759 }
0x2927   :  { %v8471_v5 = vsel %vm358_vm2, %v17760_v32, 0.0 }
0x2928   :  { %8472 = vadd.xlane.f32.xlu0 %v8471_v5 }
0x292a   :  { %v17762_v62 = vpop.eup %17761 }
0x292b   :  { %v8468_v49 = vsel %vm358_vm2, %v17762_v62, 0.0 }
0x293e   :  { %9166 = vrot.lane.b32.xlu0 %v19232_v31, %s17944_s23 }
0x2942   :  { %9388 = vrot.lane.b32.xlu0 %v19232_v31, %s17943_s22 }
0x2985   :  { %v8326_v59 = vpop.f32.mrb[108].mxu0 }
0x2986   :  { %v16697_v58 = vpop.f32.mrb[109].mxu0  ;;  %v8426_v60 = vsel %vm358_vm2, %v8326_v59, -inf }
0x2987   :  { %8427 = vmax.xlane.f32.xlu1 %v8426_v60 }
0x298b   :  { %8430 = vmax.xlane.f32.xlu1 %v8429_v61 }
0x298e   :  { %v8565_v0 = vpop.f32.mrb[110].mxu0 }
0x298f   :  { %8469 = vadd.xlane.f32.xlu1 %v8468_v49  ;;  %v16707_v52 = vpop.f32.mrb[111].mxu0  ;;  %16721 = vmatmul.mubr.msk.f32.vlgmr.msra.gmra.mrb[88].mxu1 %vm358_vm2, %v8565_v0 }
0x2990   :  { %16729 = vmatpush3.msra.mxu1 %v19359_v63  ;;  %16730 = vmatprep.mubr.msk.f32.mxu1 %vm17942_vm1, %v17941_v20 }
0x2991   :  { %16738 = vmatprep.subr.mxu1 %v17941_v20 }
0x2992   :  { %v8715_v50 = vpop.f32.mrb[112].mxu0 }
0x2993   :  { %v16717_v1 = vpop.f32.mrb[113].mxu0 }
0x29b5   :  { %v8473_v2 = vpop.xlane.xlu0 %8472 }
0x29b6   :  { %17763 = vrcp.f32 %v8473_v2  ;;  %v19425_v2 = vld [vmem:[%s20278_s13 + $0x3] ss:$0 sm:$0xff] }
0x29b9   :  { %v9167_v54 = vpop.permute.xlu0 %9166 }
0x29bb   :  { %v8864_v4 = vpop.f32.mrb[114].mxu0 }
0x29bc   :  { %v16727_v55 = vpop.f32.mrb[115].mxu0  ;;  %16731 = vmatmul.mubr.msk.f32.vlgmr.msra.gmra.mrb[90].mxu1 %vm358_vm2, %v8864_v4 }
0x29bd   :  { %16739 = vmatpush3.msra.mxu1 %v19370_v3  ;;  %16740 = vmatprep.mubr.msk.f32.mxu1 %vm17942_vm1, %v17941_v20  ;;  %v9389_v42 = vpop.permute.xlu0 %9388 }
0x29be   :  { %16748 = vmatprep.subr.mxu1 %v17941_v20 }
0x29c0   :  { %v17764_v29 = vpop.eup %17763 }
0x29c1   :  { %v8493_v14 = vmul.f32 %v17764_v29, %v17760_v32 }
0x29c3   :  { %v9014_v6 = vpop.f32.mrb[116].mxu0 }
0x29c4   :  { %v16737_v11 = vpop.f32.mrb[117].mxu0  ;;  %16741 = vmatmul.mubr.msk.f32.vlgmr.msra.gmra.mrb[92].mxu1 %vm358_vm2, %v9014_v6 }
0x29c5   :  { %16749 = vmatpush3.msra.mxu1 %v9167_v54  ;;  %16750 = vmatprep.mubr.msk.f32.mxu1 %vm17942_vm1, %v17941_v20 }
0x29c6   :  { %16758 = vmatprep.subr.mxu1 %v17941_v20 }
0x29c8   :  { %16751 = vmatmul.mubr.msk.f32.vlgmr.msra.gmra.mrb[94].mxu1 %vm358_vm2, %v8493_v14 }
0x29c9   :  { %16759 = vmatpush3.msra.mxu1 %v15231_v46  ;;  %16760 = vmatprep.mubr.msk.f32.mxu1 %vm17942_vm1, %v17941_v20 }
0x29ca   :  { %16768 = vmatprep.subr.mxu1 %v17941_v20 }
0x2a14   :  { %v8428_v15 = vpop.xlane.xlu1 %8427 }
0x2a15   :  { %v8438_v17 = vsub.f32 %v8326_v59, %v8428_v15 }
0x2a17   :  { %v8452_v16 = vmul.f32 1.442695, %v8438_v17 }
0x2a18   :  { %v8431_v18 = vpop.xlane.xlu1 %8430 }
0x2a19   :  { %17765 = vpow2.f32 %v8452_v16  ;;  %v8439_v19 = vsub.f32 %v19314_v51, %v8431_v18 }
0x2a1b   :  { %v8454_v21 = vmul.f32 1.442695, %v8439_v19 }
0x2a1c   :  { %v8470_v22 = vpop.xlane.xlu1 %8469 }
0x2a1d   :  { %17767 = vpow2.f32 %v8454_v21 }
0x2a1e   :  { %17769 = vrcp.f32 %v8470_v22 }
0x2a23   :  { %v17766_v23 = vpop.eup %17765 }
0x2a24   :  { %v8474_v8 = vsel %vm358_vm2, %v17766_v23, 0.0 }
0x2a25   :  { %8475 = vadd.xlane.f32.xlu1 %v8474_v8 }
0x2a27   :  { %v17768_v10 = vpop.eup %17767 }
0x2a28   :  { %v17770_v24 = vpop.eup %17769  ;;  %v8477_v25 = vsel %vm358_vm2, %v17768_v10, 0.0 }
0x2a29   :  { %v8492_v26 = vmul.f32 %v17770_v24, %v17762_v62  ;;  %8478 = vadd.xlane.f32.xlu1 %v8477_v25 }
0x2a2b   :  { %16746 = vmatmul.mubr.msk.f32.vlgmr.msra.gmra.mrb[118].mxu0 %vm358_vm2, %v8492_v26 }
0x2a2c   :  { %16754 = vmatpush3.msra.mxu0 %v19323_v38  ;;  %16755 = vmatprep.mubr.msk.f32.mxu0 %vm17942_vm1, %v17941_v20 }
0x2a2d   :  { %16763 = vmatprep.subr.mxu0 %v17941_v20 }
0x2a3a   :  { %9538 = vrot.lane.b32.xlu1 %v19232_v31, %s17945_s24 }
0x2a62   :  { %v8788_v28 = vpop.f32.mrb[88].mxu1 }
0x2a63   :  { %v8789_v13 = vadd.f32 %v8788_v28, %v8715_v50  ;;  %v16722_v27 = vpop.f32.mrb[89].mxu1  ;;  %v15273_v28 = vld [vmem:[%s20274_s9 + $0x60] sm:$0xff] }
0x2a8f   :  { %v8937_v51 = vpop.f32.mrb[90].mxu1 }
0x2a90   :  { %v8941_v12 = vadd.f32 %v8937_v51, %v8789_v13  ;;  %v16732_v34 = vpop.f32.mrb[91].mxu1  ;;  %v15274_v13 = vld [vmem:[%s20274_s9 + $0x68] sm:$0xff]  ;;  %v15276_v51 = vld [vmem:[%s20274_s9 + $0x78] sm:$0xff] }
0x2a91   :  { %v17443_v27 = vpack.c.bf16 %v15274_v13, %v15273_v28  ;;  %v15281_v34 = vld [vmem:[%s20276_s11 + $0x180] sm:$0xff]  ;;  %v15304_v13 = vld [vmem:[%s20290_s29 + $0x88] sm:$0xff] }
0x2a92   :  { %v15303_v28 = vld [vmem:[%s20290_s29 + $0x80] sm:$0xff] }
0x2a97   :  { %v9087_v36 = vpop.f32.mrb[92].mxu1 }
0x2a98   :  { %v9091_v38 = vadd.f32 %v9087_v36, %v8941_v12  ;;  %v16742_v39 = vpop.f32.mrb[93].mxu1  ;;  %v15282_v36 = vld [vmem:[%s20276_s11 + $0x188] sm:$0xff] }
0x2a99   :  { %v15284_v39 = vld [vmem:[%s20276_s11 + $0x198] sm:$0xff] }
0x2a9a   :  { %v9696_v40 = vadd.f32 %v19398_v37, %v9091_v38  ;;  %v17451_v38 = vpack.c.bf16 %v15282_v36, %v15281_v34  ;;  %v15310_v34 = vld [vmem:[%s20268_s3 + $0x80] sm:$0xff]  ;;  %v15311_v36 = vld [vmem:[%s20268_s3 + $0x88] sm:$0xff] }
0x2a9b   :  { %v9238_v41 = vpop.f32.mrb[94].mxu1 }
0x2a9c   :  { %v16752_v43 = vpop.f32.mrb[95].mxu1  ;;  %16756 = vmatmul.mubr.msk.f32.vlgmr.msra.gmra.mrb[120].mxu0 %vm358_vm2, %v9238_v41  ;;  %v9698_v31 = vadd.f32 %v9696_v40, %v19180_v7  ;;  %v15285_v41 = vld [vmem:[%s20276_s11 + $0x1a0] sm:$0xff] }
0x2a9d   :  { %16764 = vmatpush3.msra.mxu0 %v9389_v42  ;;  %16765 = vmatprep.mubr.msk.f32.mxu0 %vm17942_vm1, %v17941_v20  ;;  %v15286_v42 = vld [vmem:[%s20276_s11 + $0x1a8] sm:$0xff] }
0x2a9e   :  { %v9700_v30 = vsel %vm98_vm0, %v9698_v31, 0.0  ;;  %16773 = vmatprep.subr.mxu0 %v17941_v20  ;;  %v17459_v43 = vpack.c.bf16 %v15286_v42, %v15285_v41 }
0x2a9f   :  { %9701 = vadd.xlane.f32.xlu0 %v9700_v30  ;;  %v15288_v30 = vld [vmem:[%s20276_s11 + $0x1b8] sm:$0xff] }
0x2ab2   :  { %v8476_v35 = vpop.xlane.xlu1 %8475 }
0x2ab3   :  { %17771 = vrcp.f32 %v8476_v35 }
0x2ab6   :  { %v8479_v44 = vpop.xlane.xlu1 %8478 }
0x2ab7   :  { %17773 = vrcp.f32 %v8479_v44  ;;  %v15289_v44 = vld [vmem:[%s20276_s11 + $0x1c0] sm:$0xff] }
0x2aba   :  { %v9539_v33 = vpop.permute.xlu1 %9538 }
0x2abd   :  { %v17772_v45 = vpop.eup %17771 }
0x2abe   :  { %v8494_v46 = vmul.f32 %v17772_v45, %v17766_v23  ;;  %v15290_v45 = vld [vmem:[%s20276_s11 + $0x1c8] sm:$0xff] }
0x2ac0   :  { %16766 = vmatmul.mubr.msk.f32.vlgmr.msra.gmra.mrb[122].mxu0 %vm358_vm2, %v8494_v46  ;;  %v17467_v46 = vpack.c.bf16 %v15290_v45, %v15289_v44  ;;  %v15302_v44 = vld [vmem:[%s20281_s16 + $0x3] ss:$0 sm:$0xff] }
0x2ac1   :  { %v17774_v48 = vpop.eup %17773  ;;  %16774 = vmatpush3.msra.mxu0 %v9539_v33  ;;  %16775 = vmatprep.mubr.msk.f32.mxu0 %vm17942_vm1, %v17941_v20  ;;  %v15291_v33 = vld [vmem:[%s20276_s11 + $0x1d0] sm:$0xff] }
0x2ac2   :  { %v8495_v7 = vmul.f32 %v17774_v48, %v17768_v10  ;;  %17444 = vmatprep.subr.bf16.mxu0 %v17443_v27  ;;  %v15292_v48 = vld [vmem:[%s20276_s11 + $0x1d8] sm:$0xff] }
0x2ac4   :  { %16776 = vmatmul.mubr.msk.f32.vlgmr.msra.gmra.mrb[124].mxu0 %vm358_vm2, %v8495_v7  ;;  %v17471_v7 = vpack.c.bf16 %v15292_v48, %v15291_v33 }
0x2ac5   :  { %17446 = vmatpush3.bf16.msra.mxu0 %v17443_v27  ;;  %v17483_v27 = vpack.c.bf16 %v15304_v13, %v15303_v28 }
0x2afe   :  { %v9161_v47 = vpop.f32.mrb[118].mxu0 }
0x2aff   :  { %v16747_v32 = vpop.f32.mrb[119].mxu0  ;;  %16761 = vmatmul.mubr.msk.f32.vlgmr.msra.gmra.mrb[96].mxu1 %vm358_vm2, %v9161_v47  ;;  %v15293_v47 = vld [vmem:[%s20276_s11 + $0x1e0] sm:$0xff] }
0x2b00   :  { %16769 = vmatpush3.msra.mxu1 %v19359_v63  ;;  %16770 = vmatprep.mubr.msk.f32.mxu1 %vm17942_vm1, %v17941_v20  ;;  %v15294_v32 = vld [vmem:[%s20276_s11 + $0x1e8] sm:$0xff] }
0x2b01   :  { %16778 = vmatprep.subr.mxu1 %v17941_v20 }
0x2b2c   :  { %v9702_v5 = vpop.xlane.xlu0 %9701 }
0x2b2d   :  { %v9706_v53 = vmul.f32 0.03125, %v9702_v5  ;;  %v17475_v5 = vpack.c.bf16 %v15294_v32, %v15293_v47  ;;  %v15313_v47 = vld [vmem:[%s20268_s3 + $0x98] sm:$0xff] }
0x2b2f   :  { %v9708_v56 = vsub.f32 %v9698_v31, %v9706_v53  ;;  %v15287_v31 = vld [vmem:[%s20276_s11 + $0x1b0] sm:$0xff] }
0x2b30   :  { %v17463_v35 = vpack.c.bf16 %v15288_v30, %v15287_v31  ;;  %v15300_v30 = vld [vmem:[%s20280_s15 + $0x3] ss:$0 sm:$0xff] }
0x2b31   :  { %v9710_v57 = vmul.f32 %v9708_v56, %v9708_v56 }
0x2b33   :  { %v9712_v59 = vsel %vm98_vm0, %v9710_v57, 0.0 }
0x2b34   :  { %9713 = vadd.xlane.f32.xlu0 %v9712_v59 }
0x2b6f   :  { %v9311_v58 = vpop.f32.mrb[120].mxu0 }
0x2b70   :  { %v16757_v60 = vpop.f32.mrb[121].mxu0 }
0x2b93   :  { %v9460_v61 = vpop.f32.mrb[122].mxu0 }
0x2b94   :  { %v16767_v62 = vpop.f32.mrb[123].mxu0  ;;  %16771 = vmatmul.mubr.msk.f32.vlgmr.msra.gmra.mrb[98].mxu1 %vm358_vm2, %v9460_v61 }
0x2b95   :  { %16779 = vmatpush3.msra.mxu1 %v19370_v3  ;;  %16780 = vmatprep.mubr.msk.f32.mxu1 %vm17942_vm1, %v17941_v20  ;;  %v19430_v3 = vld [vmem:[%s20279_s14 + $0x3] ss:$0 sm:$0xff]  ;;  %v15295_v62 = vld [vmem:[%s20276_s11 + $0x1f0] sm:$0xff] }
0x2b96   :  { %17452 = vmatprep.subr.bf16.mxu1 %v17451_v38 }
0x2b97   :  { %v9610_v63 = vpop.f32.mrb[124].mxu0 }
0x2b98   :  { %v16777_v0 = vpop.f32.mrb[125].mxu0  ;;  %16781 = vmatmul.mubr.msk.f32.vlgmr.msra.gmra.mrb[100].mxu1 %vm358_vm2, %v9610_v63  ;;  %v15296_v63 = vld [vmem:[%s20276_s11 + $0x1f8] sm:$0xff] }
0x2b99   :  { %17454 = vmatpush3.bf16.msra.mxu1 %v17451_v38  ;;  %v17479_v0 = vpack.c.bf16 %v15296_v63, %v15295_v62  ;;  %v15307_v62 = vld [vmem:[#allocation5 + $0x4] ss:$0 sm:$0xff] }
0x2bc1   :  { %v9714_v49 = vpop.xlane.xlu0 %9713 }
0x2bc2   :  { %v9718_v52 = vmul.f32 0.03125, %v9714_v49  ;;  %v15278_v49 = vld [vmem:[%s20275_s10 + $0x3] ss:$0 sm:$0xff] }
0x2bc4   :  { %v9720_v50 = vadd.f32 1e-05, %v9718_v52 }
0x2bc6   :  { %17775 = vrsqrt.f32 %v9720_v50 }
0x2bd0   :  { %v17776_v1 = vpop.eup %17775 }
0x2bd1   :  { %v9724_v4 = vmul.f32 %v17776_v1, %v9708_v56 }
0x2bd2   :  { %v9384_v55 = vpop.f32.mrb[96].mxu1 }
0x2bd3   :  { %v9385_v29 = vadd.f32 %v9384_v55, %v9311_v58  ;;  %v16762_v6 = vpop.f32.mrb[97].mxu1  ;;  %v9734_v54 = vmul.f32 %v19425_v2, %v9724_v4 }
0x2bd5   :  { %v19434_v11 = vadd.f32 %v19430_v3, %v9734_v54 }
0x2bd7   :  { %16791 = vmatprep.mubr.msk.f32.mxu0 %vm98_vm0, %v19434_v11 }
0x2c67   :  { %v9533_v14 = vpop.f32.mrb[98].mxu1 }
0x2c68   :  { %v9537_v15 = vadd.f32 %v9533_v14, %v9385_v29  ;;  %v16772_v17 = vpop.f32.mrb[99].mxu1 }
0x2c6b   :  { %v9683_v16 = vpop.f32.mrb[100].mxu1 }
0x2c6c   :  { %v9687_v18 = vadd.f32 %v9683_v16, %v9537_v15  ;;  %v16782_v19 = vpop.f32.mrb[101].mxu1 }
0x2c6e   :  { %v9697_v21 = vadd.f32 %v19398_v37, %v9687_v18  ;;  %v15283_v37 = vld [vmem:[%s20276_s11 + $0x190] sm:$0xff] }
0x2c6f   :  { %v17455_v40 = vpack.c.bf16 %v15284_v39, %v15283_v37  ;;  %v17491_v37 = vpack.c.bf16 %v15311_v36, %v15310_v34 }
0x2c70   :  { %v9699_v22 = vadd.f32 %v9697_v21, %v19190_v9  ;;  %v15275_v9 = vld [vmem:[%s20274_s9 + $0x70] sm:$0xff] }
0x2c71   :  { %v17447_v12 = vpack.c.bf16 %v15276_v51, %v15275_v9  ;;  %17456 = vmatprep.subr.bf16.mxu1 %v17455_v40  ;;  %v15305_v9 = vld [vmem:[%s20290_s29 + $0x90] sm:$0xff]  ;;  %v15306_v51 = vld [vmem:[%s20290_s29 + $0x98] sm:$0xff] }
0x2c72   :  { %v9703_v23 = vsel %vm98_vm0, %v9699_v22, 0.0  ;;  %17458 = vmatpush3.bf16.msra.mxu1 %v17455_v40 }
0x2c73   :  { %9704 = vadd.xlane.f32.xlu1 %v9703_v23  ;;  %17448 = vmatprep.subr.bf16.mxu0 %v17447_v12 }
0x2c74   :  { %17450 = vmatpush3.bf16.msra.mxu0 %v17447_v12  ;;  %17460 = vmatprep.subr.bf16.mxu1 %v17459_v43  ;;  %v17487_v12 = vpack.c.bf16 %v15306_v51, %v15305_v9 }
0x2c75   :  { %17484 = vmatprep.subr.bf16.mxu0 %v17483_v27 }
0x2c76   :  { %17462 = vmatpush3.bf16.msra.mxu1 %v17459_v43 }
0x2c77   :  { %17464 = vmatprep.subr.bf16.mxu1 %v17463_v35 }
0x2c7a   :  { %17466 = vmatpush3.bf16.msra.mxu1 %v17463_v35 }
0x2c7b   :  { %17468 = vmatprep.subr.bf16.mxu1 %v17467_v46 }
0x2c7e   :  { %17470 = vmatpush3.bf16.msra.mxu1 %v17467_v46 }
0x2c7f   :  { %17472 = vmatprep.subr.bf16.mxu1 %v17471_v7 }
0x2c82   :  { %17474 = vmatpush3.bf16.msra.mxu1 %v17471_v7  ;;  %v15312_v7 = vld [vmem:[%s20268_s3 + $0x90] sm:$0xff] }
0x2c83   :  { %17476 = vmatprep.subr.bf16.mxu1 %v17475_v5 }
0x2c86   :  { %17478 = vmatpush3.bf16.msra.mxu1 %v17475_v5 }
0x2c87   :  { %17480 = vmatprep.subr.bf16.mxu1 %v17479_v0 }
0x2c8a   :  { %17482 = vmatpush3.bf16.msra.mxu1 %v17479_v0 }
0x2c8b   :  { %16867 = vmatprep.subr.mxu1 %v17941_v20 }
0x2d00   :  { %v9705_v8 = vpop.xlane.xlu1 %9704 }
0x2d01   :  { %v9707_v10 = vmul.f32 0.03125, %v9705_v8 }
0x2d03   :  { %v9709_v24 = vsub.f32 %v9699_v22, %v9707_v10 }
0x2d05   :  { %v9711_v25 = vmul.f32 %v9709_v24, %v9709_v24 }
0x2d07   :  { %v9715_v26 = vsel %vm98_vm0, %v9711_v25, 0.0 }
0x2d08   :  { %9716 = vadd.xlane.f32.xlu0 %v9715_v26 }
0x2d95   :  { %v9717_v53 = vpop.xlane.xlu0 %9716 }
0x2d96   :  { %v9719_v56 = vmul.f32 0.03125, %v9717_v53  ;;  %v17495_v53 = vpack.c.bf16 %v15313_v47, %v15312_v7 }
0x2d98   :  { %v9721_v57 = vadd.f32 1e-05, %v9719_v56  ;;  %v15318_v56 = vld [vmem:[%s20270_s5 + $0x80] sm:$0xff] }
0x2d9a   :  { %17777 = vrsqrt.f32 %v9721_v57  ;;  %v15319_v57 = vld [vmem:[%s20270_s5 + $0x88] sm:$0xff] }
0x2da4   :  { %v17778_v59 = vpop.eup %17777 }
0x2da5   :  { %v9725_v58 = vmul.f32 %v17778_v59, %v9709_v24  ;;  %v17499_v59 = vpack.c.bf16 %v15319_v57, %v15318_v56 }
0x2da7   :  { %v9735_v60 = vmul.f32 %v19425_v2, %v9725_v58  ;;  %v15320_v58 = vld [vmem:[%s20270_s5 + $0x90] sm:$0xff] }
0x2da9   :  { %v9745_v61 = vadd.f32 %v19430_v3, %v9735_v60  ;;  %v15298_v3 = vld [vmem:[%s20277_s12 + $0x3] ss:$0 sm:$0xff]  ;;  %v15321_v60 = vld [vmem:[%s20270_s5 + $0x98] sm:$0xff] }
0x2dab   :  { %16792 = vmatmul.mubr.msk.f32.vlgmr.msra.gmra.mrb[126].mxu0 %vm98_vm0, %v9745_v61 }
0x2dac   :  { %17486 = vmatpush3.bf16.msra.mxu0 %v17483_v27 }
0x2dad   :  { %17488 = vmatprep.subr.bf16.mxu0 %v17487_v12 }
0x2db0   :  { %17490 = vmatpush3.bf16.msra.mxu0 %v17487_v12 }
0x2db1   :  { %17492 = vmatprep.subr.bf16.mxu0 %v17491_v37 }
0x2e7e   :  { %v16793_v52 = vpop.f32.mrb[126].mxu0 }
0x2e7f   :  { %v9837_v50 = vadd.f32 %v16793_v52, %v15278_v49  ;;  %v9831_v1 = vpop.f32.mrb[127].mxu0 }
0x2e80   :  { %v9832_v2 = vadd.f32 %v15278_v49, %v9831_v1 }
0x2e81   :  { %v9841_v55 = vmax.f32 %v9837_v50, 0.0  ;;  %v15315_v50 = vld [vmem:[%s20269_s4 + $0x4] ss:$0 sm:$0xff] }
0x2e82   :  { %v9840_v4 = vmax.f32 %v9832_v2, 0.0 }
0x2e84   :  { %16826 = vmatprep.mubr.f32.mxu1 %v9840_v4 }
0x2e85   :  { %16827 = vmatmul.mubr.f32.vlgmr.msra.gmra.mrb[102].mxu1 %v9841_v55 }
0x2e86   :  { %16869 = vmatprep.mubr.msk.f32.mxu1 %vm17942_vm1, %v17941_v20 }
0x2f58   :  { %v16828_v29 = vpop.f32.mrb[102].mxu1 }
0x2f59   :  { %v9933_v6 = vpop.f32.mrb[103].mxu1  ;;  %v9939_v54 = vadd.f32 %v16828_v29, %v15298_v3 }
0x2f5a   :  { %v9934_v14 = vadd.f32 %v15298_v3, %v9933_v6  ;;  %v15323_v3 = vld [vmem:[%s20271_s6 + $0x4] ss:$0 sm:$0xff] }
0x2f5b   :  { %v9943_v17 = vadd.f32 %v9939_v54, %v9745_v61  ;;  %v17503_v61 = vpack.c.bf16 %v15321_v60, %v15320_v58 }
0x2f5c   :  { %v9942_v15 = vadd.f32 %v9934_v14, %v19434_v11 }
0x2f5d   :  { %v9947_v18 = vsel %vm98_vm0, %v9943_v17, 0.0 }
0x2f5e   :  { %v9944_v16 = vsel %vm98_vm0, %v9942_v15, 0.0 }
0x2f5f   :  { %9945 = vadd.xlane.f32.xlu0 %v9944_v16 }
0x2f63   :  { %9948 = vadd.xlane.f32.xlu0 %v9947_v18 }
0x2fec   :  { %v9946_v19 = vpop.xlane.xlu0 %9945 }
0x2fed   :  { %v9950_v21 = vmul.f32 0.03125, %v9946_v19 }
0x2fef   :  { %v9952_v22 = vsub.f32 %v9942_v15, %v9950_v21 }
0x2ff0   :  { %v9949_v23 = vpop.xlane.xlu0 %9948 }
0x2ff1   :  { %v9951_v8 = vmul.f32 0.03125, %v9949_v23  ;;  %v9954_v10 = vmul.f32 %v9952_v22, %v9952_v22 }
0x2ff3   :  { %v9953_v24 = vsub.f32 %v9943_v17, %v9951_v8  ;;  %v9956_v25 = vsel %vm98_vm0, %v9954_v10, 0.0 }
0x2ff4   :  { %9957 = vadd.xlane.f32.xlu0 %v9956_v25 }
0x2ff5   :  { %v9955_v26 = vmul.f32 %v9953_v24, %v9953_v24 }
0x2ff7   :  { %v9959_v11 = vsel %vm98_vm0, %v9955_v26, 0.0 }
0x2ff8   :  { %9960 = vadd.xlane.f32.xlu0 %v9959_v11 }
0x3081   :  { %v9958_v38 = vpop.xlane.xlu0 %9957 }
0x3082   :  { %v9962_v39 = vmul.f32 0.03125, %v9958_v38 }
0x3084   :  { %v9964_v40 = vadd.f32 1e-05, %v9962_v39 }
0x3085   :  { %v9961_v41 = vpop.xlane.xlu0 %9960 }
0x3086   :  { %17779 = vrsqrt.f32 %v9964_v40  ;;  %v9963_v42 = vmul.f32 0.03125, %v9961_v41 }
0x3088   :  { %v9965_v43 = vadd.f32 1e-05, %v9963_v42 }
0x308a   :  { %17781 = vrsqrt.f32 %v9965_v43 }
0x3090   :  { %v17780_v31 = vpop.eup %17779 }
0x3091   :  { %v9968_v35 = vmul.f32 %v17780_v31, %v9952_v22 }
0x3093   :  { %v9978_v45 = vmul.f32 %v15300_v30, %v9968_v35 }
0x3094   :  { %v17782_v46 = vpop.eup %17781 }
0x3095   :  { %v9969_v33 = vmul.f32 %v17782_v46, %v9953_v24  ;;  %v19543_v48 = vadd.f32 %v15302_v44, %v9978_v45 }
0x3097   :  { %v9979_v32 = vmul.f32 %v15300_v30, %v9969_v33  ;;  %16837 = vmatprep.mubr.msk.f32.mxu0 %vm98_vm0, %v19543_v48 }
0x3099   :  { %v19553_v5 = vadd.f32 %v15302_v44, %v9979_v32 }
0x309b   :  { %16838 = vmatmul.mubr.msk.f32.vlgmr.msra.gmra.mrb[128].mxu0 %vm98_vm0, %v19553_v5 }
0x309c   :  { %17494 = vmatpush3.bf16.msra.mxu0 %v17491_v37  ;;  %16848 = vmatprep.mubr.msk.f32.mxu0 %vm98_vm0, %v19543_v48 }
0x309d   :  { %17496 = vmatprep.subr.bf16.mxu0 %v17495_v53 }
0x30a0   :  { %17498 = vmatpush3.bf16.msra.mxu0 %v17495_v53 }
0x30a1   :  { %17500 = vmatprep.subr.bf16.mxu0 %v17499_v59 }
0x30a3   :  { %16849 = vmatmul.mubr.msk.f32.vlgmr.msra.gmra.mrb[130].mxu0 %vm98_vm0, %v19553_v5 }
0x30a4   :  { %17502 = vmatpush3.bf16.msra.mxu0 %v17499_v59  ;;  %16859 = vmatprep.mubr.msk.f32.mxu0 %vm98_vm0, %v19543_v48 }
0x30a5   :  { %17504 = vmatprep.subr.bf16.mxu0 %v17503_v61 }
0x30a8   :  { %17506 = vmatpush3.bf16.msra.mxu0 %v17503_v61 }
0x30a9   :  { %16862 = vmatprep.subr.mxu0 %v17941_v20 }
0x30ab   :  { %16860 = vmatmul.mubr.msk.f32.vlgmr.msra.gmra.mrb[132].mxu0 %vm98_vm0, %v19553_v5 }
0x30ac   :  { %16864 = vmatprep.mubr.msk.f32.mxu0 %vm17942_vm1, %v17941_v20 }
0x316e   :  { %v16839_v63 = vpop.f32.mrb[128].mxu0 }
0x316f   :  { %v10075_v0 = vpop.f32.mrb[129].mxu0  ;;  %v10081_v14 = vadd.f32 %v16839_v63, %v15307_v62 }
0x3170   :  { %v10076_v49 = vadd.f32 %v15307_v62, %v10075_v0 }
0x3171   :  { %v19599_v15 = vmul.f32 0.35355338, %v10081_v14 }
0x3172   :  { %v10084_v52 = vmul.f32 0.35355338, %v10076_v49 }
0x3174   :  { %10343 = vrot.lane.b32.xlu0 %v10084_v52, %s17944_s23 }
0x3176   :  { %v16850_v1 = vpop.f32.mrb[130].mxu0 }
0x3177   :  { %v10171_v2 = vadd.f32 %v16850_v1, %v15315_v50  ;;  %v10165_v4 = vpop.f32.mrb[131].mxu0 }
0x3178   :  { %v10166_v55 = vadd.f32 %v15315_v50, %v10165_v4 }
0x317a   :  { %10345 = vrot.lane.b32.xlu1 %v10166_v55, %s17944_s23  ;;  %16863 = vmatpush3.xpose.msk.msra.mxu0 %vm358_vm2, %v10166_v55 }
0x317b   :  { %10501 = vrot.lane.b32.xlu0 %v10166_v55, %s17945_s24  ;;  %16872 = vmatprep.subr.mxu0 %v17941_v20 }
0x317d   :  { %16865 = vmatmul.mubr.msk.f32.vlgmr.msra.gmra.mrb[134].mxu0 %vm358_vm2, %v10084_v52 }
0x317e   :  { %v16861_v29 = vpop.f32.mrb[132].mxu0  ;;  %10423 = vrot.lane.b32.xlu1 %v10166_v55, %s17943_s22  ;;  %16874 = vmatprep.mubr.msk.f32.mxu0 %vm17942_vm1, %v17941_v20 }
0x317f   :  { %v19595_v6 = vadd.f32 %v16861_v29, %v15323_v3  ;;  %v10253_v54 = vpop.f32.mrb[133].mxu0 }
0x3180   :  { %v19633_v51 = vadd.f32 %v15323_v3, %v10253_v54 }
0x3182   :  { %10421 = vrot.lane.b32.xlu1 %v10084_v52, %s17943_s22 }
0x3186   :  { %10499 = vrot.lane.b32.xlu1 %v10084_v52, %s17945_s24 }
0x318a   :  { %10653 = vrot.lane.b32.xlu1 %v19599_v15, %s17944_s23 }
0x31e6   :  { %v10344_v17 = vpop.permute.xlu0 %10343 }
0x31ec   :  { %v10346_v16 = vpop.permute.xlu1 %10345 }
0x31ed   :  { %16868 = vmatpush3.xpose.msk.msra.mxu1 %vm358_vm2, %v10346_v16  ;;  %v10502_v18 = vpop.permute.xlu0 %10501 }
0x31ee   :  { %16877 = vmatprep.subr.mxu1 %v17941_v20 }
0x31f0   :  { %v10424_v19 = vpop.permute.xlu1 %10423  ;;  %16870 = vmatmul.mubr.msk.f32.vlgmr.msra.gmra.mrb[104].mxu1 %vm358_vm2, %v10344_v17  ;;  %v19686_v17 = vld [vmem:[%s20272_s7 + $0x88] sm:$0xff] }
0x31f1   :  { %16873 = vmatpush3.xpose.msk.msra.mxu0 %vm358_vm2, %v10424_v19  ;;  %16878 = vmatpush3.xpose.msk.msra.mxu1 %vm358_vm2, %v10502_v18 }
0x31f2   :  { %16882 = vmatprep.subr.mxu0 %v17941_v20  ;;  %16879 = vmatprep.mubr.msk.f32.mxu1 %vm17942_vm1, %v17941_v20 }
0x31f3   :  { %16887 = vmatprep.subr.mxu1 %v17941_v20 }
0x31f4   :  { %v10422_v21 = vpop.permute.xlu1 %10421 }
0x31f5   :  { %16875 = vmatmul.mubr.msk.f32.vlgmr.msra.gmra.mrb[136].mxu0 %vm358_vm2, %v10422_v21 }
0x31f6   :  { %16883 = vmatpush3.xpose.msk.msra.mxu0 %vm358_vm2, %v10171_v2  ;;  %16884 = vmatprep.mubr.msk.f32.mxu0 %vm17942_vm1, %v17941_v20 }
0x31f7   :  { %16892 = vmatprep.subr.mxu0 %v17941_v20 }
0x31f8   :  { %v10500_v22 = vpop.permute.xlu1 %10499 }
0x31f9   :  { %16880 = vmatmul.mubr.msk.f32.vlgmr.msra.gmra.mrb[106].mxu1 %vm358_vm2, %v10500_v22  ;;  %16885 = vmatmul.mubr.msk.f32.vlgmr.msra.gmra.mrb[138].mxu0 %vm358_vm2, %v19599_v15 }
0x31fa   :  { %16889 = vmatprep.mubr.msk.f32.mxu1 %vm17942_vm1, %v17941_v20  ;;  %16894 = vmatprep.mubr.msk.f32.mxu0 %vm17942_vm1, %v17941_v20 }
0x31fc   :  { %v10654_v40 = vpop.permute.xlu1 %10653 }
0x3250   :  { %v19624_v23 = vpop.f32.mrb[134].mxu0 }
0x3251   :  { %v16866_v8 = vpop.f32.mrb[135].mxu0  ;;  %v10887_v7 = vsel %vm358_vm2, %v19624_v23, -inf }
0x32c3   :  { %v10417_v10 = vpop.f32.mrb[104].mxu1 }
0x32c4   :  { %v16871_v24 = vpop.f32.mrb[105].mxu1  ;;  %v10890_v25 = vsel %vm358_vm2, %v10417_v10, -inf }
0x32c5   :  { %10891 = vmax.xlane.f32.xlu0 %v10890_v25 }
0x32c8   :  { %v10495_v26 = vpop.f32.mrb[136].mxu0 }
0x32c9   :  { %v16876_v11 = vpop.f32.mrb[137].mxu0  ;;  %v10893_v12 = vsel %vm358_vm2, %v10495_v26, -inf }
0x32cc   :  { %v19627_v28 = vpop.f32.mrb[106].mxu1  ;;  %v19629_v13 = vpop.f32.mrb[138].mxu0 }
0x32cd   :  { %v16881_v27 = vpop.f32.mrb[107].mxu1  ;;  %v16886_v9 = vpop.f32.mrb[139].mxu0  ;;  %v10896_v34 = vsel %vm358_vm2, %v19627_v28, -inf  ;;  %v10899_v4 = vsel %vm358_vm2, %v19629_v13, -inf }
0x32db   :  { %10655 = vrot.lane.b32.xlu0 %v10171_v2, %s17944_s23 }
0x32df   :  { %10811 = vrot.lane.b32.xlu0 %v10171_v2, %s17945_s24 }
0x32e3   :  { %11049 = vrot.lane.b32.xlu0 %v19633_v51, %s17944_s23 }
0x3302   :  { %10894 = vmax.xlane.f32.xlu0 %v10893_v12 }
0x3306   :  { %10897 = vmax.xlane.f32.xlu0 %v10896_v34 }
0x331c   :  { %10733 = vrot.lane.b32.xlu0 %v10171_v2, %s17943_s22 }
0x3352   :  { %v10892_v36 = vpop.xlane.xlu0 %10891 }
0x3353   :  { %v10912_v37 = vsub.f32 %v10417_v10, %v10892_v36 }
0x3355   :  { %v10921_v38 = vmul.f32 1.442695, %v10912_v37 }
0x3356   :  { %v10656_v39 = vpop.permute.xlu0 %10655 }
0x3357   :  { %17783 = vpow2.f32 %v10921_v38  ;;  %16888 = vmatpush3.xpose.msk.msra.mxu1 %vm358_vm2, %v10656_v39 }
0x3358   :  { %16897 = vmatprep.subr.mxu1 %v17941_v20 }
0x335a   :  { %16890 = vmatmul.mubr.msk.f32.vlgmr.msra.gmra.mrb[108].mxu1 %vm358_vm2, %v10654_v40  ;;  %v10812_v41 = vpop.permute.xlu0 %10811 }
0x335b   :  { %16898 = vmatpush3.xpose.msk.msra.mxu1 %vm358_vm2, %v10812_v41  ;;  %16899 = vmatprep.mubr.msk.f32.mxu1 %vm17942_vm1, %v17941_v20 }
0x335c   :  { %16907 = vmatprep.subr.mxu1 %v17941_v20 }
0x335e   :  { %v11050_v31 = vpop.permute.xlu0 %11049 }
0x3361   :  { %v17784_v42 = vpop.eup %17783 }
0x3362   :  { %v10938_v43 = vsel %vm358_vm2, %v17784_v42, 0.0 }
0x3363   :  { %10939 = vadd.xlane.f32.xlu1 %v10938_v43 }
0x3374   :  { %10809 = vrot.lane.b32.xlu1 %v19599_v15, %s17945_s24 }
0x338f   :  { %v10895_v30 = vpop.xlane.xlu0 %10894 }
0x3390   :  { %v10913_v35 = vsub.f32 %v10495_v26, %v10895_v30  ;;  %v15326_v26 = vld [vmem:[%s20272_s7 + $0x80] sm:$0xff] }
0x3392   :  { %v10923_v44 = vmul.f32 1.442695, %v10913_v35 }
0x3393   :  { %v10898_v45 = vpop.xlane.xlu0 %10897 }
0x3394   :  { %17785 = vpow2.f32 %v10923_v44  ;;  %v10914_v46 = vsub.f32 %v19627_v28, %v10898_v45  ;;  %v19733_v45 = vld [vmem:[%s20272_s7 + $0x98] sm:$0xff] }
0x3396   :  { %v10925_v52 = vmul.f32 1.442695, %v10914_v46 }
0x3397   :  { %v10734_v33 = vpop.permute.xlu0 %10733 }
0x3398   :  { %10888 = vmax.xlane.f32.xlu1 %v10887_v7  ;;  %16893 = vmatpush3.xpose.msk.msra.mxu0 %vm358_vm2, %v10734_v33 }
0x3399   :  { %16902 = vmatprep.subr.mxu0 %v17941_v20 }
0x339e   :  { %v17786_v47 = vpop.eup %17785 }
0x339f   :  { %v10941_v32 = vsel %vm358_vm2, %v17786_v47, 0.0 }
0x33a0   :  { %10942 = vadd.xlane.f32.xlu0 %v10941_v32 }
0x33b6   :  { %11421 = vrot.lane.b32.xlu0 %v19633_v51, %s17945_s24 }
0x33f0   :  { %v10940_v53 = vpop.xlane.xlu1 %10939 }
0x33f1   :  { %17787 = vrcp.f32 %v10940_v53 }
0x33f4   :  { %v10810_v56 = vpop.permute.xlu1 %10809 }
0x33f5   :  { %16900 = vmatmul.mubr.msk.f32.vlgmr.msra.gmra.mrb[110].mxu1 %vm358_vm2, %v10810_v56 }
0x33f6   :  { %16908 = vmatpush3.msra.mxu1 %v11050_v31  ;;  %16909 = vmatprep.mubr.msk.f32.mxu1 %vm17942_vm1, %v17941_v20 }
0x33f7   :  { %16917 = vmatprep.subr.mxu1 %v17941_v20 }
0x33fb   :  { %v17788_v57 = vpop.eup %17787 }
0x33fc   :  { %v10968_v59 = vmul.f32 %v17788_v57, %v17784_v42  ;;  %v19722_v42 = vld [vmem:[%s20272_s7 + $0x90] sm:$0xff] }
0x33fe   :  { %16910 = vmatmul.mubr.msk.f32.vlgmr.msra.gmra.mrb[112].mxu1 %vm358_vm2, %v10968_v59 }
0x33ff   :  { %16919 = vmatprep.mubr.msk.f32.mxu1 %vm17942_vm1, %v17941_v20  ;;  %16918 = vmatpush3.msra.mxu1 %v15326_v26 }
0x3400   :  { %16927 = vmatprep.subr.mxu1 %v17941_v20 }
0x3425   :  { %v10889_v58 = vpop.xlane.xlu1 %10888 }
0x3426   :  { %v10911_v60 = vsub.f32 %v19624_v23, %v10889_v58 }
0x3428   :  { %v10919_v61 = vmul.f32 1.442695, %v10911_v60 }
0x342a   :  { %17789 = vpow2.f32 %v10919_v61 }
0x342b   :  { %17791 = vpow2.f32 %v10925_v52 }
0x342d   :  { %v10727_v62 = vpop.f32.mrb[108].mxu1  ;;  %v10943_v19 = vpop.xlane.xlu0 %10942 }
0x342e   :  { %v16891_v63 = vpop.f32.mrb[109].mxu1  ;;  %v10902_v2 = vsel %vm358_vm2, %v10727_v62, -inf }
0x3431   :  { %v11422_v10 = vpop.permute.xlu0 %11421 }
0x3434   :  { %v17790_v0 = vpop.eup %17789 }
0x3435   :  { %v10935_v49 = vsel %vm358_vm2, %v17790_v0, 0.0  ;;  %v17792_v50 = vpop.eup %17791 }
0x3436   :  { %10936 = vadd.xlane.f32.xlu1 %v10935_v49  ;;  %v10944_v1 = vsel %vm358_vm2, %v17792_v50, 0.0 }
0x3447   :  { %10731 = vrot.lane.b32.xlu1 %v19599_v15, %s17943_s22 }
0x346b   :  { %10945 = vadd.xlane.f32.xlu1 %v10944_v1 }
0x347c   :  { %11271 = vrot.lane.b32.xlu1 %v19633_v51, %s17943_s22 }
0x34a0   :  { %10903 = vmax.xlane.f32.xlu1 %v10902_v2 }
0x34a4   :  { %10900 = vmax.xlane.f32.xlu1 %v10899_v4 }
0x34c3   :  { %v10937_v55 = vpop.xlane.xlu1 %10936 }
0x34c4   :  { %17793 = vrcp.f32 %v10937_v55 }
0x34c5   :  { %17795 = vrcp.f32 %v10943_v19 }
0x34c7   :  { %v10732_v3 = vpop.permute.xlu1 %10731 }
0x34c8   :  { %16895 = vmatmul.mubr.msk.f32.vlgmr.msra.gmra.mrb[140].mxu0 %vm358_vm2, %v10732_v3  ;;  %v19677_v29 = vpop.f32.mrb[110].mxu1 }
0x34c9   :  { %16903 = vmatpush3.msra.mxu0 %v19633_v51  ;;  %v16901_v54 = vpop.f32.mrb[111].mxu1  ;;  %16904 = vmatprep.mubr.msk.f32.mxu0 %vm17942_vm1, %v17941_v20  ;;  %v10908_v40 = vsel %vm358_vm2, %v19677_v29, -inf }
0x34ca   :  { %16912 = vmatprep.subr.mxu0 %v17941_v20 }
0x34ce   :  { %v17794_v14 = vpop.eup %17793 }
0x34cf   :  { %v10967_v15 = vmul.f32 %v17794_v14, %v17790_v0  ;;  %v17796_v22 = vpop.eup %17795 }
0x34d0   :  { %v10969_v23 = vmul.f32 %v17796_v22, %v17786_v47 }
0x34d1   :  { %16905 = vmatmul.mubr.msk.f32.vlgmr.msra.gmra.mrb[142].mxu0 %vm358_vm2, %v10967_v15  ;;  %v11121_v16 = vpop.f32.mrb[112].mxu1 }
0x34d2   :  { %v16911_v18 = vpop.f32.mrb[113].mxu1  ;;  %16913 = vmatpush3.msra.mxu0 %v19686_v17  ;;  %16914 = vmatprep.mubr.msk.f32.mxu0 %vm17942_vm1, %v17941_v20 }
0x34d3   :  { %16922 = vmatprep.subr.mxu0 %v17941_v20 }
0x34d5   :  { %16915 = vmatmul.mubr.msk.f32.vlgmr.msra.gmra.mrb[144].mxu0 %vm358_vm2, %v11121_v16  ;;  %v19761_v16 = vld [vmem:[%s20273_s8 + $0x4] ss:$0 sm:$0xff] }
0x34d6   :  { %16924 = vmatprep.mubr.msk.f32.mxu0 %vm17942_vm1, %v17941_v20 }
0x34f8   :  { %v10946_v21 = vpop.xlane.xlu1 %10945 }
0x34f9   :  { %17797 = vrcp.f32 %v10946_v21 }
0x34fc   :  { %v11272_v8 = vpop.permute.xlu1 %11271 }
0x34fd   :  { %16923 = vmatpush3.msra.mxu0 %v11272_v8 }
0x34fe   :  { %16925 = vmatmul.mubr.msk.f32.vlgmr.msra.gmra.mrb[146].mxu0 %vm358_vm2, %v10969_v23  ;;  %16932 = vmatprep.subr.mxu0 %v17941_v20 }
0x34ff   :  { %16933 = vmatpush3.msra.mxu0 %v11422_v10  ;;  %16934 = vmatprep.mubr.msk.f32.mxu0 %vm17942_vm1, %v17941_v20 }
0x3500   :  { %16942 = vmatprep.subr.mxu0 %v17941_v20 }
0x3503   :  { %v17798_v24 = vpop.eup %17797 }
0x3504   :  { %v10970_v25 = vmul.f32 %v17798_v24, %v17792_v50 }
0x3506   :  { %16935 = vmatmul.mubr.msk.f32.vlgmr.msra.gmra.mrb[148].mxu0 %vm358_vm2, %v10970_v25 }
0x3507   :  { %16943 = vmatpush3.msra.mxu0 %v19595_v6  ;;  %16944 = vmatprep.mubr.msk.f32.mxu0 %vm17942_vm1, %v17941_v20 }
0x3508   :  { %16952 = vmatprep.subr.mxu0 %v17941_v20 }
0x352d   :  { %v10904_v11 = vpop.xlane.xlu1 %10903 }
0x352e   :  { %v10916_v28 = vsub.f32 %v10727_v62, %v10904_v11 }
0x3530   :  { %v10929_v27 = vmul.f32 1.442695, %v10916_v28 }
0x3531   :  { %v10901_v12 = vpop.xlane.xlu1 %10900 }
0x3532   :  { %17799 = vpow2.f32 %v10929_v27  ;;  %v10915_v34 = vsub.f32 %v19629_v13, %v10901_v12 }
0x3534   :  { %v10927_v36 = vmul.f32 1.442695, %v10915_v34 }
0x3536   :  { %17801 = vpow2.f32 %v10927_v36 }
0x353c   :  { %v17800_v9 = vpop.eup %17799 }
0x353d   :  { %v10950_v51 = vsel %vm358_vm2, %v17800_v9, 0.0 }
0x353e   :  { %10951 = vadd.xlane.f32.xlu0 %v10950_v51 }
0x3540   :  { %v17802_v41 = vpop.eup %17801 }
0x3541   :  { %v10947_v13 = vsel %vm358_vm2, %v17802_v41, 0.0 }
0x3554   :  { %11645 = vrot.lane.b32.xlu0 %v19595_v6, %s17944_s23 }
0x3558   :  { %11867 = vrot.lane.b32.xlu0 %v19595_v6, %s17943_s22 }
0x359b   :  { %v10805_v37 = vpop.f32.mrb[140].mxu0 }
0x359c   :  { %v16896_v38 = vpop.f32.mrb[141].mxu0  ;;  %v10905_v39 = vsel %vm358_vm2, %v10805_v37, -inf }
0x359d   :  { %10906 = vmax.xlane.f32.xlu1 %v10905_v39 }
0x35a1   :  { %10909 = vmax.xlane.f32.xlu1 %v10908_v40 }
0x35a4   :  { %v11044_v43 = vpop.f32.mrb[142].mxu0 }
0x35a5   :  { %10948 = vadd.xlane.f32.xlu1 %v10947_v13  ;;  %v16906_v31 = vpop.f32.mrb[143].mxu0  ;;  %16920 = vmatmul.mubr.msk.f32.vlgmr.msra.gmra.mrb[114].mxu1 %vm358_vm2, %v11044_v43 }
0x35a6   :  { %16928 = vmatpush3.msra.mxu1 %v19722_v42  ;;  %16929 = vmatprep.mubr.msk.f32.mxu1 %vm17942_vm1, %v17941_v20 }
0x35a7   :  { %16937 = vmatprep.subr.mxu1 %v17941_v20 }
0x35a8   :  { %v11194_v30 = vpop.f32.mrb[144].mxu0 }
0x35a9   :  { %v16916_v35 = vpop.f32.mrb[145].mxu0 }
0x35cb   :  { %v10952_v44 = vpop.xlane.xlu0 %10951 }
0x35cc   :  { %17803 = vrcp.f32 %v10952_v44  ;;  %v19788_v44 = vld [vmem:[%s20278_s13 + $0x4] ss:$0 sm:$0xff] }
0x35cf   :  { %v11646_v32 = vpop.permute.xlu0 %11645 }
0x35d1   :  { %v11343_v46 = vpop.f32.mrb[146].mxu0 }
0x35d2   :  { %v16926_v33 = vpop.f32.mrb[147].mxu0  ;;  %16930 = vmatmul.mubr.msk.f32.vlgmr.msra.gmra.mrb[116].mxu1 %vm358_vm2, %v11343_v46 }
0x35d3   :  { %16938 = vmatpush3.msra.mxu1 %v19733_v45  ;;  %16939 = vmatprep.mubr.msk.f32.mxu1 %vm17942_vm1, %v17941_v20  ;;  %v11868_v22 = vpop.permute.xlu0 %11867 }
0x35d4   :  { %16947 = vmatprep.subr.mxu1 %v17941_v20 }
0x35d6   :  { %v17804_v7 = vpop.eup %17803 }
0x35d7   :  { %v10972_v56 = vmul.f32 %v17804_v7, %v17800_v9 }
0x35d9   :  { %v11493_v47 = vpop.f32.mrb[148].mxu0 }
0x35da   :  { %v16936_v53 = vpop.f32.mrb[149].mxu0  ;;  %16940 = vmatmul.mubr.msk.f32.vlgmr.msra.gmra.mrb[118].mxu1 %vm358_vm2, %v11493_v47 }
0x35db   :  { %16948 = vmatpush3.msra.mxu1 %v11646_v32  ;;  %16949 = vmatprep.mubr.msk.f32.mxu1 %vm17942_vm1, %v17941_v20 }
0x35dc   :  { %16957 = vmatprep.subr.mxu1 %v17941_v20 }
0x35de   :  { %16950 = vmatmul.mubr.msk.f32.vlgmr.msra.gmra.mrb[120].mxu1 %vm358_vm2, %v10972_v56 }
0x35df   :  { %16958 = vmatpush3.msra.mxu1 %v15326_v26  ;;  %16959 = vmatprep.mubr.msk.f32.mxu1 %vm17942_vm1, %v17941_v20 }
0x35e0   :  { %16967 = vmatprep.subr.mxu1 %v17941_v20 }
0x362a   :  { %v10907_v57 = vpop.xlane.xlu1 %10906 }
0x362b   :  { %v10917_v59 = vsub.f32 %v10805_v37, %v10907_v57 }
0x362d   :  { %v10931_v58 = vmul.f32 1.442695, %v10917_v59 }
0x362e   :  { %v10910_v60 = vpop.xlane.xlu1 %10909 }
0x362f   :  { %17805 = vpow2.f32 %v10931_v58  ;;  %v10918_v61 = vsub.f32 %v19677_v29, %v10910_v60 }
0x3631   :  { %v10933_v62 = vmul.f32 1.442695, %v10918_v61 }
0x3632   :  { %v10949_v63 = vpop.xlane.xlu1 %10948 }
0x3633   :  { %17807 = vpow2.f32 %v10933_v62 }
0x3634   :  { %17809 = vrcp.f32 %v10949_v63 }
0x3639   :  { %v17806_v0 = vpop.eup %17805 }
0x363a   :  { %v10953_v49 = vsel %vm358_vm2, %v17806_v0, 0.0 }
0x363b   :  { %10954 = vadd.xlane.f32.xlu1 %v10953_v49 }
0x363d   :  { %v17808_v52 = vpop.eup %17807 }
0x363e   :  { %v17810_v50 = vpop.eup %17809  ;;  %v10956_v1 = vsel %vm358_vm2, %v17808_v52, 0.0 }
0x363f   :  { %v10971_v2 = vmul.f32 %v17810_v50, %v17802_v41  ;;  %10957 = vadd.xlane.f32.xlu1 %v10956_v1 }
0x3641   :  { %16945 = vmatmul.mubr.msk.f32.vlgmr.msra.gmra.mrb[150].mxu0 %vm358_vm2, %v10971_v2 }
0x3642   :  { %16953 = vmatpush3.msra.mxu0 %v19686_v17  ;;  %16954 = vmatprep.mubr.msk.f32.mxu0 %vm17942_vm1, %v17941_v20 }
0x3643   :  { %16962 = vmatprep.subr.mxu0 %v17941_v20 }
0x3650   :  { %12017 = vrot.lane.b32.xlu1 %v19595_v6, %s17945_s24 }
0x3678   :  { %v11267_v4 = vpop.f32.mrb[114].mxu1 }
0x3679   :  { %v11268_v55 = vadd.f32 %v11267_v4, %v11194_v30  ;;  %v16921_v3 = vpop.f32.mrb[115].mxu1  ;;  %v15368_v4 = vld [vmem:[%s20274_s9 + $0x80] sm:$0xff] }
0x36a5   :  { %v11416_v29 = vpop.f32.mrb[116].mxu1 }
0x36a6   :  { %v11420_v54 = vadd.f32 %v11416_v29, %v11268_v55  ;;  %v16931_v14 = vpop.f32.mrb[117].mxu1  ;;  %v15369_v55 = vld [vmem:[%s20274_s9 + $0x88] sm:$0xff]  ;;  %v15371_v29 = vld [vmem:[%s20274_s9 + $0x98] sm:$0xff] }
0x36a7   :  { %v17507_v3 = vpack.c.bf16 %v15369_v55, %v15368_v4  ;;  %v15376_v14 = vld [vmem:[%s20276_s11 + $0x200] sm:$0xff]  ;;  %v15399_v55 = vld [vmem:[%s20290_s29 + $0xa8] sm:$0xff] }
0x36a8   :  { %v15398_v4 = vld [vmem:[%s20290_s29 + $0xa0] sm:$0xff] }
0x36ad   :  { %v11566_v15 = vpop.f32.mrb[118].mxu1 }
0x36ae   :  { %v11570_v17 = vadd.f32 %v11566_v15, %v11420_v54  ;;  %v16941_v18 = vpop.f32.mrb[119].mxu1  ;;  %v15377_v15 = vld [vmem:[%s20276_s11 + $0x208] sm:$0xff] }
0x36af   :  { %v15379_v18 = vld [vmem:[%s20276_s11 + $0x218] sm:$0xff] }
0x36b0   :  { %v12175_v19 = vadd.f32 %v19761_v16, %v11570_v17  ;;  %v17515_v17 = vpack.c.bf16 %v15377_v15, %v15376_v14  ;;  %v15405_v14 = vld [vmem:[%s20268_s3 + $0xa0] sm:$0xff]  ;;  %v15406_v15 = vld [vmem:[%s20268_s3 + $0xa8] sm:$0xff] }
0x36b1   :  { %v11717_v21 = vpop.f32.mrb[120].mxu1 }
0x36b2   :  { %v16951_v23 = vpop.f32.mrb[121].mxu1  ;;  %16955 = vmatmul.mubr.msk.f32.vlgmr.msra.gmra.mrb[152].mxu0 %vm358_vm2, %v11717_v21  ;;  %v12177_v6 = vadd.f32 %v12175_v19, %v19543_v48  ;;  %v15380_v21 = vld [vmem:[%s20276_s11 + $0x220] sm:$0xff] }
0x36b3   :  { %16963 = vmatpush3.msra.mxu0 %v11868_v22  ;;  %16964 = vmatprep.mubr.msk.f32.mxu0 %vm17942_vm1, %v17941_v20  ;;  %v15381_v22 = vld [vmem:[%s20276_s11 + $0x228] sm:$0xff] }
0x36b4   :  { %v12179_v8 = vsel %vm98_vm0, %v12177_v6, 0.0  ;;  %16972 = vmatprep.subr.mxu0 %v17941_v20  ;;  %v17523_v23 = vpack.c.bf16 %v15381_v22, %v15380_v21 }
0x36b5   :  { %12180 = vadd.xlane.f32.xlu0 %v12179_v8  ;;  %v15383_v8 = vld [vmem:[%s20276_s11 + $0x238] sm:$0xff] }
0x36c8   :  { %v10955_v10 = vpop.xlane.xlu1 %10954 }
0x36c9   :  { %17811 = vrcp.f32 %v10955_v10 }
0x36cc   :  { %v10958_v24 = vpop.xlane.xlu1 %10957 }
0x36cd   :  { %17813 = vrcp.f32 %v10958_v24  ;;  %v15384_v24 = vld [vmem:[%s20276_s11 + $0x240] sm:$0xff] }
0x36d0   :  { %v12018_v11 = vpop.permute.xlu1 %12017 }
0x36d3   :  { %v17812_v25 = vpop.eup %17811 }
0x36d4   :  { %v10973_v26 = vmul.f32 %v17812_v25, %v17806_v0  ;;  %v15385_v25 = vld [vmem:[%s20276_s11 + $0x248] sm:$0xff] }
0x36d6   :  { %16965 = vmatmul.mubr.msk.f32.vlgmr.msra.gmra.mrb[154].mxu0 %vm358_vm2, %v10973_v26  ;;  %v17531_v26 = vpack.c.bf16 %v15385_v25, %v15384_v24  ;;  %v15397_v24 = vld [vmem:[%s20281_s16 + $0x4] ss:$0 sm:$0xff] }
0x36d7   :  { %v17814_v28 = vpop.eup %17813  ;;  %16973 = vmatpush3.msra.mxu0 %v12018_v11  ;;  %16974 = vmatprep.mubr.msk.f32.mxu0 %vm17942_vm1, %v17941_v20  ;;  %v15386_v11 = vld [vmem:[%s20276_s11 + $0x250] sm:$0xff] }
0x36d8   :  { %v10974_v48 = vmul.f32 %v17814_v28, %v17808_v52  ;;  %17508 = vmatprep.subr.bf16.mxu0 %v17507_v3  ;;  %v15387_v28 = vld [vmem:[%s20276_s11 + $0x258] sm:$0xff] }
0x36da   :  { %16975 = vmatmul.mubr.msk.f32.vlgmr.msra.gmra.mrb[156].mxu0 %vm358_vm2, %v10974_v48  ;;  %v17535_v48 = vpack.c.bf16 %v15387_v28, %v15386_v11 }
0x36db   :  { %17510 = vmatpush3.bf16.msra.mxu0 %v17507_v3  ;;  %v17547_v3 = vpack.c.bf16 %v15399_v55, %v15398_v4 }
0x3714   :  { %v11640_v27 = vpop.f32.mrb[150].mxu0 }
0x3715   :  { %v16946_v9 = vpop.f32.mrb[151].mxu0  ;;  %16960 = vmatmul.mubr.msk.f32.vlgmr.msra.gmra.mrb[122].mxu1 %vm358_vm2, %v11640_v27  ;;  %v15388_v27 = vld [vmem:[%s20276_s11 + $0x260] sm:$0xff] }
0x3716   :  { %16968 = vmatpush3.msra.mxu1 %v19722_v42  ;;  %16969 = vmatprep.mubr.msk.f32.mxu1 %vm17942_vm1, %v17941_v20  ;;  %v15389_v9 = vld [vmem:[%s20276_s11 + $0x268] sm:$0xff] }
0x3717   :  { %16977 = vmatprep.subr.mxu1 %v17941_v20 }
0x3742   :  { %v12181_v51 = vpop.xlane.xlu0 %12180 }
0x3743   :  { %v12185_v12 = vmul.f32 0.03125, %v12181_v51  ;;  %v17539_v51 = vpack.c.bf16 %v15389_v9, %v15388_v27  ;;  %v15408_v27 = vld [vmem:[%s20268_s3 + $0xb8] sm:$0xff] }
0x3745   :  { %v12187_v34 = vsub.f32 %v12177_v6, %v12185_v12  ;;  %v15382_v6 = vld [vmem:[%s20276_s11 + $0x230] sm:$0xff] }
0x3746   :  { %v17527_v10 = vpack.c.bf16 %v15383_v8, %v15382_v6  ;;  %v15395_v8 = vld [vmem:[%s20280_s15 + $0x4] ss:$0 sm:$0xff] }
0x3747   :  { %v12189_v36 = vmul.f32 %v12187_v34, %v12187_v34 }
0x3749   :  { %v12191_v37 = vsel %vm98_vm0, %v12189_v36, 0.0 }
0x374a   :  { %12192 = vadd.xlane.f32.xlu0 %v12191_v37 }
0x3785   :  { %v11790_v38 = vpop.f32.mrb[152].mxu0 }
0x3786   :  { %v16956_v39 = vpop.f32.mrb[153].mxu0 }
0x37a9   :  { %v11939_v40 = vpop.f32.mrb[154].mxu0 }
0x37aa   :  { %v16966_v41 = vpop.f32.mrb[155].mxu0  ;;  %16970 = vmatmul.mubr.msk.f32.vlgmr.msra.gmra.mrb[124].mxu1 %vm358_vm2, %v11939_v40 }
0x37ab   :  { %16978 = vmatpush3.msra.mxu1 %v19733_v45  ;;  %16979 = vmatprep.mubr.msk.f32.mxu1 %vm17942_vm1, %v17941_v20  ;;  %v19793_v45 = vld [vmem:[%s20279_s14 + $0x4] ss:$0 sm:$0xff]  ;;  %v15390_v41 = vld [vmem:[%s20276_s11 + $0x270] sm:$0xff] }
0x37ac   :  { %17516 = vmatprep.subr.bf16.mxu1 %v17515_v17 }
0x37ad   :  { %v12089_v42 = vpop.f32.mrb[156].mxu0 }
0x37ae   :  { %v16976_v43 = vpop.f32.mrb[157].mxu0  ;;  %16980 = vmatmul.mubr.msk.f32.vlgmr.msra.gmra.mrb[126].mxu1 %vm358_vm2, %v12089_v42  ;;  %v15391_v42 = vld [vmem:[%s20276_s11 + $0x278] sm:$0xff] }
0x37af   :  { %17518 = vmatpush3.bf16.msra.mxu1 %v17515_v17  ;;  %v17543_v43 = vpack.c.bf16 %v15391_v42, %v15390_v41  ;;  %v15402_v41 = vld [vmem:[#allocation5 + $0x5] ss:$0 sm:$0xff] }
0x37d7   :  { %v12193_v13 = vpop.xlane.xlu0 %12192 }
0x37d8   :  { %v12197_v31 = vmul.f32 0.03125, %v12193_v13  ;;  %v15373_v13 = vld [vmem:[%s20275_s10 + $0x4] ss:$0 sm:$0xff] }
0x37da   :  { %v12199_v30 = vadd.f32 1e-05, %v12197_v31 }
0x37dc   :  { %17815 = vrsqrt.f32 %v12199_v30 }
0x37e6   :  { %v17816_v35 = vpop.eup %17815 }
0x37e7   :  { %v12203_v46 = vmul.f32 %v17816_v35, %v12187_v34 }
0x37e8   :  { %v11863_v33 = vpop.f32.mrb[122].mxu1 }
0x37e9   :  { %v11864_v7 = vadd.f32 %v11863_v33, %v11790_v38  ;;  %v16961_v47 = vpop.f32.mrb[123].mxu1  ;;  %v12213_v32 = vmul.f32 %v19788_v44, %v12203_v46 }
0x37eb   :  { %v19797_v53 = vadd.f32 %v19793_v45, %v12213_v32 }
0x37ed   :  { %16990 = vmatprep.mubr.msk.f32.mxu0 %vm98_vm0, %v19797_v53 }
0x387d   :  { %v12012_v56 = vpop.f32.mrb[124].mxu1 }
0x387e   :  { %v12016_v57 = vadd.f32 %v12012_v56, %v11864_v7  ;;  %v16971_v59 = vpop.f32.mrb[125].mxu1 }
0x3881   :  { %v12162_v58 = vpop.f32.mrb[126].mxu1 }
0x3882   :  { %v12166_v60 = vadd.f32 %v12162_v58, %v12016_v57  ;;  %v16981_v61 = vpop.f32.mrb[127].mxu1 }
0x3884   :  { %v12176_v62 = vadd.f32 %v19761_v16, %v12166_v60  ;;  %v15378_v16 = vld [vmem:[%s20276_s11 + $0x210] sm:$0xff] }
0x3885   :  { %v17519_v19 = vpack.c.bf16 %v15379_v18, %v15378_v16  ;;  %v17555_v16 = vpack.c.bf16 %v15406_v15, %v15405_v14 }
0x3886   :  { %v12178_v63 = vadd.f32 %v12176_v62, %v19553_v5  ;;  %v15370_v5 = vld [vmem:[%s20274_s9 + $0x90] sm:$0xff] }
0x3887   :  { %v17511_v54 = vpack.c.bf16 %v15371_v29, %v15370_v5  ;;  %17520 = vmatprep.subr.bf16.mxu1 %v17519_v19  ;;  %v15400_v5 = vld [vmem:[%s20290_s29 + $0xb0] sm:$0xff]  ;;  %v15401_v29 = vld [vmem:[%s20290_s29 + $0xb8] sm:$0xff] }
0x3888   :  { %v12182_v0 = vsel %vm98_vm0, %v12178_v63, 0.0  ;;  %17522 = vmatpush3.bf16.msra.mxu1 %v17519_v19 }
0x3889   :  { %12183 = vadd.xlane.f32.xlu1 %v12182_v0  ;;  %17512 = vmatprep.subr.bf16.mxu0 %v17511_v54 }
0x388a   :  { %17514 = vmatpush3.bf16.msra.mxu0 %v17511_v54  ;;  %17524 = vmatprep.subr.bf16.mxu1 %v17523_v23  ;;  %v17551_v54 = vpack.c.bf16 %v15401_v29, %v15400_v5 }
0x388b   :  { %17548 = vmatprep.subr.bf16.mxu0 %v17547_v3 }
0x388c   :  { %17526 = vmatpush3.bf16.msra.mxu1 %v17523_v23 }
0x388d   :  { %17528 = vmatprep.subr.bf16.mxu1 %v17527_v10 }
0x3890   :  { %17530 = vmatpush3.bf16.msra.mxu1 %v17527_v10 }
0x3891   :  { %17532 = vmatprep.subr.bf16.mxu1 %v17531_v26 }
0x3894   :  { %17534 = vmatpush3.bf16.msra.mxu1 %v17531_v26 }
0x3895   :  { %17536 = vmatprep.subr.bf16.mxu1 %v17535_v48 }
0x3898   :  { %17538 = vmatpush3.bf16.msra.mxu1 %v17535_v48  ;;  %v15407_v48 = vld [vmem:[%s20268_s3 + $0xb0] sm:$0xff] }
0x3899   :  { %17540 = vmatprep.subr.bf16.mxu1 %v17539_v51 }
0x389c   :  { %17542 = vmatpush3.bf16.msra.mxu1 %v17539_v51 }
0x389d   :  { %17544 = vmatprep.subr.bf16.mxu1 %v17543_v43 }
0x38a0   :  { %17546 = vmatpush3.bf16.msra.mxu1 %v17543_v43 }
0x38a1   :  { %17066 = vmatprep.subr.mxu1 %v17941_v20 }
0x3916   :  { %v12184_v49 = vpop.xlane.xlu1 %12183 }
0x3917   :  { %v12186_v52 = vmul.f32 0.03125, %v12184_v49 }
0x3919   :  { %v12188_v50 = vsub.f32 %v12178_v63, %v12186_v52 }
0x391b   :  { %v12190_v1 = vmul.f32 %v12188_v50, %v12188_v50 }
0x391d   :  { %v12194_v2 = vsel %vm98_vm0, %v12190_v1, 0.0 }
0x391e   :  { %12195 = vadd.xlane.f32.xlu0 %v12194_v2 }
0x39ab   :  { %v12196_v12 = vpop.xlane.xlu0 %12195 }
0x39ac   :  { %v12198_v34 = vmul.f32 0.03125, %v12196_v12  ;;  %v17559_v12 = vpack.c.bf16 %v15408_v27, %v15407_v48 }
0x39ae   :  { %v12200_v36 = vadd.f32 1e-05, %v12198_v34  ;;  %v15413_v34 = vld [vmem:[%s20270_s5 + $0xa0] sm:$0xff] }
0x39b0   :  { %17817 = vrsqrt.f32 %v12200_v36  ;;  %v15414_v36 = vld [vmem:[%s20270_s5 + $0xa8] sm:$0xff] }
0x39ba   :  { %v17818_v37 = vpop.eup %17817 }
0x39bb   :  { %v12204_v38 = vmul.f32 %v17818_v37, %v12188_v50  ;;  %v17563_v37 = vpack.c.bf16 %v15414_v36, %v15413_v34 }
0x39bd   :  { %v12214_v39 = vmul.f32 %v19788_v44, %v12204_v38  ;;  %v15415_v38 = vld [vmem:[%s20270_s5 + $0xb0] sm:$0xff] }
0x39bf   :  { %v12224_v40 = vadd.f32 %v19793_v45, %v12214_v39  ;;  %v15393_v45 = vld [vmem:[%s20277_s12 + $0x4] ss:$0 sm:$0xff]  ;;  %v15416_v39 = vld [vmem:[%s20270_s5 + $0xb8] sm:$0xff] }
0x39c1   :  { %16991 = vmatmul.mubr.msk.f32.vlgmr.msra.gmra.mrb[158].mxu0 %vm98_vm0, %v12224_v40 }
0x39c2   :  { %17550 = vmatpush3.bf16.msra.mxu0 %v17547_v3 }
0x39c3   :  { %17552 = vmatprep.subr.bf16.mxu0 %v17551_v54 }
0x39c6   :  { %17554 = vmatpush3.bf16.msra.mxu0 %v17551_v54 }
0x39c7   :  { %17556 = vmatprep.subr.bf16.mxu0 %v17555_v16 }
0x3a94   :  { %v16992_v31 = vpop.f32.mrb[158].mxu0 }
0x3a95   :  { %v12316_v30 = vadd.f32 %v16992_v31, %v15373_v13  ;;  %v12310_v35 = vpop.f32.mrb[159].mxu0 }
0x3a96   :  { %v12311_v44 = vadd.f32 %v15373_v13, %v12310_v35 }
0x3a97   :  { %v12320_v33 = vmax.f32 %v12316_v30, 0.0  ;;  %v15410_v30 = vld [vmem:[%s20269_s4 + $0x5] ss:$0 sm:$0xff] }
0x3a98   :  { %v12319_v46 = vmax.f32 %v12311_v44, 0.0 }
0x3a9a   :  { %17025 = vmatprep.mubr.f32.mxu1 %v12319_v46 }
0x3a9b   :  { %17026 = vmatmul.mubr.f32.vlgmr.msra.gmra.mrb[128].mxu1 %v12320_v33 }
0x3a9c   :  { %17068 = vmatprep.mubr.msk.f32.mxu1 %vm17942_vm1, %v17941_v20 }
0x3b6e   :  { %v17027_v7 = vpop.f32.mrb[128].mxu1 }
0x3b6f   :  { %v12412_v47 = vpop.f32.mrb[129].mxu1  ;;  %v12418_v32 = vadd.f32 %v17027_v7, %v15393_v45 }
0x3b70   :  { %v12413_v56 = vadd.f32 %v15393_v45, %v12412_v47  ;;  %v15418_v45 = vld [vmem:[%s20271_s6 + $0x5] ss:$0 sm:$0xff] }
0x3b71   :  { %v12422_v59 = vadd.f32 %v12418_v32, %v12224_v40  ;;  %v17567_v40 = vpack.c.bf16 %v15416_v39, %v15415_v38 }
0x3b72   :  { %v12421_v57 = vadd.f32 %v12413_v56, %v19797_v53 }
0x3b73   :  { %v12426_v60 = vsel %vm98_vm0, %v12422_v59, 0.0 }
0x3b74   :  { %v12423_v58 = vsel %vm98_vm0, %v12421_v57, 0.0 }
0x3b75   :  { %12424 = vadd.xlane.f32.xlu0 %v12423_v58 }
0x3b79   :  { %12427 = vadd.xlane.f32.xlu0 %v12426_v60 }
0x3c02   :  { %v12425_v61 = vpop.xlane.xlu0 %12424 }
0x3c03   :  { %v12429_v62 = vmul.f32 0.03125, %v12425_v61 }
0x3c05   :  { %v12431_v63 = vsub.f32 %v12421_v57, %v12429_v62 }
0x3c06   :  { %v12428_v0 = vpop.xlane.xlu0 %12427 }
0x3c07   :  { %v12430_v49 = vmul.f32 0.03125, %v12428_v0  ;;  %v12433_v52 = vmul.f32 %v12431_v63, %v12431_v63 }
0x3c09   :  { %v12432_v50 = vsub.f32 %v12422_v59, %v12430_v49  ;;  %v12435_v1 = vsel %vm98_vm0, %v12433_v52, 0.0 }
0x3c0a   :  { %12436 = vadd.xlane.f32.xlu0 %v12435_v1 }
0x3c0b   :  { %v12434_v2 = vmul.f32 %v12432_v50, %v12432_v50 }
0x3c0d   :  { %v12438_v53 = vsel %vm98_vm0, %v12434_v2, 0.0 }
0x3c0e   :  { %12439 = vadd.xlane.f32.xlu0 %v12438_v53 }
0x3c97   :  { %v12437_v17 = vpop.xlane.xlu0 %12436 }
0x3c98   :  { %v12441_v18 = vmul.f32 0.03125, %v12437_v17 }
0x3c9a   :  { %v12443_v19 = vadd.f32 1e-05, %v12441_v18 }
0x3c9b   :  { %v12440_v21 = vpop.xlane.xlu0 %12439 }
0x3c9c   :  { %17819 = vrsqrt.f32 %v12443_v19  ;;  %v12442_v22 = vmul.f32 0.03125, %v12440_v21 }
0x3c9e   :  { %v12444_v23 = vadd.f32 1e-05, %v12442_v22 }
0x3ca0   :  { %17821 = vrsqrt.f32 %v12444_v23 }
0x3ca6   :  { %v17820_v6 = vpop.eup %17819 }
0x3ca7   :  { %v12447_v10 = vmul.f32 %v17820_v6, %v12431_v63 }
0x3ca9   :  { %v12457_v25 = vmul.f32 %v15395_v8, %v12447_v10 }
0x3caa   :  { %v17822_v26 = vpop.eup %17821 }
0x3cab   :  { %v12448_v11 = vmul.f32 %v17822_v26, %v12432_v50  ;;  %v19906_v28 = vadd.f32 %v15397_v24, %v12457_v25 }
0x3cad   :  { %v12458_v9 = vmul.f32 %v15395_v8, %v12448_v11  ;;  %17036 = vmatprep.mubr.msk.f32.mxu0 %vm98_vm0, %v19906_v28 }
0x3caf   :  { %v19916_v51 = vadd.f32 %v15397_v24, %v12458_v9 }
0x3cb1   :  { %17037 = vmatmul.mubr.msk.f32.vlgmr.msra.gmra.mrb[160].mxu0 %vm98_vm0, %v19916_v51 }
0x3cb2   :  { %17558 = vmatpush3.bf16.msra.mxu0 %v17555_v16  ;;  %17047 = vmatprep.mubr.msk.f32.mxu0 %vm98_vm0, %v19906_v28 }
0x3cb3   :  { %17560 = vmatprep.subr.bf16.mxu0 %v17559_v12 }
0x3cb6   :  { %17562 = vmatpush3.bf16.msra.mxu0 %v17559_v12 }
0x3cb7   :  { %17564 = vmatprep.subr.bf16.mxu0 %v17563_v37 }
0x3cb9   :  { %17048 = vmatmul.mubr.msk.f32.vlgmr.msra.gmra.mrb[162].mxu0 %vm98_vm0, %v19916_v51 }
0x3cba   :  { %17566 = vmatpush3.bf16.msra.mxu0 %v17563_v37  ;;  %17058 = vmatprep.mubr.msk.f32.mxu0 %vm98_vm0, %v19906_v28 }
0x3cbb   :  { %17568 = vmatprep.subr.bf16.mxu0 %v17567_v40 }
0x3cbe   :  { %17570 = vmatpush3.bf16.msra.mxu0 %v17567_v40 }
0x3cbf   :  { %17061 = vmatprep.subr.mxu0 %v17941_v20 }
0x3cc1   :  { %17059 = vmatmul.mubr.msk.f32.vlgmr.msra.gmra.mrb[164].mxu0 %vm98_vm0, %v19916_v51 }
0x3cc2   :  { %17063 = vmatprep.mubr.msk.f32.mxu0 %vm17942_vm1, %v17941_v20 }
0x3d84   :  { %v17038_v42 = vpop.f32.mrb[160].mxu0 }
0x3d85   :  { %v12554_v43 = vpop.f32.mrb[161].mxu0  ;;  %v12560_v56 = vadd.f32 %v17038_v42, %v15402_v41 }
0x3d86   :  { %v12555_v13 = vadd.f32 %v15402_v41, %v12554_v43 }
0x3d87   :  { %v19962_v57 = vmul.f32 0.35355338, %v12560_v56 }
0x3d88   :  { %v12563_v31 = vmul.f32 0.35355338, %v12555_v13 }
0x3d8a   :  { %12822 = vrot.lane.b32.xlu0 %v12563_v31, %s17944_s23 }
0x3d8c   :  { %v17049_v35 = vpop.f32.mrb[162].mxu0 }
0x3d8d   :  { %v12650_v44 = vadd.f32 %v17049_v35, %v15410_v30  ;;  %v12644_v46 = vpop.f32.mrb[163].mxu0 }
0x3d8e   :  { %v12645_v33 = vadd.f32 %v15410_v30, %v12644_v46 }
0x3d90   :  { %12824 = vrot.lane.b32.xlu1 %v12645_v33, %s17944_s23  ;;  %17062 = vmatpush3.xpose.msk.msra.mxu0 %vm358_vm2, %v12645_v33 }
0x3d91   :  { %12980 = vrot.lane.b32.xlu0 %v12645_v33, %s17945_s24  ;;  %17071 = vmatprep.subr.mxu0 %v17941_v20 }
0x3d93   :  { %17064 = vmatmul.mubr.msk.f32.vlgmr.msra.gmra.mrb[166].mxu0 %vm358_vm2, %v12563_v31 }
0x3d94   :  { %v17060_v7 = vpop.f32.mrb[164].mxu0  ;;  %12902 = vrot.lane.b32.xlu1 %v12645_v33, %s17943_s22  ;;  %17073 = vmatprep.mubr.msk.f32.mxu0 %vm17942_vm1, %v17941_v20 }
0x3d95   :  { %v19958_v47 = vadd.f32 %v17060_v7, %v15418_v45  ;;  %v12732_v32 = vpop.f32.mrb[165].mxu0 }
0x3d96   :  { %v19996_v29 = vadd.f32 %v15418_v45, %v12732_v32 }
0x3d98   :  { %12900 = vrot.lane.b32.xlu1 %v12563_v31, %s17943_s22 }
0x3d9c   :  { %12978 = vrot.lane.b32.xlu1 %v12563_v31, %s17945_s24 }
0x3da0   :  { %13132 = vrot.lane.b32.xlu1 %v19962_v57, %s17944_s23 }
0x3dfc   :  { %v12823_v59 = vpop.permute.xlu0 %12822 }
0x3e02   :  { %v12825_v58 = vpop.permute.xlu1 %12824 }
0x3e03   :  { %17067 = vmatpush3.xpose.msk.msra.mxu1 %vm358_vm2, %v12825_v58  ;;  %v12981_v60 = vpop.permute.xlu0 %12980 }
0x3e04   :  { %17076 = vmatprep.subr.mxu1 %v17941_v20 }
0x3e06   :  { %v12903_v61 = vpop.permute.xlu1 %12902  ;;  %17069 = vmatmul.mubr.msk.f32.vlgmr.msra.gmra.mrb[130].mxu1 %vm358_vm2, %v12823_v59  ;;  %v20049_v59 = vld [vmem:[%s20272_s7 + $0xa8] sm:$0xff] }
0x3e07   :  { %17072 = vmatpush3.xpose.msk.msra.mxu0 %vm358_vm2, %v12903_v61  ;;  %17077 = vmatpush3.xpose.msk.msra.mxu1 %vm358_vm2, %v12981_v60 }
0x3e08   :  { %17081 = vmatprep.subr.mxu0 %v17941_v20  ;;  %17078 = vmatprep.mubr.msk.f32.mxu1 %vm17942_vm1, %v17941_v20 }
0x3e09   :  { %17086 = vmatprep.subr.mxu1 %v17941_v20 }
0x3e0a   :  { %v12901_v62 = vpop.permute.xlu1 %12900 }
0x3e0b   :  { %17074 = vmatmul.mubr.msk.f32.vlgmr.msra.gmra.mrb[168].mxu0 %vm358_vm2, %v12901_v62 }
0x3e0c   :  { %17082 = vmatpush3.xpose.msk.msra.mxu0 %vm358_vm2, %v12650_v44  ;;  %17083 = vmatprep.mubr.msk.f32.mxu0 %vm17942_vm1, %v17941_v20 }
0x3e0d   :  { %17091 = vmatprep.subr.mxu0 %v17941_v20 }
0x3e0e   :  { %v12979_v63 = vpop.permute.xlu1 %12978 }
0x3e0f   :  { %17079 = vmatmul.mubr.msk.f32.vlgmr.msra.gmra.mrb[132].mxu1 %vm358_vm2, %v12979_v63  ;;  %17084 = vmatmul.mubr.msk.f32.vlgmr.msra.gmra.mrb[170].mxu0 %vm358_vm2, %v19962_v57 }
0x3e10   :  { %17088 = vmatprep.mubr.msk.f32.mxu1 %vm17942_vm1, %v17941_v20  ;;  %17093 = vmatprep.mubr.msk.f32.mxu0 %vm17942_vm1, %v17941_v20 }
0x3e12   :  { %v13133_v19 = vpop.permute.xlu1 %13132 }
0x3e66   :  { %v19987_v0 = vpop.f32.mrb[166].mxu0 }
0x3e67   :  { %v17065_v49 = vpop.f32.mrb[167].mxu0  ;;  %v13366_v48 = vsel %vm358_vm2, %v19987_v0, -inf }
0x3ed9   :  { %v12896_v52 = vpop.f32.mrb[130].mxu1 }
0x3eda   :  { %v17070_v50 = vpop.f32.mrb[131].mxu1  ;;  %v13369_v1 = vsel %vm358_vm2, %v12896_v52, -inf }
0x3edb   :  { %13370 = vmax.xlane.f32.xlu0 %v13369_v1 }
0x3ede   :  { %v12974_v2 = vpop.f32.mrb[168].mxu0 }
0x3edf   :  { %v17075_v53 = vpop.f32.mrb[169].mxu0  ;;  %v13372_v54 = vsel %vm358_vm2, %v12974_v2, -inf }
0x3ee2   :  { %v19990_v4 = vpop.f32.mrb[132].mxu1  ;;  %v19992_v55 = vpop.f32.mrb[170].mxu0 }
0x3ee3   :  { %v17080_v3 = vpop.f32.mrb[133].mxu1  ;;  %v17085_v5 = vpop.f32.mrb[171].mxu0  ;;  %v13375_v14 = vsel %vm358_vm2, %v19990_v4, -inf  ;;  %v13378_v46 = vsel %vm358_vm2, %v19992_v55, -inf }
0x3ef1   :  { %13134 = vrot.lane.b32.xlu0 %v12650_v44, %s17944_s23 }
0x3ef5   :  { %13290 = vrot.lane.b32.xlu0 %v12650_v44, %s17945_s24 }
0x3ef9   :  { %13528 = vrot.lane.b32.xlu0 %v19996_v29, %s17944_s23 }
0x3f18   :  { %13373 = vmax.xlane.f32.xlu0 %v13372_v54 }
0x3f1c   :  { %13376 = vmax.xlane.f32.xlu0 %v13375_v14 }
0x3f32   :  { %13212 = vrot.lane.b32.xlu0 %v12650_v44, %s17943_s22 }
0x3f68   :  { %v13371_v15 = vpop.xlane.xlu0 %13370 }
0x3f69   :  { %v13391_v16 = vsub.f32 %v12896_v52, %v13371_v15 }
0x3f6b   :  { %v13400_v17 = vmul.f32 1.442695, %v13391_v16 }
0x3f6c   :  { %v13135_v18 = vpop.permute.xlu0 %13134 }
0x3f6d   :  { %17823 = vpow2.f32 %v13400_v17  ;;  %17087 = vmatpush3.xpose.msk.msra.mxu1 %vm358_vm2, %v13135_v18 }
0x3f6e   :  { %17096 = vmatprep.subr.mxu1 %v17941_v20 }
0x3f70   :  { %17089 = vmatmul.mubr.msk.f32.vlgmr.msra.gmra.mrb[134].mxu1 %vm358_vm2, %v13133_v19  ;;  %v13291_v21 = vpop.permute.xlu0 %13290 }
0x3f71   :  { %17097 = vmatpush3.xpose.msk.msra.mxu1 %vm358_vm2, %v13291_v21  ;;  %17098 = vmatprep.mubr.msk.f32.mxu1 %vm17942_vm1, %v17941_v20 }
0x3f72   :  { %17106 = vmatprep.subr.mxu1 %v17941_v20 }
0x3f74   :  { %v13529_v6 = vpop.permute.xlu0 %13528 }
0x3f77   :  { %v17824_v22 = vpop.eup %17823 }
0x3f78   :  { %v13417_v23 = vsel %vm358_vm2, %v17824_v22, 0.0 }
0x3f79   :  { %13418 = vadd.xlane.f32.xlu1 %v13417_v23 }
0x3f8a   :  { %13288 = vrot.lane.b32.xlu1 %v19962_v57, %s17945_s24 }
0x3fa5   :  { %v13374_v8 = vpop.xlane.xlu0 %13373 }
0x3fa6   :  { %v13392_v10 = vsub.f32 %v12974_v2, %v13374_v8  ;;  %v15421_v2 = vld [vmem:[%s20272_s7 + $0xa0] sm:$0xff] }
0x3fa8   :  { %v13402_v24 = vmul.f32 1.442695, %v13392_v10 }
0x3fa9   :  { %v13377_v25 = vpop.xlane.xlu0 %13376 }
0x3faa   :  { %17825 = vpow2.f32 %v13402_v24  ;;  %v13393_v26 = vsub.f32 %v19990_v4, %v13377_v25  ;;  %v20096_v25 = vld [vmem:[%s20272_s7 + $0xb8] sm:$0xff] }
0x3fac   :  { %v13404_v31 = vmul.f32 1.442695, %v13393_v26 }
0x3fad   :  { %v13213_v11 = vpop.permute.xlu0 %13212 }
0x3fae   :  { %13367 = vmax.xlane.f32.xlu1 %v13366_v48  ;;  %17092 = vmatpush3.xpose.msk.msra.mxu0 %vm358_vm2, %v13213_v11 }
0x3faf   :  { %17101 = vmatprep.subr.mxu0 %v17941_v20 }
0x3fb4   :  { %v17826_v27 = vpop.eup %17825 }
0x3fb5   :  { %v13420_v9 = vsel %vm358_vm2, %v17826_v27, 0.0 }
0x3fb6   :  { %13421 = vadd.xlane.f32.xlu0 %v13420_v9 }
0x3fcc   :  { %13900 = vrot.lane.b32.xlu0 %v19996_v29, %s17945_s24 }
0x4006   :  { %v13419_v12 = vpop.xlane.xlu1 %13418 }
0x4007   :  { %17827 = vrcp.f32 %v13419_v12 }
0x400a   :  { %v13289_v34 = vpop.permute.xlu1 %13288 }
0x400b   :  { %17099 = vmatmul.mubr.msk.f32.vlgmr.msra.gmra.mrb[136].mxu1 %vm358_vm2, %v13289_v34 }
0x400c   :  { %17107 = vmatpush3.msra.mxu1 %v13529_v6  ;;  %17108 = vmatprep.mubr.msk.f32.mxu1 %vm17942_vm1, %v17941_v20 }
0x400d   :  { %17116 = vmatprep.subr.mxu1 %v17941_v20 }
0x4011   :  { %v17828_v36 = vpop.eup %17827 }
0x4012   :  { %v13447_v37 = vmul.f32 %v17828_v36, %v17824_v22  ;;  %v20085_v22 = vld [vmem:[%s20272_s7 + $0xb0] sm:$0xff] }
0x4014   :  { %17109 = vmatmul.mubr.msk.f32.vlgmr.msra.gmra.mrb[138].mxu1 %vm358_vm2, %v13447_v37 }
0x4015   :  { %17118 = vmatprep.mubr.msk.f32.mxu1 %vm17942_vm1, %v17941_v20  ;;  %17117 = vmatpush3.msra.mxu1 %v15421_v2 }
0x4016   :  { %17126 = vmatprep.subr.mxu1 %v17941_v20 }
0x403b   :  { %v13368_v38 = vpop.xlane.xlu1 %13367 }
0x403c   :  { %v13390_v39 = vsub.f32 %v19987_v0, %v13368_v38 }
0x403e   :  { %v13398_v40 = vmul.f32 1.442695, %v13390_v39 }
0x4040   :  { %17829 = vpow2.f32 %v13398_v40 }
0x4041   :  { %17831 = vpow2.f32 %v13404_v31 }
0x4043   :  { %v13206_v41 = vpop.f32.mrb[134].mxu1  ;;  %v13422_v61 = vpop.xlane.xlu0 %13421 }
0x4044   :  { %v17090_v42 = vpop.f32.mrb[135].mxu1  ;;  %v13381_v44 = vsel %vm358_vm2, %v13206_v41, -inf }
0x4047   :  { %v13901_v52 = vpop.permute.xlu0 %13900 }
0x404a   :  { %v17830_v43 = vpop.eup %17829 }
0x404b   :  { %v13414_v13 = vsel %vm358_vm2, %v17830_v43, 0.0  ;;  %v17832_v30 = vpop.eup %17831 }
0x404c   :  { %13415 = vadd.xlane.f32.xlu1 %v13414_v13  ;;  %v13423_v35 = vsel %vm358_vm2, %v17832_v30, 0.0 }
0x405d   :  { %13210 = vrot.lane.b32.xlu1 %v19962_v57, %s17943_s22 }
0x4081   :  { %13424 = vadd.xlane.f32.xlu1 %v13423_v35 }
0x4092   :  { %13750 = vrot.lane.b32.xlu1 %v19996_v29, %s17943_s22 }
0x40b6   :  { %13382 = vmax.xlane.f32.xlu1 %v13381_v44 }
0x40ba   :  { %13379 = vmax.xlane.f32.xlu1 %v13378_v46 }
0x40d9   :  { %v13416_v33 = vpop.xlane.xlu1 %13415 }
0x40da   :  { %17833 = vrcp.f32 %v13416_v33 }
0x40db   :  { %17835 = vrcp.f32 %v13422_v61 }
0x40dd   :  { %v13211_v45 = vpop.permute.xlu1 %13210 }
0x40de   :  { %17094 = vmatmul.mubr.msk.f32.vlgmr.msra.gmra.mrb[172].mxu0 %vm358_vm2, %v13211_v45  ;;  %v20040_v7 = vpop.f32.mrb[136].mxu1 }
0x40df   :  { %17102 = vmatpush3.msra.mxu0 %v19996_v29  ;;  %v17100_v32 = vpop.f32.mrb[137].mxu1  ;;  %17103 = vmatprep.mubr.msk.f32.mxu0 %vm17942_vm1, %v17941_v20  ;;  %v13387_v19 = vsel %vm358_vm2, %v20040_v7, -inf }
0x40e0   :  { %17111 = vmatprep.subr.mxu0 %v17941_v20 }
0x40e4   :  { %v17834_v56 = vpop.eup %17833 }
0x40e5   :  { %v13446_v57 = vmul.f32 %v17834_v56, %v17830_v43  ;;  %v17836_v63 = vpop.eup %17835 }
0x40e6   :  { %v13448_v0 = vmul.f32 %v17836_v63, %v17826_v27 }
0x40e7   :  { %17104 = vmatmul.mubr.msk.f32.vlgmr.msra.gmra.mrb[174].mxu0 %vm358_vm2, %v13446_v57  ;;  %v13600_v58 = vpop.f32.mrb[138].mxu1 }
0x40e8   :  { %v17110_v60 = vpop.f32.mrb[139].mxu1  ;;  %17112 = vmatpush3.msra.mxu0 %v20049_v59  ;;  %17113 = vmatprep.mubr.msk.f32.mxu0 %vm17942_vm1, %v17941_v20 }
0x40e9   :  { %17121 = vmatprep.subr.mxu0 %v17941_v20 }
0x40eb   :  { %17114 = vmatmul.mubr.msk.f32.vlgmr.msra.gmra.mrb[176].mxu0 %vm358_vm2, %v13600_v58  ;;  %v20124_v58 = vld [vmem:[%s20273_s8 + $0x5] ss:$0 sm:$0xff] }
0x40ec   :  { %17123 = vmatprep.mubr.msk.f32.mxu0 %vm17942_vm1, %v17941_v20 }
0x410e   :  { %v13425_v62 = vpop.xlane.xlu1 %13424 }
0x410f   :  { %17837 = vrcp.f32 %v13425_v62 }
0x4112   :  { %v13751_v49 = vpop.permute.xlu1 %13750 }
0x4113   :  { %17122 = vmatpush3.msra.mxu0 %v13751_v49 }
0x4114   :  { %17124 = vmatmul.mubr.msk.f32.vlgmr.msra.gmra.mrb[178].mxu0 %vm358_vm2, %v13448_v0  ;;  %17131 = vmatprep.subr.mxu0 %v17941_v20 }
0x4115   :  { %17132 = vmatpush3.msra.mxu0 %v13901_v52  ;;  %17133 = vmatprep.mubr.msk.f32.mxu0 %vm17942_vm1, %v17941_v20 }
0x4116   :  { %17141 = vmatprep.subr.mxu0 %v17941_v20 }
0x4119   :  { %v17838_v50 = vpop.eup %17837 }
0x411a   :  { %v13449_v1 = vmul.f32 %v17838_v50, %v17832_v30 }
0x411c   :  { %17134 = vmatmul.mubr.msk.f32.vlgmr.msra.gmra.mrb[180].mxu0 %vm358_vm2, %v13449_v1 }
0x411d   :  { %17142 = vmatpush3.msra.mxu0 %v19958_v47  ;;  %17143 = vmatprep.mubr.msk.f32.mxu0 %vm17942_vm1, %v17941_v20 }
0x411e   :  { %17151 = vmatprep.subr.mxu0 %v17941_v20 }
0x4143   :  { %v13383_v53 = vpop.xlane.xlu1 %13382 }
0x4144   :  { %v13395_v4 = vsub.f32 %v13206_v41, %v13383_v53 }
0x4146   :  { %v13408_v3 = vmul.f32 1.442695, %v13395_v4 }
0x4147   :  { %v13380_v54 = vpop.xlane.xlu1 %13379 }
0x4148   :  { %17839 = vpow2.f32 %v13408_v3  ;;  %v13394_v14 = vsub.f32 %v19992_v55, %v13380_v54 }
0x414a   :  { %v13406_v15 = vmul.f32 1.442695, %v13394_v14 }
0x414c   :  { %17841 = vpow2.f32 %v13406_v15 }
0x4152   :  { %v17840_v5 = vpop.eup %17839 }
0x4153   :  { %v13429_v29 = vsel %vm358_vm2, %v17840_v5, 0.0 }
0x4154   :  { %13430 = vadd.xlane.f32.xlu0 %v13429_v29 }
0x4156   :  { %v17842_v21 = vpop.eup %17841 }
0x4157   :  { %v13426_v55 = vsel %vm358_vm2, %v17842_v21, 0.0 }
0x416a   :  { %14124 = vrot.lane.b32.xlu0 %v19958_v47, %s17944_s23 }
0x416e   :  { %14346 = vrot.lane.b32.xlu0 %v19958_v47, %s17943_s22 }
0x41b1   :  { %v13284_v16 = vpop.f32.mrb[172].mxu0 }
0x41b2   :  { %v17095_v17 = vpop.f32.mrb[173].mxu0  ;;  %v13384_v18 = vsel %vm358_vm2, %v13284_v16, -inf }
0x41b3   :  { %13385 = vmax.xlane.f32.xlu1 %v13384_v18 }
0x41b7   :  { %13388 = vmax.xlane.f32.xlu1 %v13387_v19 }
0x41ba   :  { %v13523_v23 = vpop.f32.mrb[174].mxu0 }
0x41bb   :  { %13427 = vadd.xlane.f32.xlu1 %v13426_v55  ;;  %v17105_v6 = vpop.f32.mrb[175].mxu0  ;;  %17119 = vmatmul.mubr.msk.f32.vlgmr.msra.gmra.mrb[140].mxu1 %vm358_vm2, %v13523_v23 }
0x41bc   :  { %17127 = vmatpush3.msra.mxu1 %v20085_v22  ;;  %17128 = vmatprep.mubr.msk.f32.mxu1 %vm17942_vm1, %v17941_v20 }
0x41bd   :  { %17136 = vmatprep.subr.mxu1 %v17941_v20 }
0x41be   :  { %v13673_v8 = vpop.f32.mrb[176].mxu0 }
0x41bf   :  { %v17115_v10 = vpop.f32.mrb[177].mxu0 }
0x41e1   :  { %v13431_v24 = vpop.xlane.xlu0 %13430 }
0x41e2   :  { %17843 = vrcp.f32 %v13431_v24  ;;  %v20151_v24 = vld [vmem:[%s20278_s13 + $0x5] ss:$0 sm:$0xff] }
0x41e5   :  { %v14125_v9 = vpop.permute.xlu0 %14124 }
0x41e7   :  { %v13822_v26 = vpop.f32.mrb[178].mxu0 }
0x41e8   :  { %v17125_v11 = vpop.f32.mrb[179].mxu0  ;;  %17129 = vmatmul.mubr.msk.f32.vlgmr.msra.gmra.mrb[142].mxu1 %vm358_vm2, %v13822_v26 }
0x41e9   :  { %17137 = vmatpush3.msra.mxu1 %v20096_v25  ;;  %17138 = vmatprep.mubr.msk.f32.mxu1 %vm17942_vm1, %v17941_v20  ;;  %v14347_v63 = vpop.permute.xlu0 %14346 }
0x41ea   :  { %17146 = vmatprep.subr.mxu1 %v17941_v20 }
0x41ec   :  { %v17844_v48 = vpop.eup %17843 }
0x41ed   :  { %v13451_v34 = vmul.f32 %v17844_v48, %v17840_v5 }
0x41ef   :  { %v13972_v27 = vpop.f32.mrb[180].mxu0 }
0x41f0   :  { %v17135_v12 = vpop.f32.mrb[181].mxu0  ;;  %17139 = vmatmul.mubr.msk.f32.vlgmr.msra.gmra.mrb[144].mxu1 %vm358_vm2, %v13972_v27 }
0x41f1   :  { %17147 = vmatpush3.msra.mxu1 %v14125_v9  ;;  %17148 = vmatprep.mubr.msk.f32.mxu1 %vm17942_vm1, %v17941_v20 }
0x41f2   :  { %17156 = vmatprep.subr.mxu1 %v17941_v20 }
0x41f4   :  { %17149 = vmatmul.mubr.msk.f32.vlgmr.msra.gmra.mrb[146].mxu1 %vm358_vm2, %v13451_v34 }
0x41f5   :  { %17157 = vmatpush3.msra.mxu1 %v15421_v2  ;;  %17158 = vmatprep.mubr.msk.f32.mxu1 %vm17942_vm1, %v17941_v20 }
0x41f6   :  { %17166 = vmatprep.subr.mxu1 %v17941_v20 }
0x4240   :  { %v13386_v36 = vpop.xlane.xlu1 %13385 }
0x4241   :  { %v13396_v37 = vsub.f32 %v13284_v16, %v13386_v36 }
0x4243   :  { %v13410_v38 = vmul.f32 1.442695, %v13396_v37 }
0x4244   :  { %v13389_v39 = vpop.xlane.xlu1 %13388 }
0x4245   :  { %17845 = vpow2.f32 %v13410_v38  ;;  %v13397_v40 = vsub.f32 %v20040_v7, %v13389_v39 }
0x4247   :  { %v13412_v41 = vmul.f32 1.442695, %v13397_v40 }
0x4248   :  { %v13428_v42 = vpop.xlane.xlu1 %13427 }
0x4249   :  { %17847 = vpow2.f32 %v13412_v41 }
0x424a   :  { %17849 = vrcp.f32 %v13428_v42 }
0x424f   :  { %v17846_v43 = vpop.eup %17845 }
0x4250   :  { %v13432_v13 = vsel %vm358_vm2, %v17846_v43, 0.0 }
0x4251   :  { %13433 = vadd.xlane.f32.xlu1 %v13432_v13 }
0x4253   :  { %v17848_v31 = vpop.eup %17847 }
0x4254   :  { %v17850_v30 = vpop.eup %17849  ;;  %v13435_v35 = vsel %vm358_vm2, %v17848_v31, 0.0 }
0x4255   :  { %v13450_v44 = vmul.f32 %v17850_v30, %v17842_v21  ;;  %13436 = vadd.xlane.f32.xlu1 %v13435_v35 }
0x4257   :  { %17144 = vmatmul.mubr.msk.f32.vlgmr.msra.gmra.mrb[182].mxu0 %vm358_vm2, %v13450_v44  ;;  %v15463_v44 = vld [vmem:[%s20274_s9 + $0xa0] sm:$0xff] }
0x4258   :  { %17152 = vmatpush3.msra.mxu0 %v20049_v59  ;;  %17153 = vmatprep.mubr.msk.f32.mxu0 %vm17942_vm1, %v17941_v20 }
0x4259   :  { %17161 = vmatprep.subr.mxu0 %v17941_v20 }
0x4266   :  { %14496 = vrot.lane.b32.xlu1 %v19958_v47, %s17945_s24  ;;  %s17946_s24 = smov [#allocation7]  }
0x4267   :  { %s14955_s17 = sshll.u32 %s17946_s24, 4  ;;  %s14956_s17 = int_to_ptr.vmem [resolvable:$true] %s14955_s17 }
0x4268   :  { %s17907_s3 = scalar_lea.vmem %s14956_s17, 256  ;;  %p17912_p3 = scmp.lt.s32.totalorder %s14956_s17, %s14956_s17 }
0x4269   :  { %p17908_p2 = scmp.ne.s32.totalorder %s14956_s17, %s17907_s3  ;;  %p17913_p4 = scmp.lt.s32.totalorder %s17907_s3, %s17907_s3 }
0x426b   :  { %p17914_p5 = por %p17913_p4, %p17912_p3 }
0x426d   :  { %p17915_p6 = pnand %p17914_p5, %p17908_p2 }
0x428e   :  { %v13746_v46 = vpop.f32.mrb[140].mxu1 }
0x428f   :  { %v13747_v33 = vadd.f32 %v13746_v46, %v13673_v8  ;;  %v17120_v45 = vpop.f32.mrb[141].mxu1  ;;  %v15464_v46 = vld [vmem:[%s20274_s9 + $0xa8] sm:$0xff] }
0x4290   :  { %v15466_v45 = vld [vmem:[%s20274_s9 + $0xb8] sm:$0xff] }
0x42bb   :  { %v13895_v7 = vpop.f32.mrb[142].mxu1 }
0x42bc   :  { %v13899_v32 = vadd.f32 %v13895_v7, %v13747_v33  ;;  %v17130_v56 = vpop.f32.mrb[143].mxu1  ;;  %v17571_v33 = vpack.c.bf16 %v15464_v46, %v15463_v44 }
0x42bd   :  { %v15472_v56 = vld [vmem:[%s20276_s11 + $0x288] sm:$0xff] }
0x42c3   :  { %v14045_v57 = vpop.f32.mrb[144].mxu1 }
0x42c4   :  { %v14049_v59 = vadd.f32 %v14045_v57, %v13899_v32  ;;  %v17140_v60 = vpop.f32.mrb[145].mxu1  ;;  %v15471_v32 = vld [vmem:[%s20276_s11 + $0x280] sm:$0xff]  ;;  %v15473_v57 = vld [vmem:[%s20276_s11 + $0x290] sm:$0xff] }
0x42c6   :  { %v14654_v61 = vadd.f32 %v20124_v58, %v14049_v59  ;;  %v15474_v59 = vld [vmem:[%s20276_s11 + $0x298] sm:$0xff] }
0x42c7   :  { %v14196_v62 = vpop.f32.mrb[146].mxu1  ;;  %v17583_v60 = vpack.c.bf16 %v15474_v59, %v15473_v57  ;;  %v15492_v57 = vld [vmem:[%s20281_s16 + $0x5] ss:$0 sm:$0xff] }
0x42c8   :  { %v17150_v0 = vpop.f32.mrb[147].mxu1  ;;  %17154 = vmatmul.mubr.msk.f32.vlgmr.msra.gmra.mrb[184].mxu0 %vm358_vm2, %v14196_v62  ;;  %v14656_v47 = vadd.f32 %v14654_v61, %v19906_v28  ;;  %v15475_v61 = vld [vmem:[%s20276_s11 + $0x2a0] sm:$0xff]  ;;  %v15476_v62 = vld [vmem:[%s20276_s11 + $0x2a8] sm:$0xff] }
0x42c9   :  { %17162 = vmatpush3.msra.mxu0 %v14347_v63  ;;  %17163 = vmatprep.mubr.msk.f32.mxu0 %vm17942_vm1, %v17941_v20  ;;  %v17587_v63 = vpack.c.bf16 %v15476_v62, %v15475_v61  ;;  %v15477_v0 = vld [vmem:[%s20276_s11 + $0x2b0] sm:$0xff] }
0x42ca   :  { %v14658_v49 = vsel %vm98_vm0, %v14656_v47, 0.0  ;;  %17171 = vmatprep.subr.mxu0 %v17941_v20 }
0x42cb   :  { %14659 = vadd.xlane.f32.xlu0 %v14658_v49 }
0x42de   :  { %v13434_v52 = vpop.xlane.xlu1 %13433 }
0x42df   :  { %17851 = vrcp.f32 %v13434_v52  ;;  %v15479_v52 = vld [vmem:[%s20276_s11 + $0x2c0] sm:$0xff] }
0x42e2   :  { %v13437_v50 = vpop.xlane.xlu1 %13436 }
0x42e3   :  { %17853 = vrcp.f32 %v13437_v50  ;;  %v15480_v50 = vld [vmem:[%s20276_s11 + $0x2c8] sm:$0xff] }
0x42e6   :  { %v14497_v53 = vpop.permute.xlu1 %14496 }
0x42e9   :  { %v17852_v1 = vpop.eup %17851 }
0x42ea   :  { %v13452_v2 = vmul.f32 %v17852_v1, %v17846_v43  ;;  %v17595_v1 = vpack.c.bf16 %v15480_v50, %v15479_v52 }
0x42ec   :  { %17164 = vmatmul.mubr.msk.f32.vlgmr.msra.gmra.mrb[186].mxu0 %vm358_vm2, %v13452_v2  ;;  %v15481_v2 = vld [vmem:[%s20276_s11 + $0x2d0] sm:$0xff] }
0x42ed   :  { %v17854_v4 = vpop.eup %17853  ;;  %17172 = vmatpush3.msra.mxu0 %v14497_v53  ;;  %17173 = vmatprep.mubr.msk.f32.mxu0 %vm17942_vm1, %v17941_v20  ;;  %v15482_v53 = vld [vmem:[%s20276_s11 + $0x2d8] sm:$0xff] }
0x42ee   :  { %v13453_v28 = vmul.f32 %v17854_v4, %v17848_v31  ;;  %17572 = vmatprep.subr.bf16.mxu0 %v17571_v33  ;;  %v17599_v4 = vpack.c.bf16 %v15482_v53, %v15481_v2 }
0x42f0   :  { %17174 = vmatmul.mubr.msk.f32.vlgmr.msra.gmra.mrb[188].mxu0 %vm358_vm2, %v13453_v28  ;;  %v15483_v28 = vld [vmem:[%s20276_s11 + $0x2e0] sm:$0xff] }
0x42f1   :  { %17574 = vmatpush3.bf16.msra.mxu0 %v17571_v33 }
0x432a   :  { %v14119_v3 = vpop.f32.mrb[182].mxu0 }
0x432b   :  { %v17145_v5 = vpop.f32.mrb[183].mxu0  ;;  %17159 = vmatmul.mubr.msk.f32.vlgmr.msra.gmra.mrb[148].mxu1 %vm358_vm2, %v14119_v3  ;;  %v15484_v3 = vld [vmem:[%s20276_s11 + $0x2e8] sm:$0xff] }
0x432c   :  { %17167 = vmatpush3.msra.mxu1 %v20085_v22  ;;  %17168 = vmatprep.mubr.msk.f32.mxu1 %vm17942_vm1, %v17941_v20  ;;  %v17603_v5 = vpack.c.bf16 %v15484_v3, %v15483_v28 }
0x432d   :  { %17176 = vmatprep.subr.mxu1 %v17941_v20 }
0x4358   :  { %v14660_v29 = vpop.xlane.xlu0 %14659 }
0x4359   :  { %v14664_v54 = vmul.f32 0.03125, %v14660_v29 }
0x435b   :  { %v14666_v14 = vsub.f32 %v14656_v47, %v14664_v54  ;;  %v15478_v47 = vld [vmem:[%s20276_s11 + $0x2b8] sm:$0xff] }
0x435c   :  { %v17591_v49 = vpack.c.bf16 %v15478_v47, %v15477_v0 }
0x435d   :  { %v14668_v15 = vmul.f32 %v14666_v14, %v14666_v14 }
0x435f   :  { %v14670_v16 = vsel %vm98_vm0, %v14668_v15, 0.0 }
0x4360   :  { %14671 = vadd.xlane.f32.xlu0 %v14670_v16 }
0x439b   :  { %v14269_v17 = vpop.f32.mrb[184].mxu0 }
0x439c   :  { %v17155_v18 = vpop.f32.mrb[185].mxu0 }
0x43bf   :  { %v14418_v19 = vpop.f32.mrb[186].mxu0 }
0x43c0   :  { %v17165_v21 = vpop.f32.mrb[187].mxu0  ;;  %17169 = vmatmul.mubr.msk.f32.vlgmr.msra.gmra.mrb[150].mxu1 %vm358_vm2, %v14418_v19  ;;  %v15485_v19 = vld [vmem:[%s20276_s11 + $0x2f0] sm:$0xff] }
0x43c1   :  { %17177 = vmatpush3.msra.mxu1 %v20096_v25  ;;  %17178 = vmatprep.mubr.msk.f32.mxu1 %vm17942_vm1, %v17941_v20  ;;  %v20156_v20 = vld [vmem:[%s20279_s14 + $0x5] ss:$0 sm:$0xff]  ;;  %v15486_v21 = vld [vmem:[%s20276_s11 + $0x2f8] sm:$0xff] }
0x43c3   :  { %v14568_v22 = vpop.f32.mrb[188].mxu0 }
0x43c4   :  { %v17175_v23 = vpop.f32.mrb[189].mxu0  ;;  %17179 = vmatmul.mubr.msk.f32.vlgmr.msra.gmra.mrb[152].mxu1 %vm358_vm2, %v14568_v22  ;;  %v17607_v22 = vpack.c.bf16 %v15486_v21, %v15485_v19 }
0x43c5   :  { %v15468_v23 = vld [vmem:[%s20275_s10 + $0x5] ss:$0 sm:$0xff] }
0x43ed   :  { %v14672_v55 = vpop.xlane.xlu0 %14671 }
0x43ee   :  { %v14676_v6 = vmul.f32 0.03125, %v14672_v55 }
0x43f0   :  { %v14678_v8 = vadd.f32 1e-05, %v14676_v6 }
0x43f2   :  { %17855 = vrsqrt.f32 %v14678_v8 }
0x43fc   :  { %v17856_v10 = vpop.eup %17855 }
0x43fd   :  { %v14682_v26 = vmul.f32 %v17856_v10, %v14666_v14 }
0x43fe   :  { %v14342_v11 = vpop.f32.mrb[148].mxu1 }
0x43ff   :  { %v14343_v25 = vadd.f32 %v14342_v11, %v14269_v17  ;;  %v17160_v48 = vpop.f32.mrb[149].mxu1  ;;  %v14692_v27 = vmul.f32 %v20151_v24, %v14682_v26  ;;  %v15488_v11 = vld [vmem:[%s20277_s12 + $0x5] ss:$0 sm:$0xff] }
0x4401   :  { %v20160_v9 = vadd.f32 %v20156_v20, %v14692_v27 }
0x4403   :  { %17189 = vmatprep.mubr.msk.f32.mxu0 %vm98_vm0, %v20160_v9 }
0x4493   :  { %v14491_v12 = vpop.f32.mrb[150].mxu1 }
0x4494   :  { %v14495_v34 = vadd.f32 %v14491_v12, %v14343_v25  ;;  %v17170_v36 = vpop.f32.mrb[151].mxu1 }
0x4497   :  { %v14641_v37 = vpop.f32.mrb[152].mxu1 }
0x4498   :  { %v14645_v38 = vadd.f32 %v14641_v37, %v14495_v34  ;;  %v17180_v39 = vpop.f32.mrb[153].mxu1 }
0x449a   :  { %v14655_v40 = vadd.f32 %v20124_v58, %v14645_v38  ;;  %v17579_v58 = vpack.c.bf16 %v15472_v56, %v15471_v32  ;;  %v15490_v32 = vld [vmem:[%s20280_s15 + $0x5] ss:$0 sm:$0xff] }
0x449c   :  { %v14657_v41 = vadd.f32 %v14655_v40, %v19916_v51  ;;  %v15465_v51 = vld [vmem:[%s20274_s9 + $0xb0] sm:$0xff]  ;;  %17580 = vmatprep.subr.bf16.mxu1 %v17579_v58 }
0x449d   :  { %v17575_v7 = vpack.c.bf16 %v15466_v45, %v15465_v51  ;;  %17582 = vmatpush3.bf16.msra.mxu1 %v17579_v58 }
0x449e   :  { %v14661_v42 = vsel %vm98_vm0, %v14657_v41, 0.0  ;;  %17584 = vmatprep.subr.bf16.mxu1 %v17583_v60 }
0x449f   :  { %14662 = vadd.xlane.f32.xlu1 %v14661_v42  ;;  %17576 = vmatprep.subr.bf16.mxu0 %v17575_v7 }
0x44a0   :  { %17578 = vmatpush3.bf16.msra.mxu0 %v17575_v7 }
0x44a1   :  { %17586 = vmatpush3.bf16.msra.mxu1 %v17583_v60 }
0x44a2   :  { %17588 = vmatprep.subr.bf16.mxu1 %v17587_v63 }
0x44a5   :  { %17590 = vmatpush3.bf16.msra.mxu1 %v17587_v63 }
0x44a6   :  { %17592 = vmatprep.subr.bf16.mxu1 %v17591_v49 }
0x44a9   :  { %17594 = vmatpush3.bf16.msra.mxu1 %v17591_v49 }
0x44aa   :  { %17596 = vmatprep.subr.bf16.mxu1 %v17595_v1 }
0x44ad   :  { %17598 = vmatpush3.bf16.msra.mxu1 %v17595_v1 }
0x44ae   :  { %17600 = vmatprep.subr.bf16.mxu1 %v17599_v4 }
0x44b1   :  { %17602 = vmatpush3.bf16.msra.mxu1 %v17599_v4 }
0x44b2   :  { %17604 = vmatprep.subr.bf16.mxu1 %v17603_v5 }
0x44b5   :  { %17606 = vmatpush3.bf16.msra.mxu1 %v17603_v5 }
0x44b6   :  { %17608 = vmatprep.subr.bf16.mxu1 %v17607_v22 }
0x44b9   :  { %17610 = vmatpush3.bf16.msra.mxu1 %v17607_v22 }
0x452c   :  { %v14663_v43 = vpop.xlane.xlu1 %14662 }
0x452d   :  { %v14665_v13 = vmul.f32 0.03125, %v14663_v43 }
0x452f   :  { %v14667_v31 = vsub.f32 %v14657_v41, %v14665_v13 }
0x4531   :  { %v14669_v30 = vmul.f32 %v14667_v31, %v14667_v31 }
0x4533   :  { %v14673_v35 = vsel %vm98_vm0, %v14669_v30, 0.0 }
0x4534   :  { %14674 = vadd.xlane.f32.xlu0 %v14673_v35 }
0x45c1   :  { %v14675_v29 = vpop.xlane.xlu0 %14674 }
0x45c2   :  { %v14677_v54 = vmul.f32 0.03125, %v14675_v29 }
0x45c4   :  { %v14679_v14 = vadd.f32 1e-05, %v14677_v54 }
0x45c6   :  { %17857 = vrsqrt.f32 %v14679_v14 }
0x45d0   :  { %v17858_v15 = vpop.eup %17857 }
0x45d1   :  { %v14683_v16 = vmul.f32 %v17858_v15, %v14667_v31 }
0x45d3   :  { %v14693_v17 = vmul.f32 %v20151_v24, %v14683_v16 }
0x45d5   :  { %v14703_v18 = vadd.f32 %v20156_v20, %v14693_v17 }
0x45d7   :  { %17190 = vmatmul.mubr.msk.f32.vlgmr.msra.gmra.mrb[190].mxu0 %vm98_vm0, %v14703_v18 }
0x46aa   :  { %v17191_v55 = vpop.f32.mrb[190].mxu0 }
0x46ab   :  { %v14795_v6 = vadd.f32 %v17191_v55, %v15468_v23  ;;  %v14789_v8 = vpop.f32.mrb[191].mxu0 }
0x46ac   :  { %v14790_v10 = vadd.f32 %v15468_v23, %v14789_v8 }
0x46ad   :  { %v14799_v26 = vmax.f32 %v14795_v6, 0.0 }
0x46ae   :  { %v14798_v24 = vmax.f32 %v14790_v10, 0.0 }
0x46b0   :  { %17224 = vmatprep.mubr.f32.mxu1 %v14798_v24 }
0x46b1   :  { %17225 = vmatmul.mubr.f32.vlgmr.msra.gmra.mrb[154].mxu1 %v14799_v26 }
0x4784   :  { %v17226_v20 = vpop.f32.mrb[154].mxu1 }
0x4785   :  { %v14891_v25 = vpop.f32.mrb[155].mxu1  ;;  %v14897_v48 = vadd.f32 %v17226_v20, %v15488_v11 }
0x4786   :  { %v14892_v27 = vadd.f32 %v15488_v11, %v14891_v25 }
0x4787   :  { %v14901_v34 = vadd.f32 %v14897_v48, %v14703_v18 }
0x4788   :  { %v14900_v12 = vadd.f32 %v14892_v27, %v20160_v9 }
0x4789   :  { %v14905_v37 = vsel %vm98_vm0, %v14901_v34, 0.0 }
0x478a   :  { %v14902_v36 = vsel %vm98_vm0, %v14900_v12, 0.0 }
0x478b   :  { %14903 = vadd.xlane.f32.xlu0 %v14902_v36 }
0x478f   :  { %14906 = vadd.xlane.f32.xlu0 %v14905_v37 }
0x4818   :  { %v14904_v38 = vpop.xlane.xlu0 %14903 }
0x4819   :  { %v14908_v39 = vmul.f32 0.03125, %v14904_v38 }
0x481b   :  { %v14910_v40 = vsub.f32 %v14900_v12, %v14908_v39 }
0x481c   :  { %v14907_v41 = vpop.xlane.xlu0 %14906 }
0x481d   :  { %v14909_v42 = vmul.f32 0.03125, %v14907_v41  ;;  %v14912_v43 = vmul.f32 %v14910_v40, %v14910_v40 }
0x481f   :  { %v14911_v13 = vsub.f32 %v14901_v34, %v14909_v42  ;;  %v14914_v31 = vsel %vm98_vm0, %v14912_v43, 0.0 }
0x4820   :  { %14915 = vadd.xlane.f32.xlu0 %v14914_v31 }
0x4821   :  { %v14913_v30 = vmul.f32 %v14911_v13, %v14911_v13 }
0x4823   :  { %v14917_v9 = vsel %vm98_vm0, %v14913_v30, 0.0 }
0x4824   :  { %14918 = vadd.xlane.f32.xlu0 %v14917_v9 }
0x48ad   :  { %v14916_v35 = vpop.xlane.xlu0 %14915 }
0x48ae   :  { %v14920_v44 = vmul.f32 0.03125, %v14916_v35 }
0x48b0   :  { %v14922_v46 = vadd.f32 1e-05, %v14920_v44 }
0x48b1   :  { %v14919_v33 = vpop.xlane.xlu0 %14918 }
0x48b2   :  { %17859 = vrsqrt.f32 %v14922_v46  ;;  %v14921_v51 = vmul.f32 0.03125, %v14919_v33 }
0x48b4   :  { %v14923_v45 = vadd.f32 1e-05, %v14921_v51 }
0x48b6   :  { %17861 = vrsqrt.f32 %v14923_v45 }
0x48bc   :  { %v17860_v7 = vpop.eup %17859 }
0x48bd   :  { %v14926_v56 = vmul.f32 %v17860_v7, %v14910_v40 }
0x48bf   :  { %v14936_v58 = vmul.f32 %v15490_v32, %v14926_v56 }
0x48c0   :  { %v17862_v59 = vpop.eup %17861 }
0x48c1   :  { %v14927_v60 = vmul.f32 %v17862_v59, %v14911_v13  ;;  %v14946_v61 = vadd.f32 %v15492_v57, %v14936_v58 }
0x48c3   :  { %v14937_v62 = vmul.f32 %v15490_v32, %v14927_v60  ;;  %14948 = vst.msk [vmem:[#allocation7] sm:$0xff] %vm98_vm0, %v14946_v61 }
0x48c5   :  { %v14947_v63 = vadd.f32 %v15492_v57, %v14937_v62 }
0x48c7   :  { %14949 = vst.msk [vmem:[#allocation7 + $0x8] sm:$0xff] %vm98_vm0, %v14947_v63 }
0x48c8   :  { %17918 = shalt.err (!%p17915_p6)
}
0x48c9   :  { %s20291_s13 = sld [smem:[#allocation13_spill]] }
0x48cf   :  { %s17919_s14 = scalar_lea.hbm %s20291_s13, 256 }
0x48d0   :  { %p17920_p7 = scmp.ne.s32.totalorder %s20291_s13, %s17919_s14  ;;  %p17923_p8 = scmp.lt.u32.totalorder %s17919_s14, %s20291_s13 }
0x48d2   :  { %p17925_p9 = pnand %p17923_p8, %p17920_p7 }
0x48d4   :  { %17928 = shalt.err (!%p17925_p9)
}
0x48d5   :  { %14961 = dma.vmem_to_hbm [thread:$0]  %s14956_s17, 256, %s20291_s13, [#allocation4], %s17936_s20, %s17936_s20, %s17937_s21  }
0x48d6   :  { %17933 = dma.done.wait [#allocation4], 256  }
0x48d7   :  { %17934 = vsyncadd [#allocation4], 4294967040 }
0x48d8   :  { %14965 = vsyncpa [#allocation3], 1 }
0x48d9   :  { %14966 = vsyncpa [#allocation6], 1 }
0x48da   :  { %14967 = vsyncpa [#allocation4], 1 }

</bundles_post_ra>
